<compile_context>
chip_gen: v5e
topology: v5e:2x2
jax: 0.10.0
libtpu: 0.0.40
codegen_flags: <defaults>
</compile_context>

<pallas_src>
import functools

import jax
import jax.numpy as jnp
from jax.experimental import pallas as pl
from jax.experimental.pallas import tpu as pltpu

EPS = 1e-5
LANES = 128


def _round_up(v, m):
    return (v + m - 1) // m * m


def _pad_to(a, shape):
    return jnp.pad(a, [(0, t - s) for s, t in zip(a.shape, shape)])


def fold_bn(gamma, beta, mean, var):
    scale = gamma / jnp.sqrt(var + EPS)
    shift = beta - mean * scale
    return scale, shift


def _vmem_limit_bytes():
    # ~7/8 of physical VMEM: ~56 MiB on v7x (64 MiB/TC), ~112 MiB on v5e/v6e.
    try:
        cap = pltpu.get_tpu_info().vmem_capacity_bytes
        return int(min(cap * 7 // 8, 112 * 1024 * 1024))
    except Exception:
        return 48 * 1024 * 1024


def _invariant_spec(shape, *, single_buffer):
    """BlockSpec for a grid-invariant operand (constant index map).

    With `single_buffer`, request single buffering so the big, never-changing
    weights (w2 is 9*C*C bf16) are not duplicated by default double-buffering.
    """
    index_map = lambda n, j: (0,) * len(shape)
    if single_buffer and hasattr(pl, "Buffered"):
        try:
            return pl.BlockSpec(shape, index_map, pipeline_mode=pl.Buffered(1))
        except TypeError:
            pass
    return pl.BlockSpec(shape, index_map)


# ---------------------------------------------------------------------------
# Fused bottleneck kernel
# ---------------------------------------------------------------------------
def _bottleneck_kernel(*refs, HWp, HWd, Wp, d, C_pad, tn, nj, tail, has_ds):
    if has_ds:
        (x_ref, mask_ref, w1_ref, b1_ref, w2_ref, b2_ref, w3_ref, b3_ref,
         wds_ref, bds_ref, o_ref, out1p_ref, acc_ref, h2_ref) = refs
        res_ref = None
    else:
        (x_ref, mask_ref, w1_ref, b1_ref, w2_ref, b2_ref, w3_ref, b3_ref,
         o_ref, out1p_ref, acc_ref, h2_ref, res_ref) = refs

    j = pl.program_id(1)
    roff = d * Wp + d              # flat offset of the first valid pixel

    # ---- heavy, j-invariant stages: run once per image (j == 0) ------------
    @pl.when(j == 0)
    def _():
        # conv1 (1x1) + bn1 + relu over the whole zero-padded plane; the mask
        # zeroes the d-wide border so conv2's implicit zero padding is exact.
        h1 = jnp.dot(x_ref[0], w1_ref[...], preferred_element_type=jnp.float32)
        h1 = jnp.maximum(h1 + b1_ref[...], 0.0) * mask_ref[...]
        out1p_ref[pl.ds(0, HWp), :] = h1.astype(out1p_ref.dtype)
        if tail > 0:               # zero the few overrun rows read by deep taps
            out1p_ref[pl.ds(HWp, tail), :] = jnp.zeros(
                (tail, C_pad), out1p_ref.dtype)

        # conv2 (3x3, dilation d) + bn2 + relu: 9 accumulated matmuls over
        # CONTIGUOUS row-shifted views of the flat padded plane (no im2col, no
        # window relayout copies).  Columns >= W are garbage and are discarded
        # by the wrapper.  Accumulate in an f32 VMEM scratch ref.
        t = 0
        for ki in range(3):
            for kj in range(3):
                tap = out1p_ref[pl.ds(ki * d * Wp + kj * d, HWd), :]
                contrib = jnp.dot(tap, w2_ref[t],
                                  preferred_element_type=jnp.float32)
                if t == 0:
                    acc_ref[...] = contrib
                else:
                    acc_ref[...] += contrib
                t += 1
        h2_ref[...] = jnp.maximum(acc_ref[...] + b2_ref[...],
                                  0.0).astype(h2_ref.dtype)

        if not has_ds:
            # identity shortcut: stage per-tile channel slices of the already
            # resident x block once per image (no second HBM read of x, no
            # dynamic lane slicing later).
            xs = x_ref[0, pl.ds(roff, HWd), :]
            for jj in range(nj):
                res_ref[jj] = xs[:, jj * tn:(jj + 1) * tn]

    # ---- conv3 (1x1, per out-channel tile) + bn3 + residual + relu ---------
    y = jnp.dot(h2_ref[...], w3_ref[...],
                preferred_element_type=jnp.float32) + b3_ref[...]
    if has_ds:
        xs = x_ref[0, pl.ds(roff, HWd), :]           # contiguous VMEM view
        y += jnp.dot(xs, wds_ref[...],
                     preferred_element_type=jnp.float32) + bds_ref[...]
    else:
        y += res_ref[j].astype(jnp.float32)
    o_ref[...] = jnp.maximum(y, 0.0).reshape(1, HWd, tn).astype(o_ref.dtype)


# ---------------------------------------------------------------------------
# Parameter preparation: fold BN scale into weights, pad channels to 128 lanes
# ---------------------------------------------------------------------------
def prepare_params(params, in_channels, *, dtype=jnp.bfloat16):
    channels = params["conv1_w"].shape[0]
    out_channels = params["conv3_w"].shape[0]
    Cin_pad = _round_up(in_channels, LANES)
    C_pad = _round_up(channels, LANES)
    Cout_pad = _round_up(out_channels, LANES)

    s1, sh1 = fold_bn(*params["bn1"])
    w1 = params["conv1_w"].reshape(channels, in_channels).T * s1[None, :]
    s2, sh2 = fold_bn(*params["bn2"])
    w2 = jnp.transpose(params["conv2_w"], (2, 3, 1, 0)) * s2[None, None, None, :]
    s3, sh3 = fold_bn(*params["bn3"])
    w3 = params["conv3_w"].reshape(out_channels, channels).T * s3[None, :]

    prep = {
        "w1": _pad_to(w1, (Cin_pad, C_pad)).astype(dtype),
        "b1": _pad_to(sh1.reshape(1, channels), (1, C_pad)).astype(jnp.float32),
        "w2": _pad_to(w2, (3, 3, C_pad, C_pad)).reshape(9, C_pad, C_pad).astype(dtype),
        "b2": _pad_to(sh2.reshape(1, channels), (1, C_pad)).astype(jnp.float32),
        "w3": _pad_to(w3, (C_pad, Cout_pad)).astype(dtype),
        "b3": _pad_to(sh3.reshape(1, out_channels), (1, Cout_pad)).astype(jnp.float32),
        "Cin_pad": Cin_pad, "C_pad": C_pad, "Cout_pad": Cout_pad,
        "out_channels": out_channels,
    }
    if "ds_conv_w" in params:
        sd, shd = fold_bn(*params["ds_bn"])
        wds = params["ds_conv_w"].reshape(out_channels, in_channels).T * sd[None, :]
        prep["wds"] = _pad_to(wds, (Cin_pad, Cout_pad)).astype(dtype)
        prep["bds"] = _pad_to(shd.reshape(1, out_channels),
                              (1, Cout_pad)).astype(jnp.float32)
    return prep


# ---------------------------------------------------------------------------
# Wrapper
# ---------------------------------------------------------------------------
def bottleneck2_forward(x_nhwc, params, *, stride=1, dilation=1,
                        out_dtype=jnp.bfloat16):
    N, H, W, Cin = x_nhwc.shape
    d, s = int(dilation), int(stride)
    assert d >= 1 and s >= 1
    prep = prepare_params(params, Cin)
    Cin_pad, C_pad, Cout_pad = prep["Cin_pad"], prep["C_pad"], prep["Cout_pad"]
    out_channels = prep["out_channels"]
    has_ds = "wds" in prep

    Hp, Wp = H + 2 * d, W + 2 * d
    Ho, Wo = (H - 1) // s + 1, (W - 1) // s + 1
    HWp, HWd = Hp * Wp, H * Wp               # padded plane rows / dense rows
    R = _round_up(HWp + 2 * d, 8)            # scratch rows (deepest tap fits)
    tail = R - HWp

    # biggest lane-dense out-channel tile that divides Cout_pad
    tn = next(t for t in (512, 256, 128) if Cout_pad % t == 0)
    nj = Cout_pad // tn

    # zero-pad spatially by d and channel-pad to 128 lanes, flatten per image
    x_p = jnp.pad(x_nhwc.astype(jnp.bfloat16),
                  ((0, 0), (d, d), (d, d), (0, Cin_pad - Cin)))
    x_flat = x_p.reshape(N, HWp, Cin_pad)
    mask = jnp.zeros((Hp, Wp), jnp.float32).at[d:d + H, d:d + W].set(1.0)
    mask = mask.reshape(HWp, 1)

    kernel = functools.partial(
        _bottleneck_kernel, HWp=HWp, HWd=HWd, Wp=Wp, d=d, C_pad=C_pad,
        tn=tn, nj=nj, tail=tail, has_ds=has_ds)

    scratch = [pltpu.VMEM((R, C_pad), jnp.bfloat16),     # conv1 out (flat, padded)
               pltpu.VMEM((HWd, C_pad), jnp.float32),    # conv2 f32 accumulator
               pltpu.VMEM((HWd, C_pad), jnp.bfloat16)]   # conv2 out (conv3 lhs)
    if not has_ds:
        scratch.append(pltpu.VMEM((nj, HWd, tn), jnp.bfloat16))  # identity residual

    def run(single_buffer_weights):
        inv = functools.partial(_invariant_spec,
                                single_buffer=single_buffer_weights)
        in_specs = [
            pl.BlockSpec((1, HWp, Cin_pad), lambda n, j: (n, 0, 0)),   # x
            inv((HWp, 1)),                                             # border mask
            inv((Cin_pad, C_pad)),                                     # w1
            inv((1, C_pad)),                                           # b1
            inv((9, C_pad, C_pad)),                                    # w2
            inv((1, C_pad)),                                           # b2
            pl.BlockSpec((C_pad, tn), lambda n, j: (0, j)),            # w3 tile
            pl.BlockSpec((1, tn), lambda n, j: (0, j)),                # b3 tile
        ]
        inputs = [x_flat, mask, prep["w1"], prep["b1"], prep["w2"],
                  prep["b2"], prep["w3"], prep["b3"]]
        if has_ds:
            in_specs += [pl.BlockSpec((Cin_pad, tn), lambda n, j: (0, j)),
                         pl.BlockSpec((1, tn), lambda n, j: (0, j))]
            inputs += [prep["wds"], prep["bds"]]
        return pl.pallas_call(
            kernel,
            out_shape=jax.ShapeDtypeStruct((N, HWd, Cout_pad), out_dtype),
            grid=(N, nj),
            in_specs=in_specs,
            out_specs=pl.BlockSpec((1, HWd, tn), lambda n, j: (n, 0, j)),
            scratch_shapes=scratch,
            compiler_params=pltpu.CompilerParams(
                dimension_semantics=("parallel", "arbitrary"),
                vmem_limit_bytes=_vmem_limit_bytes()),
        )(*inputs)

    try:
        out = run(True)
    except Exception:       # pl.Buffered(1) unsupported -> default buffering
        out = run(False)

    # dense (stride-1, padded-width) plane -> NHWC: rows ::s, first Wo of the
    # ::s columns, real channels only (handled by XLA, outside the kernel).
    out = out.reshape(N, H, Wp, Cout_pad)
    out = out[:, ::s, ::s, :][:, :, :Wo, :out_channels]
    return out


# ---------------------------------------------------------------------------
# Pure-JAX reference mirroring the kernel's bf16/f32 numerics (for checking)
# ---------------------------------------------------------------------------
def reference_forward(x_nhwc, params, *, stride=1, dilation=1):
    N, H, W, Cin = x_nhwc.shape
    prep = prepare_params(params, Cin)
    d, s = dilation, stride
    Ho = (H - 1) // s + 1
    Wo = (W - 1) // s + 1
    f32 = jnp.float32
    x_p = jnp.pad(x_nhwc, ((0, 0), (0, 0), (0, 0),
                           (0, prep["Cin_pad"] - Cin))).astype(jnp.bfloat16)
    h1 = jnp.einsum("nhwc,cd->nhwd", x_p.astype(f32),
                    prep["w1"].astype(f32)) + prep["b1"][0]
    h1 = jnp.maximum(h1, 0.0).astype(jnp.bfloat16)
    h1p = jnp.pad(h1, ((0, 0), (d, d), (d, d), (0, 0)))
    acc = jnp.zeros((N, Ho, Wo, prep["C_pad"]), f32)
    for ki in range(3):
        for kj in range(3):
            win = h1p[:, ki * d: ki * d + (Ho - 1) * s + 1: s,
                      kj * d: kj * d + (Wo - 1) * s + 1: s, :]
            acc = acc + jnp.einsum("nhwc,cd->nhwd", win.astype(f32),
                                   prep["w2"][ki * 3 + kj].astype(f32))
    h2 = jnp.maximum(acc + prep["b2"][0], 0.0).astype(jnp.bfloat16)
    y = jnp.einsum("nhwc,cd->nhwd", h2.astype(f32),
                   prep["w3"].astype(f32)) + prep["b3"][0]
    if "wds" in prep:
        xs = x_p[:, ::s, ::s, :]
        res = jnp.einsum("nhwc,cd->nhwd", xs.astype(f32),
                         prep["wds"].astype(f32)) + prep["bds"][0]
    else:
        res = x_p.astype(f32)
    return jnp.maximum(y + res, 0.0)[..., :prep["out_channels"]]


# ---------------------------------------------------------------------------
# Parameter init (matches the PyTorch module's structure)
# ---------------------------------------------------------------------------
def init_params(key, in_channels, channels, stride):
    out_channels = 4 * channels
    ks = jax.random.split(key, 8)

    def conv_w(k, cout, cin, kh, kw):
        fan_in = cin * kh * kw
        return jax.random.normal(k, (cout, cin, kh, kw), jnp.float32) / jnp.sqrt(
            jnp.float32(fan_in))

    def bn_p(k, c):
        k1, k2, k3, k4 = jax.random.split(k, 4)
        gamma = 0.5 + jax.random.uniform(k1, (c,), jnp.float32)
        beta = 0.1 * jax.random.normal(k2, (c,), jnp.float32)
        mean = 0.1 * jax.random.normal(k3, (c,), jnp.float32)
        var = 0.5 + jax.random.uniform(k4, (c,), jnp.float32)
        return gamma, beta, mean, var

    p = {
        "conv1_w": conv_w(ks[0], channels, in_channels, 1, 1),
        "bn1": bn_p(ks[1], channels),
        "conv2_w": conv_w(ks[2], channels, channels, 3, 3),
        "bn2": bn_p(ks[3], channels),
        "conv3_w": conv_w(ks[4], out_channels, channels, 1, 1),
        "bn3": bn_p(ks[5], out_channels),
    }
    if stride != 1 or in_channels != out_channels:
        p["ds_conv_w"] = conv_w(ks[6], out_channels, in_channels, 1, 1)
        p["ds_bn"] = bn_p(ks[7], out_channels)
    return p


# ---------------------------------------------------------------------------
if __name__ == "__main__":
    key = jax.random.PRNGKey(0)
    k_x, k_p = jax.random.split(key)

    N, Cin, H, W = 2, 4, 16, 16
    channels = 4                       # out_channels = 16 -> downsample active
    stride, dilation = 1, 1

    x_nchw = jax.random.normal(k_x, (N, Cin, H, W), jnp.float32)
    x_nhwc = jnp.transpose(x_nchw, (0, 2, 3, 1))   # NCHW -> NHWC for the kernel
    params = init_params(k_p, Cin, channels, stride)

    out_nhwc = bottleneck2_forward(x_nhwc, params, stride=stride,
                                   dilation=dilation)
    jax.block_until_ready(out_nhwc)

    ref = reference_forward(x_nhwc, params, stride=stride, dilation=dilation)
    scale = float(jnp.max(jnp.abs(ref)))
    err = float(jnp.max(jnp.abs(out_nhwc.astype(jnp.float32) - ref)))
    assert err <= 5e-2 * (scale + 1.0), f"max abs error {err} (scale {scale})"

    out_nchw = jnp.transpose(out_nhwc, (0, 3, 1, 2))  # back to PyTorch NCHW
    jax.block_until_ready(out_nchw)
    assert out_nchw.shape == (N, 4 * channels, H, W), out_nchw.shape
    print("KERNEL_OK")
</pallas_src>

<mosaic_0001>
module attributes {stable_mosaic.version = 11 : i64} {
  func.func @_bottleneck_kernel(%arg0: i32, %arg1: i32, %arg2: memref<1x324x128xbf16, #tpu.memory_space<vmem>>, %arg3: memref<324x1xf32, #tpu.memory_space<vmem>>, %arg4: memref<128x128xbf16, #tpu.memory_space<vmem>>, %arg5: memref<1x128xf32, #tpu.memory_space<vmem>>, %arg6: memref<9x128x128xbf16, #tpu.memory_space<vmem>>, %arg7: memref<1x128xf32, #tpu.memory_space<vmem>>, %arg8: memref<128x128xbf16, #tpu.memory_space<vmem>>, %arg9: memref<1x128xf32, #tpu.memory_space<vmem>>, %arg10: memref<128x128xbf16, #tpu.memory_space<vmem>>, %arg11: memref<1x128xf32, #tpu.memory_space<vmem>>, %arg12: memref<1x288x128xbf16, #tpu.memory_space<vmem>>, %arg13: memref<328x128xbf16, #tpu.memory_space<vmem>>, %arg14: memref<288x128xf32, #tpu.memory_space<vmem>>, %arg15: memref<288x128xbf16, #tpu.memory_space<vmem>>) attributes {dimension_semantics = [#tpu.dimension_semantics<parallel>, #tpu.dimension_semantics<arbitrary>], iteration_bounds = array<i64: 2, 1>, scalar_prefetch = 0 : i64, scratch_operands = 3 : i64, tpu.core_type = #tpu.core_type<tc>, window_params = [{transform_indices = @transform_0, window_bounds = array<i64: 1, 324, 128>}, {pipeline_mode = #tpu.pipeline_mode<synchronous>, transform_indices = @transform_1, window_bounds = array<i64: 324, 1>}, {pipeline_mode = #tpu.pipeline_mode<synchronous>, transform_indices = @transform_2, window_bounds = array<i64: 128, 128>}, {pipeline_mode = #tpu.pipeline_mode<synchronous>, transform_indices = @transform_3, window_bounds = array<i64: 1, 128>}, {pipeline_mode = #tpu.pipeline_mode<synchronous>, transform_indices = @transform_4, window_bounds = array<i64: 9, 128, 128>}, {pipeline_mode = #tpu.pipeline_mode<synchronous>, transform_indices = @transform_5, window_bounds = array<i64: 1, 128>}, {transform_indices = @transform_6, window_bounds = array<i64: 128, 128>}, {transform_indices = @transform_7, window_bounds = array<i64: 1, 128>}, {transform_indices = @transform_8, window_bounds = array<i64: 128, 128>}, {transform_indices = @transform_9, window_bounds = array<i64: 1, 128>}, {transform_indices = @transform_10, window_bounds = array<i64: 1, 288, 128>}]} {
    %c0_i32 = arith.constant 0 : i32
    %0 = arith.cmpi eq, %arg1, %c0_i32 : i32
    %1 = arith.extui %0 : i1 to i32
    %c0_i32_0 = arith.constant 0 : i32
    %2 = arith.cmpi ne, %1, %c0_i32_0 : i32
    scf.if %2 {
      %c0_17 = arith.constant 0 : index
      %c0_18 = arith.constant 0 : index
      %c0_19 = arith.constant 0 : index
      %22 = vector.load %arg2[%c0_17, %c0_18, %c0_19] : memref<1x324x128xbf16, #tpu.memory_space<vmem>>, vector<1x324x128xbf16>
      %23 = vector.shape_cast %22 : vector<1x324x128xbf16> to vector<324x128xbf16>
      %c0_20 = arith.constant 0 : index
      %c0_21 = arith.constant 0 : index
      %24 = vector.load %arg4[%c0_20, %c0_21] : memref<128x128xbf16, #tpu.memory_space<vmem>>, vector<128x128xbf16>
      %cst_22 = arith.constant dense<0.000000e+00> : vector<324x128xf32>
      %25 = tpu.matmul %23, %24, %cst_22 {dimension_numbers = #tpu.dot_dimension_numbers<[1], [0], [0], [1], [0, 0, 1, 1], [], []>} : vector<324x128xbf16>, vector<128x128xbf16>, vector<324x128xf32> -> vector<324x128xf32>
      %c0_23 = arith.constant 0 : index
      %c0_24 = arith.constant 0 : index
      %26 = vector.load %arg5[%c0_23, %c0_24] : memref<1x128xf32, #tpu.memory_space<vmem>>, vector<1x128xf32>
      %27 = vector.broadcast %26 : vector<1x128xf32> to vector<324x128xf32>
      %28 = arith.addf %25, %27 : vector<324x128xf32>
      %cst_25 = arith.constant 0.000000e+00 : f32
      %29 = vector.broadcast %cst_25 : f32 to vector<324x128xf32>
      %30 = arith.maximumf %28, %29 : vector<324x128xf32>
      %c0_26 = arith.constant 0 : index
      %c0_27 = arith.constant 0 : index
      %31 = vector.load %arg3[%c0_26, %c0_27] : memref<324x1xf32, #tpu.memory_space<vmem>>, vector<324x1xf32>
      %32 = vector.broadcast %31 : vector<324x1xf32> to vector<324x128xf32>
      %33 = arith.mulf %30, %32 : vector<324x128xf32>
      %34 = arith.truncf %33 : vector<324x128xf32> to vector<324x128xbf16>
      %c0_28 = arith.constant 0 : index
      %c0_29 = arith.constant 0 : index
      %35 = vector.load %arg13[%c0_28, %c0_29] : memref<328x128xbf16, #tpu.memory_space<vmem>>, vector<324x128xbf16>
      tpu.vector_store %arg13[%c0_28, %c0_29], %34 {strides = array<i32>} : memref<328x128xbf16, #tpu.memory_space<vmem>>, vector<324x128xbf16>,
      %cst_30 = arith.constant 0.000000e+00 : bf16
      %36 = vector.broadcast %cst_30 : bf16 to vector<4x128xbf16>
      %c324 = arith.constant 324 : index
      %c0_31 = arith.constant 0 : index
      %37 = vector.load %arg13[%c324, %c0_31] : memref<328x128xbf16, #tpu.memory_space<vmem>>, vector<4x128xbf16>
      tpu.vector_store %arg13[%c324, %c0_31], %36 {strides = array<i32>} : memref<328x128xbf16, #tpu.memory_space<vmem>>, vector<4x128xbf16>,
      %c0_32 = arith.constant 0 : index
      %c0_33 = arith.constant 0 : index
      %38 = vector.load %arg13[%c0_32, %c0_33] : memref<328x128xbf16, #tpu.memory_space<vmem>>, vector<288x128xbf16>
      %c0_34 = arith.constant 0 : index
      %c0_35 = arith.constant 0 : index
      %c0_36 = arith.constant 0 : index
      %39 = vector.load %arg6[%c0_34, %c0_35, %c0_36] : memref<9x128x128xbf16, #tpu.memory_space<vmem>>, vector<1x128x128xbf16>
      %40 = vector.shape_cast %39 : vector<1x128x128xbf16> to vector<128x128xbf16>
      %cst_37 = arith.constant dense<0.000000e+00> : vector<288x128xf32>
      %41 = tpu.matmul %38, %40, %cst_37 {dimension_numbers = #tpu.dot_dimension_numbers<[1], [0], [0], [1], [0, 0, 1, 1], [], []>} : vector<288x128xbf16>, vector<128x128xbf16>, vector<288x128xf32> -> vector<288x128xf32>
      %c0_38 = arith.constant 0 : index
      %c0_39 = arith.constant 0 : index
      %42 = vector.load %arg14[%c0_38, %c0_39] : memref<288x128xf32, #tpu.memory_space<vmem>>, vector<288x128xf32>
      tpu.vector_store %arg14[%c0_38, %c0_39], %41 {strides = array<i32>} : memref<288x128xf32, #tpu.memory_space<vmem>>, vector<288x128xf32>,
      %c1 = arith.constant 1 : index
      %c0_40 = arith.constant 0 : index
      %43 = vector.load %arg13[%c1, %c0_40] : memref<328x128xbf16, #tpu.memory_space<vmem>>, vector<288x128xbf16>
      %c1_41 = arith.constant 1 : index
      %c0_42 = arith.constant 0 : index
      %c0_43 = arith.constant 0 : index
      %44 = vector.load %arg6[%c1_41, %c0_42, %c0_43] : memref<9x128x128xbf16, #tpu.memory_space<vmem>>, vector<1x128x128xbf16>
      %45 = vector.shape_cast %44 : vector<1x128x128xbf16> to vector<128x128xbf16>
      %cst_44 = arith.constant dense<0.000000e+00> : vector<288x128xf32>
      %46 = tpu.matmul %43, %45, %cst_44 {dimension_numbers = #tpu.dot_dimension_numbers<[1], [0], [0], [1], [0, 0, 1, 1], [], []>} : vector<288x128xbf16>, vector<128x128xbf16>, vector<288x128xf32> -> vector<288x128xf32>
      %c0_45 = arith.constant 0 : index
      %c0_46 = arith.constant 0 : index
      %47 = vector.load %arg14[%c0_45, %c0_46] : memref<288x128xf32, #tpu.memory_space<vmem>>, vector<288x128xf32>
      %48 = arith.addf %47, %46 : vector<288x128xf32>
      %c0_47 = arith.constant 0 : index
      %c0_48 = arith.constant 0 : index
      %49 = vector.load %arg14[%c0_47, %c0_48] : memref<288x128xf32, #tpu.memory_space<vmem>>, vector<288x128xf32>
      tpu.vector_store %arg14[%c0_47, %c0_48], %48 {strides = array<i32>} : memref<288x128xf32, #tpu.memory_space<vmem>>, vector<288x128xf32>,
      %c2 = arith.constant 2 : index
      %c0_49 = arith.constant 0 : index
      %50 = vector.load %arg13[%c2, %c0_49] : memref<328x128xbf16, #tpu.memory_space<vmem>>, vector<288x128xbf16>
      %c2_50 = arith.constant 2 : index
      %c0_51 = arith.constant 0 : index
      %c0_52 = arith.constant 0 : index
      %51 = vector.load %arg6[%c2_50, %c0_51, %c0_52] : memref<9x128x128xbf16, #tpu.memory_space<vmem>>, vector<1x128x128xbf16>
      %52 = vector.shape_cast %51 : vector<1x128x128xbf16> to vector<128x128xbf16>
      %cst_53 = arith.constant dense<0.000000e+00> : vector<288x128xf32>
      %53 = tpu.matmul %50, %52, %cst_53 {dimension_numbers = #tpu.dot_dimension_numbers<[1], [0], [0], [1], [0, 0, 1, 1], [], []>} : vector<288x128xbf16>, vector<128x128xbf16>, vector<288x128xf32> -> vector<288x128xf32>
      %c0_54 = arith.constant 0 : index
      %c0_55 = arith.constant 0 : index
      %54 = vector.load %arg14[%c0_54, %c0_55] : memref<288x128xf32, #tpu.memory_space<vmem>>, vector<288x128xf32>
      %55 = arith.addf %54, %53 : vector<288x128xf32>
      %c0_56 = arith.constant 0 : index
      %c0_57 = arith.constant 0 : index
      %56 = vector.load %arg14[%c0_56, %c0_57] : memref<288x128xf32, #tpu.memory_space<vmem>>, vector<288x128xf32>
      tpu.vector_store %arg14[%c0_56, %c0_57], %55 {strides = array<i32>} : memref<288x128xf32, #tpu.memory_space<vmem>>, vector<288x128xf32>,
      %c18 = arith.constant 18 : index
      %c0_58 = arith.constant 0 : index
      %57 = vector.load %arg13[%c18, %c0_58] : memref<328x128xbf16, #tpu.memory_space<vmem>>, vector<288x128xbf16>
      %c3 = arith.constant 3 : index
      %c0_59 = arith.constant 0 : index
      %c0_60 = arith.constant 0 : index
      %58 = vector.load %arg6[%c3, %c0_59, %c0_60] : memref<9x128x128xbf16, #tpu.memory_space<vmem>>, vector<1x128x128xbf16>
      %59 = vector.shape_cast %58 : vector<1x128x128xbf16> to vector<128x128xbf16>
      %cst_61 = arith.constant dense<0.000000e+00> : vector<288x128xf32>
      %60 = tpu.matmul %57, %59, %cst_61 {dimension_numbers = #tpu.dot_dimension_numbers<[1], [0], [0], [1], [0, 0, 1, 1], [], []>} : vector<288x128xbf16>, vector<128x128xbf16>, vector<288x128xf32> -> vector<288x128xf32>
      %c0_62 = arith.constant 0 : index
      %c0_63 = arith.constant 0 : index
      %61 = vector.load %arg14[%c0_62, %c0_63] : memref<288x128xf32, #tpu.memory_space<vmem>>, vector<288x128xf32>
      %62 = arith.addf %61, %60 : vector<288x128xf32>
      %c0_64 = arith.constant 0 : index
      %c0_65 = arith.constant 0 : index
      %63 = vector.load %arg14[%c0_64, %c0_65] : memref<288x128xf32, #tpu.memory_space<vmem>>, vector<288x128xf32>
      tpu.vector_store %arg14[%c0_64, %c0_65], %62 {strides = array<i32>} : memref<288x128xf32, #tpu.memory_space<vmem>>, vector<288x128xf32>,
      %c19_66 = arith.constant 19 : index
      %c0_67 = arith.constant 0 : index
      %64 = vector.load %arg13[%c19_66, %c0_67] : memref<328x128xbf16, #tpu.memory_space<vmem>>, vector<288x128xbf16>
      %c4 = arith.constant 4 : index
      %c0_68 = arith.constant 0 : index
      %c0_69 = arith.constant 0 : index
      %65 = vector.load %arg6[%c4, %c0_68, %c0_69] : memref<9x128x128xbf16, #tpu.memory_space<vmem>>, vector<1x128x128xbf16>
      %66 = vector.shape_cast %65 : vector<1x128x128xbf16> to vector<128x128xbf16>
      %cst_70 = arith.constant dense<0.000000e+00> : vector<288x128xf32>
      %67 = tpu.matmul %64, %66, %cst_70 {dimension_numbers = #tpu.dot_dimension_numbers<[1], [0], [0], [1], [0, 0, 1, 1], [], []>} : vector<288x128xbf16>, vector<128x128xbf16>, vector<288x128xf32> -> vector<288x128xf32>
      %c0_71 = arith.constant 0 : index
      %c0_72 = arith.constant 0 : index
      %68 = vector.load %arg14[%c0_71, %c0_72] : memref<288x128xf32, #tpu.memory_space<vmem>>, vector<288x128xf32>
      %69 = arith.addf %68, %67 : vector<288x128xf32>
      %c0_73 = arith.constant 0 : index
      %c0_74 = arith.constant 0 : index
      %70 = vector.load %arg14[%c0_73, %c0_74] : memref<288x128xf32, #tpu.memory_space<vmem>>, vector<288x128xf32>
      tpu.vector_store %arg14[%c0_73, %c0_74], %69 {strides = array<i32>} : memref<288x128xf32, #tpu.memory_space<vmem>>, vector<288x128xf32>,
      %c20 = arith.constant 20 : index
      %c0_75 = arith.constant 0 : index
      %71 = vector.load %arg13[%c20, %c0_75] : memref<328x128xbf16, #tpu.memory_space<vmem>>, vector<288x128xbf16>
      %c5 = arith.constant 5 : index
      %c0_76 = arith.constant 0 : index
      %c0_77 = arith.constant 0 : index
      %72 = vector.load %arg6[%c5, %c0_76, %c0_77] : memref<9x128x128xbf16, #tpu.memory_space<vmem>>, vector<1x128x128xbf16>
      %73 = vector.shape_cast %72 : vector<1x128x128xbf16> to vector<128x128xbf16>
      %cst_78 = arith.constant dense<0.000000e+00> : vector<288x128xf32>
      %74 = tpu.matmul %71, %73, %cst_78 {dimension_numbers = #tpu.dot_dimension_numbers<[1], [0], [0], [1], [0, 0, 1, 1], [], []>} : vector<288x128xbf16>, vector<128x128xbf16>, vector<288x128xf32> -> vector<288x128xf32>
      %c0_79 = arith.constant 0 : index
      %c0_80 = arith.constant 0 : index
      %75 = vector.load %arg14[%c0_79, %c0_80] : memref<288x128xf32, #tpu.memory_space<vmem>>, vector<288x128xf32>
      %76 = arith.addf %75, %74 : vector<288x128xf32>
      %c0_81 = arith.constant 0 : index
      %c0_82 = arith.constant 0 : index
      %77 = vector.load %arg14[%c0_81, %c0_82] : memref<288x128xf32, #tpu.memory_space<vmem>>, vector<288x128xf32>
      tpu.vector_store %arg14[%c0_81, %c0_82], %76 {strides = array<i32>} : memref<288x128xf32, #tpu.memory_space<vmem>>, vector<288x128xf32>,
      %c36 = arith.constant 36 : index
      %c0_83 = arith.constant 0 : index
      %78 = vector.load %arg13[%c36, %c0_83] : memref<328x128xbf16, #tpu.memory_space<vmem>>, vector<288x128xbf16>
      %c6 = arith.constant 6 : index
      %c0_84 = arith.constant 0 : index
      %c0_85 = arith.constant 0 : index
      %79 = vector.load %arg6[%c6, %c0_84, %c0_85] : memref<9x128x128xbf16, #tpu.memory_space<vmem>>, vector<1x128x128xbf16>
      %80 = vector.shape_cast %79 : vector<1x128x128xbf16> to vector<128x128xbf16>
      %cst_86 = arith.constant dense<0.000000e+00> : vector<288x128xf32>
      %81 = tpu.matmul %78, %80, %cst_86 {dimension_numbers = #tpu.dot_dimension_numbers<[1], [0], [0], [1], [0, 0, 1, 1], [], []>} : vector<288x128xbf16>, vector<128x128xbf16>, vector<288x128xf32> -> vector<288x128xf32>
      %c0_87 = arith.constant 0 : index
      %c0_88 = arith.constant 0 : index
      %82 = vector.load %arg14[%c0_87, %c0_88] : memref<288x128xf32, #tpu.memory_space<vmem>>, vector<288x128xf32>
      %83 = arith.addf %82, %81 : vector<288x128xf32>
      %c0_89 = arith.constant 0 : index
      %c0_90 = arith.constant 0 : index
      %84 = vector.load %arg14[%c0_89, %c0_90] : memref<288x128xf32, #tpu.memory_space<vmem>>, vector<288x128xf32>
      tpu.vector_store %arg14[%c0_89, %c0_90], %83 {strides = array<i32>} : memref<288x128xf32, #tpu.memory_space<vmem>>, vector<288x128xf32>,
      %c37 = arith.constant 37 : index
      %c0_91 = arith.constant 0 : index
      %85 = vector.load %arg13[%c37, %c0_91] : memref<328x128xbf16, #tpu.memory_space<vmem>>, vector<288x128xbf16>
      %c7 = arith.constant 7 : index
      %c0_92 = arith.constant 0 : index
      %c0_93 = arith.constant 0 : index
      %86 = vector.load %arg6[%c7, %c0_92, %c0_93] : memref<9x128x128xbf16, #tpu.memory_space<vmem>>, vector<1x128x128xbf16>
      %87 = vector.shape_cast %86 : vector<1x128x128xbf16> to vector<128x128xbf16>
      %cst_94 = arith.constant dense<0.000000e+00> : vector<288x128xf32>
      %88 = tpu.matmul %85, %87, %cst_94 {dimension_numbers = #tpu.dot_dimension_numbers<[1], [0], [0], [1], [0, 0, 1, 1], [], []>} : vector<288x128xbf16>, vector<128x128xbf16>, vector<288x128xf32> -> vector<288x128xf32>
      %c0_95 = arith.constant 0 : index
      %c0_96 = arith.constant 0 : index
      %89 = vector.load %arg14[%c0_95, %c0_96] : memref<288x128xf32, #tpu.memory_space<vmem>>, vector<288x128xf32>
      %90 = arith.addf %89, %88 : vector<288x128xf32>
      %c0_97 = arith.constant 0 : index
      %c0_98 = arith.constant 0 : index
      %91 = vector.load %arg14[%c0_97, %c0_98] : memref<288x128xf32, #tpu.memory_space<vmem>>, vector<288x128xf32>
      tpu.vector_store %arg14[%c0_97, %c0_98], %90 {strides = array<i32>} : memref<288x128xf32, #tpu.memory_space<vmem>>, vector<288x128xf32>,
      %c38 = arith.constant 38 : index
      %c0_99 = arith.constant 0 : index
      %92 = vector.load %arg13[%c38, %c0_99] : memref<328x128xbf16, #tpu.memory_space<vmem>>, vector<288x128xbf16>
      %c8 = arith.constant 8 : index
      %c0_100 = arith.constant 0 : index
      %c0_101 = arith.constant 0 : index
      %93 = vector.load %arg6[%c8, %c0_100, %c0_101] : memref<9x128x128xbf16, #tpu.memory_space<vmem>>, vector<1x128x128xbf16>
      %94 = vector.shape_cast %93 : vector<1x128x128xbf16> to vector<128x128xbf16>
      %cst_102 = arith.constant dense<0.000000e+00> : vector<288x128xf32>
      %95 = tpu.matmul %92, %94, %cst_102 {dimension_numbers = #tpu.dot_dimension_numbers<[1], [0], [0], [1], [0, 0, 1, 1], [], []>} : vector<288x128xbf16>, vector<128x128xbf16>, vector<288x128xf32> -> vector<288x128xf32>
      %c0_103 = arith.constant 0 : index
      %c0_104 = arith.constant 0 : index
      %96 = vector.load %arg14[%c0_103, %c0_104] : memref<288x128xf32, #tpu.memory_space<vmem>>, vector<288x128xf32>
      %97 = arith.addf %96, %95 : vector<288x128xf32>
      %c0_105 = arith.constant 0 : index
      %c0_106 = arith.constant 0 : index
      %98 = vector.load %arg14[%c0_105, %c0_106] : memref<288x128xf32, #tpu.memory_space<vmem>>, vector<288x128xf32>
      tpu.vector_store %arg14[%c0_105, %c0_106], %97 {strides = array<i32>} : memref<288x128xf32, #tpu.memory_space<vmem>>, vector<288x128xf32>,
      %c0_107 = arith.constant 0 : index
      %c0_108 = arith.constant 0 : index
      %99 = vector.load %arg14[%c0_107, %c0_108] : memref<288x128xf32, #tpu.memory_space<vmem>>, vector<288x128xf32>
      %c0_109 = arith.constant 0 : index
      %c0_110 = arith.constant 0 : index
      %100 = vector.load %arg7[%c0_109, %c0_110] : memref<1x128xf32, #tpu.memory_space<vmem>>, vector<1x128xf32>
      %101 = vector.broadcast %100 : vector<1x128xf32> to vector<288x128xf32>
      %102 = arith.addf %99, %101 : vector<288x128xf32>
      %cst_111 = arith.constant 0.000000e+00 : f32
      %103 = vector.broadcast %cst_111 : f32 to vector<288x128xf32>
      %104 = arith.maximumf %102, %103 : vector<288x128xf32>
      %105 = arith.truncf %104 : vector<288x128xf32> to vector<288x128xbf16>
      %c0_112 = arith.constant 0 : index
      %c0_113 = arith.constant 0 : index
      %106 = vector.load %arg15[%c0_112, %c0_113] : memref<288x128xbf16, #tpu.memory_space<vmem>>, vector<288x128xbf16>
      tpu.vector_store %arg15[%c0_112, %c0_113], %105 {strides = array<i32>} : memref<288x128xbf16, #tpu.memory_space<vmem>>, vector<288x128xbf16>,
    } else {
    }
    %c0 = arith.constant 0 : index
    %c0_1 = arith.constant 0 : index
    %3 = vector.load %arg15[%c0, %c0_1] : memref<288x128xbf16, #tpu.memory_space<vmem>>, vector<288x128xbf16>
    %c0_2 = arith.constant 0 : index
    %c0_3 = arith.constant 0 : index
    %4 = vector.load %arg8[%c0_2, %c0_3] : memref<128x128xbf16, #tpu.memory_space<vmem>>, vector<128x128xbf16>
    %cst = arith.constant dense<0.000000e+00> : vector<288x128xf32>
    %5 = tpu.matmul %3, %4, %cst {dimension_numbers = #tpu.dot_dimension_numbers<[1], [0], [0], [1], [0, 0, 1, 1], [], []>} : vector<288x128xbf16>, vector<128x128xbf16>, vector<288x128xf32> -> vector<288x128xf32>
    %c0_4 = arith.constant 0 : index
    %c0_5 = arith.constant 0 : index
    %6 = vector.load %arg9[%c0_4, %c0_5] : memref<1x128xf32, #tpu.memory_space<vmem>>, vector<1x128xf32>
    %7 = vector.broadcast %6 : vector<1x128xf32> to vector<288x128xf32>
    %8 = arith.addf %5, %7 : vector<288x128xf32>
    %c0_6 = arith.constant 0 : index
    %c19 = arith.constant 19 : index
    %c0_7 = arith.constant 0 : index
    %9 = vector.load %arg2[%c0_6, %c19, %c0_7] : memref<1x324x128xbf16, #tpu.memory_space<vmem>>, vector<1x288x128xbf16>
    %10 = vector.shape_cast %9 : vector<1x288x128xbf16> to vector<288x128xbf16>
    %c0_8 = arith.constant 0 : index
    %c0_9 = arith.constant 0 : index
    %11 = vector.load %arg10[%c0_8, %c0_9] : memref<128x128xbf16, #tpu.memory_space<vmem>>, vector<128x128xbf16>
    %cst_10 = arith.constant dense<0.000000e+00> : vector<288x128xf32>
    %12 = tpu.matmul %10, %11, %cst_10 {dimension_numbers = #tpu.dot_dimension_numbers<[1], [0], [0], [1], [0, 0, 1, 1], [], []>} : vector<288x128xbf16>, vector<128x128xbf16>, vector<288x128xf32> -> vector<288x128xf32>
    %c0_11 = arith.constant 0 : index
    %c0_12 = arith.constant 0 : index
    %13 = vector.load %arg11[%c0_11, %c0_12] : memref<1x128xf32, #tpu.memory_space<vmem>>, vector<1x128xf32>
    %14 = vector.broadcast %13 : vector<1x128xf32> to vector<288x128xf32>
    %15 = arith.addf %12, %14 : vector<288x128xf32>
    %16 = arith.addf %8, %15 : vector<288x128xf32>
    %cst_13 = arith.constant 0.000000e+00 : f32
    %17 = vector.broadcast %cst_13 : f32 to vector<288x128xf32>
    %18 = arith.maximumf %16, %17 : vector<288x128xf32>
    %19 = vector.shape_cast %18 : vector<288x128xf32> to vector<1x288x128xf32>
    %20 = arith.truncf %19 : vector<1x288x128xf32> to vector<1x288x128xbf16>
    %c0_14 = arith.constant 0 : index
    %c0_15 = arith.constant 0 : index
    %c0_16 = arith.constant 0 : index
    %21 = vector.load %arg12[%c0_14, %c0_15, %c0_16] : memref<1x288x128xbf16, #tpu.memory_space<vmem>>, vector<1x288x128xbf16>
    tpu.vector_store %arg12[%c0_14, %c0_15, %c0_16], %20 {strides = array<i32>} : memref<1x288x128xbf16, #tpu.memory_space<vmem>>, vector<1x288x128xbf16>,
    return
  }
  func.func @transform_0(%arg0: i32, %arg1: i32) -> (i32, i32, i32) {
    %c0_i32 = arith.constant 0 : i32
    %c0_i32_0 = arith.constant 0 : i32
    %c0_i32_1 = arith.constant 0 : i32
    return %arg0, %c0_i32, %c0_i32_0 : i32, i32, i32
  }
  func.func @transform_1(%arg0: i32, %arg1: i32) -> (i32, i32) {
    %c0_i32 = arith.constant 0 : i32
    %c0_i32_0 = arith.constant 0 : i32
    %c0_i32_1 = arith.constant 0 : i32
    return %c0_i32, %c0_i32_0 : i32, i32
  }
  func.func @transform_2(%arg0: i32, %arg1: i32) -> (i32, i32) {
    %c0_i32 = arith.constant 0 : i32
    %c0_i32_0 = arith.constant 0 : i32
    %c0_i32_1 = arith.constant 0 : i32
    return %c0_i32, %c0_i32_0 : i32, i32
  }
  func.func @transform_3(%arg0: i32, %arg1: i32) -> (i32, i32) {
    %c0_i32 = arith.constant 0 : i32
    %c0_i32_0 = arith.constant 0 : i32
    %c0_i32_1 = arith.constant 0 : i32
    return %c0_i32, %c0_i32_0 : i32, i32
  }
  func.func @transform_4(%arg0: i32, %arg1: i32) -> (i32, i32, i32) {
    %c0_i32 = arith.constant 0 : i32
    %c0_i32_0 = arith.constant 0 : i32
    %c0_i32_1 = arith.constant 0 : i32
    %c0_i32_2 = arith.constant 0 : i32
    return %c0_i32, %c0_i32_0, %c0_i32_1 : i32, i32, i32
  }
  func.func @transform_5(%arg0: i32, %arg1: i32) -> (i32, i32) {
    %c0_i32 = arith.constant 0 : i32
    %c0_i32_0 = arith.constant 0 : i32
    %c0_i32_1 = arith.constant 0 : i32
    return %c0_i32, %c0_i32_0 : i32, i32
  }
  func.func @transform_6(%arg0: i32, %arg1: i32) -> (i32, i32) {
    %c0_i32 = arith.constant 0 : i32
    %c0_i32_0 = arith.constant 0 : i32
    return %c0_i32, %arg1 : i32, i32
  }
  func.func @transform_7(%arg0: i32, %arg1: i32) -> (i32, i32) {
    %c0_i32 = arith.constant 0 : i32
    %c0_i32_0 = arith.constant 0 : i32
    return %c0_i32, %arg1 : i32, i32
  }
  func.func @transform_8(%arg0: i32, %arg1: i32) -> (i32, i32) {
    %c0_i32 = arith.constant 0 : i32
    %c0_i32_0 = arith.constant 0 : i32
    return %c0_i32, %arg1 : i32, i32
  }
  func.func @transform_9(%arg0: i32, %arg1: i32) -> (i32, i32) {
    %c0_i32 = arith.constant 0 : i32
    %c0_i32_0 = arith.constant 0 : i32
    return %c0_i32, %arg1 : i32, i32
  }
  func.func @transform_10(%arg0: i32, %arg1: i32) -> (i32, i32, i32) {
    %c0_i32 = arith.constant 0 : i32
    %c0_i32_0 = arith.constant 0 : i32
    return %arg0, %c0_i32, %arg1 : i32, i32, i32
  }
}

module attributes {stable_mosaic.version = 11 : i64} {
  func.func @_bottleneck_kernel(%arg0: i32, %arg1: i32, %arg2: memref<1x324x128xbf16, #tpu.memory_space<vmem>>, %arg3: memref<324x1xf32, #tpu.memory_space<vmem>>, %arg4: memref<128x128xbf16, #tpu.memory_space<vmem>>, %arg5: memref<1x128xf32, #tpu.memory_space<vmem>>, %arg6: memref<9x128x128xbf16, #tpu.memory_space<vmem>>, %arg7: memref<1x128xf32, #tpu.memory_space<vmem>>, %arg8: memref<128x128xbf16, #tpu.memory_space<vmem>>, %arg9: memref<1x128xf32, #tpu.memory_space<vmem>>, %arg10: memref<128x128xbf16, #tpu.memory_space<vmem>>, %arg11: memref<1x128xf32, #tpu.memory_space<vmem>>, %arg12: memref<1x288x128xbf16, #tpu.memory_space<vmem>>, %arg13: memref<328x128xbf16, #tpu.memory_space<vmem>>, %arg14: memref<288x128xf32, #tpu.memory_space<vmem>>, %arg15: memref<288x128xbf16, #tpu.memory_space<vmem>>) attributes {dimension_semantics = [#tpu.dimension_semantics<parallel>, #tpu.dimension_semantics<arbitrary>], iteration_bounds = array<i64: 2, 1>, scalar_prefetch = 0 : i64, scratch_operands = 3 : i64, tpu.core_type = #tpu.core_type<tc>, window_params = [{transform_indices = @transform_0, window_bounds = array<i64: 1, 324, 128>}, {pipeline_mode = #tpu.pipeline_mode<synchronous>, transform_indices = @transform_1, window_bounds = array<i64: 324, 1>}, {pipeline_mode = #tpu.pipeline_mode<synchronous>, transform_indices = @transform_2, window_bounds = array<i64: 128, 128>}, {pipeline_mode = #tpu.pipeline_mode<synchronous>, transform_indices = @transform_3, window_bounds = array<i64: 1, 128>}, {pipeline_mode = #tpu.pipeline_mode<synchronous>, transform_indices = @transform_4, window_bounds = array<i64: 9, 128, 128>}, {pipeline_mode = #tpu.pipeline_mode<synchronous>, transform_indices = @transform_5, window_bounds = array<i64: 1, 128>}, {transform_indices = @transform_6, window_bounds = array<i64: 128, 128>}, {transform_indices = @transform_7, window_bounds = array<i64: 1, 128>}, {transform_indices = @transform_8, window_bounds = array<i64: 128, 128>}, {transform_indices = @transform_9, window_bounds = array<i64: 1, 128>}, {transform_indices = @transform_10, window_bounds = array<i64: 1, 288, 128>}]} {
    %c0_i32 = arith.constant 0 : i32
    %0 = arith.cmpi eq, %arg1, %c0_i32 : i32
    %1 = arith.extui %0 : i1 to i32
    %c0_i32_0 = arith.constant 0 : i32
    %2 = arith.cmpi ne, %1, %c0_i32_0 : i32
    scf.if %2 {
      %c0_17 = arith.constant 0 : index
      %c0_18 = arith.constant 0 : index
      %c0_19 = arith.constant 0 : index
      %22 = vector.load %arg2[%c0_17, %c0_18, %c0_19] : memref<1x324x128xbf16, #tpu.memory_space<vmem>>, vector<1x324x128xbf16>
      %23 = vector.shape_cast %22 : vector<1x324x128xbf16> to vector<324x128xbf16>
      %c0_20 = arith.constant 0 : index
      %c0_21 = arith.constant 0 : index
      %24 = vector.load %arg4[%c0_20, %c0_21] : memref<128x128xbf16, #tpu.memory_space<vmem>>, vector<128x128xbf16>
      %cst_22 = arith.constant dense<0.000000e+00> : vector<324x128xf32>
      %25 = tpu.matmul %23, %24, %cst_22 {dimension_numbers = #tpu.dot_dimension_numbers<[1], [0], [0], [1], [0, 0, 1, 1], [], []>} : vector<324x128xbf16>, vector<128x128xbf16>, vector<324x128xf32> -> vector<324x128xf32>
      %c0_23 = arith.constant 0 : index
      %c0_24 = arith.constant 0 : index
      %26 = vector.load %arg5[%c0_23, %c0_24] : memref<1x128xf32, #tpu.memory_space<vmem>>, vector<1x128xf32>
      %27 = vector.broadcast %26 : vector<1x128xf32> to vector<324x128xf32>
      %28 = arith.addf %25, %27 : vector<324x128xf32>
      %cst_25 = arith.constant 0.000000e+00 : f32
      %29 = vector.broadcast %cst_25 : f32 to vector<324x128xf32>
      %30 = arith.maximumf %28, %29 : vector<324x128xf32>
      %c0_26 = arith.constant 0 : index
      %c0_27 = arith.constant 0 : index
      %31 = vector.load %arg3[%c0_26, %c0_27] : memref<324x1xf32, #tpu.memory_space<vmem>>, vector<324x1xf32>
      %32 = vector.broadcast %31 : vector<324x1xf32> to vector<324x128xf32>
      %33 = arith.mulf %30, %32 : vector<324x128xf32>
      %34 = arith.truncf %33 : vector<324x128xf32> to vector<324x128xbf16>
      %c0_28 = arith.constant 0 : index
      %c0_29 = arith.constant 0 : index
      %35 = vector.load %arg13[%c0_28, %c0_29] : memref<328x128xbf16, #tpu.memory_space<vmem>>, vector<324x128xbf16>
      tpu.vector_store %arg13[%c0_28, %c0_29], %34 {strides = array<i32>} : memref<328x128xbf16, #tpu.memory_space<vmem>>, vector<324x128xbf16>,
      %cst_30 = arith.constant 0.000000e+00 : bf16
      %36 = vector.broadcast %cst_30 : bf16 to vector<4x128xbf16>
      %c324 = arith.constant 324 : index
      %c0_31 = arith.constant 0 : index
      %37 = vector.load %arg13[%c324, %c0_31] : memref<328x128xbf16, #tpu.memory_space<vmem>>, vector<4x128xbf16>
      tpu.vector_store %arg13[%c324, %c0_31], %36 {strides = array<i32>} : memref<328x128xbf16, #tpu.memory_space<vmem>>, vector<4x128xbf16>,
      %c0_32 = arith.constant 0 : index
      %c0_33 = arith.constant 0 : index
      %38 = vector.load %arg13[%c0_32, %c0_33] : memref<328x128xbf16, #tpu.memory_space<vmem>>, vector<288x128xbf16>
      %c0_34 = arith.constant 0 : index
      %c0_35 = arith.constant 0 : index
      %c0_36 = arith.constant 0 : index
      %39 = vector.load %arg6[%c0_34, %c0_35, %c0_36] : memref<9x128x128xbf16, #tpu.memory_space<vmem>>, vector<1x128x128xbf16>
      %40 = vector.shape_cast %39 : vector<1x128x128xbf16> to vector<128x128xbf16>
      %cst_37 = arith.constant dense<0.000000e+00> : vector<288x128xf32>
      %41 = tpu.matmul %38, %40, %cst_37 {dimension_numbers = #tpu.dot_dimension_numbers<[1], [0], [0], [1], [0, 0, 1, 1], [], []>} : vector<288x128xbf16>, vector<128x128xbf16>, vector<288x128xf32> -> vector<288x128xf32>
      %c0_38 = arith.constant 0 : index
      %c0_39 = arith.constant 0 : index
      %42 = vector.load %arg14[%c0_38, %c0_39] : memref<288x128xf32, #tpu.memory_space<vmem>>, vector<288x128xf32>
      tpu.vector_store %arg14[%c0_38, %c0_39], %41 {strides = array<i32>} : memref<288x128xf32, #tpu.memory_space<vmem>>, vector<288x128xf32>,
      %c1 = arith.constant 1 : index
      %c0_40 = arith.constant 0 : index
      %43 = vector.load %arg13[%c1, %c0_40] : memref<328x128xbf16, #tpu.memory_space<vmem>>, vector<288x128xbf16>
      %c1_41 = arith.constant 1 : index
      %c0_42 = arith.constant 0 : index
      %c0_43 = arith.constant 0 : index
      %44 = vector.load %arg6[%c1_41, %c0_42, %c0_43] : memref<9x128x128xbf16, #tpu.memory_space<vmem>>, vector<1x128x128xbf16>
      %45 = vector.shape_cast %44 : vector<1x128x128xbf16> to vector<128x128xbf16>
      %cst_44 = arith.constant dense<0.000000e+00> : vector<288x128xf32>
      %46 = tpu.matmul %43, %45, %cst_44 {dimension_numbers = #tpu.dot_dimension_numbers<[1], [0], [0], [1], [0, 0, 1, 1], [], []>} : vector<288x128xbf16>, vector<128x128xbf16>, vector<288x128xf32> -> vector<288x128xf32>
      %c0_45 = arith.constant 0 : index
      %c0_46 = arith.constant 0 : index
      %47 = vector.load %arg14[%c0_45, %c0_46] : memref<288x128xf32, #tpu.memory_space<vmem>>, vector<288x128xf32>
      %48 = arith.addf %47, %46 : vector<288x128xf32>
      %c0_47 = arith.constant 0 : index
      %c0_48 = arith.constant 0 : index
      %49 = vector.load %arg14[%c0_47, %c0_48] : memref<288x128xf32, #tpu.memory_space<vmem>>, vector<288x128xf32>
      tpu.vector_store %arg14[%c0_47, %c0_48], %48 {strides = array<i32>} : memref<288x128xf32, #tpu.memory_space<vmem>>, vector<288x128xf32>,
      %c2 = arith.constant 2 : index
      %c0_49 = arith.constant 0 : index
      %50 = vector.load %arg13[%c2, %c0_49] : memref<328x128xbf16, #tpu.memory_space<vmem>>, vector<288x128xbf16>
      %c2_50 = arith.constant 2 : index
      %c0_51 = arith.constant 0 : index
      %c0_52 = arith.constant 0 : index
      %51 = vector.load %arg6[%c2_50, %c0_51, %c0_52] : memref<9x128x128xbf16, #tpu.memory_space<vmem>>, vector<1x128x128xbf16>
      %52 = vector.shape_cast %51 : vector<1x128x128xbf16> to vector<128x128xbf16>
      %cst_53 = arith.constant dense<0.000000e+00> : vector<288x128xf32>
      %53 = tpu.matmul %50, %52, %cst_53 {dimension_numbers = #tpu.dot_dimension_numbers<[1], [0], [0], [1], [0, 0, 1, 1], [], []>} : vector<288x128xbf16>, vector<128x128xbf16>, vector<288x128xf32> -> vector<288x128xf32>
      %c0_54 = arith.constant 0 : index
      %c0_55 = arith.constant 0 : index
      %54 = vector.load %arg14[%c0_54, %c0_55] : memref<288x128xf32, #tpu.memory_space<vmem>>, vector<288x128xf32>
      %55 = arith.addf %54, %53 : vector<288x128xf32>
      %c0_56 = arith.constant 0 : index
      %c0_57 = arith.constant 0 : index
      %56 = vector.load %arg14[%c0_56, %c0_57] : memref<288x128xf32, #tpu.memory_space<vmem>>, vector<288x128xf32>
      tpu.vector_store %arg14[%c0_56, %c0_57], %55 {strides = array<i32>} : memref<288x128xf32, #tpu.memory_space<vmem>>, vector<288x128xf32>,
      %c18 = arith.constant 18 : index
      %c0_58 = arith.constant 0 : index
      %57 = vector.load %arg13[%c18, %c0_58] : memref<328x128xbf16, #tpu.memory_space<vmem>>, vector<288x128xbf16>
      %c3 = arith.constant 3 : index
      %c0_59 = arith.constant 0 : index
      %c0_60 = arith.constant 0 : index
      %58 = vector.load %arg6[%c3, %c0_59, %c0_60] : memref<9x128x128xbf16, #tpu.memory_space<vmem>>, vector<1x128x128xbf16>
      %59 = vector.shape_cast %58 : vector<1x128x128xbf16> to vector<128x128xbf16>
      %cst_61 = arith.constant dense<0.000000e+00> : vector<288x128xf32>
      %60 = tpu.matmul %57, %59, %cst_61 {dimension_numbers = #tpu.dot_dimension_numbers<[1], [0], [0], [1], [0, 0, 1, 1], [], []>} : vector<288x128xbf16>, vector<128x128xbf16>, vector<288x128xf32> -> vector<288x128xf32>
      %c0_62 = arith.constant 0 : index
      %c0_63 = arith.constant 0 : index
      %61 = vector.load %arg14[%c0_62, %c0_63] : memref<288x128xf32, #tpu.memory_space<vmem>>, vector<288x128xf32>
      %62 = arith.addf %61, %60 : vector<288x128xf32>
      %c0_64 = arith.constant 0 : index
      %c0_65 = arith.constant 0 : index
      %63 = vector.load %arg14[%c0_64, %c0_65] : memref<288x128xf32, #tpu.memory_space<vmem>>, vector<288x128xf32>
      tpu.vector_store %arg14[%c0_64, %c0_65], %62 {strides = array<i32>} : memref<288x128xf32, #tpu.memory_space<vmem>>, vector<288x128xf32>,
      %c19_66 = arith.constant 19 : index
      %c0_67 = arith.constant 0 : index
      %64 = vector.load %arg13[%c19_66, %c0_67] : memref<328x128xbf16, #tpu.memory_space<vmem>>, vector<288x128xbf16>
      %c4 = arith.constant 4 : index
      %c0_68 = arith.constant 0 : index
      %c0_69 = arith.constant 0 : index
      %65 = vector.load %arg6[%c4, %c0_68, %c0_69] : memref<9x128x128xbf16, #tpu.memory_space<vmem>>, vector<1x128x128xbf16>
      %66 = vector.shape_cast %65 : vector<1x128x128xbf16> to vector<128x128xbf16>
      %cst_70 = arith.constant dense<0.000000e+00> : vector<288x128xf32>
      %67 = tpu.matmul %64, %66, %cst_70 {dimension_numbers = #tpu.dot_dimension_numbers<[1], [0], [0], [1], [0, 0, 1, 1], [], []>} : vector<288x128xbf16>, vector<128x128xbf16>, vector<288x128xf32> -> vector<288x128xf32>
      %c0_71 = arith.constant 0 : index
      %c0_72 = arith.constant 0 : index
      %68 = vector.load %arg14[%c0_71, %c0_72] : memref<288x128xf32, #tpu.memory_space<vmem>>, vector<288x128xf32>
      %69 = arith.addf %68, %67 : vector<288x128xf32>
      %c0_73 = arith.constant 0 : index
      %c0_74 = arith.constant 0 : index
      %70 = vector.load %arg14[%c0_73, %c0_74] : memref<288x128xf32, #tpu.memory_space<vmem>>, vector<288x128xf32>
      tpu.vector_store %arg14[%c0_73, %c0_74], %69 {strides = array<i32>} : memref<288x128xf32, #tpu.memory_space<vmem>>, vector<288x128xf32>,
      %c20 = arith.constant 20 : index
      %c0_75 = arith.constant 0 : index
      %71 = vector.load %arg13[%c20, %c0_75] : memref<328x128xbf16, #tpu.memory_space<vmem>>, vector<288x128xbf16>
      %c5 = arith.constant 5 : index
      %c0_76 = arith.constant 0 : index
      %c0_77 = arith.constant 0 : index
      %72 = vector.load %arg6[%c5, %c0_76, %c0_77] : memref<9x128x128xbf16, #tpu.memory_space<vmem>>, vector<1x128x128xbf16>
      %73 = vector.shape_cast %72 : vector<1x128x128xbf16> to vector<128x128xbf16>
      %cst_78 = arith.constant dense<0.000000e+00> : vector<288x128xf32>
      %74 = tpu.matmul %71, %73, %cst_78 {dimension_numbers = #tpu.dot_dimension_numbers<[1], [0], [0], [1], [0, 0, 1, 1], [], []>} : vector<288x128xbf16>, vector<128x128xbf16>, vector<288x128xf32> -> vector<288x128xf32>
      %c0_79 = arith.constant 0 : index
      %c0_80 = arith.constant 0 : index
      %75 = vector.load %arg14[%c0_79, %c0_80] : memref<288x128xf32, #tpu.memory_space<vmem>>, vector<288x128xf32>
      %76 = arith.addf %75, %74 : vector<288x128xf32>
      %c0_81 = arith.constant 0 : index
      %c0_82 = arith.constant 0 : index
      %77 = vector.load %arg14[%c0_81, %c0_82] : memref<288x128xf32, #tpu.memory_space<vmem>>, vector<288x128xf32>
      tpu.vector_store %arg14[%c0_81, %c0_82], %76 {strides = array<i32>} : memref<288x128xf32, #tpu.memory_space<vmem>>, vector<288x128xf32>,
      %c36 = arith.constant 36 : index
      %c0_83 = arith.constant 0 : index
      %78 = vector.load %arg13[%c36, %c0_83] : memref<328x128xbf16, #tpu.memory_space<vmem>>, vector<288x128xbf16>
      %c6 = arith.constant 6 : index
      %c0_84 = arith.constant 0 : index
      %c0_85 = arith.constant 0 : index
      %79 = vector.load %arg6[%c6, %c0_84, %c0_85] : memref<9x128x128xbf16, #tpu.memory_space<vmem>>, vector<1x128x128xbf16>
      %80 = vector.shape_cast %79 : vector<1x128x128xbf16> to vector<128x128xbf16>
      %cst_86 = arith.constant dense<0.000000e+00> : vector<288x128xf32>
      %81 = tpu.matmul %78, %80, %cst_86 {dimension_numbers = #tpu.dot_dimension_numbers<[1], [0], [0], [1], [0, 0, 1, 1], [], []>} : vector<288x128xbf16>, vector<128x128xbf16>, vector<288x128xf32> -> vector<288x128xf32>
      %c0_87 = arith.constant 0 : index
      %c0_88 = arith.constant 0 : index
      %82 = vector.load %arg14[%c0_87, %c0_88] : memref<288x128xf32, #tpu.memory_space<vmem>>, vector<288x128xf32>
      %83 = arith.addf %82, %81 : vector<288x128xf32>
      %c0_89 = arith.constant 0 : index
      %c0_90 = arith.constant 0 : index
      %84 = vector.load %arg14[%c0_89, %c0_90] : memref<288x128xf32, #tpu.memory_space<vmem>>, vector<288x128xf32>
      tpu.vector_store %arg14[%c0_89, %c0_90], %83 {strides = array<i32>} : memref<288x128xf32, #tpu.memory_space<vmem>>, vector<288x128xf32>,
      %c37 = arith.constant 37 : index
      %c0_91 = arith.constant 0 : index
      %85 = vector.load %arg13[%c37, %c0_91] : memref<328x128xbf16, #tpu.memory_space<vmem>>, vector<288x128xbf16>
      %c7 = arith.constant 7 : index
      %c0_92 = arith.constant 0 : index
      %c0_93 = arith.constant 0 : index
      %86 = vector.load %arg6[%c7, %c0_92, %c0_93] : memref<9x128x128xbf16, #tpu.memory_space<vmem>>, vector<1x128x128xbf16>
      %87 = vector.shape_cast %86 : vector<1x128x128xbf16> to vector<128x128xbf16>
      %cst_94 = arith.constant dense<0.000000e+00> : vector<288x128xf32>
      %88 = tpu.matmul %85, %87, %cst_94 {dimension_numbers = #tpu.dot_dimension_numbers<[1], [0], [0], [1], [0, 0, 1, 1], [], []>} : vector<288x128xbf16>, vector<128x128xbf16>, vector<288x128xf32> -> vector<288x128xf32>
      %c0_95 = arith.constant 0 : index
      %c0_96 = arith.constant 0 : index
      %89 = vector.load %arg14[%c0_95, %c0_96] : memref<288x128xf32, #tpu.memory_space<vmem>>, vector<288x128xf32>
      %90 = arith.addf %89, %88 : vector<288x128xf32>
      %c0_97 = arith.constant 0 : index
      %c0_98 = arith.constant 0 : index
      %91 = vector.load %arg14[%c0_97, %c0_98] : memref<288x128xf32, #tpu.memory_space<vmem>>, vector<288x128xf32>
      tpu.vector_store %arg14[%c0_97, %c0_98], %90 {strides = array<i32>} : memref<288x128xf32, #tpu.memory_space<vmem>>, vector<288x128xf32>,
      %c38 = arith.constant 38 : index
      %c0_99 = arith.constant 0 : index
      %92 = vector.load %arg13[%c38, %c0_99] : memref<328x128xbf16, #tpu.memory_space<vmem>>, vector<288x128xbf16>
      %c8 = arith.constant 8 : index
      %c0_100 = arith.constant 0 : index
      %c0_101 = arith.constant 0 : index
      %93 = vector.load %arg6[%c8, %c0_100, %c0_101] : memref<9x128x128xbf16, #tpu.memory_space<vmem>>, vector<1x128x128xbf16>
      %94 = vector.shape_cast %93 : vector<1x128x128xbf16> to vector<128x128xbf16>
      %cst_102 = arith.constant dense<0.000000e+00> : vector<288x128xf32>
      %95 = tpu.matmul %92, %94, %cst_102 {dimension_numbers = #tpu.dot_dimension_numbers<[1], [0], [0], [1], [0, 0, 1, 1], [], []>} : vector<288x128xbf16>, vector<128x128xbf16>, vector<288x128xf32> -> vector<288x128xf32>
      %c0_103 = arith.constant 0 : index
      %c0_104 = arith.constant 0 : index
      %96 = vector.load %arg14[%c0_103, %c0_104] : memref<288x128xf32, #tpu.memory_space<vmem>>, vector<288x128xf32>
      %97 = arith.addf %96, %95 : vector<288x128xf32>
      %c0_105 = arith.constant 0 : index
      %c0_106 = arith.constant 0 : index
      %98 = vector.load %arg14[%c0_105, %c0_106] : memref<288x128xf32, #tpu.memory_space<vmem>>, vector<288x128xf32>
      tpu.vector_store %arg14[%c0_105, %c0_106], %97 {strides = array<i32>} : memref<288x128xf32, #tpu.memory_space<vmem>>, vector<288x128xf32>,
      %c0_107 = arith.constant 0 : index
      %c0_108 = arith.constant 0 : index
      %99 = vector.load %arg14[%c0_107, %c0_108] : memref<288x128xf32, #tpu.memory_space<vmem>>, vector<288x128xf32>
      %c0_109 = arith.constant 0 : index
      %c0_110 = arith.constant 0 : index
      %100 = vector.load %arg7[%c0_109, %c0_110] : memref<1x128xf32, #tpu.memory_space<vmem>>, vector<1x128xf32>
      %101 = vector.broadcast %100 : vector<1x128xf32> to vector<288x128xf32>
      %102 = arith.addf %99, %101 : vector<288x128xf32>
      %cst_111 = arith.constant 0.000000e+00 : f32
      %103 = vector.broadcast %cst_111 : f32 to vector<288x128xf32>
      %104 = arith.maximumf %102, %103 : vector<288x128xf32>
      %105 = arith.truncf %104 : vector<288x128xf32> to vector<288x128xbf16>
      %c0_112 = arith.constant 0 : index
      %c0_113 = arith.constant 0 : index
      %106 = vector.load %arg15[%c0_112, %c0_113] : memref<288x128xbf16, #tpu.memory_space<vmem>>, vector<288x128xbf16>
      tpu.vector_store %arg15[%c0_112, %c0_113], %105 {strides = array<i32>} : memref<288x128xbf16, #tpu.memory_space<vmem>>, vector<288x128xbf16>,
    } else {
    }
    %c0 = arith.constant 0 : index
    %c0_1 = arith.constant 0 : index
    %3 = vector.load %arg15[%c0, %c0_1] : memref<288x128xbf16, #tpu.memory_space<vmem>>, vector<288x128xbf16>
    %c0_2 = arith.constant 0 : index
    %c0_3 = arith.constant 0 : index
    %4 = vector.load %arg8[%c0_2, %c0_3] : memref<128x128xbf16, #tpu.memory_space<vmem>>, vector<128x128xbf16>
    %cst = arith.constant dense<0.000000e+00> : vector<288x128xf32>
    %5 = tpu.matmul %3, %4, %cst {dimension_numbers = #tpu.dot_dimension_numbers<[1], [0], [0], [1], [0, 0, 1, 1], [], []>} : vector<288x128xbf16>, vector<128x128xbf16>, vector<288x128xf32> -> vector<288x128xf32>
    %c0_4 = arith.constant 0 : index
    %c0_5 = arith.constant 0 : index
    %6 = vector.load %arg9[%c0_4, %c0_5] : memref<1x128xf32, #tpu.memory_space<vmem>>, vector<1x128xf32>
    %7 = vector.broadcast %6 : vector<1x128xf32> to vector<288x128xf32>
    %8 = arith.addf %5, %7 : vector<288x128xf32>
    %c0_6 = arith.constant 0 : index
    %c19 = arith.constant 19 : index
    %c0_7 = arith.constant 0 : index
    %9 = vector.load %arg2[%c0_6, %c19, %c0_7] : memref<1x324x128xbf16, #tpu.memory_space<vmem>>, vector<1x288x128xbf16>
    %10 = vector.shape_cast %9 : vector<1x288x128xbf16> to vector<288x128xbf16>
    %c0_8 = arith.constant 0 : index
    %c0_9 = arith.constant 0 : index
    %11 = vector.load %arg10[%c0_8, %c0_9] : memref<128x128xbf16, #tpu.memory_space<vmem>>, vector<128x128xbf16>
    %cst_10 = arith.constant dense<0.000000e+00> : vector<288x128xf32>
    %12 = tpu.matmul %10, %11, %cst_10 {dimension_numbers = #tpu.dot_dimension_numbers<[1], [0], [0], [1], [0, 0, 1, 1], [], []>} : vector<288x128xbf16>, vector<128x128xbf16>, vector<288x128xf32> -> vector<288x128xf32>
    %c0_11 = arith.constant 0 : index
    %c0_12 = arith.constant 0 : index
    %13 = vector.load %arg11[%c0_11, %c0_12] : memref<1x128xf32, #tpu.memory_space<vmem>>, vector<1x128xf32>
    %14 = vector.broadcast %13 : vector<1x128xf32> to vector<288x128xf32>
    %15 = arith.addf %12, %14 : vector<288x128xf32>
    %16 = arith.addf %8, %15 : vector<288x128xf32>
    %cst_13 = arith.constant 0.000000e+00 : f32
    %17 = vector.broadcast %cst_13 : f32 to vector<288x128xf32>
    %18 = arith.maximumf %16, %17 : vector<288x128xf32>
    %19 = vector.shape_cast %18 : vector<288x128xf32> to vector<1x288x128xf32>
    %20 = arith.truncf %19 : vector<1x288x128xf32> to vector<1x288x128xbf16>
    %c0_14 = arith.constant 0 : index
    %c0_15 = arith.constant 0 : index
    %c0_16 = arith.constant 0 : index
    %21 = vector.load %arg12[%c0_14, %c0_15, %c0_16] : memref<1x288x128xbf16, #tpu.memory_space<vmem>>, vector<1x288x128xbf16>
    tpu.vector_store %arg12[%c0_14, %c0_15, %c0_16], %20 {strides = array<i32>} : memref<1x288x128xbf16, #tpu.memory_space<vmem>>, vector<1x288x128xbf16>,
    return
  }
  func.func @transform_0(%arg0: i32, %arg1: i32) -> (i32, i32, i32) {
    %c0_i32 = arith.constant 0 : i32
    %c0_i32_0 = arith.constant 0 : i32
    %c0_i32_1 = arith.constant 0 : i32
    return %arg0, %c0_i32, %c0_i32_0 : i32, i32, i32
  }
  func.func @transform_1(%arg0: i32, %arg1: i32) -> (i32, i32) {
    %c0_i32 = arith.constant 0 : i32
    %c0_i32_0 = arith.constant 0 : i32
    %c0_i32_1 = arith.constant 0 : i32
    return %c0_i32, %c0_i32_0 : i32, i32
  }
  func.func @transform_2(%arg0: i32, %arg1: i32) -> (i32, i32) {
    %c0_i32 = arith.constant 0 : i32
    %c0_i32_0 = arith.constant 0 : i32
    %c0_i32_1 = arith.constant 0 : i32
    return %c0_i32, %c0_i32_0 : i32, i32
  }
  func.func @transform_3(%arg0: i32, %arg1: i32) -> (i32, i32) {
    %c0_i32 = arith.constant 0 : i32
    %c0_i32_0 = arith.constant 0 : i32
    %c0_i32_1 = arith.constant 0 : i32
    return %c0_i32, %c0_i32_0 : i32, i32
  }
  func.func @transform_4(%arg0: i32, %arg1: i32) -> (i32, i32, i32) {
    %c0_i32 = arith.constant 0 : i32
    %c0_i32_0 = arith.constant 0 : i32
    %c0_i32_1 = arith.constant 0 : i32
    %c0_i32_2 = arith.constant 0 : i32
    return %c0_i32, %c0_i32_0, %c0_i32_1 : i32, i32, i32
  }
  func.func @transform_5(%arg0: i32, %arg1: i32) -> (i32, i32) {
    %c0_i32 = arith.constant 0 : i32
    %c0_i32_0 = arith.constant 0 : i32
    %c0_i32_1 = arith.constant 0 : i32
    return %c0_i32, %c0_i32_0 : i32, i32
  }
  func.func @transform_6(%arg0: i32, %arg1: i32) -> (i32, i32) {
    %c0_i32 = arith.constant 0 : i32
    %c0_i32_0 = arith.constant 0 : i32
    return %c0_i32, %arg1 : i32, i32
  }
  func.func @transform_7(%arg0: i32, %arg1: i32) -> (i32, i32) {
    %c0_i32 = arith.constant 0 : i32
    %c0_i32_0 = arith.constant 0 : i32
    return %c0_i32, %arg1 : i32, i32
  }
  func.func @transform_8(%arg0: i32, %arg1: i32) -> (i32, i32) {
    %c0_i32 = arith.constant 0 : i32
    %c0_i32_0 = arith.constant 0 : i32
    return %c0_i32, %arg1 : i32, i32
  }
  func.func @transform_9(%arg0: i32, %arg1: i32) -> (i32, i32) {
    %c0_i32 = arith.constant 0 : i32
    %c0_i32_0 = arith.constant 0 : i32
    return %c0_i32, %arg1 : i32, i32
  }
  func.func @transform_10(%arg0: i32, %arg1: i32) -> (i32, i32, i32) {
    %c0_i32 = arith.constant 0 : i32
    %c0_i32_0 = arith.constant 0 : i32
    return %arg0, %c0_i32, %arg1 : i32, i32, i32
  }
}

</mosaic_0001>

<bundles_post_ra>
// kernel: tpu_custom_call.1
= control target key start
LH: loop header
LB: loop body
LE: loop exit
PB: predicated region body
PF: predicated region fallthrough
CT: control target
= control target key end

     0   :  { %15 = vsyncpa [#allocation6], 0  ;;  %s10742_s0 = inlined_call_operand.vmem [shape: bf16[2,324,128], index: 0, kind: input, shape index: {}]   ;;  %s10743_s1 = inlined_call_operand.vmem [shape: f32[324,1], index: 1, kind: input, shape index: {}]   ;;  %s10744_s2 = inlined_call_operand.vmem [shape: bf16[128,128], index: 2, kind: input, shape index: {}]   ;;  %s10745_s3 = inlined_call_operand.vmem [shape: f32[1,128], index: 3, kind: input, shape index: {}]   ;;  %s10746_s4 = inlined_call_operand.vmem [shape: bf16[9,128,128], index: 4, kind: input, shape index: {}]   ;;  %s10747_s5 = inlined_call_operand.vmem [shape: f32[1,128], index: 5, kind: input, shape index: {}]   ;;  %s10748_s6 = inlined_call_operand.vmem [shape: bf16[128,128], index: 6, kind: input, shape index: {}]   ;;  %s10749_s7 = inlined_call_operand.vmem [shape: f32[1,128], index: 7, kind: input, shape index: {}]   ;;  %s10750_s8 = inlined_call_operand.vmem [shape: bf16[128,128], index: 8, kind: input, shape index: {}]   ;;  %s10751_s9 = inlined_call_operand.vmem [shape: f32[1,128], index: 9, kind: input, shape index: {}]   ;;  %s10752_s10 = inlined_call_operand.hbm [shape: bf16[2,288,128], index: 10, kind: output, shape index: {}]  }
   0x1   :  { %17 = vsyncpa [#allocation6 + $0x1], 0  ;;  %s9106_s13 = smov 0   ;;  %s9108_s14 = smov 0  }
   0x2   :  { %s9110_s15 = smov 0   ;;  %s9112_s16 = smov 0  }
   0x3   :  { %s9114_s17 = smov 0   ;;  %s9116_s18 = smov 0  }
   0x4 LB: > { %s6846_s19 = sadd.s32 4294967295, %s9046_s18   ;;  %s6847_s20 = sadd.s32 4294967294, %s9046_s18   ;;  %s9046_s18 = sphi %s9116_s18, %s23_s18   ;;  %s9042_s17 = sphi %s9114_s17, %s10830_s17   ;;  %s9038_s16 = sphi %s9112_s16, %s10829_s16   ;;  %s9034_s15 = sphi %s9110_s15, %s10828_s15   ;;  %s9030_s14 = sphi %s9108_s14, %s10827_s14   ;;  %s9026_s13 = sphi %s9106_s13, %s10826_s13  }
   0x5   : > { %s35_s21 = sadd.s32 1, %s9042_s17  ;;  %s279_s22 = sadd.s32 1, %s9034_s15 }
   0x6   : > { %p37_p0 = scmp.ge.s32.totalorder %s35_s21, 2  ;;  %p289_p1 = scmp.ne.s32.totalorder %s9034_s15, %s9030_s14 }
   0x7   : > { %p290_p2 = scmp.eq.s32.totalorder %s6846_s19, 1  ;;  %p295_p3 = scmp.ne.s32.totalorder %s9030_s14, %s9026_s13 }
   0x8   : > { %s10832_s21 = smov (%p37_p0, %s35_s21), 0  ;;  %p296_p5 = scmp.eq.s32.totalorder %s6847_s20, 1 }
   0x9   : > { %10754 = sst [smem:[#allocation8_spill]] %s10832_s21  ;;  %p9146_p4 = por %p290_p2, %p289_p1 }
   0xa   : > { %s274_s24 = ssub.s32 %s9042_s17, %s10832_s21  ;;  %p6854_p6 = scmp.ge.s32.totalorder %s9046_s18, 1 }
   0xb   : > { %p277_p7 = scmp.eq.s32.totalorder %s274_s24, 0  ;;  %p9153_p8 = por %p296_p5, %p295_p3 }
   0xc   : > { %p363_p9 = scmp.lt.s32.totalorder %s9046_s18, 3 }
   0xd   : > { %s9159_s26 = scalar_select %p277_p7, %s9034_s15, %s279_s22  }
   0xe   : > { %p364_p10 = pnand %p6854_p6, %p363_p9 }
  0x10   : > { %367 = sbr.rel (%p364_p10) target bundleno = 1388 (0x56c), region = 60 }
  0x15   : > { %v828_v0 = vld [vmem:[%s10743_s1 + $0x10] sm:$0xff]  ;;  %v826_v1 = vld [vmem:[%s10743_s1] sm:$0xff]  ;;  %v8270_v2 = vld [vmem:[%s10744_s2 + $0x38] sm:$0xff]  ;;  %v9048_v3 = vmov 0   ;;  %p415_p11 = scmp.lt.s32.totalorder %s9038_s16, 1  ;;  %vm2255_vm0 = vcmask 1046528  }
  0x16   : > { %8960 = vset.pattern.permute.xlu1 %v9048_v3  ;;  %1195 = vst [vmem:[#allocation2 + $0xa0] sm:$0xc] %v9048_v3  ;;  %8959 = vset.pattern.permute.xlu0 %v9048_v3  ;;  %v830_v4 = vld [vmem:[%s10743_s1 + $0x20] sm:$0xff]  ;;  %v8269_v5 = vld [vmem:[%s10744_s2 + $0x30] sm:$0xff]  ;;  %v829_v6 = vld [vmem:[%s10743_s1 + $0x18] sm:$0xff]  ;;  %vm3761_vm2 = vcmask 1045504  }
  0x17   : > { %879 = vperm.xlu1 %8960, %v828_v0   ;;  %869 = vperm.xlu0 %8959, %v826_v1   ;;  %v827_v7 = vld [vmem:[%s10743_s1 + $0x8] sm:$0xff]  ;;  %v8267_v10 = vld [vmem:[%s10744_s2 + $0x20] sm:$0xff]  ;;  %v833_v11 = vld [vmem:[%s10743_s1 + $0x38] sm:$0xff]  ;;  %s416_s27 = scalar_select %p415_p11, %s9038_s16, 1  ;;  %vm1686_vm1 = vsmask.f32 7424 }
  0x18   : > { %672 = vmatpush.bf16.msra.mxu0 %v8270_v2  ;;  %8961 = vset.pattern.permute.xlu2 %v9048_v3  ;;  %v8268_v8 = vld [vmem:[%s10744_s2 + $0x28] sm:$0xff]  ;;  %v832_v12 = vld [vmem:[%s10743_s1 + $0x30] sm:$0xff]  ;;  %v8266_v13 = vld [vmem:[%s10744_s2 + $0x18] sm:$0xff]  ;;  %vm3170_vm3 = vsmask.f32 6400  ;;  %vm5267_vm5 = vcmask 1044480  }
  0x19   : > { %889 = vperm.xlu2 %8961, %v830_v4   ;;  %8890 = vmatpush.bf16.msra.mxu1 %v8270_v2  ;;  %v831_v9 = vld [vmem:[%s10743_s1 + $0x28] sm:$0xff]  ;;  %v834_v14 = vld [vmem:[%s10743_s1 + $0x40] sm:$0xff]  ;;  %v8265_v15 = vld [vmem:[%s10744_s2 + $0x10] sm:$0xff]  ;;  %s8899_s20 = smul.u32 164, %s416_s27  ;;  %vm4676_vm4 = vsmask.f32 5376 }
  0x1a   : > { %v836_v16 = vld [vmem:[%s10743_s1 + $0x50] sm:$0xff]  ;;  %v835_v17 = vld [vmem:[%s10743_s1 + $0x48] sm:$0xff]  ;;  %v837_v19 = vld [vmem:[%s10743_s1 + $0x58] sm:$0xff]  ;;  %s412_s21 = sand.u32 1, %s9030_s14   ;;  %s8988_s30 = scalar_lea.hbm %s10752_s10, 288 }
  0x1b   : > { %v8264_v18 = vld [vmem:[%s10744_s2 + $0x8] sm:$0xff]  ;;  %v8263_v20 = vld [vmem:[%s10744_s2] sm:$0xff]  ;;  %s9226_s11 = scalar_lea.vmem %s10742_s0, %s8899_s20  ;;  %v840_v24 = vld [vmem:[%s10743_s1 + $0x70] sm:$0xff]  ;;  %s8898_s24 = smul.u32 144, %s412_s21 }
  0x1c   : > { %673 = vmatpush.bf16.msra.mxu0 %v8269_v5  ;;  %v839_v21 = vld [vmem:[%s10743_s1 + $0x68] sm:$0xff]  ;;  %v838_v22 = vld [vmem:[%s10743_s1 + $0x60] sm:$0xff]  ;;  %v8262_v25 = vld [vmem:[%s9226_s11 + $0x98] sm:$0xff] }
  0x1d   : > { %8891 = vmatpush.bf16.msra.mxu1 %v8269_v5  ;;  %v8243_v23 = vld [vmem:[%s9226_s11] sm:$0xff]  ;;  %v841_v27 = vld [vmem:[%s10743_s1 + $0x78] sm:$0xff]  ;;  %v843_v28 = vld [vmem:[%s10743_s1 + $0x88] sm:$0xff]  ;;  %s10513_s20 = scalar_lea.vmem [#allocation5], %s8898_s24 }
  0x1e   : > { %v842_v26 = vld [vmem:[%s10743_s1 + $0x80] sm:$0xff]  ;;  %v845_v29 = vld [vmem:[%s10743_s1 + $0x98] sm:$0xff]  ;;  %v844_v30 = vld [vmem:[%s10743_s1 + $0x90] sm:$0xff]  ;;  %s6717_s19 = sshll.u32 %s10513_s20, 4  ;;  %s6718_s19 = int_to_ptr.vmem [resolvable:$true] %s6717_s19 }
  0x1f   : > { %884 = vperm.xlu1 %8960, %v829_v6   ;;  %874 = vperm.xlu0 %8959, %v827_v7   ;;  %v8244_v31 = vld [vmem:[%s9226_s11 + $0x8] sm:$0xff]  ;;  %v846_v32 = vld [vmem:[%s10743_s1 + $0xa0] sm:$0xff]  ;;  %v848_v33 = vld [vmem:[%s10743_s1 + $0xb0] sm:$0xff] }
  0x20   : > { %674 = vmatpush.bf16.msra.mxu0 %v8268_v8  ;;  %v847_v34 = vld [vmem:[%s10743_s1 + $0xa8] sm:$0xff]  ;;  %v479_v35 = vld [vmem:[%s9226_s11 + $0xa0] sm:$0x3]  ;;  %v849_v36 = vld [vmem:[%s10743_s1 + $0xb8] sm:$0xff] }
  0x21   : > { %894 = vperm.xlu2 %8961, %v831_v9   ;;  %8892 = vmatpush.bf16.msra.mxu1 %v8268_v8  ;;  %v581_v37 = vunpack.c.l.b16 %v479_v35  ;;  %v851_v39 = vld [vmem:[%s10743_s1 + $0xc8] sm:$0xff]  ;;  %v850_v40 = vld [vmem:[%s10743_s1 + $0xc0] sm:$0xff]  ;;  %v8245_v41 = vld [vmem:[%s9226_s11 + $0x10] sm:$0xff] }
  0x22   : > { %v852_v42 = vld [vmem:[%s10743_s1 + $0xd0] sm:$0xff]  ;;  %v854_v43 = vld [vmem:[%s10743_s1 + $0xe0] sm:$0xff]  ;;  %v853_v44 = vld [vmem:[%s10743_s1 + $0xd8] sm:$0xff] }
  0x23   : > { %v602_v38 = vpack.c.b16 %v581_v37, %v581_v37  ;;  %v855_v45 = vld [vmem:[%s10743_s1 + $0xe8] sm:$0xff]  ;;  %v857_v46 = vld [vmem:[%s10743_s1 + $0xf8] sm:$0xff]  ;;  %v856_v47 = vld [vmem:[%s10743_s1 + $0xf0] sm:$0xff] }
  0x24   : > { %675 = vmatpush.bf16.msra.mxu0 %v8267_v10  ;;  %v8246_v48 = vld [vmem:[%s9226_s11 + $0x18] sm:$0xff]  ;;  %v858_v49 = vld [vmem:[%s10743_s1 + $0x100] sm:$0xff]  ;;  %v860_v50 = vld [vmem:[%s10743_s1 + $0x110] sm:$0xff] }
  0x25   : > { %8893 = vmatpush.bf16.msra.mxu1 %v8267_v10  ;;  %v859_v51 = vld [vmem:[%s10743_s1 + $0x108] sm:$0xff]  ;;  %v861_v52 = vld [vmem:[%s10743_s1 + $0x118] sm:$0xff]  ;;  %v862_v54 = vld [vmem:[%s10743_s1 + $0x120] sm:$0xff] }
  0x26   : > { %v863_v53 = vld [vmem:[%s10743_s1 + $0x128] sm:$0xff]  ;;  %v8247_v55 = vld [vmem:[%s9226_s11 + $0x20] sm:$0xff]  ;;  %v864_v57 = vld [vmem:[%s10743_s1 + $0x130] sm:$0xff] }
  0x27   : > { %904 = vperm.xlu1 %8960, %v833_v11   ;;  %899 = vperm.xlu0 %8959, %v832_v12   ;;  %v866_v58 = vld [vmem:[%s10743_s1 + $0x140] sm:$0xf]  ;;  %v865_v59 = vld [vmem:[%s10743_s1 + $0x138] sm:$0xff]  ;;  %v8248_v61 = vld [vmem:[%s9226_s11 + $0x28] sm:$0xff] }
  0x28   : > { %676 = vmatpush.bf16.msra.mxu0 %v8266_v13  ;;  %v8296_v0 = vld [vmem:[%s10746_s4 + $0x38] sm:$0xff]  ;;  %v8295_v4 = vld [vmem:[%s10746_s4 + $0x30] sm:$0xff]  ;;  %v8294_v7 = vld [vmem:[%s10746_s4 + $0x28] sm:$0xff] }
  0x29   : > { %909 = vperm.xlu2 %8961, %v834_v14   ;;  %8894 = vmatpush.bf16.msra.mxu1 %v8266_v13  ;;  %v8249_v6 = vld [vmem:[%s9226_s11 + $0x30] sm:$0xff]  ;;  %v8293_v10 = vld [vmem:[%s10746_s4 + $0x20] sm:$0xff]  ;;  %v8292_v12 = vld [vmem:[%s10746_s4 + $0x18] sm:$0xff] }
  0x2a   : > { %v8251_v35 = vld [vmem:[%s9226_s11 + $0x40] sm:$0xff]  ;;  %v8343_v37 = vld [vmem:[%s10746_s4 + $0x90] sm:$0xff] }
  0x2c   : > { %677 = vmatpush.bf16.msra.mxu0 %v8265_v15 }
  0x2d   : > { %8895 = vmatpush.bf16.msra.mxu1 %v8265_v15  ;;  %v8348_v15 = vld [vmem:[%s10746_s4 + $0xb8] sm:$0xff] }
  0x2e   : > { %2359 = vmatpush.bf16.msra.mxu3 %v8348_v15 }
  0x2f   : > { %919 = vperm.xlu1 %8960, %v836_v16   ;;  %914 = vperm.xlu0 %8959, %v835_v17   ;;  %v8291_v16 = vld [vmem:[%s10746_s4 + $0x10] sm:$0xff]  ;;  %v8322_v17 = vld [vmem:[%s10746_s4 + $0x78] sm:$0xff] }
  0x30   : > { %678 = vmatpush.bf16.msra.mxu0 %v8264_v18  ;;  %1901 = vmatpush.bf16.msra.mxu2 %v8322_v17 }
  0x31   : > { %924 = vperm.xlu2 %8961, %v837_v19   ;;  %8896 = vmatpush.bf16.msra.mxu1 %v8264_v18  ;;  %v8250_v18 = vld [vmem:[%s9226_s11 + $0x38] sm:$0xff]  ;;  %v8347_v19 = vld [vmem:[%s10746_s4 + $0xb0] sm:$0xff] }
  0x32   : > { %2360 = vmatpush.bf16.msra.mxu3 %v8347_v19 }
  0x34   : > { %679 = vmatpush.bf16.msra.mxu0 %v8263_v20 }
  0x35   : > { %8897 = vmatpush.bf16.msra.mxu1 %v8263_v20  ;;  %v8290_v20 = vld [vmem:[%s10746_s4 + $0x8] sm:$0xff] }
  0x37   : > { %934 = vperm.xlu1 %8960, %v839_v21   ;;  %929 = vperm.xlu0 %8959, %v838_v22   ;;  %v8321_v21 = vld [vmem:[%s10746_s4 + $0x70] sm:$0xff] }
  0x38   : > { %680 = vmatmul.bf16.vlgmr.msra.gmra.mxu0 %v8243_v23  ;;  %775 = vmatmul.bf16.vlgmr.msra.gmra.mxu1 %v8262_v25  ;;  %v8346_v25 = vld [vmem:[%s10746_s4 + $0xa8] sm:$0xff] }
  0x39   : > { %939 = vperm.xlu2 %8961, %v840_v24   ;;  %1404 = vmatpush.bf16.msrb.mxu1 %v8296_v0 }
  0x3a   : > { %1902 = vmatpush.bf16.msra.mxu2 %v8321_v21  ;;  %2361 = vmatpush.bf16.msra.mxu3 %v8346_v25 }
  0x3d   : > { %1405 = vmatpush.bf16.msrb.mxu1 %v8295_v4 }
  0x3f   : > { %949 = vperm.xlu1 %8960, %v842_v26   ;;  %944 = vperm.xlu0 %8959, %v841_v27   ;;  %v8289_v26 = vld [vmem:[%s10746_s4] sm:$0xff]  ;;  %v8320_v27 = vld [vmem:[%s10746_s4 + $0x68] sm:$0xff] }
  0x40   : > { %1903 = vmatpush.bf16.msra.mxu2 %v8320_v27 }
  0x41   : > { %954 = vperm.xlu2 %8961, %v843_v28   ;;  %1406 = vmatpush.bf16.msrb.mxu1 %v8294_v7  ;;  %v8345_v28 = vld [vmem:[%s10746_s4 + $0xa0] sm:$0xff] }
  0x42   : > { %2362 = vmatpush.bf16.msra.mxu3 %v8345_v28 }
  0x45   : > { %1407 = vmatpush.bf16.msrb.mxu1 %v8293_v10 }
  0x47   : > { %964 = vperm.xlu1 %8960, %v845_v29   ;;  %959 = vperm.xlu0 %8959, %v844_v30   ;;  %v8319_v29 = vld [vmem:[%s10746_s4 + $0x60] sm:$0xff] }
  0x48   : > { %685 = vmatmul.bf16.gmra.mxu0 %v8244_v31  ;;  %780 = vmatmul.bf16.gmra.mxu1 %v602_v38  ;;  %v9424_v38 = vld [vmem:[%s10745_s3] ss:$0 sm:$0xff] }
  0x49   : > { %969 = vperm.xlu2 %8961, %v846_v32   ;;  %1408 = vmatpush.bf16.msrb.mxu1 %v8292_v12  ;;  %v8344_v32 = vld [vmem:[%s10746_s4 + $0x98] sm:$0xff] }
  0x4a   : > { %1904 = vmatpush.bf16.msra.mxu2 %v8319_v29  ;;  %2363 = vmatpush.bf16.msra.mxu3 %v8344_v32  ;;  %v8253_v29 = vld [vmem:[%s9226_s11 + $0x50] sm:$0xff] }
  0x4d   : > { %1409 = vmatpush.bf16.msrb.mxu1 %v8291_v16 }
  0x4e   : > { %2364 = vmatpush.bf16.msra.mxu3 %v8343_v37 }
  0x4f   : > { %979 = vperm.xlu1 %8960, %v848_v33   ;;  %974 = vperm.xlu0 %8959, %v847_v34   ;;  %v8318_v34 = vld [vmem:[%s10746_s4 + $0x58] sm:$0xff] }
  0x50   : > { %1905 = vmatpush.bf16.msra.mxu2 %v8318_v34 }
  0x51   : > { %984 = vperm.xlu2 %8961, %v849_v36   ;;  %1410 = vmatpush.bf16.msrb.mxu1 %v8290_v20 }
  0x55   : > { %1411 = vmatpush.bf16.msrb.mxu1 %v8289_v26 }
  0x57   : > { %994 = vperm.xlu1 %8960, %v851_v39   ;;  %989 = vperm.xlu0 %8959, %v850_v40   ;;  %v8317_v39 = vld [vmem:[%s10746_s4 + $0x50] sm:$0xff] }
  0x58   : > { %690 = vmatmul.bf16.gmra.mxu0 %v8245_v41  ;;  %1906 = vmatpush.bf16.msra.mxu2 %v8317_v39 }
  0x59   : > { %999 = vperm.xlu2 %8961, %v852_v42   ;;  %v8342_v42 = vld [vmem:[%s10746_s4 + $0x88] sm:$0xff] }
  0x5a   : > { %2365 = vmatpush.bf16.msra.mxu3 %v8342_v42 }
  0x5f   : > { %1009 = vperm.xlu1 %8960, %v854_v43   ;;  %1004 = vperm.xlu0 %8959, %v853_v44   ;;  %v8316_v44 = vld [vmem:[%s10746_s4 + $0x48] sm:$0xff] }
  0x60   : > { %1907 = vmatpush.bf16.msra.mxu2 %v8316_v44 }
  0x61   : > { %1014 = vperm.xlu2 %8961, %v855_v45  }
  0x67   : > { %1024 = vperm.xlu1 %8960, %v857_v46   ;;  %1019 = vperm.xlu0 %8959, %v856_v47   ;;  %v8341_v47 = vld [vmem:[%s10746_s4 + $0x80] sm:$0xff] }
  0x68   : > { %695 = vmatmul.bf16.gmra.mxu0 %v8246_v48  ;;  %2366 = vmatpush.bf16.msra.mxu3 %v8341_v47 }
  0x69   : > { %1029 = vperm.xlu2 %8961, %v858_v49  }
  0x6f   : > { %1039 = vperm.xlu1 %8960, %v860_v50   ;;  %1034 = vperm.xlu0 %8959, %v859_v51   ;;  %v8315_v50 = vld [vmem:[%s10746_s4 + $0x40] sm:$0xff] }
  0x70   : > { %1908 = vmatpush.bf16.msra.mxu2 %v8315_v50 }
  0x71   : > { %1044 = vperm.xlu2 %8961, %v861_v52  }
  0x73   : > { %v9313_v56 = vpop.permute.xlu2 %889 }
  0x77   : > { %1054 = vperm.xlu1 %8960, %v863_v53   ;;  %1049 = vperm.xlu0 %8959, %v862_v54  }
  0x78   : > { %700 = vmatmul.bf16.gmra.mxu0 %v8247_v55 }
  0x79   : > { %1059 = vperm.xlu2 %8961, %v864_v57  }
  0x7b   : > { %v9324_v60 = vpop.permute.xlu2 %894 }
  0x7f   : > { %1069 = vperm.xlu1 %8960, %v866_v58   ;;  %1064 = vperm.xlu0 %8959, %v865_v59   ;;  %v8252_v59 = vld [vmem:[%s9226_s11 + $0x48] sm:$0xff] }
  0x83   : > { %v9334_v1 = vpop.permute.xlu2 %909 }
  0x88   : > { %705 = vmatmul.bf16.gmra.mxu0 %v8248_v61 }
  0x89   : > { %v9327_v62 = vpop.permute.xlu1 %879  ;;  %v9329_v63 = vpop.permute.xlu0 %869 }
  0x8b   : > { %v9343_v5 = vpop.permute.xlu2 %924 }
  0x91   : > { %v9336_v2 = vpop.permute.xlu1 %884  ;;  %v9338_v3 = vpop.permute.xlu0 %874 }
  0x93   : > { %v9356_v11 = vpop.permute.xlu2 %939 }
  0x98   : > { %710 = vmatmul.bf16.gmra.mxu0 %v8249_v6 }
  0x99   : > { %v9349_v8 = vpop.permute.xlu1 %904  ;;  %v9351_v9 = vpop.permute.xlu0 %899 }
  0x9b   : > { %v9384_v22 = vpop.permute.xlu2 %954 }
  0xa1   : > { %v9361_v13 = vpop.permute.xlu1 %919  ;;  %v9363_v14 = vpop.permute.xlu0 %914 }
  0xa3   : > { %v9412_v33 = vpop.permute.xlu2 %969 }
  0xa8   : > { %715 = vmatmul.bf16.gmra.mxu0 %v8250_v18 }
  0xa9   : > { %v9386_v23 = vpop.permute.xlu1 %934  ;;  %v9388_v24 = vpop.permute.xlu0 %929 }
  0xab   : > { %v9440_v45 = vpop.permute.xlu2 %984 }
  0xb1   : > { %v9405_v30 = vpop.permute.xlu1 %949  ;;  %v9407_v31 = vpop.permute.xlu0 %944 }
  0xb3   : > { %v9458_v0 = vpop.permute.xlu2 %999 }
  0xb5   : > { %v681_v36 = vpop.f32.mrf.mxu0  ;;  %v9449_v52 = vpop.f32.mrf.mxu1 }
  0xb6   : > { %v682_v43 = vadd.f32 %v9424_v38, %v681_v36 }
  0xb8   : > { %720 = vmatmul.bf16.gmra.mxu0 %v8251_v35  ;;  %v785_v48 = vmax.f32 %v682_v43, 0.0 }
  0xb9   : > { %v9429_v40 = vpop.permute.xlu1 %964  ;;  %v9431_v41 = vpop.permute.xlu0 %959 }
  0xba   : > { %v1072_v55 = vmul.f32 %v9329_v63, %v785_v48  ;;  %v8400_v63 = vld [vmem:[%s10746_s4 + $0x138] sm:$0xff] }
  0xbb   : > { %3407 = vmatpush.bf16.msrb.mxu2 %v8400_v63  ;;  %v9474_v18 = vpop.permute.xlu2 %1014 }
  0xbd   : > { %v683_v46 = vpop.f32.mrf.mxu0  ;;  %v9460_v4 = vpop.f32.mrf.mxu1 }
  0xbe   : > { %v684_v49 = vadd.f32 %v9424_v38, %v683_v46 }
  0xc0   : > { %v786_v51 = vmax.f32 %v684_v49, 0.0 }
  0xc1   : > { %v9451_v53 = vpop.permute.xlu1 %979  ;;  %v9453_v54 = vpop.permute.xlu0 %974 }
  0xc2   : > { %v1073_v57 = vmul.f32 %v9338_v3, %v786_v51  ;;  %v8374_v3 = vld [vmem:[%s10746_s4 + $0xf8] sm:$0xff] }
  0xc3   : > { %2816 = vmatpush.bf16.msra.mxu1 %v8374_v3  ;;  %v9487_v44 = vpop.permute.xlu2 %1029 }
  0xc4   : > { %v8560_v58 = vpack.c.bf16 %v1073_v57, %v1072_v55 }
  0xc5   : > { %v686_v61 = vpop.f32.mrf.mxu0  ;;  %v781_v20 = vpop.f32.mrf.mxu1 }
  0xc6   : > { %8561 = vst [vmem:[#allocation2] sm:$0xff] %v8560_v58   ;;  %v687_v10 = vadd.f32 %v9424_v38, %v686_v61 }
  0xc8   : > { %725 = vmatmul.bf16.gmra.mxu0 %v8252_v59  ;;  %v787_v16 = vmax.f32 %v687_v10, 0.0 }
  0xc9   : > { %v9462_v6 = vpop.permute.xlu1 %994  ;;  %v9464_v7 = vpop.permute.xlu0 %989 }
  0xca   : > { %v1074_v26 = vmul.f32 %v9327_v62, %v787_v16 }
  0xcd   : > { %v688_v12 = vpop.f32.mrf.mxu0  ;;  %v8271_v15 = vld [vmem:[#allocation2] sm:$0xff]  ;;  %v783_v37 = vpop.f32.mrf.mxu1 }
  0xce   : > { %v689_v17 = vadd.f32 %v9424_v38, %v688_v12  ;;  %1412 = vmatmul.bf16.vlgmr.msrb.gmra.mxu1 %v8271_v15  ;;  %v8297_v34 = vld [vmem:[#allocation2] sm:$0xff]  ;;  %v782_v37 = vadd.f32 %v9424_v38, %v781_v20 }
  0xcf   : > { %v7210_v35 = vld [vmem:[#allocation2] sm:$0xe]  ;;  %v8323_v36 = vld [vmem:[#allocation2] sm:$0xf0]  ;;  %v1690_v43 = vshll.u32 %v8297_v34, 16  ;;  %v1688_v59 = vshrl.u32 %v8297_v34, 16  ;;  %v777_v34 = vadd.f32 %v9424_v38, %v9449_v52 }
  0xd0   : > { %v788_v19 = vmax.f32 %v689_v17, 0.0  ;;  %v7211_v46 = vor.u32 %v8323_v36, %v7210_v35 }
  0xd1   : > { %v9476_v21 = vpop.permute.xlu1 %1009  ;;  %v9478_v25 = vpop.permute.xlu0 %1004  ;;  %v1692_v50 = vrot.slane %v1690_v43, 1  ;;  %v8399_v43 = vld [vmem:[%s10746_s4 + $0x130] sm:$0xff] }
  0xd2   : > { %v1075_v27 = vmul.f32 %v9336_v2, %v788_v19  ;;  %v2256_v57 = vrot.slane %v7211_v46, 1  ;;  %3408 = vmatpush.bf16.msrb.mxu2 %v8399_v43  ;;  %v8255_v43 = vld [vmem:[%s9226_s11 + $0x60] sm:$0xff] }
  0xd3   : > { %v1693_v15 = vor.u32 %v1692_v50, %v1688_v59 }
  0xd4   : > { %v8565_v28 = vpack.c.bf16 %v1075_v27, %v1074_v26  ;;  %v9499_v27 = vpop.permute.xlu2 %1044 }
  0xd5   : > { %v691_v32 = vpop.f32.mrf.mxu0 }
  0xd6   : > { %8837 = vst [vmem:[#allocation2 + $0x8] sm:$0xff] %v8565_v28   ;;  %v692_v62 = vadd.f32 %v9424_v38, %v691_v32 }
  0xd8   : > { %730 = vmatmul.bf16.gmra.mxu0 %v8253_v29  ;;  %v789_v51 = vmax.f32 %v692_v62, 0.0  ;;  %v8254_v29 = vld [vmem:[%s9226_s11 + $0x58] sm:$0xff]  ;;  %v823_v62 = vmax.f32 %v777_v34, 0.0 }
  0xd9   : > { %v9483_v39 = vpop.permute.xlu1 %1024  ;;  %v9485_v42 = vpop.permute.xlu0 %1019 }
  0xda   : > { %v1076_v17 = vmul.f32 %v9313_v56, %v789_v51 }
  0xdd   : > { %v693_v2 = vpop.f32.mrf.mxu0  ;;  %v8272_v47 = vld [vmem:[#allocation2 + $0x8] sm:$0xff] }
  0xde   : > { %v8324_v48 = vld [vmem:[#allocation2 + $0x8] sm:$0xff]  ;;  %v694_v55 = vadd.f32 %v9424_v38, %v693_v2  ;;  %1417 = vmatmul.bf16.gmra.mxu1 %v8272_v47 }
  0xdf   : > { %v8298_v49 = vld [vmem:[#allocation2 + $0x8] sm:$0xff]  ;;  %v2257_v58 = vrot.slane %v8324_v48, 1  ;;  %v1060_v48 = vpop.permute.xlu2 %1059 }
  0xe0   : > { %v1695_v61 = vshll.u32 %v8298_v49, 16  ;;  %v790_v10 = vmax.f32 %v694_v55, 0.0  ;;  %v1699_v59 = vshrl.u32 %v8298_v49, 16 }
  0xe1   : > { %v9491_v63 = vpop.permute.xlu1 %1039  ;;  %v9493_v3 = vpop.permute.xlu0 %1034  ;;  %v2258_v12 = vsel %vm2255_vm0, %v2256_v57, %v2257_v58  ;;  %v825_v57 = vmax.f32 %v782_v37, 0.0 }
  0xe2   : > { %v1697_v16 = vrot.slane %v1695_v61, 1  ;;  %v1077_v19 = vmul.f32 %v9324_v60, %v790_v10  ;;  %2367 = vmatmul.bf16.vlgmr.msra.gmra.mxu3 %v2258_v12  ;;  %v779_v60 = vadd.f32 %v9424_v38, %v9460_v4  ;;  %v1110_v10 = vmul.f32 %v1060_v48, %v823_v62 }
  0xe4   : > { %v1698_v26 = vsel %vm1686_vm1, %v1693_v15, %v1697_v16  ;;  %v8570_v28 = vpack.c.bf16 %v1077_v19, %v1076_v17  ;;  %v824_v51 = vmax.f32 %v779_v60, 0.0  ;;  %v1701_v19 = vor.u32 %v1699_v59, %v1697_v16 }
  0xe5   : > { %1909 = vmatmul.bf16.vlgmr.msra.gmra.mxu2 %v1698_v26  ;;  %v696_v32 = vpop.f32.mrf.mxu0 }
  0xe6   : > { %8838 = vst [vmem:[#allocation2 + $0x10] sm:$0xff] %v8570_v28   ;;  %v697_v56 = vadd.f32 %v9424_v38, %v696_v32 }
  0xe8   : > { %735 = vmatmul.bf16.gmra.mxu0 %v8254_v29  ;;  %v791_v50 = vmax.f32 %v697_v56, 0.0 }
  0xe9   : > { %v9504_v35 = vpop.permute.xlu1 %1054  ;;  %v9506_v36 = vpop.permute.xlu0 %1049 }
  0xea   : > { %v1078_v28 = vmul.f32 %v9351_v9, %v791_v50 }
  0xed   : > { %v698_v46 = vpop.f32.mrf.mxu0  ;;  %v8273_v2 = vld [vmem:[#allocation2 + $0x10] sm:$0xff] }
  0xee   : > { %v8325_v52 = vld [vmem:[#allocation2 + $0x10] sm:$0xff]  ;;  %v699_v55 = vadd.f32 %v9424_v38, %v698_v46  ;;  %1422 = vmatmul.bf16.gmra.mxu1 %v8273_v2 }
  0xef   : > { %v8299_v47 = vld [vmem:[#allocation2 + $0x10] sm:$0xff]  ;;  %v2259_v4 = vrot.slane %v8325_v52, 1 }
  0xf0   : > { %v1703_v20 = vshll.u32 %v8299_v47, 16  ;;  %v792_v61 = vmax.f32 %v699_v55, 0.0 }
  0xf1   : > { %v1070_v12 = vpop.permute.xlu1 %1069  ;;  %v1065_v15 = vpop.permute.xlu0 %1064  ;;  %v2260_v17 = vsel %vm2255_vm0, %v2257_v58, %v2259_v4  ;;  %v8373_v58 = vld [vmem:[%s10746_s4 + $0xf0] sm:$0xff] }
  0xf2   : > { %v1705_v26 = vrot.slane %v1703_v20, 1  ;;  %v1079_v29 = vmul.f32 %v9349_v8, %v792_v61  ;;  %v1112_v32 = vmul.f32 %v1070_v12, %v825_v57  ;;  %v1111_v34 = vmul.f32 %v1065_v15, %v824_v51  ;;  %2372 = vmatmul.bf16.gmra.mxu3 %v2260_v17  ;;  %2817 = vmatpush.bf16.msra.mxu1 %v8373_v58 }
  0xf3   : > { %v1707_v51 = vshrl.u32 %v8299_v47, 16 }
  0xf4   : > { %v1706_v56 = vsel %vm1686_vm1, %v1701_v19, %v1705_v26  ;;  %v8575_v49 = vpack.c.bf16 %v1079_v29, %v1078_v28  ;;  %v1153_v60 = vpack.c.bf16 %v1112_v32, %v1112_v32  ;;  %v8655_v37 = vpack.c.bf16 %v1111_v34, %v1110_v10  ;;  %v8256_v19 = vld [vmem:[%s9226_s11 + $0x68] sm:$0xff] }
  0xf5   : > { %1914 = vmatmul.bf16.gmra.mxu2 %v1706_v56  ;;  %v701_v62 = vpop.f32.mrf.mxu0  ;;  %v1709_v20 = vor.u32 %v1707_v51, %v1705_v26 }
  0xf6   : > { %8839 = vst [vmem:[#allocation2 + $0x18] sm:$0xff] %v8575_v49   ;;  %v702_v8 = vadd.f32 %v9424_v38, %v701_v62 }
  0xf7   : > { %1194 = vst [vmem:[#allocation2 + $0xa0] sm:$0x3] %v1153_v60 }
  0xf8   : > { %8855 = vst [vmem:[#allocation2 + $0x98] sm:$0xff] %v8655_v37   ;;  %740 = vmatmul.bf16.gmra.mxu0 %v8255_v43  ;;  %v793_v52 = vmax.f32 %v702_v8, 0.0 }
  0xfa   : > { %v1080_v10 = vmul.f32 %v9334_v1, %v793_v52 }
  0xfd   : > { %v703_v9 = vpop.f32.mrf.mxu0  ;;  %v8274_v16 = vld [vmem:[#allocation2 + $0x18] sm:$0xff] }
  0xfe   : > { %v8326_v46 = vld [vmem:[#allocation2 + $0x18] sm:$0xff]  ;;  %v704_v48 = vadd.f32 %v9424_v38, %v703_v9  ;;  %1427 = vmatmul.bf16.gmra.mxu1 %v8274_v16 }
  0xff   : > { %v8300_v2 = vld [vmem:[#allocation2 + $0x18] sm:$0xff]  ;;  %v2261_v50 = vrot.slane %v8326_v46, 1  ;;  %v8257_v46 = vld [vmem:[%s9226_s11 + $0x70] sm:$0xff] }
 0x100   : > { %v1711_v55 = vshll.u32 %v8300_v2, 16  ;;  %v794_v57 = vmax.f32 %v704_v48, 0.0  ;;  %v1715_v56 = vshrl.u32 %v8300_v2, 16  ;;  %v8398_v2 = vld [vmem:[%s10746_s4 + $0x128] sm:$0xff] }
 0x101   : > { %v2262_v59 = vsel %vm2255_vm0, %v2259_v4, %v2261_v50  ;;  %v8372_v48 = vld [vmem:[%s10746_s4 + $0xe8] sm:$0xff]  ;;  %3409 = vmatpush.bf16.msrb.mxu2 %v8398_v2 }
 0x102   : > { %v1713_v61 = vrot.slane %v1711_v55, 1  ;;  %v1081_v12 = vmul.f32 %v9363_v14, %v794_v57  ;;  %2377 = vmatmul.bf16.gmra.mxu3 %v2262_v59  ;;  %2818 = vmatpush.bf16.msra.mxu1 %v8372_v48 }
 0x104   : > { %v1714_v15 = vsel %vm1686_vm1, %v1709_v20, %v1713_v61  ;;  %v8580_v17 = vpack.c.bf16 %v1081_v12, %v1080_v10  ;;  %v1717_v43 = vor.u32 %v1715_v56, %v1713_v61 }
 0x105   : > { %1919 = vmatmul.bf16.gmra.mxu2 %v1714_v15  ;;  %v706_v28 = vpop.f32.mrf.mxu0 }
 0x106   : > { %8840 = vst [vmem:[#allocation2 + $0x20] sm:$0xff] %v8580_v17   ;;  %v707_v47 = vadd.f32 %v9424_v38, %v706_v28 }
 0x108   : > { %745 = vmatmul.bf16.gmra.mxu0 %v8256_v19  ;;  %v795_v34 = vmax.f32 %v707_v47, 0.0 }
 0x10a   : > { %v1082_v58 = vmul.f32 %v9361_v13, %v795_v34 }
 0x10d   : > { %v708_v29 = vpop.f32.mrf.mxu0  ;;  %v8275_v32 = vld [vmem:[#allocation2 + $0x20] sm:$0xff] }
 0x10e   : > { %v8327_v4 = vld [vmem:[#allocation2 + $0x20] sm:$0xff]  ;;  %v709_v1 = vadd.f32 %v9424_v38, %v708_v29  ;;  %1432 = vmatmul.bf16.gmra.mxu1 %v8275_v32 }
 0x10f   : > { %v8301_v26 = vld [vmem:[#allocation2 + $0x20] sm:$0xff]  ;;  %v2263_v14 = vrot.slane %v8327_v4, 1  ;;  %v8258_v4 = vld [vmem:[%s9226_s11 + $0x78] sm:$0xff] }
 0x110   : > { %v1719_v49 = vshll.u32 %v8301_v26, 16  ;;  %v796_v60 = vmax.f32 %v709_v1, 0.0  ;;  %v1723_v61 = vshrl.u32 %v8301_v26, 16  ;;  %v8452_v26 = vld [vmem:[%s10746_s4 + $0x1b8] sm:$0xff] }
 0x111   : > { %v2264_v37 = vsel %vm2255_vm0, %v2261_v50, %v2263_v14  ;;  %4322 = vmatpush.bf16.msrb.mxu0 %v8452_v26 }
 0x112   : > { %v1721_v62 = vrot.slane %v1719_v49, 1  ;;  %v1083_v8 = vmul.f32 %v9343_v5, %v796_v60  ;;  %2382 = vmatmul.bf16.gmra.mxu3 %v2264_v37 }
 0x114   : > { %v1722_v9 = vsel %vm1686_vm1, %v1717_v43, %v1721_v62  ;;  %v8585_v16 = vpack.c.bf16 %v1083_v8, %v1082_v58  ;;  %v1725_v17 = vor.u32 %v1723_v61, %v1721_v62 }
 0x115   : > { %1924 = vmatmul.bf16.gmra.mxu2 %v1722_v9  ;;  %v711_v52 = vpop.f32.mrf.mxu0  ;;  %v8450_v9 = vld [vmem:[%s10746_s4 + $0x1a8] sm:$0xff] }
 0x116   : > { %8841 = vst [vmem:[#allocation2 + $0x28] sm:$0xff] %v8585_v16   ;;  %v712_v5 = vadd.f32 %v9424_v38, %v711_v52 }
 0x118   : > { %750 = vmatmul.bf16.gmra.mxu0 %v8257_v46  ;;  %v797_v57 = vmax.f32 %v712_v5, 0.0 }
 0x11a   : > { %v1084_v28 = vmul.f32 %v9388_v24, %v797_v57  ;;  %v8397_v57 = vld [vmem:[%s10746_s4 + $0x120] sm:$0xff] }
 0x11b   : > { %3410 = vmatpush.bf16.msrb.mxu2 %v8397_v57 }
 0x11d   : > { %v713_v13 = vpop.f32.mrf.mxu0  ;;  %v8276_v50 = vld [vmem:[#allocation2 + $0x28] sm:$0xff] }
 0x11e   : > { %v8328_v51 = vld [vmem:[#allocation2 + $0x28] sm:$0xff]  ;;  %v714_v59 = vadd.f32 %v9424_v38, %v713_v13  ;;  %1437 = vmatmul.bf16.gmra.mxu1 %v8276_v50  ;;  %v8259_v50 = vld [vmem:[%s9226_s11 + $0x80] sm:$0xff] }
 0x11f   : > { %v8302_v55 = vld [vmem:[#allocation2 + $0x28] sm:$0xff]  ;;  %v2265_v20 = vrot.slane %v8328_v51, 1  ;;  %v8449_v51 = vld [vmem:[%s10746_s4 + $0x1a0] sm:$0xff] }
 0x120   : > { %v1727_v10 = vshll.u32 %v8302_v55, 16  ;;  %v798_v12 = vmax.f32 %v714_v59, 0.0  ;;  %v1731_v62 = vshrl.u32 %v8302_v55, 16  ;;  %v8371_v59 = vld [vmem:[%s10746_s4 + $0xe0] sm:$0xff] }
 0x121   : > { %v2266_v15 = vsel %vm2255_vm0, %v2263_v14, %v2265_v20  ;;  %2819 = vmatpush.bf16.msra.mxu1 %v8371_v59  ;;  %v8261_v59 = vld [vmem:[%s9226_s11 + $0x90] sm:$0xff] }
 0x122   : > { %v1729_v19 = vrot.slane %v1727_v10, 1  ;;  %v1085_v47 = vmul.f32 %v9386_v23, %v798_v12  ;;  %2387 = vmatmul.bf16.gmra.mxu3 %v2266_v15  ;;  %v8451_v23 = vld [vmem:[%s10746_s4 + $0x1b0] sm:$0xff] }
 0x123   : > { %4323 = vmatpush.bf16.msrb.mxu0 %v8451_v23 }
 0x124   : > { %v1730_v29 = vsel %vm1686_vm1, %v1725_v17, %v1729_v19  ;;  %v8590_v32 = vpack.c.bf16 %v1085_v47, %v1084_v28  ;;  %v1733_v46 = vor.u32 %v1731_v62, %v1729_v19 }
 0x125   : > { %1929 = vmatmul.bf16.gmra.mxu2 %v1730_v29  ;;  %v716_v34 = vpop.f32.mrf.mxu0 }
 0x126   : > { %8842 = vst [vmem:[#allocation2 + $0x30] sm:$0xff] %v8590_v32   ;;  %v717_v1 = vadd.f32 %v9424_v38, %v716_v34 }
 0x127   : > { %4324 = vmatpush.bf16.msrb.mxu0 %v8450_v9 }
 0x128   : > { %755 = vmatmul.bf16.gmra.mxu0 %v8258_v4  ;;  %v799_v60 = vmax.f32 %v717_v1, 0.0  ;;  %v8446_v4 = vld [vmem:[%s10746_s4 + $0x188] sm:$0xff] }
 0x12a   : > { %v1086_v2 = vmul.f32 %v9356_v11, %v799_v60  ;;  %v8448_v11 = vld [vmem:[%s10746_s4 + $0x198] sm:$0xff]  ;;  %v8445_v60 = vld [vmem:[%s10746_s4 + $0x180] sm:$0xff] }
 0x12b   : > { %4325 = vmatpush.bf16.msrb.mxu0 %v8449_v51 }
 0x12d   : > { %v718_v24 = vpop.f32.mrf.mxu0  ;;  %v8277_v14 = vld [vmem:[#allocation2 + $0x30] sm:$0xff] }
 0x12e   : > { %v8329_v56 = vld [vmem:[#allocation2 + $0x30] sm:$0xff]  ;;  %v719_v37 = vadd.f32 %v9424_v38, %v718_v24  ;;  %1442 = vmatmul.bf16.gmra.mxu1 %v8277_v14 }
 0x12f   : > { %v8303_v49 = vld [vmem:[#allocation2 + $0x30] sm:$0xff]  ;;  %v2267_v43 = vrot.slane %v8329_v56, 1  ;;  %4326 = vmatpush.bf16.msrb.mxu0 %v8448_v11 }
 0x130   : > { %v1735_v58 = vshll.u32 %v8303_v49, 16  ;;  %v800_v8 = vmax.f32 %v719_v37, 0.0  ;;  %v1739_v47 = vshrl.u32 %v8303_v49, 16  ;;  %v8260_v49 = vld [vmem:[%s9226_s11 + $0x88] sm:$0xff] }
 0x131   : > { %v2268_v16 = vsel %vm2255_vm0, %v2265_v20, %v2267_v43  ;;  %v8447_v20 = vld [vmem:[%s10746_s4 + $0x190] sm:$0xff] }
 0x132   : > { %v1737_v52 = vrot.slane %v1735_v58, 1  ;;  %v1087_v48 = vmul.f32 %v9407_v31, %v800_v8  ;;  %2392 = vmatmul.bf16.gmra.mxu3 %v2268_v16 }
 0x133   : > { %4327 = vmatpush.bf16.msrb.mxu0 %v8447_v20 }
 0x134   : > { %v1738_v5 = vsel %vm1686_vm1, %v1733_v46, %v1737_v52  ;;  %v8595_v13 = vpack.c.bf16 %v1087_v48, %v1086_v2  ;;  %v1741_v26 = vor.u32 %v1739_v47, %v1737_v52 }
 0x135   : > { %1934 = vmatmul.bf16.gmra.mxu2 %v1738_v5  ;;  %v721_v55 = vpop.f32.mrf.mxu0 }
 0x136   : > { %8843 = vst [vmem:[#allocation2 + $0x38] sm:$0xff] %v8595_v13   ;;  %v722_v31 = vadd.f32 %v9424_v38, %v721_v55 }
 0x137   : > { %4328 = vmatpush.bf16.msrb.mxu0 %v8446_v4 }
 0x138   : > { %760 = vmatmul.bf16.gmra.mxu0 %v8259_v50  ;;  %v801_v17 = vmax.f32 %v722_v31, 0.0 }
 0x13a   : > { %v1088_v23 = vmul.f32 %v9405_v30, %v801_v17 }
 0x13b   : > { %4329 = vmatpush.bf16.msrb.mxu0 %v8445_v60 }
 0x13d   : > { %v723_v61 = vpop.f32.mrf.mxu0  ;;  %v8278_v10 = vld [vmem:[#allocation2 + $0x38] sm:$0xff] }
 0x13e   : > { %v8330_v12 = vld [vmem:[#allocation2 + $0x38] sm:$0xff]  ;;  %v724_v19 = vadd.f32 %v9424_v38, %v723_v61  ;;  %1447 = vmatmul.bf16.gmra.mxu1 %v8278_v10 }
 0x13f   : > { %v8304_v15 = vld [vmem:[#allocation2 + $0x38] sm:$0xff]  ;;  %v2269_v28 = vrot.slane %v8330_v12, 1 }
 0x140   : > { %v1743_v29 = vshll.u32 %v8304_v15, 16  ;;  %v802_v32 = vmax.f32 %v724_v19, 0.0  ;;  %v1747_v52 = vshrl.u32 %v8304_v15, 16  ;;  %v8396_v10 = vld [vmem:[%s10746_s4 + $0x118] sm:$0xff] }
 0x141   : > { %v2270_v34 = vsel %vm2255_vm0, %v2267_v43, %v2269_v28  ;;  %3411 = vmatpush.bf16.msrb.mxu2 %v8396_v10 }
 0x142   : > { %v1745_v1 = vrot.slane %v1743_v29, 1  ;;  %v1089_v24 = vmul.f32 %v9384_v22, %v802_v32  ;;  %2397 = vmatmul.bf16.gmra.mxu3 %v2270_v34  ;;  %v7690_v29 = vld [vmem:[#allocation2 + $0x10] sm:$0xc]  ;;  %v8427_v32 = vld [vmem:[#allocation2 + $0x10] sm:$0xf0] }
 0x144   : > { %v1746_v14 = vsel %vm1686_vm1, %v1741_v26, %v1745_v1  ;;  %v8600_v56 = vpack.c.bf16 %v1089_v24, %v1088_v23  ;;  %v1749_v13 = vor.u32 %v1747_v52, %v1745_v1  ;;  %v8428_v1 = vld [vmem:[#allocation2 + $0x18] sm:$0xff] }
 0x145   : > { %1939 = vmatmul.bf16.gmra.mxu2 %v1746_v14  ;;  %v726_v37 = vpop.f32.mrf.mxu0 }
 0x146   : > { %8844 = vst [vmem:[#allocation2 + $0x40] sm:$0xff] %v8600_v56   ;;  %v727_v43 = vadd.f32 %v9424_v38, %v726_v37 }
 0x148   : > { %765 = vmatmul.bf16.gmra.mxu0 %v8260_v49  ;;  %v803_v9 = vmax.f32 %v727_v43, 0.0  ;;  %v7691_v49 = vor.u32 %v8427_v32, %v7690_v29 }
 0x14a   : > { %v1090_v51 = vmul.f32 %v9431_v41, %v803_v9 }
 0x14b   : > { %v9596_v30 = vpop.f32.mrf.mxu1 }
 0x14d   : > { %v728_v22 = vpop.f32.mrf.mxu0  ;;  %v8279_v62 = vld [vmem:[#allocation2 + $0x40] sm:$0xff] }
 0x14e   : > { %v8331_v58 = vld [vmem:[#allocation2 + $0x40] sm:$0xff]  ;;  %v729_v16 = vadd.f32 %v9424_v38, %v728_v22  ;;  %1452 = vmatmul.bf16.gmra.mxu1 %v8279_v62  ;;  %v4220_v22 = vrot.slane %v8428_v1, 2 }
 0x14f   : > { %v8305_v8 = vld [vmem:[#allocation2 + $0x40] sm:$0xff]  ;;  %v2271_v46 = vrot.slane %v8331_v58, 1 }
 0x150   : > { %v1751_v2 = vshll.u32 %v8305_v8, 16  ;;  %v804_v48 = vmax.f32 %v729_v16, 0.0  ;;  %v1755_v34 = vshrl.u32 %v8305_v8, 16  ;;  %v4219_v16 = vrot.slane %v7691_v49, 2 }
 0x151   : > { %v2272_v5 = vsel %vm2255_vm0, %v2269_v28, %v2271_v46 }
 0x152   : > { %v1753_v50 = vrot.slane %v1751_v2, 1  ;;  %v1091_v55 = vmul.f32 %v9429_v40, %v804_v48  ;;  %2402 = vmatmul.bf16.gmra.mxu3 %v2272_v5  ;;  %v8370_v40 = vld [vmem:[%s10746_s4 + $0xd8] sm:$0xff]  ;;  %v4221_v52 = vsel %vm3761_vm2, %v4219_v16, %v4220_v22 }
 0x153   : > { %v9603_v31 = vpop.f32.mrf.mxu1  ;;  %2820 = vmatpush.bf16.msra.mxu1 %v8370_v40  ;;  %v8426_v2 = vld [vmem:[%s10746_s4 + $0x178] sm:$0xff]  ;;  %v8429_v40 = vld [vmem:[#allocation2 + $0x20] sm:$0xff] }
 0x154   : > { %v1754_v57 = vsel %vm1686_vm1, %v1749_v13, %v1753_v50  ;;  %v8605_v11 = vpack.c.bf16 %v1091_v55, %v1090_v51  ;;  %v1757_v14 = vor.u32 %v1755_v34, %v1753_v50  ;;  %3865 = vmatpush.bf16.msrb.mxu3 %v8426_v2  ;;  %v4222_v1 = vrot.slane %v8429_v40, 2 }
 0x155   : > { %1944 = vmatmul.bf16.gmra.mxu2 %v1754_v57  ;;  %v731_v20 = vpop.f32.mrf.mxu0 }
 0x156   : > { %8845 = vst [vmem:[#allocation2 + $0x48] sm:$0xff] %v8605_v11   ;;  %v732_v61 = vadd.f32 %v9424_v38, %v731_v20 }
 0x158   : > { %770 = vmatmul.bf16.gmra.mxu0 %v8261_v59  ;;  %v805_v28 = vmax.f32 %v732_v61, 0.0 }
 0x15a   : > { %v1092_v60 = vmul.f32 %v9412_v33, %v805_v28 }
 0x15b   : > { %v9613_v41 = vpop.f32.mrf.mxu1 }
 0x15d   : > { %v733_v12 = vpop.f32.mrf.mxu0  ;;  %v8280_v15 = vld [vmem:[#allocation2 + $0x48] sm:$0xff] }
 0x15e   : > { %v8332_v17 = vld [vmem:[#allocation2 + $0x48] sm:$0xff]  ;;  %v734_v47 = vadd.f32 %v9424_v38, %v733_v12  ;;  %1457 = vmatmul.bf16.gmra.mxu1 %v8280_v15 }
 0x15f   : > { %v8306_v19 = vld [vmem:[#allocation2 + $0x48] sm:$0xff]  ;;  %v2273_v4 = vrot.slane %v8332_v17, 1 }
 0x160   : > { %v1759_v26 = vshll.u32 %v8306_v19, 16  ;;  %v806_v23 = vmax.f32 %v734_v47, 0.0  ;;  %v1763_v61 = vshrl.u32 %v8306_v19, 16 }
 0x161   : > { %v2274_v24 = vsel %vm2255_vm0, %v2271_v46, %v2273_v4 }
 0x162   : > { %v1761_v56 = vrot.slane %v1759_v26, 1  ;;  %v1093_v37 = vmul.f32 %v9453_v54, %v806_v23  ;;  %2407 = vmatmul.bf16.gmra.mxu3 %v2274_v24 }
 0x163   : > { %v9620_v58 = vpop.f32.mrf.mxu1 }
 0x164   : > { %v1762_v43 = vsel %vm1686_vm1, %v1757_v14, %v1761_v56  ;;  %v8610_v62 = vpack.c.bf16 %v1093_v37, %v1092_v60  ;;  %v1765_v28 = vor.u32 %v1763_v61, %v1761_v56  ;;  %v4223_v14 = vsel %vm3761_vm2, %v4220_v22, %v4222_v1  ;;  %v8395_v56 = vld [vmem:[%s10746_s4 + $0x110] sm:$0xff] }
 0x165   : > { %1949 = vmatmul.bf16.gmra.mxu2 %v1762_v43  ;;  %v736_v8 = vpop.f32.mrf.mxu0  ;;  %v2368_v9 = vpop.f32.mrf.mxu3 }
 0x166   : > { %8846 = vst [vmem:[#allocation2 + $0x50] sm:$0xff] %v8610_v62   ;;  %v737_v54 = vadd.f32 %v9424_v38, %v736_v8  ;;  %3412 = vmatpush.bf16.msrb.mxu2 %v8395_v56  ;;  %v8431_v56 = vld [vmem:[#allocation2 + $0x30] sm:$0xff] }
 0x168   : > { %v1910_v46 = vpop.f32.mrf.mxu2  ;;  %4330 = vmatmul.bf16.vlgmr.msrb.gmra.mxu0 %v4221_v52  ;;  %v807_v11 = vmax.f32 %v737_v54, 0.0  ;;  %v8430_v54 = vld [vmem:[#allocation2 + $0x28] sm:$0xff] }
 0x169   : > { %v2036_v33 = vadd.f32 %v1910_v46, %v9596_v30 }
 0x16a   : > { %v1094_v29 = vmul.f32 %v9451_v53, %v807_v11 }
 0x16b   : > { %v9628_v48 = vadd.f32 %v2368_v9, %v2036_v33  ;;  %v9630_v5 = vpop.f32.mrf.mxu1 }
 0x16d   : > { %v738_v13 = vpop.f32.mrf.mxu0  ;;  %v2370_v50 = vpop.f32.mrf.mxu3  ;;  %v8281_v51 = vld [vmem:[#allocation2 + $0x50] sm:$0xff] }
 0x16e   : > { %v8333_v55 = vld [vmem:[#allocation2 + $0x50] sm:$0xff]  ;;  %v739_v30 = vadd.f32 %v9424_v38, %v738_v13  ;;  %1462 = vmatmul.bf16.gmra.mxu1 %v8281_v51 }
 0x16f   : > { %v8307_v57 = vld [vmem:[#allocation2 + $0x50] sm:$0xff]  ;;  %v2275_v20 = vrot.slane %v8333_v55, 1 }
 0x170   : > { %v1912_v59 = vpop.f32.mrf.mxu2  ;;  %v1767_v10 = vshll.u32 %v8307_v57, 16  ;;  %v808_v12 = vmax.f32 %v739_v30, 0.0  ;;  %v1771_v52 = vshrl.u32 %v8307_v57, 16 }
 0x171   : > { %v2037_v15 = vadd.f32 %v1912_v59, %v9603_v31  ;;  %v2276_v17 = vsel %vm2255_vm0, %v2273_v4, %v2275_v20 }
 0x172   : > { %v1769_v47 = vrot.slane %v1767_v10, 1  ;;  %v1095_v32 = vmul.f32 %v9440_v45, %v808_v12  ;;  %2412 = vmatmul.bf16.gmra.mxu3 %v2276_v17  ;;  %v4224_v10 = vrot.slane %v8430_v54, 2  ;;  %v4226_v54 = vrot.slane %v8431_v56, 2 }
 0x173   : > { %v9637_v34 = vadd.f32 %v2370_v50, %v2037_v15  ;;  %v9640_v23 = vpop.f32.mrf.mxu1 }
 0x174   : > { %v1770_v26 = vsel %vm1686_vm1, %v1765_v28, %v1769_v47  ;;  %v8615_v19 = vpack.c.bf16 %v1095_v32, %v1094_v29  ;;  %v1773_v51 = vor.u32 %v1771_v52, %v1769_v47  ;;  %v8425_v28 = vld [vmem:[%s10746_s4 + $0x170] sm:$0xff] }
 0x175   : > { %1954 = vmatmul.bf16.gmra.mxu2 %v1770_v26  ;;  %v741_v24 = vpop.f32.mrf.mxu0  ;;  %v2373_v31 = vpop.f32.mrf.mxu3  ;;  %3866 = vmatpush.bf16.msrb.mxu3 %v8425_v28 }
 0x176   : > { %8847 = vst [vmem:[#allocation2 + $0x58] sm:$0xff] %v8615_v19   ;;  %v742_v45 = vadd.f32 %v9424_v38, %v741_v24 }
 0x178   : > { %v1915_v4 = vpop.f32.mrf.mxu2  ;;  %4335 = vmatmul.bf16.gmra.mxu0 %v4223_v14  ;;  %v809_v22 = vmax.f32 %v742_v45, 0.0 }
 0x179   : > { %v2038_v53 = vadd.f32 %v1915_v4, %v9613_v41 }
 0x17a   : > { %v1096_v11 = vmul.f32 %v9464_v7, %v809_v22 }
 0x17b   : > { %v9648_v49 = vadd.f32 %v2373_v31, %v2038_v53  ;;  %v9650_v60 = vpop.f32.mrf.mxu1 }
 0x17d   : > { %v743_v37 = vpop.f32.mrf.mxu0  ;;  %v2375_v43 = vpop.f32.mrf.mxu3  ;;  %v8282_v62 = vld [vmem:[#allocation2 + $0x58] sm:$0xff] }
 0x17e   : > { %v8334_v8 = vld [vmem:[#allocation2 + $0x58] sm:$0xff]  ;;  %v744_v41 = vadd.f32 %v9424_v38, %v743_v37  ;;  %1467 = vmatmul.bf16.gmra.mxu1 %v8282_v62 }
 0x17f   : > { %v8308_v9 = vld [vmem:[#allocation2 + $0x58] sm:$0xff]  ;;  %v2277_v46 = vrot.slane %v8334_v8, 1 }
 0x180   : > { %v1917_v16 = vpop.f32.mrf.mxu2  ;;  %v1775_v33 = vshll.u32 %v8308_v9, 16  ;;  %v810_v2 = vmax.f32 %v744_v41, 0.0  ;;  %v1779_v53 = vshrl.u32 %v8308_v9, 16 }
 0x181   : > { %v2039_v13 = vadd.f32 %v1917_v16, %v9620_v58  ;;  %v2278_v50 = vsel %vm2255_vm0, %v2275_v20, %v2277_v46  ;;  %v8369_v20 = vld [vmem:[%s10746_s4 + $0xd0] sm:$0xff] }
 0x182   : > { %v1777_v55 = vrot.slane %v1775_v33, 1  ;;  %v1097_v30 = vmul.f32 %v9462_v6, %v810_v2  ;;  %2417 = vmatmul.bf16.gmra.mxu3 %v2278_v50  ;;  %v4225_v6 = vsel %vm3761_vm2, %v4222_v1, %v4224_v10  ;;  %2821 = vmatpush.bf16.msra.mxu1 %v8369_v20  ;;  %v4227_v50 = vsel %vm3761_vm2, %v4224_v10, %v4226_v54 }
 0x183   : > { %v9657_v59 = vadd.f32 %v2375_v43, %v2039_v13  ;;  %v9660_v40 = vpop.f32.mrf.mxu1 }
 0x184   : > { %v1778_v61 = vsel %vm1686_vm1, %v1773_v51, %v1777_v55  ;;  %v8620_v57 = vpack.c.bf16 %v1097_v30, %v1096_v11  ;;  %v1781_v8 = vor.u32 %v1779_v53, %v1777_v55 }
 0x185   : > { %1959 = vmatmul.bf16.gmra.mxu2 %v1778_v61  ;;  %v746_v12 = vpop.f32.mrf.mxu0  ;;  %v2378_v58 = vpop.f32.mrf.mxu3 }
 0x186   : > { %8848 = vst [vmem:[#allocation2 + $0x60] sm:$0xff] %v8620_v57   ;;  %v747_v17 = vadd.f32 %v9424_v38, %v746_v12 }
 0x188   : > { %v1920_v7 = vpop.f32.mrf.mxu2  ;;  %4340 = vmatmul.bf16.gmra.mxu0 %v4225_v6  ;;  %v811_v31 = vmax.f32 %v747_v17, 0.0 }
 0x189   : > { %v2040_v15 = vadd.f32 %v1920_v7, %v9630_v5 }
 0x18a   : > { %v1098_v41 = vmul.f32 %v9458_v0, %v811_v31 }
 0x18b   : > { %v9671_v47 = vadd.f32 %v2378_v58, %v2040_v15  ;;  %v9673_v29 = vpop.f32.mrf.mxu1  ;;  %v9693_v15 = vld [vmem:[#allocation2 + $0x38] sm:$0xff] }
 0x18d   : > { %v748_v32 = vpop.f32.mrf.mxu0  ;;  %v2380_v26 = vpop.f32.mrf.mxu3  ;;  %v8283_v19 = vld [vmem:[#allocation2 + $0x60] sm:$0xff] }
 0x18e   : > { %v8335_v24 = vld [vmem:[#allocation2 + $0x60] sm:$0xff]  ;;  %v749_v5 = vadd.f32 %v9424_v38, %v748_v32  ;;  %1472 = vmatmul.bf16.gmra.mxu1 %v8283_v19 }
 0x18f   : > { %v8309_v1 = vld [vmem:[#allocation2 + $0x60] sm:$0xff]  ;;  %v2279_v14 = vrot.slane %v8335_v24, 1 }
 0x190   : > { %v1922_v4 = vpop.f32.mrf.mxu2  ;;  %v1783_v45 = vshll.u32 %v8309_v1, 16  ;;  %v812_v37 = vmax.f32 %v749_v5, 0.0  ;;  %v1787_v6 = vshrl.u32 %v8309_v1, 16  ;;  %v4228_v1 = vrot.slane %v9693_v15, 2 }
 0x191   : > { %v2041_v43 = vadd.f32 %v1922_v4, %v9640_v23  ;;  %v2280_v62 = vsel %vm2255_vm0, %v2277_v46, %v2279_v14 }
 0x192   : > { %v1785_v22 = vrot.slane %v1783_v45, 1  ;;  %v1099_v16 = vmul.f32 %v9478_v25, %v812_v37  ;;  %2422 = vmatmul.bf16.gmra.mxu3 %v2280_v62  ;;  %v4229_v56 = vsel %vm3761_vm2, %v4226_v54, %v4228_v1 }
 0x193   : > { %v9680_v52 = vadd.f32 %v2380_v26, %v2041_v43  ;;  %v9683_v2 = vpop.f32.mrf.mxu1  ;;  %v9716_v43 = vld [vmem:[%s10745_s3] ss:$0 sm:$0xff] }
 0x194   : > { %v1786_v33 = vsel %vm1686_vm1, %v1781_v8, %v1785_v22  ;;  %v8625_v9 = vpack.c.bf16 %v1099_v16, %v1098_v41  ;;  %v1789_v26 = vor.u32 %v1787_v6, %v1785_v22 }
 0x195   : > { %1964 = vmatmul.bf16.gmra.mxu2 %v1786_v33  ;;  %v751_v13 = vpop.f32.mrf.mxu0  ;;  %v2383_v23 = vpop.f32.mrf.mxu3 }
 0x196   : > { %8849 = vst [vmem:[#allocation2 + $0x68] sm:$0xff] %v8625_v9   ;;  %v752_v25 = vadd.f32 %v9424_v38, %v751_v13 }
 0x198   : > { %v1925_v46 = vpop.f32.mrf.mxu2  ;;  %4345 = vmatmul.bf16.gmra.mxu0 %v4227_v50  ;;  %v813_v58 = vmax.f32 %v752_v25, 0.0  ;;  %v8433_v25 = vld [vmem:[#allocation2 + $0x40] sm:$0xff] }
 0x199   : > { %v2042_v0 = vadd.f32 %v1925_v46, %v9650_v60  ;;  %v4230_v15 = vrot.slane %v8433_v25, 2 }
 0x19a   : > { %v1100_v24 = vmul.f32 %v9476_v21, %v813_v58  ;;  %v8394_v21 = vld [vmem:[%s10746_s4 + $0x108] sm:$0xff] }
 0x19b   : > { %v9688_v51 = vadd.f32 %v2383_v23, %v2042_v0  ;;  %v9690_v55 = vpop.f32.mrf.mxu1  ;;  %3413 = vmatpush.bf16.msrb.mxu2 %v8394_v21 }
 0x19d   : > { %v753_v11 = vpop.f32.mrf.mxu0  ;;  %v2385_v30 = vpop.f32.mrf.mxu3  ;;  %v8284_v61 = vld [vmem:[#allocation2 + $0x68] sm:$0xff] }
 0x19e   : > { %v8336_v57 = vld [vmem:[#allocation2 + $0x68] sm:$0xff]  ;;  %v754_v20 = vadd.f32 %v9424_v38, %v753_v11  ;;  %1477 = vmatmul.bf16.gmra.mxu1 %v8284_v61 }
 0x19f   : > { %v8310_v12 = vld [vmem:[#allocation2 + $0x68] sm:$0xff]  ;;  %v2281_v10 = vrot.slane %v8336_v57, 1 }
 0x1a0   : > { %v1927_v7 = vpop.f32.mrf.mxu2  ;;  %v1791_v60 = vshll.u32 %v8310_v12, 16  ;;  %v814_v17 = vmax.f32 %v754_v20, 0.0  ;;  %v1795_v50 = vshrl.u32 %v8310_v12, 16 }
 0x1a1   : > { %v2043_v28 = vadd.f32 %v1927_v7, %v9660_v40  ;;  %v2282_v32 = vsel %vm2255_vm0, %v2279_v14, %v2281_v10 }
 0x1a2   : > { %v1793_v19 = vrot.slane %v1791_v60, 1  ;;  %v1101_v31 = vmul.f32 %v9474_v18, %v814_v17  ;;  %2427 = vmatmul.bf16.gmra.mxu3 %v2282_v32  ;;  %v8368_v18 = vld [vmem:[%s10746_s4 + $0xc8] sm:$0xff] }
 0x1a3   : > { %v9699_v38 = vadd.f32 %v2385_v30, %v2043_v28  ;;  %v9703_v53 = vpop.f32.mrf.mxu1  ;;  %2822 = vmatpush.bf16.msra.mxu1 %v8368_v18 }
 0x1a4   : > { %v1794_v5 = vsel %vm1686_vm1, %v1789_v26, %v1793_v19  ;;  %v8630_v4 = vpack.c.bf16 %v1101_v31, %v1100_v24  ;;  %v1797_v57 = vor.u32 %v1795_v50, %v1793_v19 }
 0x1a5   : > { %1969 = vmatmul.bf16.gmra.mxu2 %v1794_v5  ;;  %v756_v40 = vpop.f32.mrf.mxu0  ;;  %v2388_v45 = vpop.f32.mrf.mxu3 }
 0x1a6   : > { %8850 = vst [vmem:[#allocation2 + $0x70] sm:$0xff] %v8630_v4   ;;  %v757_v62 = vadd.f32 %v9716_v43, %v756_v40 }
 0x1a8   : > { %v1930_v14 = vpop.f32.mrf.mxu2  ;;  %4350 = vmatmul.bf16.gmra.mxu0 %v4229_v56 }
 0x1a9   : > { %v2044_v37 = vadd.f32 %v1930_v14, %v9673_v29  ;;  %v815_v29 = vmax.f32 %v757_v62, 0.0 }
 0x1ab   : > { %v9719_v8 = vadd.f32 %v2388_v45, %v2044_v37  ;;  %v9721_v22 = vpop.f32.mrf.mxu1  ;;  %v1102_v20 = vmul.f32 %v9485_v42, %v815_v29  ;;  %v9744_v37 = vld [vmem:[#allocation2 + $0x48] sm:$0xff] }
 0x1ad   : > { %v758_v41 = vpop.f32.mrf.mxu0  ;;  %v2390_v16 = vpop.f32.mrf.mxu3  ;;  %v8285_v33 = vld [vmem:[#allocation2 + $0x70] sm:$0xff] }
 0x1ae   : > { %v8337_v54 = vld [vmem:[#allocation2 + $0x70] sm:$0xff]  ;;  %v759_v13 = vadd.f32 %v9716_v43, %v758_v41  ;;  %1482 = vmatmul.bf16.gmra.mxu1 %v8285_v33 }
 0x1af   : > { %v8311_v9 = vld [vmem:[#allocation2 + $0x70] sm:$0xff]  ;;  %v2283_v46 = vrot.slane %v8337_v54, 1 }
 0x1b0   : > { %v1932_v23 = vpop.f32.mrf.mxu2  ;;  %v1799_v0 = vshll.u32 %v8311_v9, 16  ;;  %v816_v11 = vmax.f32 %v759_v13, 0.0 }
 0x1b1   : > { %v2045_v30 = vadd.f32 %v1932_v23, %v9683_v2  ;;  %v2284_v61 = vsel %vm2255_vm0, %v2281_v10, %v2283_v46  ;;  %v8424_v10 = vld [vmem:[%s10746_s4 + $0x168] sm:$0xff] }
 0x1b2   : > { %v1801_v58 = vrot.slane %v1799_v0, 1  ;;  %v1103_v7 = vmul.f32 %v9483_v39, %v816_v11  ;;  %2432 = vmatmul.bf16.gmra.mxu3 %v2284_v61  ;;  %v4231_v39 = vsel %vm3761_vm2, %v4228_v1, %v4230_v15 }
 0x1b3   : > { %v9728_v6 = vadd.f32 %v2390_v16, %v2045_v30  ;;  %v9731_v17 = vpop.f32.mrf.mxu1  ;;  %3867 = vmatpush.bf16.msrb.mxu3 %v8424_v10 }
 0x1b4   : > { %v1802_v60 = vsel %vm1686_vm1, %v1797_v57, %v1801_v58  ;;  %v8635_v12 = vpack.c.bf16 %v1103_v7, %v1102_v20 }
 0x1b5   : > { %1974 = vmatmul.bf16.gmra.mxu2 %v1802_v60  ;;  %v761_v28 = vpop.f32.mrf.mxu0  ;;  %v2393_v2 = vpop.f32.mrf.mxu3 }
 0x1b6   : > { %8851 = vst [vmem:[#allocation2 + $0x78] sm:$0xff] %v8635_v12   ;;  %v762_v26 = vadd.f32 %v9716_v43, %v761_v28 }
 0x1b8   : > { %v1935_v42 = vpop.f32.mrf.mxu2  ;;  %4355 = vmatmul.bf16.gmra.mxu0 %v4231_v39  ;;  %v817_v21 = vmax.f32 %v762_v26, 0.0  ;;  %v9770_v26 = vld [vmem:[#allocation2 + $0x50] sm:$0xff] }
 0x1b9   : > { %v2046_v32 = vadd.f32 %v1935_v42, %v9690_v55  ;;  %v1803_v55 = vshrl.u32 %v8311_v9, 16  ;;  %v4232_v9 = vrot.slane %v9744_v37, 2  ;;  %v4234_v37 = vrot.slane %v9770_v26, 2 }
 0x1ba   : > { %v1104_v29 = vmul.f32 %v9487_v44, %v817_v21  ;;  %v8393_v44 = vld [vmem:[%s10746_s4 + $0x100] sm:$0xff] }
 0x1bb   : > { %v9739_v19 = vadd.f32 %v2393_v2, %v2046_v32  ;;  %v9741_v24 = vpop.f32.mrf.mxu1  ;;  %v1805_v33 = vor.u32 %v1803_v55, %v1801_v58  ;;  %v4233_v30 = vsel %vm3761_vm2, %v4230_v15, %v4232_v9  ;;  %3414 = vmatpush.bf16.msrb.mxu2 %v8393_v44 }
 0x1bd   : > { %v763_v31 = vpop.f32.mrf.mxu0  ;;  %v2395_v5 = vpop.f32.mrf.mxu3  ;;  %v8286_v4 = vld [vmem:[#allocation2 + $0x78] sm:$0xff] }
 0x1be   : > { %v8338_v40 = vld [vmem:[#allocation2 + $0x78] sm:$0xff]  ;;  %v764_v18 = vadd.f32 %v9716_v43, %v763_v31  ;;  %1487 = vmatmul.bf16.gmra.mxu1 %v8286_v4  ;;  %v8423_v4 = vld [vmem:[%s10746_s4 + $0x160] sm:$0xff] }
 0x1bf   : > { %v8312_v45 = vld [vmem:[#allocation2 + $0x78] sm:$0xff]  ;;  %v2285_v14 = vrot.slane %v8338_v40, 1  ;;  %3868 = vmatpush.bf16.msrb.mxu3 %v8423_v4 }
 0x1c0   : > { %v1937_v1 = vpop.f32.mrf.mxu2  ;;  %v1807_v56 = vshll.u32 %v8312_v45, 16  ;;  %v818_v62 = vmax.f32 %v764_v18, 0.0  ;;  %v1811_v39 = vshrl.u32 %v8312_v45, 16 }
 0x1c1   : > { %v2047_v41 = vadd.f32 %v1937_v1, %v9703_v53  ;;  %v2286_v16 = vsel %vm2255_vm0, %v2283_v46, %v2285_v14 }
 0x1c2   : > { %v1809_v54 = vrot.slane %v1807_v56, 1  ;;  %v1105_v13 = vmul.f32 %v9493_v3, %v818_v62  ;;  %2437 = vmatmul.bf16.gmra.mxu3 %v2286_v16  ;;  %v8367_v3 = vld [vmem:[%s10746_s4 + $0xc0] sm:$0xff]  ;;  %v4235_v16 = vsel %vm3761_vm2, %v4232_v9, %v4234_v37 }
 0x1c3   : > { %v9750_v23 = vadd.f32 %v2395_v5, %v2047_v41  ;;  %v9754_v25 = vpop.f32.mrf.mxu1  ;;  %2823 = vmatpush.bf16.msra.mxu1 %v8367_v3 }
 0x1c4   : > { %v1810_v50 = vsel %vm1686_vm1, %v1805_v33, %v1809_v54  ;;  %v8640_v0 = vpack.c.bf16 %v1105_v13, %v1104_v29  ;;  %v1813_v21 = vor.u32 %v1811_v39, %v1809_v54  ;;  %v8421_v54 = vld [vmem:[%s10746_s4 + $0x150] sm:$0xff] }
 0x1c5   : > { %1979 = vmatmul.bf16.gmra.mxu2 %v1810_v50  ;;  %v766_v53 = vpop.f32.mrf.mxu0  ;;  %v2398_v11 = vpop.f32.mrf.mxu3 }
 0x1c6   : > { %8852 = vst [vmem:[#allocation2 + $0x80] sm:$0xff] %v8640_v0   ;;  %v767_v57 = vadd.f32 %v9716_v43, %v766_v53 }
 0x1c8   : > { %v1940_v46 = vpop.f32.mrf.mxu2  ;;  %4360 = vmatmul.bf16.gmra.mxu0 %v4233_v30  ;;  %v819_v10 = vmax.f32 %v767_v57, 0.0 }
 0x1c9   : > { %v2048_v61 = vadd.f32 %v1940_v46, %v9721_v22  ;;  %v8420_v46 = vld [vmem:[%s10746_s4 + $0x148] sm:$0xff] }
 0x1ca   : > { %v1106_v1 = vmul.f32 %v9491_v63, %v819_v10  ;;  %v8422_v63 = vld [vmem:[%s10746_s4 + $0x158] sm:$0xff] }
 0x1cb   : > { %v9765_v58 = vadd.f32 %v2398_v11, %v2048_v61  ;;  %v9767_v20 = vpop.f32.mrf.mxu1  ;;  %3869 = vmatpush.bf16.msrb.mxu3 %v8422_v63 }
 0x1cd   : > { %v768_v7 = vpop.f32.mrf.mxu0  ;;  %v2400_v60 = vpop.f32.mrf.mxu3  ;;  %v8287_v12 = vld [vmem:[#allocation2 + $0x80] sm:$0xff] }
 0x1ce   : > { %v8339_v28 = vld [vmem:[#allocation2 + $0x80] sm:$0xff]  ;;  %v769_v42 = vadd.f32 %v9716_v43, %v768_v7  ;;  %1492 = vmatmul.bf16.gmra.mxu1 %v8287_v12 }
 0x1cf   : > { %v8313_v2 = vld [vmem:[#allocation2 + $0x80] sm:$0xff]  ;;  %v2287_v22 = vrot.slane %v8339_v28, 1  ;;  %3870 = vmatpush.bf16.msrb.mxu3 %v8421_v54 }
 0x1d0   : > { %v1942_v15 = vpop.f32.mrf.mxu2  ;;  %v1815_v32 = vshll.u32 %v8313_v2, 16  ;;  %v820_v31 = vmax.f32 %v769_v42, 0.0  ;;  %v1819_v57 = vshrl.u32 %v8313_v2, 16 }
 0x1d1   : > { %v2049_v5 = vadd.f32 %v1942_v15, %v9731_v17  ;;  %v2288_v40 = vsel %vm2255_vm0, %v2285_v14, %v2287_v22 }
 0x1d2   : > { %v1817_v18 = vrot.slane %v1815_v32, 1  ;;  %v1107_v55 = vmul.f32 %v9499_v27, %v820_v31  ;;  %2442 = vmatmul.bf16.gmra.mxu3 %v2288_v40  ;;  %v8349_v40 = vld [vmem:[#allocation2 + $0x8] sm:$0xf0] }
 0x1d3   : > { %v9779_v45 = vadd.f32 %v2400_v60, %v2049_v5  ;;  %v9783_v62 = vpop.f32.mrf.mxu1  ;;  %v9808_v60 = vld [vmem:[#allocation2 + $0x58] sm:$0xff]  ;;  %3871 = vmatpush.bf16.msrb.mxu3 %v8420_v46 }
 0x1d4   : > { %v1818_v56 = vsel %vm1686_vm1, %v1813_v21, %v1817_v18  ;;  %v8645_v17 = vpack.c.bf16 %v1107_v55, %v1106_v1  ;;  %v1821_v42 = vor.u32 %v1819_v57, %v1817_v18  ;;  %v8350_v21 = vld [vmem:[#allocation2 + $0x10] sm:$0xff]  ;;  %v8504_v18 = vld [vmem:[%s10746_s4 + $0x238] sm:$0xff] }
 0x1d5   : > { %1984 = vmatmul.bf16.gmra.mxu2 %v1818_v56  ;;  %v771_v41 = vpop.f32.mrf.mxu0  ;;  %v2403_v14 = vpop.f32.mrf.mxu3  ;;  %v8478_v56 = vld [vmem:[%s10746_s4 + $0x1f8] sm:$0xff] }
 0x1d6   : > { %8853 = vst [vmem:[#allocation2 + $0x88] sm:$0xff] %v8645_v17   ;;  %v772_v29 = vadd.f32 %v9716_v43, %v771_v41  ;;  %5371 = vmatpush.bf16.msra.mxu2 %v8504_v18  ;;  %v2714_v17 = vrot.slane %v8350_v21, 1  ;;  %4913 = vmatpush.bf16.msrb.mxu1 %v8478_v56  ;;  %v7570_v21 = vld [vmem:[#allocation2 + $0x8] sm:$0xc]  ;;  %v8402_v18 = vld [vmem:[#allocation2 + $0x10] sm:$0xff] }
 0x1d8   : > { %v1945_v27 = vpop.f32.mrf.mxu2  ;;  %4365 = vmatmul.bf16.gmra.mxu0 %v4235_v16 }
 0x1d9   : > { %v2050_v33 = vadd.f32 %v1945_v27, %v9741_v24  ;;  %v821_v24 = vmax.f32 %v772_v29, 0.0 }
 0x1db   : > { %v9794_v13 = vadd.f32 %v2403_v14, %v2050_v33  ;;  %v9796_v50 = vpop.f32.mrf.mxu1  ;;  %v1108_v39 = vmul.f32 %v9506_v36, %v821_v24 }
 0x1dd   : > { %v773_v0 = vpop.f32.mrf.mxu0  ;;  %v2405_v53 = vpop.f32.mrf.mxu3  ;;  %v8288_v11 = vld [vmem:[#allocation2 + $0x88] sm:$0xff] }
 0x1de   : > { %v9798_v44 = vld [vmem:[#allocation2 + $0x88] sm:$0xff]  ;;  %v774_v3 = vadd.f32 %v9716_v43, %v773_v0  ;;  %1497 = vmatmul.bf16.gmra.mxu1 %v8288_v11  ;;  %v8419_v43 = vld [vmem:[%s10746_s4 + $0x140] sm:$0xff] }
 0x1df   : > { %v9800_v9 = vld [vmem:[#allocation2 + $0x88] sm:$0xff]  ;;  %v2289_v61 = vrot.slane %v9798_v44, 1  ;;  %3872 = vmatpush.bf16.msrb.mxu3 %v8419_v43  ;;  %v9836_v0 = vld [vmem:[#allocation2 + $0x60] sm:$0xff] }
 0x1e0   : > { %v1947_v30 = vpop.f32.mrf.mxu2  ;;  %v1823_v7 = vshll.u32 %v9800_v9, 16  ;;  %v822_v12 = vmax.f32 %v774_v3, 0.0  ;;  %v1827_v3 = vshrl.u32 %v9800_v9, 16  ;;  %v4238_v57 = vrot.slane %v9836_v0, 2 }
 0x1e1   : > { %v2051_v28 = vadd.f32 %v1947_v30, %v9754_v25  ;;  %v2290_v10 = vsel %vm2255_vm0, %v2287_v22, %v2289_v61  ;;  %v4236_v25 = vrot.slane %v9808_v60, 2  ;;  %v7330_v22 = vld [vmem:[#allocation2 + $0x8] sm:$0xe] }
 0x1e2   : > { %v1825_v15 = vrot.slane %v1823_v7, 1  ;;  %v1109_v2 = vmul.f32 %v9504_v35, %v822_v12  ;;  %2447 = vmatmul.bf16.gmra.mxu3 %v2290_v10  ;;  %v7331_v55 = vor.u32 %v8349_v40, %v7330_v22  ;;  %v7450_v10 = vld [vmem:[#allocation2 + $0x8] sm:$0xe] }
 0x1e3   : > { %v9817_v32 = vadd.f32 %v2405_v53, %v2051_v28  ;;  %v9821_v5 = vpop.f32.mrf.mxu1  ;;  %v4237_v35 = vsel %vm3761_vm2, %v4234_v37, %v4236_v25 }
 0x1e4   : > { %v1826_v26 = vsel %vm1686_vm1, %v1821_v42, %v1825_v15  ;;  %v8650_v31 = vpack.c.bf16 %v1109_v2, %v1108_v39  ;;  %v2713_v37 = vrot.slane %v7331_v55, 1  ;;  %v1829_v12 = vor.u32 %v1827_v3, %v1825_v15  ;;  %v8351_v39 = vld [vmem:[#allocation2 + $0x18] sm:$0xff]  ;;  %v8376_v2 = vld [vmem:[#allocation2 + $0x10] sm:$0xff] }
 0x1e5   : > { %1989 = vmatmul.bf16.gmra.mxu2 %v1826_v26  ;;  %v2408_v4 = vpop.f32.mrf.mxu3  ;;  %v4239_v26 = vsel %vm3761_vm2, %v4236_v25, %v4238_v57  ;;  %v2716_v22 = vrot.slane %v8351_v39, 1  ;;  %v3183_v15 = vshll.u32 %v8376_v2, 16 }
 0x1e6   : > { %8854 = vst [vmem:[#allocation2 + $0x90] sm:$0xff] %v8650_v31   ;;  %v2715_v33 = vsel %vm2255_vm0, %v2713_v37, %v2714_v17 }
 0x1e7   : > { %v2717_v37 = vsel %vm2255_vm0, %v2714_v17, %v2716_v22 }
 0x1e8   : > { %v1950_v36 = vpop.f32.mrf.mxu2  ;;  %4370 = vmatmul.bf16.gmra.mxu0 %v4237_v35 }
 0x1e9   : > { %v2052_v1 = vadd.f32 %v1950_v36, %v9767_v20  ;;  %v8401_v36 = vld [vmem:[#allocation2 + $0x8] sm:$0xf0] }
 0x1ea   : > { %v7571_v25 = vor.u32 %v8401_v36, %v7570_v21 }
 0x1eb   : > { %v9831_v41 = vadd.f32 %v2408_v4, %v2052_v1  ;;  %v9833_v14 = vpop.f32.mrf.mxu1 }
 0x1ec   : > { %v3762_v0 = vrot.slane %v7571_v25, 2 }
 0x1ed   : > { %v2410_v63 = vpop.f32.mrf.mxu3  ;;  %v2144_v27 = vld [vmem:[#allocation2 + $0x90] sm:$0x1] }
 0x1ee   : > { %v1575_v16 = vld [vmem:[#allocation2 + $0x90] sm:$0x1]  ;;  %v2235_v20 = vunpack.c.l.b16 %v2144_v27  ;;  %2824 = vmatmul.bf16.vlgmr.msra.gmra.mxu1 %v2715_v33 }
 0x1ef   : > { %v1666_v54 = vunpack.c.l.b16 %v1575_v16  ;;  %v8438_v16 = vld [vmem:[#allocation2 + $0x68] sm:$0xff] }
 0x1f0   : > { %v1952_v29 = vpop.f32.mrf.mxu2  ;;  %v2254_v11 = vpack.c.b16 %v2235_v20, %v2235_v20  ;;  %v3763_v20 = vrot.slane %v8402_v18, 2  ;;  %v8439_v18 = vld [vmem:[#allocation2 + $0x70] sm:$0xff] }
 0x1f1   : > { %v2053_v53 = vadd.f32 %v1952_v29, %v9783_v62  ;;  %v1685_v44 = vpack.c.b16 %v1666_v54, %v1666_v54  ;;  %v8375_v62 = vld [vmem:[#allocation2 + $0x8] sm:$0xf0]  ;;  %v4242_v25 = vrot.slane %v8439_v18, 2 }
 0x1f2   : > { %v2291_v24 = vrot.slane %v2254_v11, 1  ;;  %v7451_v4 = vor.u32 %v8375_v62, %v7450_v10  ;;  %v3764_v17 = vsel %vm3761_vm2, %v3762_v0, %v3763_v20  ;;  %v8503_v62 = vld [vmem:[%s10746_s4 + $0x230] sm:$0xff] }
 0x1f3   : > { %v1831_v46 = vshll.u32 %v1685_v44, 16  ;;  %v9840_v30 = vadd.f32 %v2410_v63, %v2053_v53  ;;  %v9843_v7 = vpop.f32.mrf.mxu1  ;;  %v4240_v44 = vrot.slane %v8438_v16, 2  ;;  %5372 = vmatpush.bf16.msra.mxu2 %v8503_v62 }
 0x1f4   : > { %v2292_v60 = vsel %vm2255_vm0, %v2289_v61, %v2291_v24  ;;  %v3180_v61 = vshrl.u32 %v8376_v2, 16  ;;  %v3172_v1 = vshrl.u32 %v7451_v4, 16  ;;  %v3175_v55 = vshll.u32 %v7451_v4, 16  ;;  %v8403_v4 = vld [vmem:[#allocation2 + $0x18] sm:$0xff] }
 0x1f5   : > { %v1833_v28 = vrot.slane %v1831_v46, 1  ;;  %2452 = vmatmul.bf16.gmra.mxu3 %v2292_v60  ;;  %v2413_v43 = vpop.f32.mrf.mxu3 }
 0x1f6   : > { %v3182_v63 = vrot.slane %v3180_v61, 1  ;;  %v3174_v54 = vrot.slane %v3172_v1, 1  ;;  %v3177_v29 = vrot.slane %v3175_v55, 2  ;;  %v3765_v55 = vrot.slane %v8403_v4, 2 }
 0x1f7   : > { %v1834_v42 = vsel %vm1686_vm1, %v1829_v12, %v1833_v28  ;;  %v8352_v12 = vld [vmem:[#allocation2 + $0x20] sm:$0xff] }
 0x1f8   : > { %1994 = vmatmul.bf16.gmra.mxu2 %v1834_v42  ;;  %v1955_v9 = vpop.f32.mrf.mxu2  ;;  %4375 = vmatmul.bf16.gmra.mxu0 %v4239_v26  ;;  %v3178_v3 = vor.u32 %v3177_v29, %v3174_v54  ;;  %v9866_v42 = vpop.f32.mrf.mxu0  ;;  %v2718_v39 = vrot.slane %v8352_v12, 1  ;;  %v8378_v54 = vld [vmem:[#allocation2 + $0x20] sm:$0xff] }
 0x1f9   : > { %v2054_v31 = vadd.f32 %v1955_v9, %v9796_v50  ;;  %v3185_v50 = vrot.slane %v3183_v15, 2 }
 0x1fb   : > { %v9849_v40 = vadd.f32 %v2413_v43, %v2054_v31  ;;  %v9851_v35 = vpop.f32.mrf.mxu1  ;;  %v3186_v53 = vor.u32 %v3185_v50, %v3182_v63  ;;  %v4241_v43 = vsel %vm3761_vm2, %v4238_v57, %v4240_v44  ;;  %v2719_v57 = vsel %vm2255_vm0, %v2716_v22, %v2718_v39 }
 0x1fd   : > { %v2415_v56 = vpop.f32.mrf.mxu3  ;;  %v3187_v60 = vsel %vm3170_vm3, %v3178_v3, %v3186_v53  ;;  %v3198_v3 = vshrl.u32 %v8378_v54, 16 }
 0x1fe   : > { %2829 = vmatmul.bf16.gmra.mxu1 %v2717_v37 }
 0x200   : > { %v1957_v27 = vpop.f32.mrf.mxu2  ;;  %v9877_v63 = vpop.f32.mrf.mxu0 }
 0x201   : > { %v2055_v33 = vadd.f32 %v1957_v27, %v9821_v5  ;;  %v8377_v5 = vld [vmem:[#allocation2 + $0x18] sm:$0xff]  ;;  %v3766_v27 = vsel %vm3761_vm2, %v3763_v20, %v3765_v55  ;;  %v8404_v20 = vld [vmem:[#allocation2 + $0x20] sm:$0xff] }
 0x202   : > { %v3189_v2 = vshrl.u32 %v8377_v5, 16  ;;  %v3192_v9 = vshll.u32 %v8377_v5, 16 }
 0x203   : > { %v9855_v11 = vadd.f32 %v2415_v56, %v2055_v33  ;;  %v9857_v24 = vpop.f32.mrf.mxu1  ;;  %v8353_v33 = vld [vmem:[#allocation2 + $0x28] sm:$0xff] }
 0x204   : > { %v3191_v15 = vrot.slane %v3189_v2, 1  ;;  %v3194_v21 = vrot.slane %v3192_v9, 2  ;;  %v3767_v2 = vrot.slane %v8404_v20, 2 }
 0x205   : > { %3873 = vmatmul.bf16.vlgmr.msrb.gmra.mxu3 %v3764_v17  ;;  %v2418_v46 = vpop.f32.mrf.mxu3  ;;  %v2720_v17 = vrot.slane %v8353_v33, 1 }
 0x206   : > { %v3195_v56 = vor.u32 %v3194_v21, %v3191_v15 }
 0x208   : > { %3415 = vmatmul.bf16.vlgmr.msrb.gmra.mxu2 %v3187_v60  ;;  %v1960_v28 = vpop.f32.mrf.mxu2  ;;  %4380 = vmatmul.bf16.gmra.mxu0 %v4241_v43  ;;  %v3196_v16 = vsel %vm3170_vm3, %v3186_v53, %v3195_v56  ;;  %v2721_v53 = vsel %vm2255_vm0, %v2718_v39, %v2720_v17  ;;  %v3200_v43 = vrot.slane %v3198_v3, 1  ;;  %v8354_v39 = vld [vmem:[#allocation2 + $0x30] sm:$0xff] }
 0x209   : > { %v2056_v10 = vadd.f32 %v1960_v28, %v9833_v14  ;;  %v8477_v14 = vld [vmem:[%s10746_s4 + $0x1f0] sm:$0xff]  ;;  %v9885_v28 = vpop.f32.mrf.mxu0 }
 0x20a   : > { %4914 = vmatpush.bf16.msrb.mxu1 %v8477_v14 }
 0x20b   : > { %v9868_v26 = vadd.f32 %v2418_v46, %v2056_v10  ;;  %v1473_v31 = vpop.f32.mrf.mxu1  ;;  %v3201_v46 = vshll.u32 %v8378_v54, 16 }
 0x20d   : > { %v2420_v61 = vpop.f32.mrf.mxu3  ;;  %v3203_v10 = vrot.slane %v3201_v46, 2 }
 0x20e   : > { %2834 = vmatmul.bf16.gmra.mxu1 %v2719_v57  ;;  %v3768_v57 = vsel %vm3761_vm2, %v3765_v55, %v3767_v2 }
 0x20f   : > { %v3204_v9 = vor.u32 %v3203_v10, %v3200_v43 }
 0x210   : > { %v1962_v36 = vpop.f32.mrf.mxu2 }
 0x211   : > { %v2057_v1 = vadd.f32 %v1962_v36, %v9843_v7  ;;  %v4243_v7 = vsel %vm3761_vm2, %v4240_v44, %v4242_v25  ;;  %v8440_v44 = vld [vmem:[#allocation2 + $0x78] sm:$0xff]  ;;  %v3205_v21 = vsel %vm3170_vm3, %v3195_v56, %v3204_v9  ;;  %v8379_v36 = vld [vmem:[#allocation2 + $0x28] sm:$0xff] }
 0x212   : > { %v3210_v33 = vshll.u32 %v8379_v36, 16  ;;  %v8502_v56 = vld [vmem:[%s10746_s4 + $0x228] sm:$0xff] }
 0x213   : > { %v9875_v37 = vadd.f32 %v2420_v61, %v2057_v1  ;;  %v1475_v50 = vpop.f32.mrf.mxu1  ;;  %v4244_v61 = vrot.slane %v8440_v44, 2  ;;  %5373 = vmatpush.bf16.msra.mxu2 %v8502_v56 }
 0x215   : > { %3878 = vmatmul.bf16.gmra.mxu3 %v3766_v27  ;;  %v2423_v22 = vpop.f32.mrf.mxu3  ;;  %v4245_v1 = vsel %vm3761_vm2, %v4242_v25, %v4244_v61  ;;  %v9894_v27 = vpop.f32.mrf.mxu0  ;;  %v3212_v25 = vrot.slane %v3210_v33, 2 }
 0x218   : > { %3420 = vmatmul.bf16.gmra.mxu2 %v3196_v16  ;;  %v1965_v29 = vpop.f32.mrf.mxu2  ;;  %4385 = vmatmul.bf16.gmra.mxu0 %v4243_v7  ;;  %v3207_v16 = vshrl.u32 %v8379_v36, 16 }
 0x219   : > { %v2058_v0 = vadd.f32 %v1965_v29, %v9851_v35  ;;  %v8405_v29 = vld [vmem:[#allocation2 + $0x28] sm:$0xff] }
 0x21a   : > { %v3209_v3 = vrot.slane %v3207_v16, 1 }
 0x21b   : > { %v9883_v60 = vadd.f32 %v2423_v22, %v2058_v0  ;;  %v1478_v12 = vpop.f32.mrf.mxu1  ;;  %v2722_v22 = vrot.slane %v8354_v39, 1 }
 0x21c   : > { %v3213_v10 = vor.u32 %v3212_v25, %v3209_v3 }
 0x21d   : > { %v2425_v5 = vpop.f32.mrf.mxu3  ;;  %v2723_v0 = vsel %vm2255_vm0, %v2720_v17, %v2722_v22  ;;  %v9905_v43 = vpop.f32.mrf.mxu0 }
 0x21e   : > { %2839 = vmatmul.bf16.gmra.mxu1 %v2721_v53  ;;  %v8476_v53 = vld [vmem:[%s10746_s4 + $0x1e8] sm:$0xff]  ;;  %10757 = vst [vmem:[#allocation9_spill] sm:$0xff] %v9905_v43 }
 0x21f   : > { %4915 = vmatpush.bf16.msrb.mxu1 %v8476_v53 }
 0x220   : > { %v1967_v62 = vpop.f32.mrf.mxu2 }
 0x221   : > { %v2059_v35 = vadd.f32 %v1967_v62, %v9857_v24 }
 0x223   : > { %v9889_v4 = vadd.f32 %v2425_v5, %v2059_v35  ;;  %v1480_v14 = vpop.f32.mrf.mxu1  ;;  %v3769_v5 = vrot.slane %v8405_v29, 2 }
 0x225   : > { %3883 = vmatmul.bf16.gmra.mxu3 %v3768_v57  ;;  %v2428_v15 = vpop.f32.mrf.mxu3  ;;  %v3770_v35 = vsel %vm3761_vm2, %v3767_v2, %v3769_v5  ;;  %v9914_v29 = vpop.f32.mrf.mxu0 }
 0x226   : > { %10758 = vst [vmem:[#allocation10_spill] sm:$0xff] %v9914_v29 }
 0x228   : > { %3425 = vmatmul.bf16.gmra.mxu2 %v3205_v21  ;;  %v1970_v18 = vpop.f32.mrf.mxu2  ;;  %4390 = vmatmul.bf16.gmra.mxu0 %v4245_v1  ;;  %v8380_v21 = vld [vmem:[#allocation2 + $0x30] sm:$0xff] }
 0x229   : > { %v2060_v24 = vadd.f32 %v1970_v18, %v1473_v31  ;;  %v8441_v31 = vld [vmem:[#allocation2 + $0x80] sm:$0xff]  ;;  %v3219_v16 = vshll.u32 %v8380_v21, 16 }
 0x22a   : > { %v4246_v44 = vrot.slane %v8441_v31, 2 }
 0x22b   : > { %v9896_v54 = vadd.f32 %v2428_v15, %v2060_v24  ;;  %v1483_v55 = vpop.f32.mrf.mxu1  ;;  %v3214_v15 = vsel %vm3170_vm3, %v3204_v9, %v3213_v10  ;;  %v3216_v24 = vshrl.u32 %v8380_v21, 16  ;;  %v3221_v3 = vrot.slane %v3219_v16, 2  ;;  %v8356_v21 = vld [vmem:[#allocation2 + $0x40] sm:$0xff] }
 0x22c   : > { %v4247_v36 = vsel %vm3761_vm2, %v4244_v61, %v4246_v44 }
 0x22d   : > { %v2430_v7 = vpop.f32.mrf.mxu3 }
 0x22e   : > { %2844 = vmatmul.bf16.gmra.mxu1 %v2723_v0  ;;  %v3218_v0 = vrot.slane %v3216_v24, 1  ;;  %v2726_v24 = vrot.slane %v8356_v21, 1 }
 0x230   : > { %v1972_v46 = vpop.f32.mrf.mxu2  ;;  %v3222_v31 = vor.u32 %v3221_v3, %v3218_v0 }
 0x231   : > { %v2061_v20 = vadd.f32 %v1972_v46, %v1475_v50  ;;  %v8355_v50 = vld [vmem:[#allocation2 + $0x38] sm:$0xff]  ;;  %v8442_v46 = vld [vmem:[#allocation2 + $0x88] sm:$0xff] }
 0x232   : > { %v2724_v1 = vrot.slane %v8355_v50, 1  ;;  %v4248_v53 = vrot.slane %v8442_v46, 2  ;;  %v9920_v50 = vpop.f32.mrf.mxu0 }
 0x233   : > { %v9907_v62 = vadd.f32 %v2430_v7, %v2061_v20  ;;  %v1485_v17 = vpop.f32.mrf.mxu1  ;;  %v8406_v7 = vld [vmem:[#allocation2 + $0x30] sm:$0xff]  ;;  %10759 = vst [vmem:[#allocation11_spill] sm:$0xff] %v9920_v50 }
 0x234   : > { %v2725_v9 = vsel %vm2255_vm0, %v2722_v22, %v2724_v1  ;;  %v3223_v22 = vsel %vm3170_vm3, %v3213_v10, %v3222_v31  ;;  %v2727_v3 = vsel %vm2255_vm0, %v2724_v1, %v2726_v24 }
 0x235   : > { %3888 = vmatmul.bf16.gmra.mxu3 %v3770_v35  ;;  %v2433_v57 = vpop.f32.mrf.mxu3 }
 0x238   : > { %3430 = vmatmul.bf16.gmra.mxu2 %v3214_v15  ;;  %v1975_v39 = vpop.f32.mrf.mxu2  ;;  %4395 = vmatmul.bf16.gmra.mxu0 %v4247_v36 }
 0x239   : > { %v2062_v18 = vadd.f32 %v1975_v39, %v1478_v12  ;;  %v3771_v12 = vrot.slane %v8406_v7, 2  ;;  %v8381_v39 = vld [vmem:[#allocation2 + $0x38] sm:$0xff] }
 0x23a   : > { %v3225_v16 = vshrl.u32 %v8381_v39, 16  ;;  %v3228_v7 = vshll.u32 %v8381_v39, 16 }
 0x23b   : > { %v9912_v33 = vadd.f32 %v2433_v57, %v2062_v18  ;;  %v1488_v2 = vpop.f32.mrf.mxu1  ;;  %v3772_v57 = vsel %vm3761_vm2, %v3769_v5, %v3771_v12 }
 0x23c   : > { %v3230_v10 = vrot.slane %v3228_v7, 2 }
 0x23d   : > { %v2435_v56 = vpop.f32.mrf.mxu3 }
 0x23e   : > { %2849 = vmatmul.bf16.gmra.mxu1 %v2725_v9  ;;  %v8407_v9 = vld [vmem:[#allocation2 + $0x38] sm:$0xff] }
 0x240   : > { %v1977_v25 = vpop.f32.mrf.mxu2 }
 0x241   : > { %v2063_v61 = vadd.f32 %v1977_v25, %v1480_v14  ;;  %v4249_v14 = vsel %vm3761_vm2, %v4246_v44, %v4248_v53  ;;  %v3227_v25 = vrot.slane %v3225_v16, 1  ;;  %v8357_v16 = vld [vmem:[#allocation2 + $0x48] sm:$0xff] }
 0x243   : > { %v9917_v20 = vadd.f32 %v2435_v56, %v2063_v61  ;;  %v1490_v35 = vpop.f32.mrf.mxu1  ;;  %v8443_v61 = vld [vmem:[#allocation2 + $0x90] sm:$0xff] }
 0x244   : > { %v4250_v39 = vrot.slane %v8443_v61, 2 }
 0x245   : > { %3893 = vmatmul.bf16.gmra.mxu3 %v3772_v57  ;;  %v2438_v15 = vpop.f32.mrf.mxu3  ;;  %v9927_v57 = vpop.f32.mrf.mxu0 }
 0x246   : > { %10760 = vst [vmem:[#allocation12_spill] sm:$0xff] %v9927_v57 }
 0x248   : > { %3435 = vmatmul.bf16.gmra.mxu2 %v3223_v22  ;;  %v1980_v36 = vpop.f32.mrf.mxu2  ;;  %4400 = vmatmul.bf16.gmra.mxu0 %v4249_v14  ;;  %v8501_v22 = vld [vmem:[%s10746_s4 + $0x220] sm:$0xff] }
 0x249   : > { %v2064_v18 = vadd.f32 %v1980_v36, %v1483_v55  ;;  %v3773_v55 = vrot.slane %v8407_v9, 2  ;;  %5374 = vmatpush.bf16.msra.mxu2 %v8501_v22  ;;  %v4251_v9 = vsel %vm3761_vm2, %v4248_v53, %v4250_v39 }
 0x24b   : > { %v9924_v56 = vadd.f32 %v2438_v15, %v2064_v18  ;;  %v1493_v5 = vpop.f32.mrf.mxu1  ;;  %v3231_v15 = vor.u32 %v3230_v10, %v3227_v25  ;;  %v3774_v1 = vsel %vm3761_vm2, %v3771_v12, %v3773_v55  ;;  %v2728_v12 = vrot.slane %v8357_v16, 1 }
 0x24d   : > { %v2440_v0 = vpop.f32.mrf.mxu3  ;;  %v3232_v18 = vsel %vm3170_vm3, %v3222_v31, %v3231_v15  ;;  %v9942_v25 = vpop.f32.mrf.mxu0  ;;  %v2729_v53 = vsel %vm2255_vm0, %v2726_v24, %v2728_v12 }
 0x24e   : > { %2854 = vmatmul.bf16.gmra.mxu1 %v2727_v3  ;;  %10761 = vst [vmem:[#allocation13_spill] sm:$0xff] %v9942_v25 }
 0x250   : > { %v1982_v46 = vpop.f32.mrf.mxu2 }
 0x251   : > { %v2065_v44 = vadd.f32 %v1982_v46, %v1485_v17  ;;  %v8382_v17 = vld [vmem:[#allocation2 + $0x40] sm:$0xff] }
 0x252   : > { %v3234_v10 = vshrl.u32 %v8382_v17, 16  ;;  %v3237_v46 = vshll.u32 %v8382_v17, 16 }
 0x253   : > { %v9932_v21 = vadd.f32 %v2440_v0, %v2065_v44  ;;  %v9934_v36 = vpop.f32.mrf.mxu1  ;;  %v8475_v0 = vld [vmem:[%s10746_s4 + $0x1e0] sm:$0xff] }
 0x254   : > { %4916 = vmatpush.bf16.msrb.mxu1 %v8475_v0  ;;  %v8408_v44 = vld [vmem:[#allocation2 + $0x40] sm:$0xff] }
 0x255   : > { %3898 = vmatmul.bf16.gmra.mxu3 %v3774_v1  ;;  %v2443_v14 = vpop.f32.mrf.mxu3  ;;  %v3236_v1 = vrot.slane %v3234_v10, 1  ;;  %v9951_v16 = vpop.f32.mrf.mxu0  ;;  %v8358_v10 = vld [vmem:[#allocation2 + $0x50] sm:$0xff] }
 0x256   : > { %10762 = vst [vmem:[#allocation14_spill] sm:$0xff] %v9951_v16 }
 0x258   : > { %3440 = vmatmul.bf16.gmra.mxu2 %v3232_v18  ;;  %v1985_v7 = vpop.f32.mrf.mxu2  ;;  %4405 = vmatmul.bf16.gmra.mxu0 %v4251_v9  ;;  %v3239_v18 = vrot.slane %v3237_v46, 2  ;;  %v8444_v9 = vld [vmem:[#allocation2 + $0x98] sm:$0xff]  ;;  %v8383_v46 = vld [vmem:[#allocation2 + $0x48] sm:$0xff] }
 0x259   : > { %v2066_v3 = vadd.f32 %v1985_v7, %v1488_v2  ;;  %v3775_v7 = vrot.slane %v8408_v44, 2 }
 0x25a   : > { %v3240_v0 = vor.u32 %v3239_v18, %v3236_v1  ;;  %v3243_v1 = vshrl.u32 %v8383_v46, 16  ;;  %v3246_v18 = vshll.u32 %v8383_v46, 16 }
 0x25b   : > { %v9944_v61 = vadd.f32 %v2443_v14, %v2066_v3  ;;  %v9946_v31 = vpop.f32.mrf.mxu1  ;;  %v3776_v17 = vsel %vm3761_vm2, %v3773_v55, %v3775_v7  ;;  %v4252_v3 = vrot.slane %v8444_v9, 2  ;;  %v8409_v9 = vld [vmem:[#allocation2 + $0x48] sm:$0xff] }
 0x25c   : > { %v3241_v24 = vsel %vm3170_vm3, %v3231_v15, %v3240_v0  ;;  %v3245_v29 = vrot.slane %v3243_v1, 1  ;;  %v8359_v1 = vld [vmem:[#allocation2 + $0x58] sm:$0xff] }
 0x25d   : > { %v2445_v22 = vpop.f32.mrf.mxu3  ;;  %v9963_v15 = vpop.f32.mrf.mxu0 }
 0x25e   : > { %2859 = vmatmul.bf16.gmra.mxu1 %v2729_v53  ;;  %v2730_v53 = vrot.slane %v8358_v10, 1 }
 0x260   : > { %v1987_v57 = vpop.f32.mrf.mxu2 }
 0x261   : > { %v2067_v2 = vadd.f32 %v1987_v57, %v1490_v35  ;;  %v4253_v57 = vsel %vm3761_vm2, %v4250_v39, %v4252_v3  ;;  %v3248_v39 = vrot.slane %v3246_v18, 2  ;;  %v8384_v18 = vld [vmem:[#allocation2 + $0x50] sm:$0xff] }
 0x263   : > { %v9949_v25 = vadd.f32 %v2445_v22, %v2067_v2  ;;  %v9953_v14 = vpop.f32.mrf.mxu1  ;;  %v4108_v22 = vld [vmem:[#allocation2 + $0xa0] sm:$0x3] }
 0x264   : > { %v4199_v55 = vunpack.c.l.b16 %v4108_v22 }
 0x265   : > { %3903 = vmatmul.bf16.gmra.mxu3 %v3776_v17  ;;  %v2448_v50 = vpop.f32.mrf.mxu3 }
 0x268   : > { %3445 = vmatmul.bf16.gmra.mxu2 %v3241_v24  ;;  %v1990_v35 = vpop.f32.mrf.mxu2  ;;  %4410 = vmatmul.bf16.gmra.mxu0 %v4253_v57  ;;  %v2731_v24 = vsel %vm2255_vm0, %v2728_v12, %v2730_v53  ;;  %v3249_v57 = vor.u32 %v3248_v39, %v3245_v29  ;;  %v8500_v29 = vld [vmem:[%s10746_s4 + $0x218] sm:$0xff] }
 0x269   : > { %v2068_v44 = vadd.f32 %v1990_v35, %v1493_v5  ;;  %v4218_v35 = vpack.c.b16 %v4199_v55, %v4199_v55  ;;  %5375 = vmatpush.bf16.msra.mxu2 %v8500_v29 }
 0x26a   : > { %v3250_v12 = vsel %vm3170_vm3, %v3240_v0, %v3249_v57 }
 0x26b   : > { %v9958_v2 = vadd.f32 %v2448_v50, %v2068_v44  ;;  %v2825_v17 = vpop.f32.mrf.mxu1  ;;  %v3777_v50 = vrot.slane %v8409_v9, 2  ;;  %v4254_v22 = vrot.slane %v4218_v35, 2 }
 0x26c   : > { %v9961_v16 = vadd.f32 %v2825_v17, %v9628_v48 }
 0x26d   : > { %v2450_v10 = vpop.f32.mrf.mxu3  ;;  %v3778_v48 = vsel %vm3761_vm2, %v3775_v7, %v3777_v50  ;;  %v4255_v55 = vsel %vm3761_vm2, %v4252_v3, %v4254_v22  ;;  %v8474_v3 = vld [vmem:[%s10746_s4 + $0x1d8] sm:$0xff] }
 0x26e   : > { %2864 = vmatmul.bf16.gmra.mxu1 %v2731_v24  ;;  %v3255_v24 = vshll.u32 %v8384_v18, 16 }
 0x26f   : > { %4917 = vmatpush.bf16.msrb.mxu1 %v8474_v3 }
 0x270   : > { %v1992_v5 = vpop.f32.mrf.mxu2 }
 0x271   : > { %v2069_v46 = vadd.f32 %v1992_v5, %v9934_v36  ;;  %v9978_v36 = vpop.f32.mrf.mxu0  ;;  %v8410_v5 = vld [vmem:[#allocation2 + $0x50] sm:$0xff] }
 0x272   : > { %10763 = vst [vmem:[#allocation15_spill] sm:$0xff] %v9978_v36 }
 0x273   : > { %v9967_v44 = vadd.f32 %v2450_v10, %v2069_v46  ;;  %v2827_v43 = vpop.f32.mrf.mxu1 }
 0x274   : > { %v9971_v17 = vadd.f32 %v2827_v43, %v9637_v34  ;;  %v2732_v34 = vrot.slane %v8359_v1, 1  ;;  %v3252_v43 = vshrl.u32 %v8384_v18, 16  ;;  %v3779_v1 = vrot.slane %v8410_v5, 2 }
 0x275   : > { %3908 = vmatmul.bf16.gmra.mxu3 %v3778_v48  ;;  %v3257_v48 = vrot.slane %v3255_v24, 2  ;;  %v8360_v24 = vld [vmem:[#allocation2 + $0x60] sm:$0xff] }
 0x276   : > { %v2733_v46 = vsel %vm2255_vm0, %v2730_v53, %v2732_v34  ;;  %v3254_v22 = vrot.slane %v3252_v43, 1  ;;  %v8530_v53 = vld [vmem:[%s10748_s6 + $0x38] sm:$0xff]  ;;  %v2734_v5 = vrot.slane %v8360_v24, 1 }
 0x277   : > { %5974 = vmatpush.bf16.msra.mxu3 %v8530_v53 }
 0x278   : > { %3450 = vmatmul.bf16.gmra.mxu2 %v3250_v12  ;;  %v2453_v9 = vpop.f32.mrf.mxu3  ;;  %4415 = vmatmul.bf16.gmra.mxu0 %v4255_v55 }
 0x27b   : > { %v1995_v7 = vpop.f32.mrf.mxu2  ;;  %v2830_v39 = vpop.f32.mrf.mxu1 }
 0x27c   : > { %v2070_v0 = vadd.f32 %v1995_v7, %v9946_v31  ;;  %v2953_v35 = vadd.f32 %v2830_v39, %v9648_v49  ;;  %v3258_v31 = vor.u32 %v3257_v48, %v3254_v22  ;;  %v3780_v49 = vsel %vm3761_vm2, %v3777_v50, %v3779_v1  ;;  %v8411_v22 = vld [vmem:[#allocation2 + $0x58] sm:$0xff] }
 0x27d   : > { %v3781_v53 = vrot.slane %v8411_v22, 2 }
 0x27e   : > { %v9985_v10 = vadd.f32 %v2453_v9, %v2070_v0  ;;  %2869 = vmatmul.bf16.gmra.mxu1 %v2733_v46  ;;  %v3259_v43 = vsel %vm3170_vm3, %v3249_v57, %v3258_v31  ;;  %v8385_v0 = vld [vmem:[#allocation2 + $0x58] sm:$0xff] }
 0x27f   : > { %v3261_v3 = vshrl.u32 %v8385_v0, 16  ;;  %v3264_v50 = vshll.u32 %v8385_v0, 16  ;;  %v8556_v57 = vld [vmem:[%s10750_s8 + $0x38] sm:$0xff] }
 0x280   : > { %v2455_v12 = vpop.f32.mrf.mxu3  ;;  %6460 = vmatpush.bf16.msra.mxu0 %v8556_v57 }
 0x283   : > { %v1997_v18 = vpop.f32.mrf.mxu2  ;;  %v2832_v29 = vpop.f32.mrf.mxu1 }
 0x284   : > { %v2071_v55 = vadd.f32 %v1997_v18, %v9953_v14  ;;  %v2954_v7 = vadd.f32 %v2832_v29, %v9657_v59  ;;  %v2735_v18 = vsel %vm2255_vm0, %v2732_v34, %v2734_v5  ;;  %v3266_v29 = vrot.slane %v3264_v50, 2  ;;  %v8386_v50 = vld [vmem:[#allocation2 + $0x60] sm:$0xff] }
 0x285   : > { %3913 = vmatmul.bf16.gmra.mxu3 %v3780_v49  ;;  %v3270_v57 = vshrl.u32 %v8386_v50, 16 }
 0x286   : > { %v9994_v9 = vadd.f32 %v2455_v12, %v2071_v55  ;;  %v3263_v55 = vrot.slane %v3261_v3, 1  ;;  %v8361_v3 = vld [vmem:[#allocation2 + $0x68] sm:$0xff] }
 0x287   : > { %v2736_v22 = vrot.slane %v8361_v3, 1 }
 0x288   : > { %3455 = vmatmul.bf16.gmra.mxu2 %v3259_v43  ;;  %v3874_v39 = vpop.f32.mrf.mxu3 }
 0x28b   : > { %v3416_v14 = vpop.f32.mrf.mxu2  ;;  %v2835_v46 = vpop.f32.mrf.mxu1 }
 0x28c   : > { %v3542_v59 = vadd.f32 %v3416_v14, %v9961_v16  ;;  %v2955_v12 = vadd.f32 %v2835_v46, %v9671_v47  ;;  %v3267_v16 = vor.u32 %v3266_v29, %v3263_v55  ;;  %v8412_v29 = vld [vmem:[#allocation2 + $0x60] sm:$0xff] }
 0x28e   : > { %v9998_v48 = vadd.f32 %v3874_v39, %v3542_v59  ;;  %2874 = vmatmul.bf16.gmra.mxu1 %v2735_v18  ;;  %v3782_v39 = vsel %vm3761_vm2, %v3779_v1, %v3781_v53  ;;  %v3268_v34 = vsel %vm3170_vm3, %v3258_v31, %v3267_v16  ;;  %v3273_v18 = vshll.u32 %v8386_v50, 16  ;;  %v8473_v31 = vld [vmem:[%s10746_s4 + $0x1d0] sm:$0xff] }
 0x28f   : > { %4918 = vmatpush.bf16.msrb.mxu1 %v8473_v31 }
 0x290   : > { %v3876_v49 = vpop.f32.mrf.mxu3 }
 0x293   : > { %v3418_v43 = vpop.f32.mrf.mxu2  ;;  %v2837_v0 = vpop.f32.mrf.mxu1 }
 0x294   : > { %v3543_v24 = vadd.f32 %v3418_v43, %v9971_v17  ;;  %v2956_v14 = vadd.f32 %v2837_v0, %v9680_v52  ;;  %v8499_v52 = vld [vmem:[%s10746_s4 + $0x210] sm:$0xff]  ;;  %v3275_v0 = vrot.slane %v3273_v18, 2  ;;  %v8387_v18 = vld [vmem:[#allocation2 + $0x68] sm:$0xff] }
 0x295   : > { %3918 = vmatmul.bf16.gmra.mxu3 %v3782_v39  ;;  %5376 = vmatpush.bf16.msra.mxu2 %v8499_v52  ;;  %v3783_v39 = vrot.slane %v8412_v29, 2  ;;  %v8529_v29 = vld [vmem:[%s10748_s6 + $0x30] sm:$0xff]  ;;  %v3279_v31 = vshrl.u32 %v8387_v18, 16 }
 0x296   : > { %v10007_v47 = vadd.f32 %v3876_v49, %v3543_v24  ;;  %v2737_v49 = vsel %vm2255_vm0, %v2734_v5, %v2736_v22  ;;  %v3272_v24 = vrot.slane %v3270_v57, 1  ;;  %v8362_v57 = vld [vmem:[#allocation2 + $0x70] sm:$0xff]  ;;  %5975 = vmatpush.bf16.msra.mxu3 %v8529_v29 }
 0x298   : > { %3460 = vmatmul.bf16.gmra.mxu2 %v3268_v34  ;;  %v3879_v59 = vpop.f32.mrf.mxu3  ;;  %v3276_v3 = vor.u32 %v3275_v0, %v3272_v24  ;;  %v8413_v0 = vld [vmem:[#allocation2 + $0x68] sm:$0xff] }
 0x29a   : > { %v3277_v5 = vsel %vm3170_vm3, %v3267_v16, %v3276_v3 }
 0x29b   : > { %v3421_v46 = vpop.f32.mrf.mxu2  ;;  %v2840_v17 = vpop.f32.mrf.mxu1 }
 0x29c   : > { %v3544_v55 = vadd.f32 %v3421_v46, %v2953_v35  ;;  %v2957_v1 = vadd.f32 %v2840_v17, %v9688_v51 }
 0x29e   : > { %v10011_v43 = vadd.f32 %v3879_v59, %v3544_v55  ;;  %2879 = vmatmul.bf16.gmra.mxu1 %v2737_v49  ;;  %v3784_v59 = vsel %vm3761_vm2, %v3781_v53, %v3783_v39  ;;  %v3282_v49 = vshll.u32 %v8387_v18, 16 }
 0x2a0   : > { %v3881_v35 = vpop.f32.mrf.mxu3 }
 0x2a3   : > { %v3423_v34 = vpop.f32.mrf.mxu2  ;;  %v2842_v50 = vpop.f32.mrf.mxu1 }
 0x2a4   : > { %v3545_v51 = vadd.f32 %v3423_v34, %v2954_v7  ;;  %v2958_v55 = vadd.f32 %v2842_v50, %v9699_v38  ;;  %v2738_v7 = vrot.slane %v8362_v57, 1  ;;  %v3284_v50 = vrot.slane %v3282_v49, 2 }
 0x2a5   : > { %3923 = vmatmul.bf16.gmra.mxu3 %v3784_v59 }
 0x2a6   : > { %v10022_v46 = vadd.f32 %v3881_v35, %v3545_v51  ;;  %v8555_v35 = vld [vmem:[%s10750_s8 + $0x30] sm:$0xff]  ;;  %v2739_v34 = vsel %vm2255_vm0, %v2736_v22, %v2738_v7  ;;  %v3281_v51 = vrot.slane %v3279_v31, 1  ;;  %v8363_v22 = vld [vmem:[#allocation2 + $0x78] sm:$0xff] }
 0x2a7   : > { %6461 = vmatpush.bf16.msra.mxu0 %v8555_v35  ;;  %v8388_v31 = vld [vmem:[#allocation2 + $0x70] sm:$0xff]  ;;  %v2740_v35 = vrot.slane %v8363_v22, 1 }
 0x2a8   : > { %3465 = vmatmul.bf16.gmra.mxu2 %v3277_v5  ;;  %v3884_v17 = vpop.f32.mrf.mxu3  ;;  %v3785_v5 = vrot.slane %v8413_v0, 2  ;;  %v3288_v0 = vshrl.u32 %v8388_v31, 16 }
 0x2ab   : > { %v3426_v52 = vpop.f32.mrf.mxu2  ;;  %v2845_v24 = vpop.f32.mrf.mxu1 }
 0x2ac   : > { %v3546_v53 = vadd.f32 %v3426_v52, %v2955_v12  ;;  %v2959_v16 = vadd.f32 %v2845_v24, %v9719_v8  ;;  %v3285_v12 = vor.u32 %v3284_v50, %v3281_v51  ;;  %v8414_v50 = vld [vmem:[#allocation2 + $0x70] sm:$0xff] }
 0x2ae   : > { %v10029_v38 = vadd.f32 %v3884_v17, %v3546_v53  ;;  %2884 = vmatmul.bf16.gmra.mxu1 %v2739_v34  ;;  %v3786_v17 = vsel %vm3761_vm2, %v3783_v39, %v3785_v5  ;;  %v3286_v53 = vsel %vm3170_vm3, %v3276_v3, %v3285_v12  ;;  %v3291_v34 = vshll.u32 %v8388_v31, 16 }
 0x2af   : > { %v2741_v3 = vsel %vm2255_vm0, %v2738_v7, %v2740_v35  ;;  %v8472_v7 = vld [vmem:[%s10746_s4 + $0x1c8] sm:$0xff] }
 0x2b0   : > { %v3886_v59 = vpop.f32.mrf.mxu3  ;;  %4919 = vmatpush.bf16.msrb.mxu1 %v8472_v7 }
 0x2b3   : > { %v3428_v57 = vpop.f32.mrf.mxu2  ;;  %v2847_v29 = vpop.f32.mrf.mxu1 }
 0x2b4   : > { %v3547_v18 = vadd.f32 %v3428_v57, %v2956_v14  ;;  %v2960_v8 = vadd.f32 %v2847_v29, %v9728_v6  ;;  %v8498_v6 = vld [vmem:[%s10746_s4 + $0x208] sm:$0xff] }
 0x2b5   : > { %3928 = vmatmul.bf16.gmra.mxu3 %v3786_v17  ;;  %5377 = vmatpush.bf16.msra.mxu2 %v8498_v6  ;;  %v3787_v17 = vrot.slane %v8414_v50, 2 }
 0x2b6   : > { %v10037_v52 = vadd.f32 %v3886_v59, %v3547_v18  ;;  %v3290_v59 = vrot.slane %v3288_v0, 1  ;;  %v3293_v18 = vrot.slane %v3291_v34, 2  ;;  %v8364_v34 = vld [vmem:[#allocation2 + $0x80] sm:$0xff] }
 0x2b7   : > { %v2742_v50 = vrot.slane %v8364_v34, 1 }
 0x2b8   : > { %3470 = vmatmul.bf16.gmra.mxu2 %v3286_v53  ;;  %v3889_v49 = vpop.f32.mrf.mxu3 }
 0x2bb   : > { %v3431_v24 = vpop.f32.mrf.mxu2  ;;  %v2850_v14 = vpop.f32.mrf.mxu1 }
 0x2bc   : > { %v3548_v51 = vadd.f32 %v3431_v24, %v2957_v1  ;;  %v2961_v39 = vadd.f32 %v2850_v14, %v9739_v19  ;;  %v3294_v1 = vor.u32 %v3293_v18, %v3290_v59  ;;  %v8415_v18 = vld [vmem:[#allocation2 + $0x78] sm:$0xff] }
 0x2bd   : > { %v3789_v7 = vrot.slane %v8415_v18, 2 }
 0x2be   : > { %v10041_v57 = vadd.f32 %v3889_v49, %v3548_v51  ;;  %2889 = vmatmul.bf16.gmra.mxu1 %v2741_v3  ;;  %v3788_v49 = vsel %vm3761_vm2, %v3785_v5, %v3787_v17  ;;  %v3295_v0 = vsel %vm3170_vm3, %v3285_v12, %v3294_v1  ;;  %v8389_v51 = vld [vmem:[#allocation2 + $0x78] sm:$0xff]  ;;  %v8528_v12 = vld [vmem:[%s10748_s6 + $0x28] sm:$0xff] }
 0x2bf   : > { %v3297_v6 = vshrl.u32 %v8389_v51, 16  ;;  %v3300_v5 = vshll.u32 %v8389_v51, 16  ;;  %5976 = vmatpush.bf16.msra.mxu3 %v8528_v12 }
 0x2c0   : > { %v3891_v29 = vpop.f32.mrf.mxu3 }
 0x2c3   : > { %v3433_v53 = vpop.f32.mrf.mxu2  ;;  %v2852_v31 = vpop.f32.mrf.mxu1 }
 0x2c4   : > { %v3549_v22 = vadd.f32 %v3433_v53, %v2958_v55  ;;  %v2962_v19 = vadd.f32 %v2852_v31, %v9750_v23  ;;  %v2743_v53 = vsel %vm2255_vm0, %v2740_v35, %v2742_v50  ;;  %v3302_v31 = vrot.slane %v3300_v5, 2  ;;  %v8554_v35 = vld [vmem:[%s10750_s8 + $0x28] sm:$0xff] }
 0x2c5   : > { %3933 = vmatmul.bf16.gmra.mxu3 %v3788_v49  ;;  %v8365_v5 = vld [vmem:[#allocation2 + $0x88] sm:$0xff]  ;;  %6462 = vmatpush.bf16.msra.mxu0 %v8554_v35 }
 0x2c6   : > { %v10049_v24 = vadd.f32 %v3891_v29, %v3549_v22  ;;  %v3299_v22 = vrot.slane %v3297_v6, 1  ;;  %v2744_v18 = vrot.slane %v8365_v5, 1 }
 0x2c8   : > { %3475 = vmatmul.bf16.gmra.mxu2 %v3295_v0  ;;  %v3894_v14 = vpop.f32.mrf.mxu3 }
 0x2cb   : > { %v3436_v55 = vpop.f32.mrf.mxu2  ;;  %v2855_v59 = vpop.f32.mrf.mxu1 }
 0x2cc   : > { %v3550_v3 = vadd.f32 %v3436_v55, %v2959_v16  ;;  %v2963_v29 = vadd.f32 %v2855_v59, %v9765_v58  ;;  %v3303_v16 = vor.u32 %v3302_v31, %v3299_v22  ;;  %v8416_v31 = vld [vmem:[#allocation2 + $0x80] sm:$0xff] }
 0x2ce   : > { %v10056_v23 = vadd.f32 %v3894_v14, %v3550_v3  ;;  %2894 = vmatmul.bf16.gmra.mxu1 %v2743_v53  ;;  %v3790_v14 = vsel %vm3761_vm2, %v3787_v17, %v3789_v7  ;;  %v3304_v6 = vsel %vm3170_vm3, %v3294_v1, %v3303_v16  ;;  %v8390_v3 = vld [vmem:[#allocation2 + $0x80] sm:$0xff] }
 0x2cf   : > { %v3306_v12 = vshrl.u32 %v8390_v3, 16  ;;  %v3309_v17 = vshll.u32 %v8390_v3, 16 }
 0x2d0   : > { %v3896_v49 = vpop.f32.mrf.mxu3 }
 0x2d1   : > { %v3311_v1 = vrot.slane %v3309_v17, 2 }
 0x2d3   : > { %v3438_v0 = vpop.f32.mrf.mxu2  ;;  %v2857_v51 = vpop.f32.mrf.mxu1 }
 0x2d4   : > { %v3551_v34 = vadd.f32 %v3438_v0, %v2960_v8  ;;  %v2964_v58 = vadd.f32 %v2857_v51, %v9779_v45  ;;  %v2745_v0 = vsel %vm2255_vm0, %v2742_v50, %v2744_v18 }
 0x2d5   : > { %3938 = vmatmul.bf16.gmra.mxu3 %v3790_v14  ;;  %v3791_v14 = vrot.slane %v8416_v31, 2 }
 0x2d6   : > { %v10064_v55 = vadd.f32 %v3896_v49, %v3551_v34  ;;  %v3308_v34 = vrot.slane %v3306_v12, 1  ;;  %v8391_v12 = vld [vmem:[#allocation2 + $0x88] sm:$0xff] }
 0x2d7   : > { %v3792_v3 = vsel %vm3761_vm2, %v3789_v7, %v3791_v14  ;;  %v3315_v17 = vshrl.u32 %v8391_v12, 16 }
 0x2d8   : > { %3480 = vmatmul.bf16.gmra.mxu2 %v3304_v6  ;;  %v3899_v59 = vpop.f32.mrf.mxu3  ;;  %v3312_v6 = vor.u32 %v3311_v1, %v3308_v34 }
 0x2da   : > { %v3313_v50 = vsel %vm3170_vm3, %v3303_v16, %v3312_v6 }
 0x2db   : > { %v3441_v8 = vpop.f32.mrf.mxu2  ;;  %v2860_v22 = vpop.f32.mrf.mxu1 }
 0x2dc   : > { %v3552_v53 = vadd.f32 %v3441_v8, %v2961_v39  ;;  %v2965_v49 = vadd.f32 %v2860_v22, %v9794_v13  ;;  %v8497_v13 = vld [vmem:[%s10746_s4 + $0x200] sm:$0xff]  ;;  %v8366_v8 = vld [vmem:[#allocation2 + $0x90] sm:$0xff] }
 0x2dd   : > { %5378 = vmatpush.bf16.msra.mxu2 %v8497_v13  ;;  %v8527_v13 = vld [vmem:[%s10748_s6 + $0x20] sm:$0xff] }
 0x2de   : > { %v10071_v45 = vadd.f32 %v3899_v59, %v3552_v53  ;;  %2899 = vmatmul.bf16.gmra.mxu1 %v2745_v0  ;;  %v3318_v53 = vshll.u32 %v8391_v12, 16  ;;  %v8417_v0 = vld [vmem:[#allocation2 + $0x88] sm:$0xff]  ;;  %5977 = vmatpush.bf16.msra.mxu3 %v8527_v13 }
 0x2e0   : > { %v3901_v51 = vpop.f32.mrf.mxu3 }
 0x2e3   : > { %v3443_v35 = vpop.f32.mrf.mxu2  ;;  %v2862_v5 = vpop.f32.mrf.mxu1 }
 0x2e4   : > { %v3553_v36 = vadd.f32 %v3443_v35, %v2962_v19  ;;  %v10079_v59 = vadd.f32 %v2862_v5, %v9817_v32  ;;  %v8471_v19 = vld [vmem:[%s10746_s4 + $0x1c0] sm:$0xff]  ;;  %v2746_v32 = vrot.slane %v8366_v8, 1  ;;  %v3320_v35 = vrot.slane %v3318_v53, 2 }
 0x2e5   : > { %3943 = vmatmul.bf16.gmra.mxu3 %v3792_v3  ;;  %4920 = vmatpush.bf16.msrb.mxu1 %v8471_v19  ;;  %v3793_v3 = vrot.slane %v8417_v0, 2  ;;  %v8553_v53 = vld [vmem:[%s10750_s8 + $0x20] sm:$0xff] }
 0x2e6   : > { %v10076_v39 = vadd.f32 %v3901_v51, %v3553_v36  ;;  %v2747_v1 = vsel %vm2255_vm0, %v2744_v18, %v2746_v32  ;;  %v3317_v51 = vrot.slane %v3315_v17, 1  ;;  %v8392_v17 = vld [vmem:[#allocation2 + $0x90] sm:$0xff]  ;;  %6463 = vmatpush.bf16.msra.mxu0 %v8553_v53 }
 0x2e7   : > { %v3794_v19 = vsel %vm3761_vm2, %v3791_v14, %v3793_v3  ;;  %v3324_v0 = vshrl.u32 %v8392_v17, 16 }
 0x2e8   : > { %3485 = vmatmul.bf16.gmra.mxu2 %v3313_v50  ;;  %v3904_v7 = vpop.f32.mrf.mxu3  ;;  %v3321_v8 = vor.u32 %v3320_v35, %v3317_v51 }
 0x2eb   : > { %v3446_v36 = vpop.f32.mrf.mxu2  ;;  %v2865_v31 = vpop.f32.mrf.mxu1 }
 0x2ec   : > { %v3554_v22 = vadd.f32 %v3446_v36, %v2963_v29  ;;  %v10091_v16 = vadd.f32 %v2865_v31, %v9831_v41  ;;  %v2602_v29 = vld [vmem:[#allocation2 + $0x98] sm:$0x1]  ;;  %v3322_v36 = vsel %vm3170_vm3, %v3312_v6, %v3321_v8 }
 0x2ed   : > { %v2693_v18 = vunpack.c.l.b16 %v2602_v29  ;;  %v7810_v29 = vld [vmem:[#allocation2 + $0x10] sm:$0xc] }
 0x2ee   : > { %v10088_v34 = vadd.f32 %v3904_v7, %v3554_v22  ;;  %2904 = vmatmul.bf16.gmra.mxu1 %v2747_v1  ;;  %v3327_v1 = vshll.u32 %v8392_v17, 16 }
 0x2ef   : > { %v2712_v31 = vpack.c.b16 %v2693_v18, %v2693_v18  ;;  %v8454_v18 = vld [vmem:[#allocation2 + $0x18] sm:$0xff] }
 0x2f0   : > { %10764 = vst [vmem:[#allocation16_spill] sm:$0xff] %v10088_v34  ;;  %v10094_v5 = vpop.f32.mrf.mxu3 }
 0x2f1   : > { %v2748_v35 = vrot.slane %v2712_v31, 1 }
 0x2f3   : > { %v3448_v50 = vpop.f32.mrf.mxu2  ;;  %v2867_v41 = vpop.f32.mrf.mxu1 }
 0x2f4   : > { %v10099_v12 = vadd.f32 %v3448_v50, %v2964_v58  ;;  %v10103_v7 = vadd.f32 %v2867_v41, %v9840_v30  ;;  %v8418_v30 = vld [vmem:[#allocation2 + $0x90] sm:$0xff]  ;;  %v2749_v41 = vsel %vm2255_vm0, %v2746_v32, %v2748_v35 }
 0x2f5   : > { %3948 = vmatmul.bf16.gmra.mxu3 %v3794_v19  ;;  %v8453_v50 = vld [vmem:[#allocation2 + $0x10] sm:$0xf0]  ;;  %v3326_v19 = vrot.slane %v3324_v0, 1  ;;  %v3795_v17 = vrot.slane %v8418_v30, 2 }
 0x2f8   : > { %3490 = vmatmul.bf16.gmra.mxu2 %v3322_v36  ;;  %v3909_v22 = vpop.f32.mrf.mxu3  ;;  %v3329_v36 = vrot.slane %v3327_v1, 2 }
 0x2fa   : > { %v3330_v34 = vor.u32 %v3329_v36, %v3326_v19 }
 0x2fb   : > { %v3451_v58 = vpop.f32.mrf.mxu2  ;;  %v2870_v51 = vpop.f32.mrf.mxu1 }
 0x2fc   : > { %v3556_v14 = vadd.f32 %v3451_v58, %v2965_v49  ;;  %v10112_v6 = vadd.f32 %v2870_v51, %v9849_v40  ;;  %v7811_v49 = vor.u32 %v8453_v50, %v7810_v29  ;;  %v3059_v58 = vld [vmem:[#allocation2 + $0x98] sm:$0x3]  ;;  %v3331_v30 = vsel %vm3170_vm3, %v3321_v8, %v3330_v34 }
 0x2fd   : > { %v3150_v1 = vunpack.c.l.b16 %v3059_v58 }
 0x2fe   : > { %v10109_v13 = vadd.f32 %v3909_v22, %v3556_v14  ;;  %2909 = vmatmul.bf16.gmra.mxu1 %v2749_v41  ;;  %v4686_v22 = vshrl.u32 %v8454_v18, 16  ;;  %v4689_v14 = vshll.u32 %v8454_v18, 16  ;;  %v4678_v32 = vshrl.u32 %v7811_v49, 16  ;;  %v3650_v41 = vld [vmem:[#allocation2 + $0x98] sm:$0x3] }
 0x2ff   : > { %v4681_v0 = vshll.u32 %v7811_v49, 16  ;;  %v3169_v18 = vpack.c.b16 %v3150_v1, %v3150_v1 }
 0x300   : > { %10765 = vst [vmem:[#allocation17_spill] sm:$0xff] %v10109_v13  ;;  %v10115_v53 = vpop.f32.mrf.mxu3  ;;  %v3796_v13 = vsel %vm3761_vm2, %v3793_v3, %v3795_v17  ;;  %v4688_v29 = vrot.slane %v4686_v22, 2  ;;  %v4691_v50 = vrot.slane %v4689_v14, 3  ;;  %v4680_v36 = vrot.slane %v4678_v32, 2  ;;  %v8455_v32 = vld [vmem:[#allocation2 + $0x20] sm:$0xff] }
 0x301   : > { %10766 = vst [vmem:[#allocation18_spill] sm:$0xff] %v10115_v53  ;;  %v3741_v3 = vunpack.c.l.b16 %v3650_v41  ;;  %v4698_v41 = vshll.u32 %v8455_v32, 16 }
 0x302   : > { %v4692_v53 = vor.u32 %v4691_v50, %v4688_v29  ;;  %v4695_v50 = vshrl.u32 %v8455_v32, 16  ;;  %v8479_v32 = vld [vmem:[#allocation2 + $0x10] sm:$0xf0] }
 0x303   : > { %v3453_v31 = vpop.f32.mrf.mxu2  ;;  %v2872_v51 = vpop.f32.mrf.mxu1  ;;  %v3760_v14 = vpack.c.b16 %v3741_v3, %v3741_v3 }
 0x304   : > { %v10118_v40 = vadd.f32 %v3453_v31, %v10079_v59  ;;  %v10122_v35 = vadd.f32 %v2872_v51, %v9855_v11  ;;  %v4683_v59 = vrot.slane %v4681_v0, 3  ;;  %v3333_v51 = vshrl.u32 %v3169_v18, 16 }
 0x305   : > { %3953 = vmatmul.bf16.gmra.mxu3 %v3796_v13  ;;  %v3336_v13 = vshll.u32 %v3169_v18, 16 }
 0x306   : > { %10767 = vst [vmem:[#allocation19_spill] sm:$0xff] %v10118_v40  ;;  %v4684_v11 = vor.u32 %v4683_v59, %v4680_v36  ;;  %v3335_v1 = vrot.slane %v3333_v51, 1 }
 0x308   : > { %3495 = vmatmul.bf16.gmra.mxu2 %v3331_v30  ;;  %v3914_v19 = vpop.f32.mrf.mxu3  ;;  %v4693_v22 = vsel %vm4676_vm4, %v4684_v11, %v4692_v53  ;;  %v3338_v30 = vrot.slane %v3336_v13, 2 }
 0x30b   : > { %v3456_v31 = vpop.f32.mrf.mxu2  ;;  %v2875_v58 = vpop.f32.mrf.mxu1 }
 0x30c   : > { %v3558_v49 = vadd.f32 %v3456_v31, %v10091_v16  ;;  %v2971_v8 = vadd.f32 %v2875_v58, %v9868_v26  ;;  %v3797_v16 = vrot.slane %v3760_v14, 2  ;;  %v3339_v26 = vor.u32 %v3338_v30, %v3335_v1  ;;  %v8526_v31 = vld [vmem:[%s10748_s6 + $0x18] sm:$0xff]  ;;  %v7930_v14 = vld [vmem:[#allocation2 + $0x10] sm:$0x8] }
 0x30d   : > { %v4700_v58 = vrot.slane %v4698_v41, 3  ;;  %5978 = vmatpush.bf16.msra.mxu3 %v8526_v31  ;;  %v8480_v30 = vld [vmem:[#allocation2 + $0x18] sm:$0xff] }
 0x30e   : > { %v10126_v40 = vadd.f32 %v3914_v19, %v3558_v49  ;;  %4921 = vmatmul.bf16.vlgmr.msrb.gmra.mxu1 %v4693_v22  ;;  %v3798_v59 = vsel %vm3761_vm2, %v3795_v17, %v3797_v16  ;;  %v3340_v3 = vsel %vm3170_vm3, %v3330_v34, %v3339_v26  ;;  %v4697_v49 = vrot.slane %v4695_v50, 2  ;;  %v8552_v34 = vld [vmem:[%s10750_s8 + $0x18] sm:$0xff] }
 0x30f   : > { %6464 = vmatpush.bf16.msra.mxu0 %v8552_v34  ;;  %v5269_v41 = vrot.slane %v8480_v30, 3  ;;  %v8457_v30 = vld [vmem:[#allocation2 + $0x30] sm:$0xff] }
 0x310   : > { %v10130_v0 = vpop.f32.mrf.mxu3  ;;  %v4701_v51 = vor.u32 %v4700_v58, %v4697_v49 }
 0x312   : > { %v4702_v1 = vsel %vm4676_vm4, %v4692_v53, %v4701_v51 }
 0x313   : > { %v3458_v29 = vpop.f32.mrf.mxu2  ;;  %v2877_v19 = vpop.f32.mrf.mxu1 }
 0x314   : > { %v10133_v36 = vadd.f32 %v3458_v29, %v10103_v7  ;;  %v2972_v18 = vadd.f32 %v2877_v19, %v9875_v37  ;;  %v8456_v29 = vld [vmem:[#allocation2 + $0x28] sm:$0xff] }
 0x315   : > { %3958 = vmatmul.bf16.gmra.mxu3 %v3798_v59  ;;  %v4704_v19 = vshrl.u32 %v8456_v29, 16  ;;  %v4707_v59 = vshll.u32 %v8456_v29, 16 }
 0x317   : > { %v4706_v49 = vrot.slane %v4704_v19, 2  ;;  %v4709_v58 = vrot.slane %v4707_v59, 3  ;;  %v4716_v19 = vshll.u32 %v8457_v30, 16 }
 0x318   : > { %3500 = vmatmul.bf16.gmra.mxu2 %v3340_v3  ;;  %v3919_v11 = vpop.f32.mrf.mxu3 }
 0x31b   : > { %v3461_v7 = vpop.f32.mrf.mxu2  ;;  %v2880_v17 = vpop.f32.mrf.mxu1 }
 0x31c   : > { %v3560_v13 = vadd.f32 %v3461_v7, %v10112_v6  ;;  %v2973_v37 = vadd.f32 %v2880_v17, %v9883_v60  ;;  %v7931_v6 = vor.u32 %v8479_v32, %v7930_v14 }
 0x31e   : > { %v10142_v22 = vadd.f32 %v3919_v11, %v3560_v13  ;;  %4926 = vmatmul.bf16.gmra.mxu1 %v4702_v1  ;;  %v5268_v31 = vrot.slane %v7931_v6, 3  ;;  %v4710_v13 = vor.u32 %v4709_v58, %v4706_v49  ;;  %v8481_v1 = vld [vmem:[#allocation2 + $0x20] sm:$0xff]  ;;  %v8525_v49 = vld [vmem:[%s10748_s6 + $0x10] sm:$0xff] }
 0x31f   : > { %v5271_v6 = vrot.slane %v8481_v1, 3  ;;  %5979 = vmatpush.bf16.msra.mxu3 %v8525_v49  ;;  %v8482_v1 = vld [vmem:[#allocation2 + $0x28] sm:$0xff] }
 0x320   : > { %v10149_v16 = vpop.f32.mrf.mxu3  ;;  %v5270_v53 = vsel %vm5267_vm5, %v5268_v31, %v5269_v41  ;;  %v4711_v34 = vsel %vm4676_vm4, %v4701_v51, %v4710_v13 }
 0x321   : > { %v5272_v31 = vsel %vm5267_vm5, %v5269_v41, %v5271_v6  ;;  %v8551_v41 = vld [vmem:[%s10750_s8 + $0x10] sm:$0xff] }
 0x322   : > { %6465 = vmatpush.bf16.msra.mxu0 %v8551_v41 }
 0x323   : > { %v3463_v50 = vpop.f32.mrf.mxu2  ;;  %v2882_v26 = vpop.f32.mrf.mxu1 }
 0x324   : > { %v10152_v60 = vadd.f32 %v3463_v50, %v10122_v35  ;;  %v2974_v3 = vadd.f32 %v2882_v26, %v9889_v4  ;;  %v4713_v50 = vshrl.u32 %v8457_v30, 16  ;;  %v8458_v30 = vld [vmem:[#allocation2 + $0x38] sm:$0xff] }
 0x328   : > { %5379 = vmatmul.bf16.vlgmr.msra.gmra.mxu2 %v5270_v53  ;;  %v3924_v11 = vpop.f32.mrf.mxu3  ;;  %v4715_v53 = vrot.slane %v4713_v50, 2  ;;  %v5273_v50 = vrot.slane %v8482_v1, 3 }
 0x32b   : > { %v3466_v7 = vpop.f32.mrf.mxu2  ;;  %v2885_v14 = vpop.f32.mrf.mxu1 }
 0x32c   : > { %v3562_v17 = vadd.f32 %v3466_v7, %v2971_v8  ;;  %v2975_v35 = vadd.f32 %v2885_v14, %v9896_v54  ;;  %v4718_v54 = vrot.slane %v4716_v19, 3  ;;  %v4722_v19 = vshrl.u32 %v8458_v30, 16 }
 0x32e   : > { %v10156_v32 = vadd.f32 %v3924_v11, %v3562_v17  ;;  %4931 = vmatmul.bf16.gmra.mxu1 %v4711_v34  ;;  %v4719_v11 = vor.u32 %v4718_v54, %v4715_v53  ;;  %v10169_v17 = vpop.f32.mrf.mxu0 }
 0x330   : > { %v10160_v4 = vpop.f32.mrf.mxu3  ;;  %v4720_v34 = vsel %vm4676_vm4, %v4710_v13, %v4719_v11  ;;  %v4724_v13 = vrot.slane %v4722_v19, 2 }
 0x333   : > { %v3468_v29 = vpop.f32.mrf.mxu2  ;;  %v2887_v26 = vpop.f32.mrf.mxu1 }
 0x334   : > { %v10162_v59 = vadd.f32 %v3468_v29, %v2972_v18  ;;  %v2976_v8 = vadd.f32 %v2887_v26, %v9907_v62  ;;  %v4725_v26 = vshll.u32 %v8458_v30, 16 }
 0x336   : > { %v10183_v54 = vpop.f32.mrf.mxu0  ;;  %v4727_v49 = vrot.slane %v4725_v26, 3 }
 0x338   : > { %5384 = vmatmul.bf16.gmra.mxu2 %v5272_v31  ;;  %v3929_v51 = vpop.f32.mrf.mxu3 }
 0x33b   : > { %v3471_v58 = vpop.f32.mrf.mxu2  ;;  %v2890_v18 = vpop.f32.mrf.mxu1 }
 0x33c   : > { %v3564_v7 = vadd.f32 %v3471_v58, %v2973_v37  ;;  %v2977_v62 = vadd.f32 %v2890_v18, %v9912_v33  ;;  %v4728_v18 = vor.u32 %v4727_v49, %v4724_v13 }
 0x33e   : > { %v10171_v14 = vadd.f32 %v3929_v51, %v3564_v7  ;;  %4936 = vmatmul.bf16.gmra.mxu1 %v4720_v34  ;;  %v5274_v51 = vsel %vm5267_vm5, %v5271_v6, %v5273_v50  ;;  %v4729_v30 = vsel %vm4676_vm4, %v4719_v11, %v4728_v18 }
 0x340   : > { %10768 = vst [vmem:[#allocation20_spill] sm:$0xff] %v10171_v14  ;;  %v10178_v29 = vpop.f32.mrf.mxu3 }
 0x341   : > { %10769 = vst [vmem:[#allocation21_spill] sm:$0xff] %v10178_v29 }
 0x343   : > { %v3473_v37 = vpop.f32.mrf.mxu2  ;;  %v2892_v53 = vpop.f32.mrf.mxu1 }
 0x344   : > { %v10180_v31 = vadd.f32 %v3473_v37, %v2974_v3  ;;  %v2978_v33 = vadd.f32 %v2892_v53, %v9917_v20  ;;  %v8483_v37 = vld [vmem:[#allocation2 + $0x30] sm:$0xff]  ;;  %v8459_v20 = vld [vmem:[#allocation2 + $0x40] sm:$0xff]  ;;  %v10190_v53 = vpop.f32.mrf.mxu0 }
 0x345   : > { %v5275_v26 = vrot.slane %v8483_v37, 3  ;;  %v4734_v14 = vshll.u32 %v8459_v20, 16 }
 0x346   : > { %10770 = vst [vmem:[#allocation22_spill] sm:$0xff] %v10180_v31 }
 0x347   : > { %v4736_v11 = vrot.slane %v4734_v14, 3  ;;  %v8460_v14 = vld [vmem:[#allocation2 + $0x48] sm:$0xff] }
 0x348   : > { %5389 = vmatmul.bf16.gmra.mxu2 %v5274_v51  ;;  %v3934_v58 = vpop.f32.mrf.mxu3  ;;  %v4731_v51 = vshrl.u32 %v8459_v20, 16  ;;  %v8484_v20 = vld [vmem:[#allocation2 + $0x38] sm:$0xff] }
 0x34b   : > { %v3476_v7 = vpop.f32.mrf.mxu2  ;;  %v2895_v34 = vpop.f32.mrf.mxu1 }
 0x34c   : > { %v3566_v41 = vadd.f32 %v3476_v7, %v2975_v35  ;;  %v2979_v3 = vadd.f32 %v2895_v34, %v9924_v56  ;;  %v5276_v56 = vsel %vm5267_vm5, %v5273_v50, %v5275_v26 }
 0x34e   : > { %v10186_v1 = vadd.f32 %v3934_v58, %v3566_v41  ;;  %4941 = vmatmul.bf16.gmra.mxu1 %v4729_v30  ;;  %v4733_v58 = vrot.slane %v4731_v51, 2  ;;  %v10198_v41 = vpop.f32.mrf.mxu0 }
 0x350   : > { %10771 = vst [vmem:[#allocation23_spill] sm:$0xff] %v10186_v1  ;;  %v10192_v6 = vpop.f32.mrf.mxu3  ;;  %v4737_v30 = vor.u32 %v4736_v11, %v4733_v58 }
 0x351   : > { %10772 = vst [vmem:[#allocation24_spill] sm:$0xff] %v10192_v6 }
 0x352   : > { %v4738_v50 = vsel %vm4676_vm4, %v4728_v18, %v4737_v30  ;;  %v8550_v18 = vld [vmem:[%s10750_s8 + $0x8] sm:$0xff] }
 0x353   : > { %v3478_v19 = vpop.f32.mrf.mxu2  ;;  %v2897_v35 = vpop.f32.mrf.mxu1  ;;  %6466 = vmatpush.bf16.msra.mxu0 %v8550_v18 }
 0x354   : > { %v10194_v13 = vadd.f32 %v3478_v19, %v2976_v8  ;;  %v2980_v49 = vadd.f32 %v2897_v35, %v9932_v21  ;;  %v8524_v21 = vld [vmem:[%s10748_s6 + $0x8] sm:$0xff]  ;;  %v5277_v35 = vrot.slane %v8484_v20, 3 }
 0x355   : > { %5980 = vmatpush.bf16.msra.mxu3 %v8524_v21 }
 0x356   : > { %10773 = vst [vmem:[#allocation25_spill] sm:$0xff] %v10194_v13  ;;  %v10211_v58 = vpop.f32.mrf.mxu0  ;;  %v5278_v11 = vsel %vm5267_vm5, %v5275_v26, %v5277_v35 }
 0x358   : > { %5394 = vmatmul.bf16.gmra.mxu2 %v5276_v56  ;;  %v3939_v7 = vpop.f32.mrf.mxu3  ;;  %v4743_v56 = vshll.u32 %v8460_v14, 16 }
 0x35b   : > { %v3481_v34 = vpop.f32.mrf.mxu2  ;;  %v2900_v6 = vpop.f32.mrf.mxu1 }
 0x35c   : > { %v3568_v1 = vadd.f32 %v3481_v34, %v2977_v62  ;;  %v2981_v8 = vadd.f32 %v2900_v6, %v9944_v61  ;;  %v4740_v62 = vshrl.u32 %v8460_v14, 16  ;;  %v4745_v34 = vrot.slane %v4743_v56, 3 }
 0x35e   : > { %v10200_v37 = vadd.f32 %v3939_v7, %v3568_v1  ;;  %4946 = vmatmul.bf16.gmra.mxu1 %v4738_v50  ;;  %v4742_v7 = vrot.slane %v4740_v62, 2 }
 0x360   : > { %10774 = vst [vmem:[#allocation26_spill] sm:$0xff] %v10200_v37  ;;  %v10207_v19 = vpop.f32.mrf.mxu3  ;;  %v4746_v20 = vor.u32 %v4745_v34, %v4742_v7 }
 0x361   : > { %10775 = vst [vmem:[#allocation27_spill] sm:$0xff] %v10207_v19  ;;  %v8485_v19 = vld [vmem:[#allocation2 + $0x40] sm:$0xff] }
 0x362   : > { %v5279_v56 = vrot.slane %v8485_v19, 3 }
 0x363   : > { %v3483_v51 = vpop.f32.mrf.mxu2  ;;  %v2902_v61 = vpop.f32.mrf.mxu1 }
 0x364   : > { %v10209_v1 = vadd.f32 %v3483_v51, %v2978_v33  ;;  %v2982_v6 = vadd.f32 %v2902_v61, %v9949_v25  ;;  %v10221_v25 = vpop.f32.mrf.mxu0  ;;  %v4747_v61 = vsel %vm4676_vm4, %v4737_v30, %v4746_v20 }
 0x366   : > { %10776 = vst [vmem:[#allocation28_spill] sm:$0xff] %v10209_v1  ;;  %v8461_v1 = vld [vmem:[#allocation2 + $0x50] sm:$0xff] }
 0x367   : > { %v4749_v18 = vshrl.u32 %v8461_v1, 16 }
 0x368   : > { %5399 = vmatmul.bf16.gmra.mxu2 %v5278_v11  ;;  %v3944_v21 = vpop.f32.mrf.mxu3  ;;  %v4752_v11 = vshll.u32 %v8461_v1, 16 }
 0x36b   : > { %v3486_v50 = vpop.f32.mrf.mxu2  ;;  %v2905_v14 = vpop.f32.mrf.mxu1 }
 0x36c   : > { %v3570_v33 = vadd.f32 %v3486_v50, %v2979_v3  ;;  %v2983_v37 = vadd.f32 %v2905_v14, %v9958_v2  ;;  %v5280_v2 = vsel %vm5267_vm5, %v5277_v35, %v5279_v56  ;;  %v4754_v50 = vrot.slane %v4752_v11, 3  ;;  %v10230_v30 = vpop.f32.mrf.mxu0 }
 0x36e   : > { %v10218_v51 = vadd.f32 %v3944_v21, %v3570_v33  ;;  %4951 = vmatmul.bf16.gmra.mxu1 %v4747_v61  ;;  %v4751_v21 = vrot.slane %v4749_v18, 2  ;;  %v8523_v18 = vld [vmem:[%s10748_s6] sm:$0xff] }
 0x36f   : > { %5981 = vmatpush.bf16.msra.mxu3 %v8523_v18 }
 0x370   : > { %10777 = vst [vmem:[#allocation29_spill] sm:$0xff] %v10218_v51  ;;  %v10224_v26 = vpop.f32.mrf.mxu3  ;;  %v4755_v61 = vor.u32 %v4754_v50, %v4751_v21 }
 0x371   : > { %10778 = vst [vmem:[#allocation30_spill] sm:$0xff] %v10224_v26 }
 0x372   : > { %v4756_v1 = vsel %vm4676_vm4, %v4746_v20, %v4755_v61 }
 0x373   : > { %v3488_v62 = vpop.f32.mrf.mxu2  ;;  %v2907_v3 = vpop.f32.mrf.mxu1 }
 0x374   : > { %v10226_v7 = vadd.f32 %v3488_v62, %v2980_v49  ;;  %v2984_v34 = vadd.f32 %v2907_v3, %v9967_v44  ;;  %v8486_v62 = vld [vmem:[#allocation2 + $0x48] sm:$0xff]  ;;  %v8462_v44 = vld [vmem:[#allocation2 + $0x58] sm:$0xff]  ;;  %v10241_v11 = vpop.f32.mrf.mxu0 }
 0x376   : > { %10779 = vst [vmem:[#allocation31_spill] sm:$0xff] %v10226_v7  ;;  %v8138_v7 = vld [vmem:[%s9226_s11 + $0x8] sm:$0xe] }
 0x378   : > { %5404 = vmatmul.bf16.gmra.mxu2 %v5280_v2  ;;  %v3949_v33 = vpop.f32.mrf.mxu3  ;;  %v4758_v2 = vshrl.u32 %v8462_v44, 16 }
 0x37a   : > { %v4760_v50 = vrot.slane %v4758_v2, 2  ;;  %v8463_v2 = vld [vmem:[#allocation2 + $0x60] sm:$0xff] }
 0x37b   : > { %v3491_v14 = vpop.f32.mrf.mxu2  ;;  %v2910_v26 = vpop.f32.mrf.mxu1 }
 0x37c   : > { %v3572_v51 = vadd.f32 %v3491_v14, %v2981_v8  ;;  %v2985_v49 = vadd.f32 %v2910_v26, %v9985_v10  ;;  %v5281_v8 = vrot.slane %v8486_v62, 3  ;;  %v8549_v14 = vld [vmem:[%s10750_s8] sm:$0xff]  ;;  %v10250_v18 = vpop.f32.mrf.mxu0 }
 0x37d   : > { %6467 = vmatpush.bf16.msra.mxu0 %v8549_v14  ;;  %10783 = vst [vmem:[#allocation35_spill] sm:$0xff] %v10250_v18 }
 0x37e   : > { %v10232_v19 = vadd.f32 %v3949_v33, %v3572_v51  ;;  %4956 = vmatmul.bf16.gmra.mxu1 %v4756_v1  ;;  %v4761_v51 = vshll.u32 %v8462_v44, 16  ;;  %v5282_v26 = vsel %vm5267_vm5, %v5279_v56, %v5281_v8  ;;  %v8487_v56 = vld [vmem:[#allocation2 + $0x50] sm:$0xff] }
 0x380   : > { %10780 = vst [vmem:[#allocation32_spill] sm:$0xff] %v10232_v19  ;;  %v10236_v35 = vpop.f32.mrf.mxu3  ;;  %v4763_v33 = vrot.slane %v4761_v51, 3 }
 0x381   : > { %10781 = vst [vmem:[#allocation33_spill] sm:$0xff] %v10236_v35  ;;  %v4767_v35 = vshrl.u32 %v8463_v2, 16 }
 0x382   : > { %v4764_v19 = vor.u32 %v4763_v33, %v4760_v50 }
 0x383   : > { %v3493_v3 = vpop.f32.mrf.mxu2  ;;  %v2912_v10 = vpop.f32.mrf.mxu1 }
 0x384   : > { %v10243_v21 = vadd.f32 %v3493_v3, %v2982_v6  ;;  %v2986_v20 = vadd.f32 %v2912_v10, %v9994_v9  ;;  %v4765_v9 = vsel %vm4676_vm4, %v4755_v61, %v4764_v19 }
 0x386   : > { %10782 = vst [vmem:[#allocation34_spill] sm:$0xff] %v10243_v21  ;;  %v4770_v21 = vshll.u32 %v8463_v2, 16 }
 0x388   : > { %5409 = vmatmul.bf16.gmra.mxu2 %v5282_v26  ;;  %v3954_v1 = vpop.f32.mrf.mxu3  ;;  %v5283_v26 = vrot.slane %v8487_v56, 3 }
 0x38a   : > { %v5284_v33 = vsel %vm5267_vm5, %v5281_v8, %v5283_v26 }
 0x38b   : > { %v3496_v62 = vpop.f32.mrf.mxu2  ;;  %v4922_v6 = vpop.f32.mrf.mxu1 }
 0x38c   : > { %v3574_v44 = vadd.f32 %v3496_v62, %v2983_v37  ;;  %v10259_v37 = vpop.f32.mrf.mxu0  ;;  %v4772_v62 = vrot.slane %v4770_v21, 3 }
 0x38d   : > { %10787 = vst [vmem:[#allocation39_spill] sm:$0xff] %v10259_v37 }
 0x38e   : > { %v10252_v3 = vadd.f32 %v3954_v1, %v3574_v44  ;;  %4961 = vmatmul.bf16.gmra.mxu1 %v4765_v9  ;;  %v4769_v1 = vrot.slane %v4767_v35, 2 }
 0x390   : > { %10784 = vst [vmem:[#allocation36_spill] sm:$0xff] %v10252_v3  ;;  %v10255_v51 = vpop.f32.mrf.mxu3  ;;  %v4773_v44 = vor.u32 %v4772_v62, %v4769_v1  ;;  %v8531_v1 = vld [vmem:[%s9226_s11 + $0x8] sm:$0xf0]  ;;  %v8532_v62 = vld [vmem:[%s9226_s11 + $0x10] sm:$0xff] }
 0x391   : > { %10785 = vst [vmem:[#allocation37_spill] sm:$0xff] %v10255_v51  ;;  %v8464_v51 = vld [vmem:[#allocation2 + $0x68] sm:$0xff]  ;;  %v6233_v29 = vshrl.u32 %v8532_v62, 16 }
 0x393   : > { %v3498_v10 = vpop.f32.mrf.mxu2  ;;  %v4924_v50 = vpop.f32.mrf.mxu1 }
 0x394   : > { %v10257_v14 = vadd.f32 %v3498_v10, %v2984_v34  ;;  %v8488_v34 = vld [vmem:[#allocation2 + $0x58] sm:$0xff]  ;;  %v4774_v10 = vsel %vm4676_vm4, %v4764_v19, %v4773_v44  ;;  %v10267_v8 = vpop.f32.mrf.mxu0 }
 0x395   : > { %10789 = vst [vmem:[#allocation41_spill] sm:$0xff] %v10267_v8  ;;  %v5285_v35 = vrot.slane %v8488_v34, 3  ;;  %v6236_v8 = vshll.u32 %v8532_v62, 16 }
 0x396   : > { %10786 = vst [vmem:[#allocation38_spill] sm:$0xff] %v10257_v14  ;;  %v4779_v14 = vshll.u32 %v8464_v51, 16 }
 0x397   : > { %v6238_v37 = vrot.slane %v6236_v8, 2  ;;  %v8465_v8 = vld [vmem:[#allocation2 + $0x70] sm:$0xff] }
 0x398   : > { %5414 = vmatmul.bf16.gmra.mxu2 %v5284_v33  ;;  %v3959_v3 = vpop.f32.mrf.mxu3  ;;  %v4776_v33 = vshrl.u32 %v8464_v51, 16  ;;  %v6235_v51 = vrot.slane %v6233_v29, 1  ;;  %v8489_v29 = vld [vmem:[#allocation2 + $0x60] sm:$0xff] }
 0x39b   : > { %v3501_v61 = vpop.f32.mrf.mxu2  ;;  %v10262_v56 = vpop.f32.mrf.mxu1 }
 0x39c   : > { %v3576_v9 = vadd.f32 %v3501_v61, %v2985_v49  ;;  %v8139_v61 = vor.u32 %v8531_v1, %v8138_v7  ;;  %v6239_v1 = vor.u32 %v6238_v37, %v6235_v51  ;;  %v10290_v37 = vld [vmem:[%s10747_s5] ss:$0 sm:$0xff] }
 0x39e   : > { %v10264_v2 = vadd.f32 %v3959_v3, %v3576_v9  ;;  %4966 = vmatmul.bf16.gmra.mxu1 %v4774_v10  ;;  %v5286_v3 = vsel %vm5267_vm5, %v5283_v26, %v5285_v35  ;;  %v6225_v9 = vshrl.u32 %v8139_v61, 16  ;;  %v6228_v19 = vshll.u32 %v8139_v61, 16 }
 0x39f   : > { %v4781_v10 = vrot.slane %v4779_v14, 3  ;;  %v4457_v26 = vadd.f32 %v9866_v42, %v9998_v48 }
 0x3a0   : > { %10788 = vst [vmem:[#allocation40_spill] sm:$0xff] %v10264_v2  ;;  %v4778_v2 = vrot.slane %v4776_v33, 2  ;;  %v6227_v34 = vrot.slane %v6225_v9, 1  ;;  %v6230_v31 = vrot.slane %v6228_v19, 2  ;;  %v8533_v9 = vld [vmem:[%s9226_s11 + $0x18] sm:$0xff] }
 0x3a1   : > { %v5048_v33 = vadd.f32 %v4922_v6, %v4457_v26  ;;  %v4785_v6 = vshrl.u32 %v8465_v8, 16 }
 0x3a2   : > { %v6231_v18 = vor.u32 %v6230_v31, %v6227_v34  ;;  %v4782_v7 = vor.u32 %v4781_v10, %v4778_v2  ;;  %v4458_v31 = vadd.f32 %v9877_v63, %v10007_v47  ;;  %v4788_v2 = vshll.u32 %v8465_v8, 16 }
 0x3a3   : > { %v3503_v21 = vpop.f32.mrf.mxu2  ;;  %v10274_v13 = vpop.f32.mrf.mxu1  ;;  %v6242_v47 = vshrl.u32 %v8533_v9, 16  ;;  %v6245_v34 = vshll.u32 %v8533_v9, 16  ;;  %v8466_v9 = vld [vmem:[#allocation2 + $0x78] sm:$0xff] }
 0x3a4   : > { %v10271_v49 = vadd.f32 %v3503_v21, %v2986_v20  ;;  %v10277_v20 = vpop.f32.mrf.mxu0  ;;  %v6240_v14 = vsel %vm3170_vm3, %v6231_v18, %v6239_v1  ;;  %v4783_v62 = vsel %vm4676_vm4, %v4773_v44, %v4782_v7  ;;  %v5049_v42 = vadd.f32 %v4924_v50, %v4458_v31 }
 0x3a5   : > { %6468 = vmatmul.bf16.vlgmr.msra.gmra.mxu0 %v6240_v14  ;;  %v5287_v18 = vrot.slane %v8489_v29, 3  ;;  %v4790_v50 = vrot.slane %v4788_v2, 3 }
 0x3a6   : > { %10790 = vst [vmem:[#allocation42_spill] sm:$0xff] %v10271_v49 }
 0x3a7   : > { %v5288_v51 = vsel %vm5267_vm5, %v5285_v35, %v5287_v18 }
 0x3a8   : > { %5419 = vmatmul.bf16.gmra.mxu2 %v5286_v3 }
 0x3ab   : > { %v5380_v21 = vpop.f32.mrf.mxu2  ;;  %v10281_v49 = vpop.f32.mrf.mxu1 }
 0x3ac   : > { %v5506_v61 = vadd.f32 %v5380_v21, %v5048_v33  ;;  %v10294_v19 = vpop.f32.mrf.mxu0  ;;  %v4787_v21 = vrot.slane %v4785_v6, 2  ;;  %v6244_v33 = vrot.slane %v6242_v47, 1 }
 0x3ae   : > { %4971 = vmatmul.bf16.gmra.mxu1 %v4783_v62  ;;  %v5618_v3 = vadd.f32 %v10290_v37, %v5506_v61  ;;  %v6247_v62 = vrot.slane %v6245_v34, 2  ;;  %v4791_v61 = vor.u32 %v4790_v50, %v4787_v21 }
 0x3b0   : > { %v5654_v26 = vmax.f32 %v5618_v3, 0.0  ;;  %v6248_v8 = vor.u32 %v6247_v62, %v6244_v33  ;;  %v4792_v2 = vsel %vm4676_vm4, %v4782_v7, %v4791_v61  ;;  %v8490_v3 = vld [vmem:[#allocation2 + $0x68] sm:$0xff] }
 0x3b1   : > { %v5289_v34 = vrot.slane %v8490_v3, 3 }
 0x3b3   : > { %v5382_v48 = vpop.f32.mrf.mxu2  ;;  %v10296_v10 = vpop.f32.mrf.mxu1 }
 0x3b4   : > { %v5507_v44 = vadd.f32 %v5382_v48, %v5049_v42  ;;  %v4459_v42 = vadd.f32 %v9885_v28, %v10011_v43  ;;  %v6249_v48 = vsel %vm3170_vm3, %v6239_v1, %v6248_v8  ;;  %v10306_v6 = vpop.f32.mrf.mxu0 }
 0x3b5   : > { %6473 = vmatmul.bf16.gmra.mxu0 %v6249_v48 }
 0x3b6   : > { %v5619_v63 = vadd.f32 %v10290_v37, %v5507_v44  ;;  %v5050_v35 = vadd.f32 %v10262_v56, %v4459_v42  ;;  %v4797_v56 = vshll.u32 %v8466_v9, 16 }
 0x3b8   : > { %v5655_v14 = vmax.f32 %v5619_v63, 0.0  ;;  %5424 = vmatmul.bf16.gmra.mxu2 %v5288_v51  ;;  %v4460_v63 = vadd.f32 %v9894_v27, %v10022_v46  ;;  %v4794_v51 = vshrl.u32 %v8466_v9, 16  ;;  %v5290_v46 = vsel %vm5267_vm5, %v5287_v18, %v5289_v34 }
 0x3ba   : > { %v8660_v29 = vpack.c.bf16 %v5655_v14, %v5654_v26  ;;  %v5051_v28 = vadd.f32 %v10274_v13, %v4460_v63  ;;  %v8534_v26 = vld [vmem:[%s9226_s11 + $0x20] sm:$0xff]  ;;  %v4796_v62 = vrot.slane %v4794_v51, 2  ;;  %v4799_v13 = vrot.slane %v4797_v56, 3  ;;  %v8491_v56 = vld [vmem:[#allocation2 + $0x70] sm:$0xff] }
 0x3bb   : > { %v5385_v31 = vpop.f32.mrf.mxu2  ;;  %v10303_v44 = vpop.f32.mrf.mxu1  ;;  %v6251_v33 = vshrl.u32 %v8534_v26, 16  ;;  %v6254_v27 = vshll.u32 %v8534_v26, 16 }
 0x3bc   : > { %8661 = vst [vmem:[#allocation4] sm:$0xff] %v8660_v29   ;;  %v5508_v47 = vadd.f32 %v5385_v31, %v5050_v35  ;;  %v10318_v35 = vpop.f32.mrf.mxu0  ;;  %v4800_v63 = vor.u32 %v4799_v13, %v4796_v62 }
 0x3bd   : > { %v6253_v42 = vrot.slane %v6251_v33, 1  ;;  %v6256_v48 = vrot.slane %v6254_v27, 2 }
 0x3be   : > { %4976 = vmatmul.bf16.gmra.mxu1 %v4792_v2  ;;  %v5620_v21 = vadd.f32 %v10290_v37, %v5508_v47  ;;  %v10791_v47 = vld [vmem:[#allocation9_spill] sm:$0xff]  ;;  %v4801_v51 = vsel %vm4676_vm4, %v4791_v61, %v4800_v63  ;;  %v8535_v61 = vld [vmem:[%s9226_s11 + $0x28] sm:$0xff] }
 0x3bf   : > { %v6257_v3 = vor.u32 %v6256_v48, %v6253_v42  ;;  %v6260_v42 = vshrl.u32 %v8535_v61, 16  ;;  %v6263_v48 = vshll.u32 %v8535_v61, 16 }
 0x3c0   : > { %v5656_v29 = vmax.f32 %v5620_v21, 0.0  ;;  %v8467_v21 = vld [vmem:[#allocation2 + $0x80] sm:$0xff] }
 0x3c1   : > { %v4803_v62 = vshrl.u32 %v8467_v21, 16 }
 0x3c3   : > { %v5387_v43 = vpop.f32.mrf.mxu2  ;;  %v8505_v1 = vld [vmem:[#allocation4] sm:$0xff]  ;;  %v10314_v14 = vpop.f32.mrf.mxu1 }
 0x3c4   : > { %v5509_v50 = vadd.f32 %v5387_v43, %v5051_v28  ;;  %5982 = vmatmul.bf16.vlgmr.msra.gmra.mxu3 %v8505_v1  ;;  %v4461_v28 = vadd.f32 %v10791_v47, %v10029_v38  ;;  %v6258_v43 = vsel %vm3170_vm3, %v6248_v8, %v6257_v3  ;;  %v10330_v33 = vpop.f32.mrf.mxu0 }
 0x3c5   : > { %6478 = vmatmul.bf16.gmra.mxu0 %v6258_v43  ;;  %v6262_v43 = vrot.slane %v6260_v42, 1 }
 0x3c6   : > { %v5621_v7 = vadd.f32 %v10290_v37, %v5509_v50  ;;  %v5052_v1 = vadd.f32 %v10281_v49, %v4461_v28  ;;  %v10792_v50 = vld [vmem:[#allocation10_spill] sm:$0xff]  ;;  %v4806_v49 = vshll.u32 %v8467_v21, 16 }
 0x3c7   : > { %v4462_v26 = vadd.f32 %v10792_v50, %v10037_v52 }
 0x3c8   : > { %v5657_v31 = vmax.f32 %v5621_v7, 0.0  ;;  %5429 = vmatmul.bf16.gmra.mxu2 %v5290_v46  ;;  %v5291_v46 = vrot.slane %v8491_v56, 3 }
 0x3c9   : > { %v5053_v38 = vadd.f32 %v10296_v10, %v4462_v26  ;;  %v10793_v26 = vld [vmem:[#allocation11_spill] sm:$0xff] }
 0x3ca   : > { %v8665_v2 = vpack.c.bf16 %v5657_v31, %v5656_v29  ;;  %v5292_v10 = vsel %vm5267_vm5, %v5289_v34, %v5291_v46 }
 0x3cb   : > { %v5390_v9 = vpop.f32.mrf.mxu2  ;;  %v10323_v18 = vpop.f32.mrf.mxu1 }
 0x3cc   : > { %8856 = vst [vmem:[#allocation4 + $0x38] sm:$0xff] %v8665_v2   ;;  %v5510_v7 = vadd.f32 %v5390_v9, %v5052_v1  ;;  %v4805_v2 = vrot.slane %v4803_v62, 2  ;;  %v4808_v9 = vrot.slane %v4806_v49, 3  ;;  %v6265_v1 = vrot.slane %v6263_v48, 2  ;;  %v8492_v49 = vld [vmem:[#allocation2 + $0x78] sm:$0xff] }
 0x3cd   : > { %v5293_v48 = vrot.slane %v8492_v49, 3 }
 0x3ce   : > { %4981 = vmatmul.bf16.gmra.mxu1 %v4801_v51  ;;  %v5622_v13 = vadd.f32 %v10290_v37, %v5510_v7  ;;  %v6266_v56 = vor.u32 %v6265_v1, %v6262_v43  ;;  %v4809_v50 = vor.u32 %v4808_v9, %v4805_v2  ;;  %v4463_v7 = vadd.f32 %v10793_v26, %v10041_v57 }
 0x3d0   : > { %v5658_v47 = vmax.f32 %v5622_v13, 0.0  ;;  %v4810_v62 = vsel %vm4676_vm4, %v4800_v63, %v4809_v50  ;;  %v8468_v13 = vld [vmem:[#allocation2 + $0x88] sm:$0xff] }
 0x3d1   : > { %v4815_v2 = vshll.u32 %v8468_v13, 16 }
 0x3d3   : > { %v5392_v8 = vpop.f32.mrf.mxu2  ;;  %v8506_v27 = vld [vmem:[#allocation4 + $0x38] sm:$0xff]  ;;  %v10334_v31 = vpop.f32.mrf.mxu1 }
 0x3d4   : > { %v5511_v29 = vadd.f32 %v5392_v8, %v5053_v38  ;;  %5987 = vmatmul.bf16.gmra.mxu3 %v8506_v27  ;;  %v6267_v38 = vsel %vm3170_vm3, %v6257_v3, %v6266_v56  ;;  %v10341_v8 = vpop.f32.mrf.mxu0  ;;  %v5054_v27 = vadd.f32 %v10303_v44, %v4463_v7 }
 0x3d5   : > { %6483 = vmatmul.bf16.gmra.mxu0 %v6267_v38 }
 0x3d6   : > { %v5623_v52 = vadd.f32 %v10290_v37, %v5511_v29  ;;  %v10794_v29 = vld [vmem:[#allocation12_spill] sm:$0xff] }
 0x3d7   : > { %v4464_v61 = vadd.f32 %v10794_v29, %v10049_v24 }
 0x3d8   : > { %v5659_v28 = vmax.f32 %v5623_v52, 0.0  ;;  %5434 = vmatmul.bf16.gmra.mxu2 %v5292_v10  ;;  %v4812_v10 = vshrl.u32 %v8468_v13, 16 }
 0x3d9   : > { %v5055_v57 = vadd.f32 %v10314_v14, %v4464_v61  ;;  %v5294_v14 = vsel %vm5267_vm5, %v5291_v46, %v5293_v48  ;;  %v10795_v61 = vld [vmem:[#allocation13_spill] sm:$0xff] }
 0x3da   : > { %v8670_v51 = vpack.c.bf16 %v5659_v28, %v5658_v47  ;;  %v8536_v47 = vld [vmem:[%s9226_s11 + $0x30] sm:$0xff] }
 0x3db   : > { %v5395_v21 = vpop.f32.mrf.mxu2  ;;  %v10343_v34 = vpop.f32.mrf.mxu1  ;;  %v6269_v43 = vshrl.u32 %v8536_v47, 16  ;;  %v6272_v24 = vshll.u32 %v8536_v47, 16 }
 0x3dc   : > { %8857 = vst [vmem:[#allocation4 + $0x78] sm:$0xff] %v8670_v51   ;;  %v5512_v52 = vadd.f32 %v5395_v21, %v5054_v27  ;;  %v10355_v1 = vpop.f32.mrf.mxu0  ;;  %v4814_v51 = vrot.slane %v4812_v10, 2  ;;  %v4817_v21 = vrot.slane %v4815_v2, 3  ;;  %v8493_v10 = vld [vmem:[#allocation2 + $0x80] sm:$0xff]  ;;  %v8469_v2 = vld [vmem:[#allocation2 + $0x90] sm:$0xff] }
 0x3dd   : > { %v6271_v38 = vrot.slane %v6269_v43, 1  ;;  %v6274_v27 = vrot.slane %v6272_v24, 2  ;;  %v5295_v24 = vrot.slane %v8493_v10, 3 }
 0x3de   : > { %4986 = vmatmul.bf16.gmra.mxu1 %v4810_v62  ;;  %v5624_v44 = vadd.f32 %v10290_v37, %v5512_v52  ;;  %v4818_v29 = vor.u32 %v4817_v21, %v4814_v51  ;;  %v4465_v52 = vadd.f32 %v10795_v61, %v10056_v23 }
 0x3df   : > { %v6275_v49 = vor.u32 %v6274_v27, %v6271_v38  ;;  %v5296_v27 = vsel %vm5267_vm5, %v5293_v48, %v5295_v24 }
 0x3e0   : > { %v5660_v26 = vmax.f32 %v5624_v44, 0.0  ;;  %v5056_v46 = vadd.f32 %v10323_v18, %v4465_v52  ;;  %v10796_v44 = vld [vmem:[#allocation14_spill] sm:$0xff]  ;;  %v4824_v18 = vshll.u32 %v8469_v2, 16 }
 0x3e3   : > { %v5397_v3 = vpop.f32.mrf.mxu2  ;;  %v8507_v42 = vld [vmem:[#allocation4 + $0x78] sm:$0xff]  ;;  %v10352_v28 = vpop.f32.mrf.mxu1 }
 0x3e4   : > { %v5513_v9 = vadd.f32 %v5397_v3, %v5055_v57  ;;  %5992 = vmatmul.bf16.gmra.mxu3 %v8507_v42  ;;  %v6276_v57 = vsel %vm3170_vm3, %v6266_v56, %v6275_v49  ;;  %v4819_v42 = vsel %vm4676_vm4, %v4809_v50, %v4818_v29  ;;  %v8537_v50 = vld [vmem:[%s9226_s11 + $0x38] sm:$0xff] }
 0x3e5   : > { %6488 = vmatmul.bf16.gmra.mxu0 %v6276_v57  ;;  %v6281_v38 = vshll.u32 %v8537_v50, 16 }
 0x3e6   : > { %v5625_v63 = vadd.f32 %v10290_v37, %v5513_v9  ;;  %v4466_v9 = vadd.f32 %v10796_v44, %v10064_v55 }
 0x3e7   : > { %v6283_v57 = vrot.slane %v6281_v38, 2 }
 0x3e8   : > { %v5661_v7 = vmax.f32 %v5625_v63, 0.0  ;;  %5439 = vmatmul.bf16.gmra.mxu2 %v5294_v14  ;;  %v10367_v63 = vpop.f32.mrf.mxu0  ;;  %v5057_v23 = vadd.f32 %v10334_v31, %v4466_v9  ;;  %v4821_v14 = vshrl.u32 %v8469_v2, 16  ;;  %v4826_v31 = vrot.slane %v4824_v18, 3 }
 0x3e9   : > { %v4467_v9 = vadd.f32 %v9963_v15, %v10071_v45 }
 0x3ea   : > { %v8675_v62 = vpack.c.bf16 %v5661_v7, %v5660_v26  ;;  %v6278_v7 = vshrl.u32 %v8537_v50, 16 }
 0x3eb   : > { %v5400_v13 = vpop.f32.mrf.mxu2  ;;  %v10361_v3 = vpop.f32.mrf.mxu1 }
 0x3ec   : > { %8858 = vst [vmem:[#allocation4 + $0x58] sm:$0xff] %v8675_v62   ;;  %v5514_v47 = vadd.f32 %v5400_v13, %v5056_v46  ;;  %v4823_v62 = vrot.slane %v4821_v14, 2  ;;  %v6280_v52 = vrot.slane %v6278_v7, 1  ;;  %v10797_v14 = vld [vmem:[#allocation15_spill] sm:$0xff] }
 0x3ed   : > { %v4468_v18 = vadd.f32 %v10797_v14, %v10076_v39 }
 0x3ee   : > { %4991 = vmatmul.bf16.gmra.mxu1 %v4819_v42  ;;  %v5626_v51 = vadd.f32 %v10290_v37, %v5514_v47  ;;  %v10376_v42 = vor.u32 %v6283_v57, %v6280_v52  ;;  %v4827_v44 = vor.u32 %v4826_v31, %v4823_v62 }
 0x3ef   : > { %v5059_v15 = vadd.f32 %v10352_v28, %v4468_v18 }
 0x3f0   : > { %v5662_v13 = vmax.f32 %v5626_v51, 0.0  ;;  %v10378_v10 = vpop.f32.mrf.mxu0  ;;  %v6285_v48 = vsel %vm3170_vm3, %v6275_v49, %v10376_v42 }
 0x3f3   : > { %v5402_v56 = vpop.f32.mrf.mxu2  ;;  %v8508_v43 = vld [vmem:[#allocation4 + $0x58] sm:$0xff]  ;;  %v10372_v26 = vpop.f32.mrf.mxu1 }
 0x3f4   : > { %v5515_v21 = vadd.f32 %v5402_v56, %v5057_v23  ;;  %5997 = vmatmul.bf16.gmra.mxu3 %v8508_v43  ;;  %v5058_v23 = vadd.f32 %v10343_v34, %v4467_v9  ;;  %v4828_v56 = vsel %vm4676_vm4, %v4818_v29, %v4827_v44  ;;  %v8494_v43 = vld [vmem:[#allocation2 + $0x88] sm:$0xff]  ;;  %v8538_v9 = vld [vmem:[%s9226_s11 + $0x40] sm:$0xff] }
 0x3f5   : > { %6493 = vmatmul.bf16.gmra.mxu0 %v6285_v48  ;;  %v4013_v48 = vadd.f32 %v10094_v5, %v10099_v12  ;;  %v6287_v14 = vshrl.u32 %v8538_v9, 16  ;;  %v6290_v18 = vshll.u32 %v8538_v9, 16 }
 0x3f6   : > { %v5627_v55 = vadd.f32 %v10290_v37, %v5515_v21  ;;  %v8470_v21 = vld [vmem:[#allocation2 + $0x98] sm:$0xff] }
 0x3f7   : > { %v4830_v29 = vshrl.u32 %v8470_v21, 16  ;;  %v4470_v5 = vadd.f32 %v10183_v54, %v4013_v48 }
 0x3f8   : > { %v5663_v61 = vmax.f32 %v5627_v55, 0.0  ;;  %5444 = vmatmul.bf16.gmra.mxu2 %v5296_v27  ;;  %v5297_v55 = vrot.slane %v8494_v43, 3  ;;  %v10392_v38 = vpop.f32.mrf.mxu0  ;;  %v4833_v27 = vshll.u32 %v8470_v21, 16 }
 0x3fa   : > { %v8680_v46 = vpack.c.bf16 %v5663_v61, %v5662_v13  ;;  %v5298_v62 = vsel %vm5267_vm5, %v5295_v24, %v5297_v55  ;;  %v4565_v13 = vld [vmem:[#allocation2 + $0xa0] sm:$0x7]  ;;  %v4832_v61 = vrot.slane %v4830_v29, 2  ;;  %v4835_v52 = vrot.slane %v4833_v27, 3 }
 0x3fb   : > { %v5405_v2 = vpop.f32.mrf.mxu2  ;;  %v10384_v47 = vpop.f32.mrf.mxu1  ;;  %v5061_v29 = vadd.f32 %v10372_v26, %v4470_v5 }
 0x3fc   : > { %8859 = vst [vmem:[#allocation4 + $0x20] sm:$0xff] %v8680_v46   ;;  %v5516_v51 = vadd.f32 %v5405_v2, %v5058_v23  ;;  %v4656_v2 = vunpack.c.l.b16 %v4565_v13  ;;  %v10798_v23 = vld [vmem:[#allocation16_spill] sm:$0xff]  ;;  %v4836_v24 = vor.u32 %v4835_v52, %v4832_v61 }
 0x3fe   : > { %4996 = vmatmul.bf16.gmra.mxu1 %v4828_v56  ;;  %v5628_v49 = vadd.f32 %v10290_v37, %v5516_v51  ;;  %v4469_v56 = vadd.f32 %v10169_v17, %v10798_v23 }
 0x400   : > { %v5664_v31 = vmax.f32 %v5628_v49, 0.0  ;;  %v5060_v51 = vadd.f32 %v10361_v3, %v4469_v56  ;;  %v10406_v21 = vpop.f32.mrf.mxu0  ;;  %v6289_v49 = vrot.slane %v6287_v14, 1  ;;  %v8539_v56 = vld [vmem:[%s9226_s11 + $0x48] sm:$0xff] }
 0x401   : > { %v10799_v14 = vld [vmem:[#allocation19_spill] sm:$0xff] }
 0x403   : > { %v5407_v45 = vpop.f32.mrf.mxu2  ;;  %v8509_v50 = vld [vmem:[#allocation4 + $0x20] sm:$0xff]  ;;  %v10394_v34 = vpop.f32.mrf.mxu1 }
 0x404   : > { %v5517_v7 = vadd.f32 %v5407_v45, %v5059_v15  ;;  %6002 = vmatmul.bf16.gmra.mxu3 %v8509_v50  ;;  %v4837_v15 = vsel %vm4676_vm4, %v4827_v44, %v4836_v24  ;;  %v8495_v45 = vld [vmem:[#allocation2 + $0x90] sm:$0xff]  ;;  %v4675_v50 = vpack.c.b16 %v4656_v2, %v4656_v2 }
 0x406   : > { %v5629_v39 = vadd.f32 %v10290_v37, %v5517_v7  ;;  %v6292_v7 = vrot.slane %v6290_v18, 2  ;;  %v4842_v3 = vshll.u32 %v4675_v50, 16  ;;  %v10800_v18 = vld [vmem:[#allocation18_spill] sm:$0xff] }
 0x408   : > { %v5665_v28 = vmax.f32 %v5629_v39, 0.0  ;;  %5449 = vmatmul.bf16.gmra.mxu2 %v5298_v62  ;;  %v6293_v17 = vor.u32 %v6292_v7, %v6289_v49  ;;  %v5299_v62 = vrot.slane %v8495_v45, 3  ;;  %v10418_v9 = vpop.f32.mrf.mxu0  ;;  %v6299_v49 = vshll.u32 %v8539_v56, 16 }
 0x40a   : > { %v8685_v57 = vpack.c.bf16 %v5665_v28, %v5664_v31  ;;  %v4839_v31 = vshrl.u32 %v4675_v50, 16  ;;  %v6294_v28 = vsel %vm3170_vm3, %v10376_v42, %v6293_v17  ;;  %v5300_v26 = vsel %vm5267_vm5, %v5297_v55, %v5299_v62 }
 0x40b   : > { %v5410_v46 = vpop.f32.mrf.mxu2  ;;  %v10403_v43 = vpop.f32.mrf.mxu1  ;;  %6498 = vmatmul.bf16.gmra.mxu0 %v6294_v28  ;;  %v6296_v55 = vshrl.u32 %v8539_v56, 16  ;;  %v4017_v56 = vadd.f32 %v10130_v0, %v10133_v36 }
 0x40c   : > { %8860 = vst [vmem:[#allocation4 + $0x8] sm:$0xff] %v8685_v57   ;;  %v5518_v12 = vadd.f32 %v5410_v46, %v5060_v51  ;;  %v4841_v52 = vrot.slane %v4839_v31, 2  ;;  %v4844_v57 = vrot.slane %v4842_v3, 3  ;;  %v4015_v51 = vadd.f32 %v10800_v18, %v10799_v14  ;;  %v8496_v31 = vld [vmem:[#allocation2 + $0x98] sm:$0xff]  ;;  %v8540_v18 = vld [vmem:[%s9226_s11 + $0x50] sm:$0xff] }
 0x40d   : > { %v4473_v14 = vadd.f32 %v10211_v58, %v10126_v40 }
 0x40e   : > { %5001 = vmatmul.bf16.gmra.mxu1 %v4837_v15  ;;  %v5630_v44 = vadd.f32 %v10290_v37, %v5518_v12  ;;  %v4845_v23 = vor.u32 %v4844_v57, %v4841_v52  ;;  %v10801_v15 = vld [vmem:[#allocation17_spill] sm:$0xff]  ;;  %v6298_v12 = vrot.slane %v6296_v55, 1 }
 0x40f   : > { %v4471_v45 = vadd.f32 %v10190_v53, %v10801_v15  ;;  %v6305_v15 = vshrl.u32 %v8540_v18, 16 }
 0x410   : > { %v5666_v46 = vmax.f32 %v5630_v44, 0.0  ;;  %v4846_v5 = vsel %vm4676_vm4, %v4836_v24, %v4845_v23  ;;  %v10431_v53 = vpop.f32.mrf.mxu0 }
 0x411   : > { %v5062_v7 = vadd.f32 %v10384_v47, %v4471_v45  ;;  %v6308_v45 = vshll.u32 %v8540_v18, 16 }
 0x413   : > { %v5412_v27 = vpop.f32.mrf.mxu2  ;;  %v8510_v39 = vld [vmem:[#allocation4 + $0x8] sm:$0xff]  ;;  %v10414_v61 = vpop.f32.mrf.mxu1 }
 0x414   : > { %v5519_v13 = vadd.f32 %v5412_v27, %v5061_v29  ;;  %6007 = vmatmul.bf16.gmra.mxu3 %v8510_v39  ;;  %v6301_v29 = vrot.slane %v6299_v49, 2  ;;  %v4472_v27 = vadd.f32 %v10198_v41, %v4015_v51  ;;  %v5301_v41 = vrot.slane %v8496_v31, 3 }
 0x415   : > { %v4474_v49 = vadd.f32 %v10221_v25, %v4017_v56 }
 0x416   : > { %v5631_v54 = vadd.f32 %v10290_v37, %v5519_v13  ;;  %v6302_v3 = vor.u32 %v6301_v29, %v6298_v12  ;;  %v5063_v28 = vadd.f32 %v10394_v34, %v4472_v27  ;;  %v5302_v57 = vsel %vm5267_vm5, %v5299_v62, %v5301_v41 }
 0x417   : > { %v5064_v62 = vadd.f32 %v10403_v43, %v4473_v14  ;;  %v6310_v12 = vrot.slane %v6308_v45, 2  ;;  %v5065_v29 = vadd.f32 %v10414_v61, %v4474_v49 }
 0x418   : > { %v5667_v2 = vmax.f32 %v5631_v54, 0.0  ;;  %5454 = vmatmul.bf16.gmra.mxu2 %v5300_v26  ;;  %v6303_v54 = vsel %vm3170_vm3, %v6293_v17, %v6302_v3 }
 0x41a   : > { %v8690_v42 = vpack.c.bf16 %v5667_v2, %v5666_v46  ;;  %v5156_v2 = vld [vmem:[#allocation2 + $0xa0] sm:$0x7] }
 0x41b   : > { %v5415_v48 = vpop.f32.mrf.mxu2  ;;  %v10425_v50 = vpop.f32.mrf.mxu1  ;;  %6503 = vmatmul.bf16.gmra.mxu0 %v6303_v54  ;;  %v5247_v23 = vunpack.c.l.b16 %v5156_v2 }
 0x41c   : > { %8861 = vst [vmem:[#allocation4 + $0x70] sm:$0xff] %v8690_v42   ;;  %v5520_v39 = vadd.f32 %v5415_v48, %v5062_v7 }
 0x41d   : > { %v5266_v55 = vpack.c.b16 %v5247_v23, %v5247_v23 }
 0x41e   : > { %5006 = vmatmul.bf16.gmra.mxu1 %v4846_v5  ;;  %v5632_v47 = vadd.f32 %v10290_v37, %v5520_v39  ;;  %v6307_v5 = vrot.slane %v6305_v15, 1 }
 0x41f   : > { %v5303_v40 = vrot.slane %v5266_v55, 3 }
 0x420   : > { %v5668_v46 = vmax.f32 %v5632_v47, 0.0  ;;  %v6311_v0 = vor.u32 %v6310_v12, %v6307_v5  ;;  %v10485_v5 = vld [vmem:[%s10749_s7] ss:$0 sm:$0xff] }
 0x421   : > { %v5304_v61 = vsel %vm5267_vm5, %v5301_v41, %v5303_v40 }
 0x422   : > { %v10437_v17 = vpop.f32.mrf.mxu0  ;;  %v6312_v43 = vsel %vm3170_vm3, %v6302_v3, %v6311_v0  ;;  %v4475_v3 = vadd.f32 %v10230_v30, %v10142_v22 }
 0x423   : > { %v5417_v44 = vpop.f32.mrf.mxu2  ;;  %v8511_v13 = vld [vmem:[#allocation4 + $0x70] sm:$0xff]  ;;  %v4969_v24 = vpop.f32.mrf.mxu1 }
 0x424   : > { %v5521_v26 = vadd.f32 %v5417_v44, %v5063_v28  ;;  %6012 = vmatmul.bf16.gmra.mxu3 %v8511_v13 }
 0x426   : > { %v5633_v52 = vadd.f32 %v10290_v37, %v5521_v26 }
 0x428   : > { %v5669_v34 = vmax.f32 %v5633_v52, 0.0  ;;  %5459 = vmatmul.bf16.gmra.mxu2 %v5302_v57  ;;  %v4019_v52 = vadd.f32 %v10149_v16, %v10152_v60  ;;  %v8541_v57 = vld [vmem:[%s9226_s11 + $0x58] sm:$0xff] }
 0x429   : > { %v6314_v41 = vshrl.u32 %v8541_v57, 16  ;;  %v6317_v2 = vshll.u32 %v8541_v57, 16 }
 0x42a   : > { %v8695_v42 = vpack.c.bf16 %v5669_v34, %v5668_v46  ;;  %v10449_v58 = vpop.f32.mrf.mxu0  ;;  %v5066_v34 = vadd.f32 %v10425_v50, %v4475_v3 }
 0x42b   : > { %v5420_v48 = vpop.f32.mrf.mxu2  ;;  %v10444_v51 = vpop.f32.mrf.mxu1  ;;  %6508 = vmatmul.bf16.gmra.mxu0 %v6312_v43  ;;  %v6316_v56 = vrot.slane %v6314_v41, 1  ;;  %v6319_v14 = vrot.slane %v6317_v2, 2 }
 0x42c   : > { %8862 = vst [vmem:[#allocation4 + $0x80] sm:$0xff] %v8695_v42   ;;  %v5522_v7 = vadd.f32 %v5420_v48, %v5064_v62  ;;  %v10467_v42 = vpop.f32.mrf.mxu3  ;;  %v4476_v48 = vadd.f32 %v10241_v11, %v4019_v52 }
 0x42d   : > { %v6320_v16 = vor.u32 %v6319_v14, %v6316_v56 }
 0x42e   : > { %v5634_v39 = vadd.f32 %v10290_v37, %v5522_v7  ;;  %v5067_v18 = vadd.f32 %v4969_v24, %v4476_v48  ;;  %v10480_v7 = vld [vmem:[%s10751_s9] ss:$0 sm:$0xff] }
 0x42f   : > { %v6321_v50 = vsel %vm3170_vm3, %v6311_v0, %v6320_v16 }
 0x430   : > { %v5670_v44 = vmax.f32 %v5634_v39, 0.0  ;;  %v8542_v39 = vld [vmem:[%s9226_s11 + $0x60] sm:$0xff] }
 0x432   : > { %v10457_v26 = vpop.f32.mrf.mxu0 }
 0x433   : > { %v5422_v36 = vpop.f32.mrf.mxu2  ;;  %v8512_v27 = vld [vmem:[#allocation4 + $0x80] sm:$0xff]  ;;  %v10453_v28 = vpop.f32.mrf.mxu1 }
 0x434   : > { %v5523_v31 = vadd.f32 %v5422_v36, %v5065_v29  ;;  %6017 = vmatmul.bf16.gmra.mxu3 %v8512_v27  ;;  %v4021_v36 = vadd.f32 %v10160_v4, %v10162_v59  ;;  %v10802_v27 = vld [vmem:[#allocation35_spill] sm:$0xff] }
 0x435   : > { %v4477_v40 = vadd.f32 %v10802_v27, %v10156_v32  ;;  %v10807_v27 = vld [vmem:[#allocation41_spill] sm:$0xff] }
 0x436   : > { %v5635_v25 = vadd.f32 %v10290_v37, %v5523_v31  ;;  %v6470_v31 = vadd.f32 %v10480_v7, %v10437_v17  ;;  %v6472_v17 = vadd.f32 %v10480_v7, %v10449_v58 }
 0x438   : > { %v5671_v13 = vmax.f32 %v5635_v25, 0.0  ;;  %5464 = vmatmul.bf16.gmra.mxu2 %v5304_v61  ;;  %v5068_v25 = vadd.f32 %v10444_v51, %v4477_v40  ;;  %v6323_v61 = vshrl.u32 %v8542_v39, 16 }
 0x43a   : > { %v8700_v54 = vpack.c.bf16 %v5671_v13, %v5670_v44  ;;  %v10470_v22 = vpop.f32.mrf.mxu0  ;;  %v6326_v44 = vshll.u32 %v8542_v39, 16  ;;  %v10803_v13 = vld [vmem:[#allocation39_spill] sm:$0xff]  ;;  %v6325_v32 = vrot.slane %v6323_v61, 1 }
 0x43b   : > { %v5425_v47 = vpop.f32.mrf.mxu2  ;;  %v10464_v46 = vpop.f32.mrf.mxu1  ;;  %6513 = vmatmul.bf16.gmra.mxu0 %v6321_v50  ;;  %v8543_v39 = vld [vmem:[%s9226_s11 + $0x68] sm:$0xff] }
 0x43c   : > { %8863 = vst [vmem:[#allocation4 + $0x88] sm:$0xff] %v8700_v54   ;;  %v5524_v23 = vadd.f32 %v5425_v47, %v5066_v34  ;;  %v4478_v54 = vadd.f32 %v10803_v13, %v4021_v36  ;;  %v6328_v52 = vrot.slane %v6326_v44, 2  ;;  %v10806_v36 = vld [vmem:[#allocation20_spill] sm:$0xff]  ;;  %v6332_v61 = vshrl.u32 %v8543_v39, 16 }
 0x43d   : > { %v4479_v40 = vadd.f32 %v10807_v27, %v10806_v36  ;;  %v6335_v44 = vshll.u32 %v8543_v39, 16 }
 0x43e   : > { %v5636_v30 = vadd.f32 %v10290_v37, %v5524_v23  ;;  %v5069_v34 = vadd.f32 %v10453_v28, %v4478_v54  ;;  %v6329_v51 = vor.u32 %v6328_v52, %v6325_v32 }
 0x43f   : > { %v6337_v32 = vrot.slane %v6335_v44, 2 }
 0x440   : > { %v5672_v55 = vmax.f32 %v5636_v30, 0.0 }
 0x442   : > { %v10487_v0 = vpop.f32.mrf.mxu0 }
 0x443   : > { %v5427_v60 = vpop.f32.mrf.mxu2  ;;  %v8513_v62 = vld [vmem:[#allocation4 + $0x88] sm:$0xff]  ;;  %v10475_v11 = vpop.f32.mrf.mxu1  ;;  %v6480_v36 = vadd.f32 %v10480_v7, %v10487_v0 }
 0x444   : > { %v5525_v15 = vadd.f32 %v5427_v60, %v5067_v18  ;;  %6022 = vmatmul.bf16.gmra.mxu3 %v8513_v62  ;;  %v6330_v18 = vsel %vm3170_vm3, %v6320_v16, %v6329_v51  ;;  %v10804_v16 = vld [vmem:[#allocation22_spill] sm:$0xff] }
 0x446   : > { %v5637_v45 = vadd.f32 %v10290_v37, %v5525_v15 }
 0x447   : > { %v5983_v24 = vpop.f32.mrf.mxu3 }
 0x448   : > { %v5673_v49 = vmax.f32 %v5637_v45, 0.0  ;;  %v5984_v43 = vadd.f32 %v10485_v5, %v5983_v24 }
 0x44a   : > { %v8705_v12 = vpack.c.bf16 %v5673_v49, %v5672_v55  ;;  %v6559_v3 = vadd.f32 %v6470_v31, %v5984_v43  ;;  %v10508_v23 = vpop.f32.mrf.mxu0  ;;  %v6475_v31 = vadd.f32 %v10480_v7, %v10457_v26 }
 0x44b   : > { %v5430_v29 = vpop.f32.mrf.mxu2  ;;  %v10500_v4 = vpop.f32.mrf.mxu1  ;;  %6518 = vmatmul.bf16.gmra.mxu0 %v6330_v18 }
 0x44c   : > { %8864 = vst [vmem:[#allocation4 + $0x40] sm:$0xff] %v8705_v12   ;;  %v5526_v47 = vadd.f32 %v5430_v29, %v5068_v25  ;;  %v6595_v60 = vmax.f32 %v6559_v3, 0.0  ;;  %v10805_v12 = vld [vmem:[#allocation21_spill] sm:$0xff]  ;;  %v5070_v25 = vadd.f32 %v10464_v46, %v4479_v40  ;;  %v6477_v3 = vadd.f32 %v10480_v7, %v10470_v22 }
 0x44d   : > { %v4023_v29 = vadd.f32 %v10805_v12, %v10804_v16  ;;  %v10810_v16 = vld [vmem:[#allocation23_spill] sm:$0xff] }
 0x44e   : > { %v5638_v56 = vadd.f32 %v10290_v37, %v5526_v47  ;;  %v4481_v12 = vadd.f32 %v10294_v19, %v10810_v16  ;;  %v6482_v19 = vadd.f32 %v10480_v7, %v10508_v23 }
 0x44f   : > { %v5985_v59 = vpop.f32.mrf.mxu3  ;;  %v4480_v13 = vadd.f32 %v10277_v20, %v4023_v29  ;;  %v8544_v29 = vld [vmem:[%s9226_s11 + $0x70] sm:$0xff] }
 0x450   : > { %v5986_v57 = vadd.f32 %v10485_v5, %v5985_v59  ;;  %v5674_v30 = vmax.f32 %v5638_v56, 0.0  ;;  %v6334_v59 = vrot.slane %v6332_v61, 1  ;;  %v5072_v40 = vadd.f32 %v10500_v4, %v4481_v12 }
 0x451   : > { %v5071_v26 = vadd.f32 %v10475_v11, %v4480_v13  ;;  %v6341_v39 = vshrl.u32 %v8544_v29, 16 }
 0x452   : > { %v6560_v41 = vadd.f32 %v6472_v17, %v5986_v57  ;;  %v10516_v24 = vpop.f32.mrf.mxu0  ;;  %v6338_v57 = vor.u32 %v6337_v32, %v6334_v59 }
 0x453   : > { %v5432_v2 = vpop.f32.mrf.mxu2  ;;  %v8514_v48 = vld [vmem:[#allocation4 + $0x40] sm:$0xff]  ;;  %v4984_v55 = vpop.f32.mrf.mxu1  ;;  %v6343_v13 = vrot.slane %v6341_v39, 1 }
 0x454   : > { %v5527_v14 = vadd.f32 %v5432_v2, %v5069_v34  ;;  %v6596_v62 = vmax.f32 %v6560_v41, 0.0  ;;  %6027 = vmatmul.bf16.gmra.mxu3 %v8514_v48  ;;  %v6339_v56 = vsel %vm3170_vm3, %v6329_v51, %v6338_v57 }
 0x456   : > { %v5639_v58 = vadd.f32 %v10290_v37, %v5527_v14  ;;  %v8750_v28 = vpack.c.bf16 %v6596_v62, %v6595_v60 }
 0x457   : > { %v5988_v50 = vpop.f32.mrf.mxu3 }
 0x458   : > { %v5675_v15 = vmax.f32 %v5639_v58, 0.0  ;;  %8751 = vst [vmem:[%s10513_s20] sm:$0xff] %v8750_v28   ;;  %v5989_v43 = vadd.f32 %v10485_v5, %v5988_v50 }
 0x45a   : > { %v8710_v45 = vpack.c.bf16 %v5675_v15, %v5674_v30  ;;  %v6561_v52 = vadd.f32 %v6475_v31, %v5989_v43  ;;  %v10532_v2 = vpop.f32.mrf.mxu0  ;;  %v6344_v31 = vshll.u32 %v8544_v29, 16 }
 0x45b   : > { %v5435_v49 = vpop.f32.mrf.mxu2  ;;  %v4987_v18 = vpop.f32.mrf.mxu1  ;;  %6523 = vmatmul.bf16.gmra.mxu0 %v6339_v56 }
 0x45c   : > { %8865 = vst [vmem:[#allocation4 + $0x50] sm:$0xff] %v8710_v45   ;;  %v5528_v54 = vadd.f32 %v5435_v49, %v5070_v25  ;;  %v6597_v14 = vmax.f32 %v6561_v52, 0.0  ;;  %v10808_v45 = vld [vmem:[#allocation25_spill] sm:$0xff]  ;;  %v10809_v49 = vld [vmem:[#allocation24_spill] sm:$0xff] }
 0x45d   : > { %v4025_v51 = vadd.f32 %v10809_v49, %v10808_v45 }
 0x45e   : > { %v5640_v20 = vadd.f32 %v10290_v37, %v5528_v54  ;;  %v6346_v54 = vrot.slane %v6344_v31, 2 }
 0x45f   : > { %v5990_v47 = vpop.f32.mrf.mxu3  ;;  %v4482_v25 = vadd.f32 %v10306_v6, %v4025_v51 }
 0x460   : > { %v5991_v17 = vadd.f32 %v10485_v5, %v5990_v47  ;;  %v5676_v62 = vmax.f32 %v5640_v20, 0.0  ;;  %v6347_v32 = vor.u32 %v6346_v54, %v6343_v13 }
 0x461   : > { %v5073_v0 = vadd.f32 %v4984_v55, %v4482_v25 }
 0x462   : > { %v6562_v34 = vadd.f32 %v6477_v3, %v5991_v17  ;;  %v10538_v50 = vpop.f32.mrf.mxu0 }
 0x463   : > { %v5437_v41 = vpop.f32.mrf.mxu2  ;;  %v8515_v46 = vld [vmem:[#allocation4 + $0x50] sm:$0xff]  ;;  %v4989_v43 = vpop.f32.mrf.mxu1 }
 0x464   : > { %v5529_v48 = vadd.f32 %v5437_v41, %v5071_v26  ;;  %v6598_v22 = vmax.f32 %v6562_v34, 0.0  ;;  %6032 = vmatmul.bf16.gmra.mxu3 %v8515_v46  ;;  %v6348_v34 = vsel %vm3170_vm3, %v6338_v57, %v6347_v32 }
 0x466   : > { %v5641_v11 = vadd.f32 %v10290_v37, %v5529_v48  ;;  %v8755_v60 = vpack.c.bf16 %v6598_v22, %v6597_v14 }
 0x467   : > { %v5993_v28 = vpop.f32.mrf.mxu3 }
 0x468   : > { %v5677_v58 = vmax.f32 %v5641_v11, 0.0  ;;  %8873 = vst [vmem:[%s10513_s20 + $0x8] sm:$0xff] %v8755_v60   ;;  %v5994_v27 = vadd.f32 %v10485_v5, %v5993_v28  ;;  %v10811_v60 = vld [vmem:[#allocation28_spill] sm:$0xff]  ;;  %v10813_v28 = vld [vmem:[#allocation26_spill] sm:$0xff] }
 0x469   : > { %v4483_v57 = vadd.f32 %v10318_v35, %v10813_v28  ;;  %v6487_v35 = vadd.f32 %v10480_v7, %v10532_v2 }
 0x46a   : > { %v8715_v30 = vpack.c.bf16 %v5677_v58, %v5676_v62  ;;  %v6563_v47 = vadd.f32 %v6480_v36, %v5994_v27  ;;  %v10553_v17 = vpop.f32.mrf.mxu0  ;;  %v10812_v62 = vld [vmem:[#allocation27_spill] sm:$0xff] }
 0x46b   : > { %v5440_v15 = vpop.f32.mrf.mxu2  ;;  %6528 = vmatmul.bf16.gmra.mxu0 %v6348_v34  ;;  %v4992_v14 = vpop.f32.mrf.mxu1  ;;  %v4027_v58 = vadd.f32 %v10812_v62, %v10811_v60  ;;  %v5074_v49 = vadd.f32 %v4987_v18, %v4483_v57 }
 0x46c   : > { %8866 = vst [vmem:[#allocation4 + $0x28] sm:$0xff] %v8715_v30   ;;  %v5530_v61 = vadd.f32 %v5440_v15, %v5072_v40  ;;  %v6599_v41 = vmax.f32 %v6563_v47, 0.0  ;;  %v8545_v30 = vld [vmem:[%s9226_s11 + $0x78] sm:$0xff]  ;;  %v6485_v15 = vadd.f32 %v10480_v7, %v10516_v24 }
 0x46d   : > { %v6350_v51 = vshrl.u32 %v8545_v30, 16  ;;  %v6353_v16 = vshll.u32 %v8545_v30, 16  ;;  %v4484_v12 = vadd.f32 %v10330_v33, %v4027_v58  ;;  %v10576_v33 = vld [vmem:[%s10747_s5] ss:$0 sm:$0xff] }
 0x46e   : > { %v5642_v6 = vadd.f32 %v10290_v37, %v5530_v61 }
 0x46f   : > { %v5995_v44 = vpop.f32.mrf.mxu3  ;;  %v6352_v27 = vrot.slane %v6350_v51, 1  ;;  %v6355_v40 = vrot.slane %v6353_v16, 2  ;;  %v5075_v24 = vadd.f32 %v4989_v43, %v4484_v12 }
 0x470   : > { %v5996_v59 = vadd.f32 %v10485_v5, %v5995_v44  ;;  %v5678_v20 = vmax.f32 %v5642_v6, 0.0 }
 0x471   : > { %v6356_v25 = vor.u32 %v6355_v40, %v6352_v27 }
 0x472   : > { %v6564_v52 = vadd.f32 %v6482_v19, %v5996_v59  ;;  %v10567_v45 = vpop.f32.mrf.mxu0 }
 0x473   : > { %v5442_v3 = vpop.f32.mrf.mxu2  ;;  %v8516_v4 = vld [vmem:[#allocation4 + $0x28] sm:$0xff]  ;;  %v4994_v61 = vpop.f32.mrf.mxu1  ;;  %v6357_v19 = vsel %vm3170_vm3, %v6347_v32, %v6356_v25  ;;  %v10816_v32 = vld [vmem:[#allocation29_spill] sm:$0xff] }
 0x474   : > { %v5531_v26 = vadd.f32 %v5442_v3, %v5073_v0  ;;  %v6600_v46 = vmax.f32 %v6564_v52, 0.0  ;;  %6037 = vmatmul.bf16.gmra.mxu3 %v8516_v4 }
 0x476   : > { %v5643_v23 = vadd.f32 %v10290_v37, %v5531_v26  ;;  %v8760_v55 = vpack.c.bf16 %v6600_v46, %v6599_v41  ;;  %v10814_v41 = vld [vmem:[#allocation31_spill] sm:$0xff]  ;;  %v10815_v46 = vld [vmem:[#allocation30_spill] sm:$0xff] }
 0x477   : > { %v5998_v56 = vpop.f32.mrf.mxu3 }
 0x478   : > { %v5679_v48 = vmax.f32 %v5643_v23, 0.0  ;;  %8874 = vst [vmem:[%s10513_s20 + $0x10] sm:$0xff] %v8760_v55   ;;  %v5999_v37 = vadd.f32 %v10485_v5, %v5998_v56  ;;  %v4029_v23 = vadd.f32 %v10815_v46, %v10814_v41  ;;  %v4485_v55 = vadd.f32 %v10341_v8, %v10816_v32 }
 0x479   : > { %v6490_v56 = vadd.f32 %v10480_v7, %v10538_v50  ;;  %v6492_v8 = vadd.f32 %v10480_v7, %v10553_v17 }
 0x47a   : > { %v8720_v22 = vpack.c.bf16 %v5679_v48, %v5678_v20  ;;  %v6565_v39 = vadd.f32 %v6485_v15, %v5999_v37  ;;  %v10581_v52 = vpop.f32.mrf.mxu0  ;;  %v8546_v20 = vld [vmem:[%s9226_s11 + $0x80] sm:$0xff]  ;;  %v4486_v58 = vadd.f32 %v10355_v1, %v4029_v23 }
 0x47b   : > { %v5445_v11 = vpop.f32.mrf.mxu2  ;;  %6533 = vmatmul.bf16.gmra.mxu0 %v6357_v19  ;;  %v4997_v48 = vpop.f32.mrf.mxu1  ;;  %v6359_v60 = vshrl.u32 %v8546_v20, 16  ;;  %v6362_v62 = vshll.u32 %v8546_v20, 16  ;;  %v10818_v19 = vld [vmem:[#allocation33_spill] sm:$0xff] }
 0x47c   : > { %8867 = vst [vmem:[#allocation4 + $0x10] sm:$0xff] %v8720_v22   ;;  %v5532_v29 = vadd.f32 %v5445_v11, %v5074_v49  ;;  %v6601_v2 = vmax.f32 %v6565_v39, 0.0  ;;  %v5076_v11 = vadd.f32 %v4992_v14, %v4485_v55  ;;  %v5077_v50 = vadd.f32 %v4994_v61, %v4486_v58 }
 0x47d   : > { %v6361_v30 = vrot.slane %v6359_v60, 1  ;;  %v6364_v15 = vrot.slane %v6362_v62, 2 }
 0x47e   : > { %v5644_v54 = vadd.f32 %v10576_v33, %v5532_v29 }
 0x47f   : > { %v6000_v36 = vpop.f32.mrf.mxu3  ;;  %v6365_v16 = vor.u32 %v6364_v15, %v6361_v30 }
 0x480   : > { %v6001_v31 = vadd.f32 %v10485_v5, %v6000_v36  ;;  %v5680_v3 = vmax.f32 %v5644_v54, 0.0 }
 0x481   : > { %v6366_v27 = vsel %vm3170_vm3, %v6356_v25, %v6365_v16  ;;  %v10819_v25 = vld [vmem:[#allocation32_spill] sm:$0xff] }
 0x482   : > { %v6566_v44 = vadd.f32 %v6487_v35, %v6001_v31 }
 0x483   : > { %v5447_v13 = vpop.f32.mrf.mxu2  ;;  %v8517_v18 = vld [vmem:[#allocation4 + $0x10] sm:$0xff]  ;;  %v4999_v35 = vpop.f32.mrf.mxu1 }
 0x484   : > { %v5533_v47 = vadd.f32 %v5447_v13, %v5075_v24  ;;  %v6602_v59 = vmax.f32 %v6566_v44, 0.0  ;;  %6042 = vmatmul.bf16.gmra.mxu3 %v8517_v18 }
 0x486   : > { %v5645_v43 = vadd.f32 %v10576_v33, %v5533_v47  ;;  %v8765_v0 = vpack.c.bf16 %v6602_v59, %v6601_v2  ;;  %v10817_v47 = vld [vmem:[#allocation34_spill] sm:$0xff]  ;;  %v4487_v59 = vadd.f32 %v10367_v63, %v10819_v25  ;;  %v6497_v63 = vadd.f32 %v10480_v7, %v10581_v52 }
 0x487   : > { %v6003_v6 = vpop.f32.mrf.mxu3  ;;  %v4031_v2 = vadd.f32 %v10818_v19, %v10817_v47 }
 0x488   : > { %v5681_v4 = vmax.f32 %v5645_v43, 0.0  ;;  %8875 = vst [vmem:[%s10513_s20 + $0x18] sm:$0xff] %v8765_v0   ;;  %v6004_v22 = vadd.f32 %v10485_v5, %v6003_v6  ;;  %v10596_v51 = vpop.f32.mrf.mxu0  ;;  %v8547_v43 = vld [vmem:[%s9226_s11 + $0x88] sm:$0xff]  ;;  %v6495_v0 = vadd.f32 %v10480_v7, %v10567_v45 }
 0x489   : > { %v6368_v6 = vshrl.u32 %v8547_v43, 16 }
 0x48a   : > { %v8725_v26 = vpack.c.bf16 %v5681_v4, %v5680_v3  ;;  %v6567_v37 = vadd.f32 %v6490_v56, %v6004_v22  ;;  %v5078_v4 = vadd.f32 %v4997_v48, %v4487_v59 }
 0x48b   : > { %v5450_v34 = vpop.f32.mrf.mxu2  ;;  %6538 = vmatmul.bf16.gmra.mxu0 %v6366_v27  ;;  %v6370_v23 = vrot.slane %v6368_v6, 1  ;;  %v5002_v55 = vpop.f32.mrf.mxu1 }
 0x48c   : > { %8868 = vst [vmem:[#allocation4 + $0x48] sm:$0xff] %v8725_v26   ;;  %v5534_v28 = vadd.f32 %v5450_v34, %v5076_v11  ;;  %v6603_v40 = vmax.f32 %v6567_v37, 0.0  ;;  %v6371_v26 = vshll.u32 %v8547_v43, 16  ;;  %v4488_v34 = vadd.f32 %v10378_v10, %v4031_v2 }
 0x48e   : > { %v5646_v1 = vadd.f32 %v10576_v33, %v5534_v28  ;;  %v6373_v32 = vrot.slane %v6371_v26, 2  ;;  %v5079_v45 = vadd.f32 %v4999_v35, %v4488_v34 }
 0x48f   : > { %v6005_v57 = vpop.f32.mrf.mxu3 }
 0x490   : > { %v6006_v49 = vadd.f32 %v10485_v5, %v6005_v57  ;;  %v5682_v24 = vmax.f32 %v5646_v1, 0.0  ;;  %v6501_v13 = vpop.f32.mrf.mxu0  ;;  %v6374_v11 = vor.u32 %v6373_v32, %v6370_v23  ;;  %v10820_v1 = vld [vmem:[#allocation38_spill] sm:$0xff] }
 0x491   : > { %v6502_v25 = vadd.f32 %v10480_v7, %v6501_v13 }
 0x492   : > { %v6568_v12 = vadd.f32 %v6492_v8, %v6006_v49  ;;  %v6375_v28 = vsel %vm3170_vm3, %v6365_v16, %v6374_v11  ;;  %v10822_v16 = vld [vmem:[#allocation36_spill] sm:$0xff] }
 0x493   : > { %v5452_v14 = vpop.f32.mrf.mxu2  ;;  %v8518_v29 = vld [vmem:[#allocation4 + $0x48] sm:$0xff] }
 0x494   : > { %v5535_v36 = vadd.f32 %v5452_v14, %v5077_v50  ;;  %v6604_v39 = vmax.f32 %v6568_v12, 0.0  ;;  %6047 = vmatmul.bf16.gmra.mxu3 %v8518_v29  ;;  %v5004_v14 = vpop.f32.mrf.mxu1 }
 0x496   : > { %v5647_v17 = vadd.f32 %v10576_v33, %v5535_v36  ;;  %v8770_v31 = vpack.c.bf16 %v6604_v39, %v6603_v40  ;;  %v10821_v36 = vld [vmem:[#allocation37_spill] sm:$0xff]  ;;  %v4489_v40 = vadd.f32 %v10392_v38, %v10822_v16 }
 0x497   : > { %v6008_v44 = vpop.f32.mrf.mxu3  ;;  %v4033_v27 = vadd.f32 %v10821_v36, %v10820_v1  ;;  %v8548_v39 = vld [vmem:[%s9226_s11 + $0x90] sm:$0xff] }
 0x498   : > { %v5683_v61 = vmax.f32 %v5647_v17, 0.0  ;;  %8876 = vst [vmem:[%s10513_s20 + $0x20] sm:$0xff] %v8770_v31   ;;  %v6009_v3 = vadd.f32 %v10485_v5, %v6008_v44  ;;  %v10614_v22 = vpop.f32.mrf.mxu0  ;;  %v6500_v17 = vadd.f32 %v10480_v7, %v10596_v51  ;;  %v5080_v31 = vadd.f32 %v5002_v55, %v4489_v40 }
 0x499   : > { %v4490_v44 = vadd.f32 %v10406_v21, %v4033_v27 }
 0x49a   : > { %v8730_v18 = vpack.c.bf16 %v5683_v61, %v5682_v24  ;;  %v6569_v20 = vadd.f32 %v6495_v0, %v6009_v3  ;;  %v6377_v24 = vshrl.u32 %v8548_v39, 16  ;;  %v6380_v61 = vshll.u32 %v8548_v39, 16 }
 0x49b   : > { %v5455_v54 = vpop.f32.mrf.mxu2  ;;  %6543 = vmatmul.bf16.gmra.mxu0 %v6375_v28  ;;  %v5081_v59 = vadd.f32 %v5004_v14, %v4490_v44 }
 0x49c   : > { %8869 = vst [vmem:[#allocation4 + $0x30] sm:$0xff] %v8730_v18   ;;  %v5536_v41 = vadd.f32 %v5455_v54, %v5078_v4  ;;  %v6605_v57 = vmax.f32 %v6569_v20, 0.0  ;;  %v6379_v47 = vrot.slane %v6377_v24, 1  ;;  %v6382_v19 = vrot.slane %v6380_v61, 2  ;;  %v5007_v34 = vpop.f32.mrf.mxu1 }
 0x49e   : > { %v5648_v10 = vadd.f32 %v10576_v33, %v5536_v41  ;;  %v6383_v51 = vor.u32 %v6382_v19, %v6379_v47 }
 0x49f   : > { %v6010_v46 = vpop.f32.mrf.mxu3 }
 0x4a0   : > { %v6011_v56 = vadd.f32 %v10485_v5, %v6010_v46  ;;  %v5684_v37 = vmax.f32 %v5648_v10, 0.0  ;;  %v6506_v50 = vpop.f32.mrf.mxu0  ;;  %v6384_v26 = vsel %vm3170_vm3, %v6374_v11, %v6383_v51  ;;  %v10824_v10 = vld [vmem:[#allocation40_spill] sm:$0xff] }
 0x4a2   : > { %v6570_v48 = vadd.f32 %v6497_v63, %v6011_v56  ;;  %v6109_v63 = vld [vmem:[%s9226_s11 + $0x98] sm:$0x3]  ;;  %s8900_s11 = smul.u32 144, %s9038_s16  ;;  %s6704_s16 = scalar_lea.sflag [#allocation6], %s412_s21 }
 0x4a3   : > { %v5457_v60 = vpop.f32.mrf.mxu2  ;;  %v8519_v62 = vld [vmem:[#allocation4 + $0x30] sm:$0xff] }
 0x4a4   : > { %v5537_v58 = vadd.f32 %v5457_v60, %v5079_v45  ;;  %v6606_v30 = vmax.f32 %v6570_v48, 0.0  ;;  %6052 = vmatmul.bf16.gmra.mxu3 %v8519_v62  ;;  %v6203_v48 = vunpack.c.l.b16 %v6109_v63  ;;  %v10823_v62 = vld [vmem:[#allocation42_spill] sm:$0xff]  ;;  %s6716_s12 = scalar_lea.hbm %s10752_s10, %s8900_s11 }
 0x4a5   : > { %v4035_v11 = vadd.f32 %v10467_v42, %v10823_v62  ;;  %s6719_s22 = sshll.u32 %s6716_s12, 4  ;;  %s6720_s22 = int_to_ptr.hbm [resolvable:$true] %s6719_s22 }
 0x4a6   : > { %v5649_v52 = vadd.f32 %v10576_v33, %v5537_v58  ;;  %v8775_v15 = vpack.c.bf16 %v6606_v30, %v6605_v57  ;;  %v4491_v58 = vadd.f32 %v10418_v9, %v10824_v10  ;;  %v6222_v28 = vpack.c.b16 %v6203_v48, %v6203_v48  ;;  %s8982_s24 = sshra.s32 %s6720_s22, 4  ;;  %s8983_s24 = int_to_ptr.hbm [resolvable:$true] %s8982_s24 }
 0x4a7   : > { %v6013_v49 = vpop.f32.mrf.mxu3  ;;  %v6505_v57 = vadd.f32 %v10480_v7, %v10614_v22  ;;  %v6507_v9 = vadd.f32 %v10480_v7, %v6506_v50  ;;  %s8984_s28 = scalar_lea.hbm %s8983_s24, 144  ;;  %p8989_p1 = scmp.lt.s32.totalorder %s8983_s24, %s10752_s10 }
 0x4a8   : > { %v5685_v8 = vmax.f32 %v5649_v52, 0.0  ;;  %8877 = vst [vmem:[%s10513_s20 + $0x28] sm:$0xff] %v8775_v15   ;;  %v6014_v35 = vadd.f32 %v10485_v5, %v6013_v49  ;;  %v10631_v43 = vpop.f32.mrf.mxu0  ;;  %v5082_v52 = vadd.f32 %v5007_v34, %v4491_v58  ;;  %v6386_v15 = vshrl.u32 %v6222_v28, 16  ;;  %p8985_p12 = scmp.ne.s32.totalorder %s8983_s24, %s8984_s28  ;;  %p8990_p2 = scmp.lt.s32.totalorder %s8988_s30, %s8984_s28 }
 0x4a9   : > { %v4492_v49 = vadd.f32 %v10431_v53, %v4035_v11 }
 0x4aa   : > { %v8735_v12 = vpack.c.bf16 %v5685_v8, %v5684_v37  ;;  %v6571_v2 = vadd.f32 %v6500_v17, %v6014_v35  ;;  %v6389_v37 = vshll.u32 %v6222_v28, 16  ;;  %v5009_v8 = vpop.f32.mrf.mxu1  ;;  %p8986_p13 = pnand %p8985_p12, %p9146_p4  ;;  %p8991_p3 = por %p8990_p2, %p8989_p1 }
 0x4ab   : > { %v5460_v29 = vpop.f32.mrf.mxu2  ;;  %6548 = vmatmul.bf16.gmra.mxu0 %v6384_v26  ;;  %v5083_v27 = vadd.f32 %v5009_v8, %v4492_v49 }
 0x4ac   : > { %8870 = vst [vmem:[#allocation4 + $0x18] sm:$0xff] %v8735_v12   ;;  %v5538_v18 = vadd.f32 %v5460_v29, %v5080_v31  ;;  %v6607_v41 = vmax.f32 %v6571_v2, 0.0  ;;  %v6388_v29 = vrot.slane %v6386_v15, 1  ;;  %v6391_v42 = vrot.slane %v6389_v37, 2  ;;  %p8987_p0 = pneg %p8986_p13 }
 0x4ae   : > { %v5650_v21 = vadd.f32 %v10576_v33, %v5538_v18  ;;  %v6392_v22 = vor.u32 %v6391_v42, %v6388_v29  ;;  %p8992_p5 = pnand %p8991_p3, %p8987_p0 }
 0x4af   : > { %v6015_v54 = vpop.f32.mrf.mxu3 }
 0x4b0   : > { %v6016_v38 = vadd.f32 %v10485_v5, %v6015_v54  ;;  %v5686_v32 = vmax.f32 %v5650_v21, 0.0  ;;  %v6511_v45 = vpop.f32.mrf.mxu0  ;;  %v6393_v53 = vsel %vm3170_vm3, %v6383_v51, %v6392_v22 }
 0x4b2   : > { %v6572_v0 = vadd.f32 %v6502_v25, %v6016_v38  ;;  %v6510_v25 = vadd.f32 %v10480_v7, %v10631_v43 }
 0x4b3   : > { %v5462_v3 = vpop.f32.mrf.mxu2  ;;  %v8520_v4 = vld [vmem:[#allocation4 + $0x18] sm:$0xff] }
 0x4b4   : > { %v5539_v6 = vadd.f32 %v5462_v3, %v5081_v59  ;;  %v6608_v46 = vmax.f32 %v6572_v0, 0.0  ;;  %6057 = vmatmul.bf16.gmra.mxu3 %v8520_v4  ;;  %v6512_v0 = vadd.f32 %v10480_v7, %v6511_v45 }
 0x4b6   : > { %v5651_v13 = vadd.f32 %v10576_v33, %v5539_v6  ;;  %v8780_v23 = vpack.c.bf16 %v6608_v46, %v6607_v41 }
 0x4b7   : > { %v6018_v20 = vpop.f32.mrf.mxu3 }
 0x4b8   : > { %v5687_v55 = vmax.f32 %v5651_v13, 0.0  ;;  %8878 = vst [vmem:[%s10513_s20 + $0x30] sm:$0xff] %v8780_v23   ;;  %v6019_v30 = vadd.f32 %v10485_v5, %v6018_v20  ;;  %v6514_v16 = vpop.f32.mrf.mxu0 }
 0x4b9   : > { %v6515_v43 = vadd.f32 %v10480_v7, %v6514_v16 }
 0x4ba   : > { %v8740_v56 = vpack.c.bf16 %v5687_v55, %v5686_v32  ;;  %v6573_v1 = vadd.f32 %v6505_v57, %v6019_v30 }
 0x4bb   : > { %v5465_v60 = vpop.f32.mrf.mxu2  ;;  %6553 = vmatmul.bf16.gmra.mxu0 %v6393_v53 }
 0x4bc   : > { %8871 = vst [vmem:[#allocation4 + $0x68] sm:$0xff] %v8740_v56   ;;  %v5540_v12 = vadd.f32 %v5465_v60, %v5082_v52  ;;  %v6609_v24 = vmax.f32 %v6573_v1, 0.0 }
 0x4be   : > { %v5652_v35 = vadd.f32 %v10576_v33, %v5540_v12 }
 0x4bf   : > { %v6020_v14 = vpop.f32.mrf.mxu3 }
 0x4c0   : > { %v6021_v36 = vadd.f32 %v10485_v5, %v6020_v14  ;;  %v5688_v18 = vmax.f32 %v5652_v35, 0.0  ;;  %v6516_v2 = vpop.f32.mrf.mxu0 }
 0x4c1   : > { %v6517_v55 = vadd.f32 %v10480_v7, %v6516_v2 }
 0x4c2   : > { %v6574_v40 = vadd.f32 %v6507_v9, %v6021_v36 }
 0x4c3   : > { %v5467_v39 = vpop.f32.mrf.mxu2  ;;  %v8521_v17 = vld [vmem:[#allocation4 + $0x68] sm:$0xff] }
 0x4c4   : > { %v5541_v31 = vadd.f32 %v5467_v39, %v5083_v27  ;;  %v6610_v61 = vmax.f32 %v6574_v40, 0.0  ;;  %6062 = vmatmul.bf16.gmra.mxu3 %v8521_v17 }
 0x4c6   : > { %v5653_v50 = vadd.f32 %v10576_v33, %v5541_v31  ;;  %v8785_v44 = vpack.c.bf16 %v6610_v61, %v6609_v24 }
 0x4c7   : > { %v6023_v47 = vpop.f32.mrf.mxu3 }
 0x4c8   : > { %v5689_v54 = vmax.f32 %v5653_v50, 0.0  ;;  %8879 = vst [vmem:[%s10513_s20 + $0x38] sm:$0xff] %v8785_v44   ;;  %v6024_v38 = vadd.f32 %v10485_v5, %v6023_v47  ;;  %v6519_v3 = vpop.f32.mrf.mxu0 }
 0x4c9   : > { %v6520_v10 = vadd.f32 %v10480_v7, %v6519_v3 }
 0x4ca   : > { %v8745_v19 = vpack.c.bf16 %v5689_v54, %v5688_v18  ;;  %v6575_v51 = vadd.f32 %v6510_v25, %v6024_v38 }
 0x4cc   : > { %8872 = vst [vmem:[#allocation4 + $0x60] sm:$0xff] %v8745_v19   ;;  %v6611_v6 = vmax.f32 %v6575_v51, 0.0 }
 0x4cf   : > { %v6025_v59 = vpop.f32.mrf.mxu3 }
 0x4d0   : > { %v6026_v33 = vadd.f32 %v10485_v5, %v6025_v59  ;;  %v6521_v46 = vpop.f32.mrf.mxu0 }
 0x4d1   : > { %v6522_v30 = vadd.f32 %v10480_v7, %v6521_v46 }
 0x4d2   : > { %v6576_v4 = vadd.f32 %v6512_v0, %v6026_v33 }
 0x4d3   : > { %v8522_v21 = vld [vmem:[#allocation4 + $0x60] sm:$0xff] }
 0x4d4   : > { %v6612_v26 = vmax.f32 %v6576_v4, 0.0  ;;  %6067 = vmatmul.bf16.gmra.mxu3 %v8522_v21 }
 0x4d6   : > { %v8790_v34 = vpack.c.bf16 %v6612_v26, %v6611_v6 }
 0x4d7   : > { %v6028_v41 = vpop.f32.mrf.mxu3 }
 0x4d8   : > { %8880 = vst [vmem:[%s10513_s20 + $0x40] sm:$0xff] %v8790_v34   ;;  %v6029_v13 = vadd.f32 %v10485_v5, %v6028_v41  ;;  %v6524_v63 = vpop.f32.mrf.mxu0 }
 0x4d9   : > { %v6525_v42 = vadd.f32 %v10480_v7, %v6524_v63 }
 0x4da   : > { %v6577_v32 = vadd.f32 %v6515_v43, %v6029_v13 }
 0x4dc   : > { %v6613_v45 = vmax.f32 %v6577_v32, 0.0 }
 0x4df   : > { %v6030_v23 = vpop.f32.mrf.mxu3 }
 0x4e0   : > { %v6031_v20 = vadd.f32 %v10485_v5, %v6030_v23  ;;  %v6526_v11 = vpop.f32.mrf.mxu0 }
 0x4e1   : > { %v6527_v27 = vadd.f32 %v10480_v7, %v6526_v11 }
 0x4e2   : > { %v6578_v56 = vadd.f32 %v6517_v55, %v6031_v20 }
 0x4e4   : > { %v6614_v48 = vmax.f32 %v6578_v56, 0.0 }
 0x4e6   : > { %v8795_v60 = vpack.c.bf16 %v6614_v48, %v6613_v45 }
 0x4e7   : > { %v6033_v62 = vpop.f32.mrf.mxu3 }
 0x4e8   : > { %8881 = vst [vmem:[%s10513_s20 + $0x48] sm:$0xff] %v8795_v60   ;;  %v6034_v58 = vadd.f32 %v10485_v5, %v6033_v62  ;;  %v6529_v15 = vpop.f32.mrf.mxu0 }
 0x4e9   : > { %v6530_v53 = vadd.f32 %v10480_v7, %v6529_v15 }
 0x4ea   : > { %v6579_v57 = vadd.f32 %v6520_v10, %v6034_v58 }
 0x4ec   : > { %v6615_v8 = vmax.f32 %v6579_v57, 0.0 }
 0x4ef   : > { %v6035_v28 = vpop.f32.mrf.mxu3 }
 0x4f0   : > { %v6036_v52 = vadd.f32 %v10485_v5, %v6035_v28  ;;  %v6531_v29 = vpop.f32.mrf.mxu0 }
 0x4f1   : > { %v6532_v18 = vadd.f32 %v10480_v7, %v6531_v29 }
 0x4f2   : > { %v6580_v37 = vadd.f32 %v6522_v30, %v6036_v52 }
 0x4f4   : > { %v6616_v49 = vmax.f32 %v6580_v37, 0.0 }
 0x4f6   : > { %v8800_v12 = vpack.c.bf16 %v6616_v49, %v6615_v8 }
 0x4f7   : > { %v6038_v14 = vpop.f32.mrf.mxu3 }
 0x4f8   : > { %8882 = vst [vmem:[%s10513_s20 + $0x50] sm:$0xff] %v8800_v12   ;;  %v6039_v1 = vadd.f32 %v10485_v5, %v6038_v14  ;;  %v6534_v40 = vpop.f32.mrf.mxu0 }
 0x4f9   : > { %v6535_v51 = vadd.f32 %v10480_v7, %v6534_v40 }
 0x4fa   : > { %v6581_v36 = vadd.f32 %v6525_v42, %v6039_v1 }
 0x4fc   : > { %v6617_v39 = vmax.f32 %v6581_v36, 0.0 }
 0x4ff   : > { %v6040_v9 = vpop.f32.mrf.mxu3 }
 0x500   : > { %v6041_v16 = vadd.f32 %v10485_v5, %v6040_v9  ;;  %v6536_v61 = vpop.f32.mrf.mxu0 }
 0x501   : > { %v6537_v4 = vadd.f32 %v10480_v7, %v6536_v61 }
 0x502   : > { %v6582_v22 = vadd.f32 %v6527_v27, %v6041_v16 }
 0x504   : > { %v6618_v17 = vmax.f32 %v6582_v22, 0.0 }
 0x506   : > { %v8805_v35 = vpack.c.bf16 %v6618_v17, %v6617_v39 }
 0x507   : > { %v6043_v31 = vpop.f32.mrf.mxu3 }
 0x508   : > { %8883 = vst [vmem:[%s10513_s20 + $0x58] sm:$0xff] %v8805_v35   ;;  %v6044_v24 = vadd.f32 %v10485_v5, %v6043_v31  ;;  %v6539_v59 = vpop.f32.mrf.mxu0 }
 0x509   : > { %v6540_v23 = vadd.f32 %v10480_v7, %v6539_v59 }
 0x50a   : > { %v6583_v44 = vadd.f32 %v6530_v53, %v6044_v24 }
 0x50c   : > { %v6619_v19 = vmax.f32 %v6583_v44, 0.0 }
 0x50f   : > { %v6045_v50 = vpop.f32.mrf.mxu3 }
 0x510   : > { %v6046_v54 = vadd.f32 %v10485_v5, %v6045_v50  ;;  %v6541_v6 = vpop.f32.mrf.mxu0 }
 0x511   : > { %v6542_v63 = vadd.f32 %v10480_v7, %v6541_v6 }
 0x512   : > { %v6584_v47 = vadd.f32 %v6532_v18, %v6046_v54 }
 0x514   : > { %v6620_v2 = vmax.f32 %v6584_v47, 0.0 }
 0x516   : > { %v8810_v25 = vpack.c.bf16 %v6620_v2, %v6619_v19 }
 0x517   : > { %v6048_v38 = vpop.f32.mrf.mxu3 }
 0x518   : > { %8884 = vst [vmem:[%s10513_s20 + $0x60] sm:$0xff] %v8810_v25   ;;  %v6049_v0 = vadd.f32 %v10485_v5, %v6048_v38  ;;  %v6544_v13 = vpop.f32.mrf.mxu0 }
 0x519   : > { %v6545_v58 = vadd.f32 %v10480_v7, %v6544_v13 }
 0x51a   : > { %v6585_v3 = vadd.f32 %v6535_v51, %v6049_v0 }
 0x51c   : > { %v6621_v34 = vmax.f32 %v6585_v3, 0.0 }
 0x51f   : > { %v6050_v33 = vpop.f32.mrf.mxu3 }
 0x520   : > { %v6051_v21 = vadd.f32 %v10485_v5, %v6050_v33  ;;  %v6546_v62 = vpop.f32.mrf.mxu0 }
 0x521   : > { %v6547_v15 = vadd.f32 %v10480_v7, %v6546_v62 }
 0x522   : > { %v6586_v26 = vadd.f32 %v6537_v4, %v6051_v21 }
 0x524   : > { %v6622_v41 = vmax.f32 %v6586_v26, 0.0 }
 0x526   : > { %v8815_v46 = vpack.c.bf16 %v6622_v41, %v6621_v34 }
 0x527   : > { %v6053_v43 = vpop.f32.mrf.mxu3 }
 0x528   : > { %8885 = vst [vmem:[%s10513_s20 + $0x68] sm:$0xff] %v8815_v46   ;;  %v6054_v32 = vadd.f32 %v10485_v5, %v6053_v43  ;;  %v6549_v30 = vpop.f32.mrf.mxu0 }
 0x529   : > { %v6550_v1 = vadd.f32 %v10480_v7, %v6549_v30 }
 0x52a   : > { %v6587_v20 = vadd.f32 %v6540_v23, %v6054_v32 }
 0x52c   : > { %v6623_v48 = vmax.f32 %v6587_v20, 0.0 }
 0x52f   : > { %v6055_v55 = vpop.f32.mrf.mxu3 }
 0x530   : > { %v6056_v56 = vadd.f32 %v10485_v5, %v6055_v55  ;;  %v6551_v42 = vpop.f32.mrf.mxu0 }
 0x531   : > { %v6552_v16 = vadd.f32 %v10480_v7, %v6551_v42 }
 0x532   : > { %v6588_v45 = vadd.f32 %v6542_v63, %v6056_v56 }
 0x534   : > { %v6624_v60 = vmax.f32 %v6588_v45, 0.0 }
 0x536   : > { %v8820_v11 = vpack.c.bf16 %v6624_v60, %v6623_v48 }
 0x537   : > { %v6058_v10 = vpop.f32.mrf.mxu3 }
 0x538   : > { %8886 = vst [vmem:[%s10513_s20 + $0x70] sm:$0xff] %v8820_v11   ;;  %v6059_v28 = vadd.f32 %v10485_v5, %v6058_v10  ;;  %v6554_v39 = vpop.f32.mrf.mxu0 }
 0x539   : > { %v6555_v24 = vadd.f32 %v10480_v7, %v6554_v39 }
 0x53a   : > { %v6589_v52 = vadd.f32 %v6545_v58, %v6059_v28 }
 0x53c   : > { %v6625_v49 = vmax.f32 %v6589_v52, 0.0 }
 0x53f   : > { %v6060_v57 = vpop.f32.mrf.mxu3 }
 0x540   : > { %v6061_v37 = vadd.f32 %v10485_v5, %v6060_v57  ;;  %v6556_v50 = vpop.f32.mrf.mxu0 }
 0x541   : > { %v6557_v54 = vadd.f32 %v10480_v7, %v6556_v50 }
 0x542   : > { %v6590_v8 = vadd.f32 %v6547_v15, %v6061_v37 }
 0x544   : > { %v6626_v12 = vmax.f32 %v6590_v8, 0.0 }
 0x546   : > { %v8825_v14 = vpack.c.bf16 %v6626_v12, %v6625_v49 }
 0x547   : > { %v6063_v29 = vpop.f32.mrf.mxu3 }
 0x548   : > { %8887 = vst [vmem:[%s10513_s20 + $0x78] sm:$0xff] %v8825_v14   ;;  %v6064_v9 = vadd.f32 %v10485_v5, %v6063_v29 }
 0x54a   : > { %v6591_v27 = vadd.f32 %v6550_v1, %v6064_v9 }
 0x54c   : > { %v6627_v17 = vmax.f32 %v6591_v27, 0.0 }
 0x54f   : > { %v6065_v36 = vpop.f32.mrf.mxu3 }
 0x550   : > { %v6066_v22 = vadd.f32 %v10485_v5, %v6065_v36 }
 0x552   : > { %v6592_v40 = vadd.f32 %v6552_v16, %v6066_v22 }
 0x554   : > { %v6628_v35 = vmax.f32 %v6592_v40, 0.0 }
 0x556   : > { %v8830_v31 = vpack.c.bf16 %v6628_v35, %v6627_v17 }
 0x557   : > { %v6068_v53 = vpop.f32.mrf.mxu3 }
 0x558   : > { %8888 = vst [vmem:[%s10513_s20 + $0x80] sm:$0xff] %v8830_v31   ;;  %v6069_v61 = vadd.f32 %v10485_v5, %v6068_v53 }
 0x55a   : > { %v6593_v18 = vadd.f32 %v6555_v24, %v6069_v61 }
 0x55c   : > { %v6629_v2 = vmax.f32 %v6593_v18, 0.0 }
 0x55f   : > { %v6070_v44 = vpop.f32.mrf.mxu3 }
 0x560   : > { %v6071_v47 = vadd.f32 %v10485_v5, %v6070_v44 }
 0x562   : > { %v6594_v19 = vadd.f32 %v6557_v54, %v6071_v47 }
 0x564   : > { %v6630_v25 = vmax.f32 %v6594_v19, 0.0 }
 0x566   : > { %v8835_v38 = vpack.c.bf16 %v6630_v25, %v6629_v2 }
 0x568   : > { %8889 = vst [vmem:[%s10513_s20 + $0x88] sm:$0xff] %v8835_v38  }
 0x569   : > { %8995 = shalt.err (!%p8992_p5)
}
 0x56a   : > { %s9049_s21 = smov 64   ;;  %s9050_s20 = smov 4  }
 0x56b   : > { %8901 = dma.vmem_to_hbm [thread:$0]  (%p9146_p4), %s6718_s19, 2304, %s6720_s22, %s6704_s16, %s9049_s21, %s9049_s21, %s9050_s20  }
 0x56c PF: > { %p8907_p6 = scmp.ge.s32.totalorder %s9046_s18, 2  ;;  %s6734_s29 = sand.u32 1, %s9026_s13  }
 0x56d   : > { %s6735_s11 = scalar_lea.sflag [#allocation6], %s6734_s29 }
 0x56e   : > { %p8904_p7 = pnand %p8907_p6, %p9153_p8 }
 0x570   : > { %p8905_p9 = pneg %p8904_p7 }
 0x572   : > { %9021 = dma.done.wait (%p8905_p9), %s6735_s11, 2304  }
 0x573   : > { %9023 = vsyncadd (%p8905_p9), %s6735_s11, 4294964992  ;;  %s23_s18 = sadd.s32 1, %s9046_s18   ;;  %s10825_s23 = sld [smem:[#allocation8_spill]] }
 0x574   : > { %p20_p10 = scmp.ge.s32.totalorder %s23_s18, 4   ;;  %s10826_s13 = smov %s9030_s14 }
 0x575   : > { %s10827_s14 = smov %s9034_s15  ;;  %s10828_s15 = smov %s9159_s26 }
 0x576   : > { %s10829_s16 = smov %s9042_s17  ;;  %22 = sbr.rel (!%p20_p10) target bundleno = 4 (0x4), region = 119 }
 0x579   : > { %s10830_s17 = smov %s10825_s23 }
 0x57b   :  { %6741 = vsyncpa [#allocation6], 1 }
 0x57c   :  { %6743 = vsyncpa [#allocation6 + $0x1], 1 }

// kernel: tpu_custom_call.1
= control target key start
LH: loop header
LB: loop body
LE: loop exit
PB: predicated region body
PF: predicated region fallthrough
CT: control target
= control target key end

     0   :  { %15 = vsyncpa [#allocation6], 0  ;;  %s10742_s0 = inlined_call_operand.vmem [shape: bf16[2,324,128], index: 0, kind: input, shape index: {}]   ;;  %s10743_s1 = inlined_call_operand.vmem [shape: f32[324,1], index: 1, kind: input, shape index: {}]   ;;  %s10744_s2 = inlined_call_operand.vmem [shape: bf16[128,128], index: 2, kind: input, shape index: {}]   ;;  %s10745_s3 = inlined_call_operand.vmem [shape: f32[1,128], index: 3, kind: input, shape index: {}]   ;;  %s10746_s4 = inlined_call_operand.vmem [shape: bf16[9,128,128], index: 4, kind: input, shape index: {}]   ;;  %s10747_s5 = inlined_call_operand.vmem [shape: f32[1,128], index: 5, kind: input, shape index: {}]   ;;  %s10748_s6 = inlined_call_operand.vmem [shape: bf16[128,128], index: 6, kind: input, shape index: {}]   ;;  %s10749_s7 = inlined_call_operand.vmem [shape: f32[1,128], index: 7, kind: input, shape index: {}]   ;;  %s10750_s8 = inlined_call_operand.vmem [shape: bf16[128,128], index: 8, kind: input, shape index: {}]   ;;  %s10751_s9 = inlined_call_operand.vmem [shape: f32[1,128], index: 9, kind: input, shape index: {}]   ;;  %s10752_s10 = inlined_call_operand.hbm [shape: bf16[2,288,128], index: 10, kind: output, shape index: {}]  }
   0x1   :  { %17 = vsyncpa [#allocation6 + $0x1], 0  ;;  %s9106_s13 = smov 0   ;;  %s9108_s14 = smov 0  }
   0x2   :  { %s9110_s15 = smov 0   ;;  %s9112_s16 = smov 0  }
   0x3   :  { %s9114_s17 = smov 0   ;;  %s9116_s18 = smov 0  }
   0x4 LB: > { %s6846_s19 = sadd.s32 4294967295, %s9046_s18   ;;  %s6847_s20 = sadd.s32 4294967294, %s9046_s18   ;;  %s9046_s18 = sphi %s9116_s18, %s23_s18   ;;  %s9042_s17 = sphi %s9114_s17, %s10830_s17   ;;  %s9038_s16 = sphi %s9112_s16, %s10829_s16   ;;  %s9034_s15 = sphi %s9110_s15, %s10828_s15   ;;  %s9030_s14 = sphi %s9108_s14, %s10827_s14   ;;  %s9026_s13 = sphi %s9106_s13, %s10826_s13  }
   0x5   : > { %s35_s21 = sadd.s32 1, %s9042_s17  ;;  %s279_s22 = sadd.s32 1, %s9034_s15 }
   0x6   : > { %p37_p0 = scmp.ge.s32.totalorder %s35_s21, 2  ;;  %p289_p1 = scmp.ne.s32.totalorder %s9034_s15, %s9030_s14 }
   0x7   : > { %p290_p2 = scmp.eq.s32.totalorder %s6846_s19, 1  ;;  %p295_p3 = scmp.ne.s32.totalorder %s9030_s14, %s9026_s13 }
   0x8   : > { %s10832_s21 = smov (%p37_p0, %s35_s21), 0  ;;  %p296_p5 = scmp.eq.s32.totalorder %s6847_s20, 1 }
   0x9   : > { %10754 = sst [smem:[#allocation8_spill]] %s10832_s21  ;;  %p9146_p4 = por %p290_p2, %p289_p1 }
   0xa   : > { %s274_s24 = ssub.s32 %s9042_s17, %s10832_s21  ;;  %p6854_p6 = scmp.ge.s32.totalorder %s9046_s18, 1 }
   0xb   : > { %p277_p7 = scmp.eq.s32.totalorder %s274_s24, 0  ;;  %p9153_p8 = por %p296_p5, %p295_p3 }
   0xc   : > { %p363_p9 = scmp.lt.s32.totalorder %s9046_s18, 3 }
   0xd   : > { %s9159_s26 = scalar_select %p277_p7, %s9034_s15, %s279_s22  }
   0xe   : > { %p364_p10 = pnand %p6854_p6, %p363_p9 }
  0x10   : > { %367 = sbr.rel (%p364_p10) target bundleno = 1388 (0x56c), region = 60 }
  0x15   : > { %v828_v0 = vld [vmem:[%s10743_s1 + $0x10] sm:$0xff]  ;;  %v826_v1 = vld [vmem:[%s10743_s1] sm:$0xff]  ;;  %v8270_v2 = vld [vmem:[%s10744_s2 + $0x38] sm:$0xff]  ;;  %v9048_v3 = vmov 0   ;;  %p415_p11 = scmp.lt.s32.totalorder %s9038_s16, 1  ;;  %vm2255_vm0 = vcmask 1046528  }
  0x16   : > { %8960 = vset.pattern.permute.xlu1 %v9048_v3  ;;  %1195 = vst [vmem:[#allocation2 + $0xa0] sm:$0xc] %v9048_v3  ;;  %8959 = vset.pattern.permute.xlu0 %v9048_v3  ;;  %v830_v4 = vld [vmem:[%s10743_s1 + $0x20] sm:$0xff]  ;;  %v8269_v5 = vld [vmem:[%s10744_s2 + $0x30] sm:$0xff]  ;;  %v829_v6 = vld [vmem:[%s10743_s1 + $0x18] sm:$0xff]  ;;  %vm3761_vm2 = vcmask 1045504  }
  0x17   : > { %879 = vperm.xlu1 %8960, %v828_v0   ;;  %869 = vperm.xlu0 %8959, %v826_v1   ;;  %v827_v7 = vld [vmem:[%s10743_s1 + $0x8] sm:$0xff]  ;;  %v8267_v10 = vld [vmem:[%s10744_s2 + $0x20] sm:$0xff]  ;;  %v833_v11 = vld [vmem:[%s10743_s1 + $0x38] sm:$0xff]  ;;  %s416_s27 = scalar_select %p415_p11, %s9038_s16, 1  ;;  %vm1686_vm1 = vsmask.f32 7424 }
  0x18   : > { %672 = vmatpush.bf16.msra.mxu0 %v8270_v2  ;;  %8961 = vset.pattern.permute.xlu2 %v9048_v3  ;;  %v8268_v8 = vld [vmem:[%s10744_s2 + $0x28] sm:$0xff]  ;;  %v832_v12 = vld [vmem:[%s10743_s1 + $0x30] sm:$0xff]  ;;  %v8266_v13 = vld [vmem:[%s10744_s2 + $0x18] sm:$0xff]  ;;  %vm3170_vm3 = vsmask.f32 6400  ;;  %vm5267_vm5 = vcmask 1044480  }
  0x19   : > { %889 = vperm.xlu2 %8961, %v830_v4   ;;  %8890 = vmatpush.bf16.msra.mxu1 %v8270_v2  ;;  %v831_v9 = vld [vmem:[%s10743_s1 + $0x28] sm:$0xff]  ;;  %v834_v14 = vld [vmem:[%s10743_s1 + $0x40] sm:$0xff]  ;;  %v8265_v15 = vld [vmem:[%s10744_s2 + $0x10] sm:$0xff]  ;;  %s8899_s20 = smul.u32 164, %s416_s27  ;;  %vm4676_vm4 = vsmask.f32 5376 }
  0x1a   : > { %v836_v16 = vld [vmem:[%s10743_s1 + $0x50] sm:$0xff]  ;;  %v835_v17 = vld [vmem:[%s10743_s1 + $0x48] sm:$0xff]  ;;  %v837_v19 = vld [vmem:[%s10743_s1 + $0x58] sm:$0xff]  ;;  %s412_s21 = sand.u32 1, %s9030_s14   ;;  %s8988_s30 = scalar_lea.hbm %s10752_s10, 288 }
  0x1b   : > { %v8264_v18 = vld [vmem:[%s10744_s2 + $0x8] sm:$0xff]  ;;  %v8263_v20 = vld [vmem:[%s10744_s2] sm:$0xff]  ;;  %s9226_s11 = scalar_lea.vmem %s10742_s0, %s8899_s20  ;;  %v840_v24 = vld [vmem:[%s10743_s1 + $0x70] sm:$0xff]  ;;  %s8898_s24 = smul.u32 144, %s412_s21 }
  0x1c   : > { %673 = vmatpush.bf16.msra.mxu0 %v8269_v5  ;;  %v839_v21 = vld [vmem:[%s10743_s1 + $0x68] sm:$0xff]  ;;  %v838_v22 = vld [vmem:[%s10743_s1 + $0x60] sm:$0xff]  ;;  %v8262_v25 = vld [vmem:[%s9226_s11 + $0x98] sm:$0xff] }
  0x1d   : > { %8891 = vmatpush.bf16.msra.mxu1 %v8269_v5  ;;  %v8243_v23 = vld [vmem:[%s9226_s11] sm:$0xff]  ;;  %v841_v27 = vld [vmem:[%s10743_s1 + $0x78] sm:$0xff]  ;;  %v843_v28 = vld [vmem:[%s10743_s1 + $0x88] sm:$0xff]  ;;  %s10513_s20 = scalar_lea.vmem [#allocation5], %s8898_s24 }
  0x1e   : > { %v842_v26 = vld [vmem:[%s10743_s1 + $0x80] sm:$0xff]  ;;  %v845_v29 = vld [vmem:[%s10743_s1 + $0x98] sm:$0xff]  ;;  %v844_v30 = vld [vmem:[%s10743_s1 + $0x90] sm:$0xff]  ;;  %s6717_s19 = sshll.u32 %s10513_s20, 4  ;;  %s6718_s19 = int_to_ptr.vmem [resolvable:$true] %s6717_s19 }
  0x1f   : > { %884 = vperm.xlu1 %8960, %v829_v6   ;;  %874 = vperm.xlu0 %8959, %v827_v7   ;;  %v8244_v31 = vld [vmem:[%s9226_s11 + $0x8] sm:$0xff]  ;;  %v846_v32 = vld [vmem:[%s10743_s1 + $0xa0] sm:$0xff]  ;;  %v848_v33 = vld [vmem:[%s10743_s1 + $0xb0] sm:$0xff] }
  0x20   : > { %674 = vmatpush.bf16.msra.mxu0 %v8268_v8  ;;  %v847_v34 = vld [vmem:[%s10743_s1 + $0xa8] sm:$0xff]  ;;  %v479_v35 = vld [vmem:[%s9226_s11 + $0xa0] sm:$0x3]  ;;  %v849_v36 = vld [vmem:[%s10743_s1 + $0xb8] sm:$0xff] }
  0x21   : > { %894 = vperm.xlu2 %8961, %v831_v9   ;;  %8892 = vmatpush.bf16.msra.mxu1 %v8268_v8  ;;  %v581_v37 = vunpack.c.l.b16 %v479_v35  ;;  %v851_v39 = vld [vmem:[%s10743_s1 + $0xc8] sm:$0xff]  ;;  %v850_v40 = vld [vmem:[%s10743_s1 + $0xc0] sm:$0xff]  ;;  %v8245_v41 = vld [vmem:[%s9226_s11 + $0x10] sm:$0xff] }
  0x22   : > { %v852_v42 = vld [vmem:[%s10743_s1 + $0xd0] sm:$0xff]  ;;  %v854_v43 = vld [vmem:[%s10743_s1 + $0xe0] sm:$0xff]  ;;  %v853_v44 = vld [vmem:[%s10743_s1 + $0xd8] sm:$0xff] }
  0x23   : > { %v602_v38 = vpack.c.b16 %v581_v37, %v581_v37  ;;  %v855_v45 = vld [vmem:[%s10743_s1 + $0xe8] sm:$0xff]  ;;  %v857_v46 = vld [vmem:[%s10743_s1 + $0xf8] sm:$0xff]  ;;  %v856_v47 = vld [vmem:[%s10743_s1 + $0xf0] sm:$0xff] }
  0x24   : > { %675 = vmatpush.bf16.msra.mxu0 %v8267_v10  ;;  %v8246_v48 = vld [vmem:[%s9226_s11 + $0x18] sm:$0xff]  ;;  %v858_v49 = vld [vmem:[%s10743_s1 + $0x100] sm:$0xff]  ;;  %v860_v50 = vld [vmem:[%s10743_s1 + $0x110] sm:$0xff] }
  0x25   : > { %8893 = vmatpush.bf16.msra.mxu1 %v8267_v10  ;;  %v859_v51 = vld [vmem:[%s10743_s1 + $0x108] sm:$0xff]  ;;  %v861_v52 = vld [vmem:[%s10743_s1 + $0x118] sm:$0xff]  ;;  %v862_v54 = vld [vmem:[%s10743_s1 + $0x120] sm:$0xff] }
  0x26   : > { %v863_v53 = vld [vmem:[%s10743_s1 + $0x128] sm:$0xff]  ;;  %v8247_v55 = vld [vmem:[%s9226_s11 + $0x20] sm:$0xff]  ;;  %v864_v57 = vld [vmem:[%s10743_s1 + $0x130] sm:$0xff] }
  0x27   : > { %904 = vperm.xlu1 %8960, %v833_v11   ;;  %899 = vperm.xlu0 %8959, %v832_v12   ;;  %v866_v58 = vld [vmem:[%s10743_s1 + $0x140] sm:$0xf]  ;;  %v865_v59 = vld [vmem:[%s10743_s1 + $0x138] sm:$0xff]  ;;  %v8248_v61 = vld [vmem:[%s9226_s11 + $0x28] sm:$0xff] }
  0x28   : > { %676 = vmatpush.bf16.msra.mxu0 %v8266_v13  ;;  %v8296_v0 = vld [vmem:[%s10746_s4 + $0x38] sm:$0xff]  ;;  %v8295_v4 = vld [vmem:[%s10746_s4 + $0x30] sm:$0xff]  ;;  %v8294_v7 = vld [vmem:[%s10746_s4 + $0x28] sm:$0xff] }
  0x29   : > { %909 = vperm.xlu2 %8961, %v834_v14   ;;  %8894 = vmatpush.bf16.msra.mxu1 %v8266_v13  ;;  %v8249_v6 = vld [vmem:[%s9226_s11 + $0x30] sm:$0xff]  ;;  %v8293_v10 = vld [vmem:[%s10746_s4 + $0x20] sm:$0xff]  ;;  %v8292_v12 = vld [vmem:[%s10746_s4 + $0x18] sm:$0xff] }
  0x2a   : > { %v8251_v35 = vld [vmem:[%s9226_s11 + $0x40] sm:$0xff]  ;;  %v8343_v37 = vld [vmem:[%s10746_s4 + $0x90] sm:$0xff] }
  0x2c   : > { %677 = vmatpush.bf16.msra.mxu0 %v8265_v15 }
  0x2d   : > { %8895 = vmatpush.bf16.msra.mxu1 %v8265_v15  ;;  %v8348_v15 = vld [vmem:[%s10746_s4 + $0xb8] sm:$0xff] }
  0x2e   : > { %2359 = vmatpush.bf16.msra.mxu3 %v8348_v15 }
  0x2f   : > { %919 = vperm.xlu1 %8960, %v836_v16   ;;  %914 = vperm.xlu0 %8959, %v835_v17   ;;  %v8291_v16 = vld [vmem:[%s10746_s4 + $0x10] sm:$0xff]  ;;  %v8322_v17 = vld [vmem:[%s10746_s4 + $0x78] sm:$0xff] }
  0x30   : > { %678 = vmatpush.bf16.msra.mxu0 %v8264_v18  ;;  %1901 = vmatpush.bf16.msra.mxu2 %v8322_v17 }
  0x31   : > { %924 = vperm.xlu2 %8961, %v837_v19   ;;  %8896 = vmatpush.bf16.msra.mxu1 %v8264_v18  ;;  %v8250_v18 = vld [vmem:[%s9226_s11 + $0x38] sm:$0xff]  ;;  %v8347_v19 = vld [vmem:[%s10746_s4 + $0xb0] sm:$0xff] }
  0x32   : > { %2360 = vmatpush.bf16.msra.mxu3 %v8347_v19 }
  0x34   : > { %679 = vmatpush.bf16.msra.mxu0 %v8263_v20 }
  0x35   : > { %8897 = vmatpush.bf16.msra.mxu1 %v8263_v20  ;;  %v8290_v20 = vld [vmem:[%s10746_s4 + $0x8] sm:$0xff] }
  0x37   : > { %934 = vperm.xlu1 %8960, %v839_v21   ;;  %929 = vperm.xlu0 %8959, %v838_v22   ;;  %v8321_v21 = vld [vmem:[%s10746_s4 + $0x70] sm:$0xff] }
  0x38   : > { %680 = vmatmul.bf16.vlgmr.msra.gmra.mxu0 %v8243_v23  ;;  %775 = vmatmul.bf16.vlgmr.msra.gmra.mxu1 %v8262_v25  ;;  %v8346_v25 = vld [vmem:[%s10746_s4 + $0xa8] sm:$0xff] }
  0x39   : > { %939 = vperm.xlu2 %8961, %v840_v24   ;;  %1404 = vmatpush.bf16.msrb.mxu1 %v8296_v0 }
  0x3a   : > { %1902 = vmatpush.bf16.msra.mxu2 %v8321_v21  ;;  %2361 = vmatpush.bf16.msra.mxu3 %v8346_v25 }
  0x3d   : > { %1405 = vmatpush.bf16.msrb.mxu1 %v8295_v4 }
  0x3f   : > { %949 = vperm.xlu1 %8960, %v842_v26   ;;  %944 = vperm.xlu0 %8959, %v841_v27   ;;  %v8289_v26 = vld [vmem:[%s10746_s4] sm:$0xff]  ;;  %v8320_v27 = vld [vmem:[%s10746_s4 + $0x68] sm:$0xff] }
  0x40   : > { %1903 = vmatpush.bf16.msra.mxu2 %v8320_v27 }
  0x41   : > { %954 = vperm.xlu2 %8961, %v843_v28   ;;  %1406 = vmatpush.bf16.msrb.mxu1 %v8294_v7  ;;  %v8345_v28 = vld [vmem:[%s10746_s4 + $0xa0] sm:$0xff] }
  0x42   : > { %2362 = vmatpush.bf16.msra.mxu3 %v8345_v28 }
  0x45   : > { %1407 = vmatpush.bf16.msrb.mxu1 %v8293_v10 }
  0x47   : > { %964 = vperm.xlu1 %8960, %v845_v29   ;;  %959 = vperm.xlu0 %8959, %v844_v30   ;;  %v8319_v29 = vld [vmem:[%s10746_s4 + $0x60] sm:$0xff] }
  0x48   : > { %685 = vmatmul.bf16.gmra.mxu0 %v8244_v31  ;;  %780 = vmatmul.bf16.gmra.mxu1 %v602_v38  ;;  %v9424_v38 = vld [vmem:[%s10745_s3] ss:$0 sm:$0xff] }
  0x49   : > { %969 = vperm.xlu2 %8961, %v846_v32   ;;  %1408 = vmatpush.bf16.msrb.mxu1 %v8292_v12  ;;  %v8344_v32 = vld [vmem:[%s10746_s4 + $0x98] sm:$0xff] }
  0x4a   : > { %1904 = vmatpush.bf16.msra.mxu2 %v8319_v29  ;;  %2363 = vmatpush.bf16.msra.mxu3 %v8344_v32  ;;  %v8253_v29 = vld [vmem:[%s9226_s11 + $0x50] sm:$0xff] }
  0x4d   : > { %1409 = vmatpush.bf16.msrb.mxu1 %v8291_v16 }
  0x4e   : > { %2364 = vmatpush.bf16.msra.mxu3 %v8343_v37 }
  0x4f   : > { %979 = vperm.xlu1 %8960, %v848_v33   ;;  %974 = vperm.xlu0 %8959, %v847_v34   ;;  %v8318_v34 = vld [vmem:[%s10746_s4 + $0x58] sm:$0xff] }
  0x50   : > { %1905 = vmatpush.bf16.msra.mxu2 %v8318_v34 }
  0x51   : > { %984 = vperm.xlu2 %8961, %v849_v36   ;;  %1410 = vmatpush.bf16.msrb.mxu1 %v8290_v20 }
  0x55   : > { %1411 = vmatpush.bf16.msrb.mxu1 %v8289_v26 }
  0x57   : > { %994 = vperm.xlu1 %8960, %v851_v39   ;;  %989 = vperm.xlu0 %8959, %v850_v40   ;;  %v8317_v39 = vld [vmem:[%s10746_s4 + $0x50] sm:$0xff] }
  0x58   : > { %690 = vmatmul.bf16.gmra.mxu0 %v8245_v41  ;;  %1906 = vmatpush.bf16.msra.mxu2 %v8317_v39 }
  0x59   : > { %999 = vperm.xlu2 %8961, %v852_v42   ;;  %v8342_v42 = vld [vmem:[%s10746_s4 + $0x88] sm:$0xff] }
  0x5a   : > { %2365 = vmatpush.bf16.msra.mxu3 %v8342_v42 }
  0x5f   : > { %1009 = vperm.xlu1 %8960, %v854_v43   ;;  %1004 = vperm.xlu0 %8959, %v853_v44   ;;  %v8316_v44 = vld [vmem:[%s10746_s4 + $0x48] sm:$0xff] }
  0x60   : > { %1907 = vmatpush.bf16.msra.mxu2 %v8316_v44 }
  0x61   : > { %1014 = vperm.xlu2 %8961, %v855_v45  }
  0x67   : > { %1024 = vperm.xlu1 %8960, %v857_v46   ;;  %1019 = vperm.xlu0 %8959, %v856_v47   ;;  %v8341_v47 = vld [vmem:[%s10746_s4 + $0x80] sm:$0xff] }
  0x68   : > { %695 = vmatmul.bf16.gmra.mxu0 %v8246_v48  ;;  %2366 = vmatpush.bf16.msra.mxu3 %v8341_v47 }
  0x69   : > { %1029 = vperm.xlu2 %8961, %v858_v49  }
  0x6f   : > { %1039 = vperm.xlu1 %8960, %v860_v50   ;;  %1034 = vperm.xlu0 %8959, %v859_v51   ;;  %v8315_v50 = vld [vmem:[%s10746_s4 + $0x40] sm:$0xff] }
  0x70   : > { %1908 = vmatpush.bf16.msra.mxu2 %v8315_v50 }
  0x71   : > { %1044 = vperm.xlu2 %8961, %v861_v52  }
  0x73   : > { %v9313_v56 = vpop.permute.xlu2 %889 }
  0x77   : > { %1054 = vperm.xlu1 %8960, %v863_v53   ;;  %1049 = vperm.xlu0 %8959, %v862_v54  }
  0x78   : > { %700 = vmatmul.bf16.gmra.mxu0 %v8247_v55 }
  0x79   : > { %1059 = vperm.xlu2 %8961, %v864_v57  }
  0x7b   : > { %v9324_v60 = vpop.permute.xlu2 %894 }
  0x7f   : > { %1069 = vperm.xlu1 %8960, %v866_v58   ;;  %1064 = vperm.xlu0 %8959, %v865_v59   ;;  %v8252_v59 = vld [vmem:[%s9226_s11 + $0x48] sm:$0xff] }
  0x83   : > { %v9334_v1 = vpop.permute.xlu2 %909 }
  0x88   : > { %705 = vmatmul.bf16.gmra.mxu0 %v8248_v61 }
  0x89   : > { %v9327_v62 = vpop.permute.xlu1 %879  ;;  %v9329_v63 = vpop.permute.xlu0 %869 }
  0x8b   : > { %v9343_v5 = vpop.permute.xlu2 %924 }
  0x91   : > { %v9336_v2 = vpop.permute.xlu1 %884  ;;  %v9338_v3 = vpop.permute.xlu0 %874 }
  0x93   : > { %v9356_v11 = vpop.permute.xlu2 %939 }
  0x98   : > { %710 = vmatmul.bf16.gmra.mxu0 %v8249_v6 }
  0x99   : > { %v9349_v8 = vpop.permute.xlu1 %904  ;;  %v9351_v9 = vpop.permute.xlu0 %899 }
  0x9b   : > { %v9384_v22 = vpop.permute.xlu2 %954 }
  0xa1   : > { %v9361_v13 = vpop.permute.xlu1 %919  ;;  %v9363_v14 = vpop.permute.xlu0 %914 }
  0xa3   : > { %v9412_v33 = vpop.permute.xlu2 %969 }
  0xa8   : > { %715 = vmatmul.bf16.gmra.mxu0 %v8250_v18 }
  0xa9   : > { %v9386_v23 = vpop.permute.xlu1 %934  ;;  %v9388_v24 = vpop.permute.xlu0 %929 }
  0xab   : > { %v9440_v45 = vpop.permute.xlu2 %984 }
  0xb1   : > { %v9405_v30 = vpop.permute.xlu1 %949  ;;  %v9407_v31 = vpop.permute.xlu0 %944 }
  0xb3   : > { %v9458_v0 = vpop.permute.xlu2 %999 }
  0xb5   : > { %v681_v36 = vpop.f32.mrf.mxu0  ;;  %v9449_v52 = vpop.f32.mrf.mxu1 }
  0xb6   : > { %v682_v43 = vadd.f32 %v9424_v38, %v681_v36 }
  0xb8   : > { %720 = vmatmul.bf16.gmra.mxu0 %v8251_v35  ;;  %v785_v48 = vmax.f32 %v682_v43, 0.0 }
  0xb9   : > { %v9429_v40 = vpop.permute.xlu1 %964  ;;  %v9431_v41 = vpop.permute.xlu0 %959 }
  0xba   : > { %v1072_v55 = vmul.f32 %v9329_v63, %v785_v48  ;;  %v8400_v63 = vld [vmem:[%s10746_s4 + $0x138] sm:$0xff] }
  0xbb   : > { %3407 = vmatpush.bf16.msrb.mxu2 %v8400_v63  ;;  %v9474_v18 = vpop.permute.xlu2 %1014 }
  0xbd   : > { %v683_v46 = vpop.f32.mrf.mxu0  ;;  %v9460_v4 = vpop.f32.mrf.mxu1 }
  0xbe   : > { %v684_v49 = vadd.f32 %v9424_v38, %v683_v46 }
  0xc0   : > { %v786_v51 = vmax.f32 %v684_v49, 0.0 }
  0xc1   : > { %v9451_v53 = vpop.permute.xlu1 %979  ;;  %v9453_v54 = vpop.permute.xlu0 %974 }
  0xc2   : > { %v1073_v57 = vmul.f32 %v9338_v3, %v786_v51  ;;  %v8374_v3 = vld [vmem:[%s10746_s4 + $0xf8] sm:$0xff] }
  0xc3   : > { %2816 = vmatpush.bf16.msra.mxu1 %v8374_v3  ;;  %v9487_v44 = vpop.permute.xlu2 %1029 }
  0xc4   : > { %v8560_v58 = vpack.c.bf16 %v1073_v57, %v1072_v55 }
  0xc5   : > { %v686_v61 = vpop.f32.mrf.mxu0  ;;  %v781_v20 = vpop.f32.mrf.mxu1 }
  0xc6   : > { %8561 = vst [vmem:[#allocation2] sm:$0xff] %v8560_v58   ;;  %v687_v10 = vadd.f32 %v9424_v38, %v686_v61 }
  0xc8   : > { %725 = vmatmul.bf16.gmra.mxu0 %v8252_v59  ;;  %v787_v16 = vmax.f32 %v687_v10, 0.0 }
  0xc9   : > { %v9462_v6 = vpop.permute.xlu1 %994  ;;  %v9464_v7 = vpop.permute.xlu0 %989 }
  0xca   : > { %v1074_v26 = vmul.f32 %v9327_v62, %v787_v16 }
  0xcd   : > { %v688_v12 = vpop.f32.mrf.mxu0  ;;  %v8271_v15 = vld [vmem:[#allocation2] sm:$0xff]  ;;  %v783_v37 = vpop.f32.mrf.mxu1 }
  0xce   : > { %v689_v17 = vadd.f32 %v9424_v38, %v688_v12  ;;  %1412 = vmatmul.bf16.vlgmr.msrb.gmra.mxu1 %v8271_v15  ;;  %v8297_v34 = vld [vmem:[#allocation2] sm:$0xff]  ;;  %v782_v37 = vadd.f32 %v9424_v38, %v781_v20 }
  0xcf   : > { %v7210_v35 = vld [vmem:[#allocation2] sm:$0xe]  ;;  %v8323_v36 = vld [vmem:[#allocation2] sm:$0xf0]  ;;  %v1690_v43 = vshll.u32 %v8297_v34, 16  ;;  %v1688_v59 = vshrl.u32 %v8297_v34, 16  ;;  %v777_v34 = vadd.f32 %v9424_v38, %v9449_v52 }
  0xd0   : > { %v788_v19 = vmax.f32 %v689_v17, 0.0  ;;  %v7211_v46 = vor.u32 %v8323_v36, %v7210_v35 }
  0xd1   : > { %v9476_v21 = vpop.permute.xlu1 %1009  ;;  %v9478_v25 = vpop.permute.xlu0 %1004  ;;  %v1692_v50 = vrot.slane %v1690_v43, 1  ;;  %v8399_v43 = vld [vmem:[%s10746_s4 + $0x130] sm:$0xff] }
  0xd2   : > { %v1075_v27 = vmul.f32 %v9336_v2, %v788_v19  ;;  %v2256_v57 = vrot.slane %v7211_v46, 1  ;;  %3408 = vmatpush.bf16.msrb.mxu2 %v8399_v43  ;;  %v8255_v43 = vld [vmem:[%s9226_s11 + $0x60] sm:$0xff] }
  0xd3   : > { %v1693_v15 = vor.u32 %v1692_v50, %v1688_v59 }
  0xd4   : > { %v8565_v28 = vpack.c.bf16 %v1075_v27, %v1074_v26  ;;  %v9499_v27 = vpop.permute.xlu2 %1044 }
  0xd5   : > { %v691_v32 = vpop.f32.mrf.mxu0 }
  0xd6   : > { %8837 = vst [vmem:[#allocation2 + $0x8] sm:$0xff] %v8565_v28   ;;  %v692_v62 = vadd.f32 %v9424_v38, %v691_v32 }
  0xd8   : > { %730 = vmatmul.bf16.gmra.mxu0 %v8253_v29  ;;  %v789_v51 = vmax.f32 %v692_v62, 0.0  ;;  %v8254_v29 = vld [vmem:[%s9226_s11 + $0x58] sm:$0xff]  ;;  %v823_v62 = vmax.f32 %v777_v34, 0.0 }
  0xd9   : > { %v9483_v39 = vpop.permute.xlu1 %1024  ;;  %v9485_v42 = vpop.permute.xlu0 %1019 }
  0xda   : > { %v1076_v17 = vmul.f32 %v9313_v56, %v789_v51 }
  0xdd   : > { %v693_v2 = vpop.f32.mrf.mxu0  ;;  %v8272_v47 = vld [vmem:[#allocation2 + $0x8] sm:$0xff] }
  0xde   : > { %v8324_v48 = vld [vmem:[#allocation2 + $0x8] sm:$0xff]  ;;  %v694_v55 = vadd.f32 %v9424_v38, %v693_v2  ;;  %1417 = vmatmul.bf16.gmra.mxu1 %v8272_v47 }
  0xdf   : > { %v8298_v49 = vld [vmem:[#allocation2 + $0x8] sm:$0xff]  ;;  %v2257_v58 = vrot.slane %v8324_v48, 1  ;;  %v1060_v48 = vpop.permute.xlu2 %1059 }
  0xe0   : > { %v1695_v61 = vshll.u32 %v8298_v49, 16  ;;  %v790_v10 = vmax.f32 %v694_v55, 0.0  ;;  %v1699_v59 = vshrl.u32 %v8298_v49, 16 }
  0xe1   : > { %v9491_v63 = vpop.permute.xlu1 %1039  ;;  %v9493_v3 = vpop.permute.xlu0 %1034  ;;  %v2258_v12 = vsel %vm2255_vm0, %v2256_v57, %v2257_v58  ;;  %v825_v57 = vmax.f32 %v782_v37, 0.0 }
  0xe2   : > { %v1697_v16 = vrot.slane %v1695_v61, 1  ;;  %v1077_v19 = vmul.f32 %v9324_v60, %v790_v10  ;;  %2367 = vmatmul.bf16.vlgmr.msra.gmra.mxu3 %v2258_v12  ;;  %v779_v60 = vadd.f32 %v9424_v38, %v9460_v4  ;;  %v1110_v10 = vmul.f32 %v1060_v48, %v823_v62 }
  0xe4   : > { %v1698_v26 = vsel %vm1686_vm1, %v1693_v15, %v1697_v16  ;;  %v8570_v28 = vpack.c.bf16 %v1077_v19, %v1076_v17  ;;  %v824_v51 = vmax.f32 %v779_v60, 0.0  ;;  %v1701_v19 = vor.u32 %v1699_v59, %v1697_v16 }
  0xe5   : > { %1909 = vmatmul.bf16.vlgmr.msra.gmra.mxu2 %v1698_v26  ;;  %v696_v32 = vpop.f32.mrf.mxu0 }
  0xe6   : > { %8838 = vst [vmem:[#allocation2 + $0x10] sm:$0xff] %v8570_v28   ;;  %v697_v56 = vadd.f32 %v9424_v38, %v696_v32 }
  0xe8   : > { %735 = vmatmul.bf16.gmra.mxu0 %v8254_v29  ;;  %v791_v50 = vmax.f32 %v697_v56, 0.0 }
  0xe9   : > { %v9504_v35 = vpop.permute.xlu1 %1054  ;;  %v9506_v36 = vpop.permute.xlu0 %1049 }
  0xea   : > { %v1078_v28 = vmul.f32 %v9351_v9, %v791_v50 }
  0xed   : > { %v698_v46 = vpop.f32.mrf.mxu0  ;;  %v8273_v2 = vld [vmem:[#allocation2 + $0x10] sm:$0xff] }
  0xee   : > { %v8325_v52 = vld [vmem:[#allocation2 + $0x10] sm:$0xff]  ;;  %v699_v55 = vadd.f32 %v9424_v38, %v698_v46  ;;  %1422 = vmatmul.bf16.gmra.mxu1 %v8273_v2 }
  0xef   : > { %v8299_v47 = vld [vmem:[#allocation2 + $0x10] sm:$0xff]  ;;  %v2259_v4 = vrot.slane %v8325_v52, 1 }
  0xf0   : > { %v1703_v20 = vshll.u32 %v8299_v47, 16  ;;  %v792_v61 = vmax.f32 %v699_v55, 0.0 }
  0xf1   : > { %v1070_v12 = vpop.permute.xlu1 %1069  ;;  %v1065_v15 = vpop.permute.xlu0 %1064  ;;  %v2260_v17 = vsel %vm2255_vm0, %v2257_v58, %v2259_v4  ;;  %v8373_v58 = vld [vmem:[%s10746_s4 + $0xf0] sm:$0xff] }
  0xf2   : > { %v1705_v26 = vrot.slane %v1703_v20, 1  ;;  %v1079_v29 = vmul.f32 %v9349_v8, %v792_v61  ;;  %v1112_v32 = vmul.f32 %v1070_v12, %v825_v57  ;;  %v1111_v34 = vmul.f32 %v1065_v15, %v824_v51  ;;  %2372 = vmatmul.bf16.gmra.mxu3 %v2260_v17  ;;  %2817 = vmatpush.bf16.msra.mxu1 %v8373_v58 }
  0xf3   : > { %v1707_v51 = vshrl.u32 %v8299_v47, 16 }
  0xf4   : > { %v1706_v56 = vsel %vm1686_vm1, %v1701_v19, %v1705_v26  ;;  %v8575_v49 = vpack.c.bf16 %v1079_v29, %v1078_v28  ;;  %v1153_v60 = vpack.c.bf16 %v1112_v32, %v1112_v32  ;;  %v8655_v37 = vpack.c.bf16 %v1111_v34, %v1110_v10  ;;  %v8256_v19 = vld [vmem:[%s9226_s11 + $0x68] sm:$0xff] }
  0xf5   : > { %1914 = vmatmul.bf16.gmra.mxu2 %v1706_v56  ;;  %v701_v62 = vpop.f32.mrf.mxu0  ;;  %v1709_v20 = vor.u32 %v1707_v51, %v1705_v26 }
  0xf6   : > { %8839 = vst [vmem:[#allocation2 + $0x18] sm:$0xff] %v8575_v49   ;;  %v702_v8 = vadd.f32 %v9424_v38, %v701_v62 }
  0xf7   : > { %1194 = vst [vmem:[#allocation2 + $0xa0] sm:$0x3] %v1153_v60 }
  0xf8   : > { %8855 = vst [vmem:[#allocation2 + $0x98] sm:$0xff] %v8655_v37   ;;  %740 = vmatmul.bf16.gmra.mxu0 %v8255_v43  ;;  %v793_v52 = vmax.f32 %v702_v8, 0.0 }
  0xfa   : > { %v1080_v10 = vmul.f32 %v9334_v1, %v793_v52 }
  0xfd   : > { %v703_v9 = vpop.f32.mrf.mxu0  ;;  %v8274_v16 = vld [vmem:[#allocation2 + $0x18] sm:$0xff] }
  0xfe   : > { %v8326_v46 = vld [vmem:[#allocation2 + $0x18] sm:$0xff]  ;;  %v704_v48 = vadd.f32 %v9424_v38, %v703_v9  ;;  %1427 = vmatmul.bf16.gmra.mxu1 %v8274_v16 }
  0xff   : > { %v8300_v2 = vld [vmem:[#allocation2 + $0x18] sm:$0xff]  ;;  %v2261_v50 = vrot.slane %v8326_v46, 1  ;;  %v8257_v46 = vld [vmem:[%s9226_s11 + $0x70] sm:$0xff] }
 0x100   : > { %v1711_v55 = vshll.u32 %v8300_v2, 16  ;;  %v794_v57 = vmax.f32 %v704_v48, 0.0  ;;  %v1715_v56 = vshrl.u32 %v8300_v2, 16  ;;  %v8398_v2 = vld [vmem:[%s10746_s4 + $0x128] sm:$0xff] }
 0x101   : > { %v2262_v59 = vsel %vm2255_vm0, %v2259_v4, %v2261_v50  ;;  %v8372_v48 = vld [vmem:[%s10746_s4 + $0xe8] sm:$0xff]  ;;  %3409 = vmatpush.bf16.msrb.mxu2 %v8398_v2 }
 0x102   : > { %v1713_v61 = vrot.slane %v1711_v55, 1  ;;  %v1081_v12 = vmul.f32 %v9363_v14, %v794_v57  ;;  %2377 = vmatmul.bf16.gmra.mxu3 %v2262_v59  ;;  %2818 = vmatpush.bf16.msra.mxu1 %v8372_v48 }
 0x104   : > { %v1714_v15 = vsel %vm1686_vm1, %v1709_v20, %v1713_v61  ;;  %v8580_v17 = vpack.c.bf16 %v1081_v12, %v1080_v10  ;;  %v1717_v43 = vor.u32 %v1715_v56, %v1713_v61 }
 0x105   : > { %1919 = vmatmul.bf16.gmra.mxu2 %v1714_v15  ;;  %v706_v28 = vpop.f32.mrf.mxu0 }
 0x106   : > { %8840 = vst [vmem:[#allocation2 + $0x20] sm:$0xff] %v8580_v17   ;;  %v707_v47 = vadd.f32 %v9424_v38, %v706_v28 }
 0x108   : > { %745 = vmatmul.bf16.gmra.mxu0 %v8256_v19  ;;  %v795_v34 = vmax.f32 %v707_v47, 0.0 }
 0x10a   : > { %v1082_v58 = vmul.f32 %v9361_v13, %v795_v34 }
 0x10d   : > { %v708_v29 = vpop.f32.mrf.mxu0  ;;  %v8275_v32 = vld [vmem:[#allocation2 + $0x20] sm:$0xff] }
 0x10e   : > { %v8327_v4 = vld [vmem:[#allocation2 + $0x20] sm:$0xff]  ;;  %v709_v1 = vadd.f32 %v9424_v38, %v708_v29  ;;  %1432 = vmatmul.bf16.gmra.mxu1 %v8275_v32 }
 0x10f   : > { %v8301_v26 = vld [vmem:[#allocation2 + $0x20] sm:$0xff]  ;;  %v2263_v14 = vrot.slane %v8327_v4, 1  ;;  %v8258_v4 = vld [vmem:[%s9226_s11 + $0x78] sm:$0xff] }
 0x110   : > { %v1719_v49 = vshll.u32 %v8301_v26, 16  ;;  %v796_v60 = vmax.f32 %v709_v1, 0.0  ;;  %v1723_v61 = vshrl.u32 %v8301_v26, 16  ;;  %v8452_v26 = vld [vmem:[%s10746_s4 + $0x1b8] sm:$0xff] }
 0x111   : > { %v2264_v37 = vsel %vm2255_vm0, %v2261_v50, %v2263_v14  ;;  %4322 = vmatpush.bf16.msrb.mxu0 %v8452_v26 }
 0x112   : > { %v1721_v62 = vrot.slane %v1719_v49, 1  ;;  %v1083_v8 = vmul.f32 %v9343_v5, %v796_v60  ;;  %2382 = vmatmul.bf16.gmra.mxu3 %v2264_v37 }
 0x114   : > { %v1722_v9 = vsel %vm1686_vm1, %v1717_v43, %v1721_v62  ;;  %v8585_v16 = vpack.c.bf16 %v1083_v8, %v1082_v58  ;;  %v1725_v17 = vor.u32 %v1723_v61, %v1721_v62 }
 0x115   : > { %1924 = vmatmul.bf16.gmra.mxu2 %v1722_v9  ;;  %v711_v52 = vpop.f32.mrf.mxu0  ;;  %v8450_v9 = vld [vmem:[%s10746_s4 + $0x1a8] sm:$0xff] }
 0x116   : > { %8841 = vst [vmem:[#allocation2 + $0x28] sm:$0xff] %v8585_v16   ;;  %v712_v5 = vadd.f32 %v9424_v38, %v711_v52 }
 0x118   : > { %750 = vmatmul.bf16.gmra.mxu0 %v8257_v46  ;;  %v797_v57 = vmax.f32 %v712_v5, 0.0 }
 0x11a   : > { %v1084_v28 = vmul.f32 %v9388_v24, %v797_v57  ;;  %v8397_v57 = vld [vmem:[%s10746_s4 + $0x120] sm:$0xff] }
 0x11b   : > { %3410 = vmatpush.bf16.msrb.mxu2 %v8397_v57 }
 0x11d   : > { %v713_v13 = vpop.f32.mrf.mxu0  ;;  %v8276_v50 = vld [vmem:[#allocation2 + $0x28] sm:$0xff] }
 0x11e   : > { %v8328_v51 = vld [vmem:[#allocation2 + $0x28] sm:$0xff]  ;;  %v714_v59 = vadd.f32 %v9424_v38, %v713_v13  ;;  %1437 = vmatmul.bf16.gmra.mxu1 %v8276_v50  ;;  %v8259_v50 = vld [vmem:[%s9226_s11 + $0x80] sm:$0xff] }
 0x11f   : > { %v8302_v55 = vld [vmem:[#allocation2 + $0x28] sm:$0xff]  ;;  %v2265_v20 = vrot.slane %v8328_v51, 1  ;;  %v8449_v51 = vld [vmem:[%s10746_s4 + $0x1a0] sm:$0xff] }
 0x120   : > { %v1727_v10 = vshll.u32 %v8302_v55, 16  ;;  %v798_v12 = vmax.f32 %v714_v59, 0.0  ;;  %v1731_v62 = vshrl.u32 %v8302_v55, 16  ;;  %v8371_v59 = vld [vmem:[%s10746_s4 + $0xe0] sm:$0xff] }
 0x121   : > { %v2266_v15 = vsel %vm2255_vm0, %v2263_v14, %v2265_v20  ;;  %2819 = vmatpush.bf16.msra.mxu1 %v8371_v59  ;;  %v8261_v59 = vld [vmem:[%s9226_s11 + $0x90] sm:$0xff] }
 0x122   : > { %v1729_v19 = vrot.slane %v1727_v10, 1  ;;  %v1085_v47 = vmul.f32 %v9386_v23, %v798_v12  ;;  %2387 = vmatmul.bf16.gmra.mxu3 %v2266_v15  ;;  %v8451_v23 = vld [vmem:[%s10746_s4 + $0x1b0] sm:$0xff] }
 0x123   : > { %4323 = vmatpush.bf16.msrb.mxu0 %v8451_v23 }
 0x124   : > { %v1730_v29 = vsel %vm1686_vm1, %v1725_v17, %v1729_v19  ;;  %v8590_v32 = vpack.c.bf16 %v1085_v47, %v1084_v28  ;;  %v1733_v46 = vor.u32 %v1731_v62, %v1729_v19 }
 0x125   : > { %1929 = vmatmul.bf16.gmra.mxu2 %v1730_v29  ;;  %v716_v34 = vpop.f32.mrf.mxu0 }
 0x126   : > { %8842 = vst [vmem:[#allocation2 + $0x30] sm:$0xff] %v8590_v32   ;;  %v717_v1 = vadd.f32 %v9424_v38, %v716_v34 }
 0x127   : > { %4324 = vmatpush.bf16.msrb.mxu0 %v8450_v9 }
 0x128   : > { %755 = vmatmul.bf16.gmra.mxu0 %v8258_v4  ;;  %v799_v60 = vmax.f32 %v717_v1, 0.0  ;;  %v8446_v4 = vld [vmem:[%s10746_s4 + $0x188] sm:$0xff] }
 0x12a   : > { %v1086_v2 = vmul.f32 %v9356_v11, %v799_v60  ;;  %v8448_v11 = vld [vmem:[%s10746_s4 + $0x198] sm:$0xff]  ;;  %v8445_v60 = vld [vmem:[%s10746_s4 + $0x180] sm:$0xff] }
 0x12b   : > { %4325 = vmatpush.bf16.msrb.mxu0 %v8449_v51 }
 0x12d   : > { %v718_v24 = vpop.f32.mrf.mxu0  ;;  %v8277_v14 = vld [vmem:[#allocation2 + $0x30] sm:$0xff] }
 0x12e   : > { %v8329_v56 = vld [vmem:[#allocation2 + $0x30] sm:$0xff]  ;;  %v719_v37 = vadd.f32 %v9424_v38, %v718_v24  ;;  %1442 = vmatmul.bf16.gmra.mxu1 %v8277_v14 }
 0x12f   : > { %v8303_v49 = vld [vmem:[#allocation2 + $0x30] sm:$0xff]  ;;  %v2267_v43 = vrot.slane %v8329_v56, 1  ;;  %4326 = vmatpush.bf16.msrb.mxu0 %v8448_v11 }
 0x130   : > { %v1735_v58 = vshll.u32 %v8303_v49, 16  ;;  %v800_v8 = vmax.f32 %v719_v37, 0.0  ;;  %v1739_v47 = vshrl.u32 %v8303_v49, 16  ;;  %v8260_v49 = vld [vmem:[%s9226_s11 + $0x88] sm:$0xff] }
 0x131   : > { %v2268_v16 = vsel %vm2255_vm0, %v2265_v20, %v2267_v43  ;;  %v8447_v20 = vld [vmem:[%s10746_s4 + $0x190] sm:$0xff] }
 0x132   : > { %v1737_v52 = vrot.slane %v1735_v58, 1  ;;  %v1087_v48 = vmul.f32 %v9407_v31, %v800_v8  ;;  %2392 = vmatmul.bf16.gmra.mxu3 %v2268_v16 }
 0x133   : > { %4327 = vmatpush.bf16.msrb.mxu0 %v8447_v20 }
 0x134   : > { %v1738_v5 = vsel %vm1686_vm1, %v1733_v46, %v1737_v52  ;;  %v8595_v13 = vpack.c.bf16 %v1087_v48, %v1086_v2  ;;  %v1741_v26 = vor.u32 %v1739_v47, %v1737_v52 }
 0x135   : > { %1934 = vmatmul.bf16.gmra.mxu2 %v1738_v5  ;;  %v721_v55 = vpop.f32.mrf.mxu0 }
 0x136   : > { %8843 = vst [vmem:[#allocation2 + $0x38] sm:$0xff] %v8595_v13   ;;  %v722_v31 = vadd.f32 %v9424_v38, %v721_v55 }
 0x137   : > { %4328 = vmatpush.bf16.msrb.mxu0 %v8446_v4 }
 0x138   : > { %760 = vmatmul.bf16.gmra.mxu0 %v8259_v50  ;;  %v801_v17 = vmax.f32 %v722_v31, 0.0 }
 0x13a   : > { %v1088_v23 = vmul.f32 %v9405_v30, %v801_v17 }
 0x13b   : > { %4329 = vmatpush.bf16.msrb.mxu0 %v8445_v60 }
 0x13d   : > { %v723_v61 = vpop.f32.mrf.mxu0  ;;  %v8278_v10 = vld [vmem:[#allocation2 + $0x38] sm:$0xff] }
 0x13e   : > { %v8330_v12 = vld [vmem:[#allocation2 + $0x38] sm:$0xff]  ;;  %v724_v19 = vadd.f32 %v9424_v38, %v723_v61  ;;  %1447 = vmatmul.bf16.gmra.mxu1 %v8278_v10 }
 0x13f   : > { %v8304_v15 = vld [vmem:[#allocation2 + $0x38] sm:$0xff]  ;;  %v2269_v28 = vrot.slane %v8330_v12, 1 }
 0x140   : > { %v1743_v29 = vshll.u32 %v8304_v15, 16  ;;  %v802_v32 = vmax.f32 %v724_v19, 0.0  ;;  %v1747_v52 = vshrl.u32 %v8304_v15, 16  ;;  %v8396_v10 = vld [vmem:[%s10746_s4 + $0x118] sm:$0xff] }
 0x141   : > { %v2270_v34 = vsel %vm2255_vm0, %v2267_v43, %v2269_v28  ;;  %3411 = vmatpush.bf16.msrb.mxu2 %v8396_v10 }
 0x142   : > { %v1745_v1 = vrot.slane %v1743_v29, 1  ;;  %v1089_v24 = vmul.f32 %v9384_v22, %v802_v32  ;;  %2397 = vmatmul.bf16.gmra.mxu3 %v2270_v34  ;;  %v7690_v29 = vld [vmem:[#allocation2 + $0x10] sm:$0xc]  ;;  %v8427_v32 = vld [vmem:[#allocation2 + $0x10] sm:$0xf0] }
 0x144   : > { %v1746_v14 = vsel %vm1686_vm1, %v1741_v26, %v1745_v1  ;;  %v8600_v56 = vpack.c.bf16 %v1089_v24, %v1088_v23  ;;  %v1749_v13 = vor.u32 %v1747_v52, %v1745_v1  ;;  %v8428_v1 = vld [vmem:[#allocation2 + $0x18] sm:$0xff] }
 0x145   : > { %1939 = vmatmul.bf16.gmra.mxu2 %v1746_v14  ;;  %v726_v37 = vpop.f32.mrf.mxu0 }
 0x146   : > { %8844 = vst [vmem:[#allocation2 + $0x40] sm:$0xff] %v8600_v56   ;;  %v727_v43 = vadd.f32 %v9424_v38, %v726_v37 }
 0x148   : > { %765 = vmatmul.bf16.gmra.mxu0 %v8260_v49  ;;  %v803_v9 = vmax.f32 %v727_v43, 0.0  ;;  %v7691_v49 = vor.u32 %v8427_v32, %v7690_v29 }
 0x14a   : > { %v1090_v51 = vmul.f32 %v9431_v41, %v803_v9 }
 0x14b   : > { %v9596_v30 = vpop.f32.mrf.mxu1 }
 0x14d   : > { %v728_v22 = vpop.f32.mrf.mxu0  ;;  %v8279_v62 = vld [vmem:[#allocation2 + $0x40] sm:$0xff] }
 0x14e   : > { %v8331_v58 = vld [vmem:[#allocation2 + $0x40] sm:$0xff]  ;;  %v729_v16 = vadd.f32 %v9424_v38, %v728_v22  ;;  %1452 = vmatmul.bf16.gmra.mxu1 %v8279_v62  ;;  %v4220_v22 = vrot.slane %v8428_v1, 2 }
 0x14f   : > { %v8305_v8 = vld [vmem:[#allocation2 + $0x40] sm:$0xff]  ;;  %v2271_v46 = vrot.slane %v8331_v58, 1 }
 0x150   : > { %v1751_v2 = vshll.u32 %v8305_v8, 16  ;;  %v804_v48 = vmax.f32 %v729_v16, 0.0  ;;  %v1755_v34 = vshrl.u32 %v8305_v8, 16  ;;  %v4219_v16 = vrot.slane %v7691_v49, 2 }
 0x151   : > { %v2272_v5 = vsel %vm2255_vm0, %v2269_v28, %v2271_v46 }
 0x152   : > { %v1753_v50 = vrot.slane %v1751_v2, 1  ;;  %v1091_v55 = vmul.f32 %v9429_v40, %v804_v48  ;;  %2402 = vmatmul.bf16.gmra.mxu3 %v2272_v5  ;;  %v8370_v40 = vld [vmem:[%s10746_s4 + $0xd8] sm:$0xff]  ;;  %v4221_v52 = vsel %vm3761_vm2, %v4219_v16, %v4220_v22 }
 0x153   : > { %v9603_v31 = vpop.f32.mrf.mxu1  ;;  %2820 = vmatpush.bf16.msra.mxu1 %v8370_v40  ;;  %v8426_v2 = vld [vmem:[%s10746_s4 + $0x178] sm:$0xff]  ;;  %v8429_v40 = vld [vmem:[#allocation2 + $0x20] sm:$0xff] }
 0x154   : > { %v1754_v57 = vsel %vm1686_vm1, %v1749_v13, %v1753_v50  ;;  %v8605_v11 = vpack.c.bf16 %v1091_v55, %v1090_v51  ;;  %v1757_v14 = vor.u32 %v1755_v34, %v1753_v50  ;;  %3865 = vmatpush.bf16.msrb.mxu3 %v8426_v2  ;;  %v4222_v1 = vrot.slane %v8429_v40, 2 }
 0x155   : > { %1944 = vmatmul.bf16.gmra.mxu2 %v1754_v57  ;;  %v731_v20 = vpop.f32.mrf.mxu0 }
 0x156   : > { %8845 = vst [vmem:[#allocation2 + $0x48] sm:$0xff] %v8605_v11   ;;  %v732_v61 = vadd.f32 %v9424_v38, %v731_v20 }
 0x158   : > { %770 = vmatmul.bf16.gmra.mxu0 %v8261_v59  ;;  %v805_v28 = vmax.f32 %v732_v61, 0.0 }
 0x15a   : > { %v1092_v60 = vmul.f32 %v9412_v33, %v805_v28 }
 0x15b   : > { %v9613_v41 = vpop.f32.mrf.mxu1 }
 0x15d   : > { %v733_v12 = vpop.f32.mrf.mxu0  ;;  %v8280_v15 = vld [vmem:[#allocation2 + $0x48] sm:$0xff] }
 0x15e   : > { %v8332_v17 = vld [vmem:[#allocation2 + $0x48] sm:$0xff]  ;;  %v734_v47 = vadd.f32 %v9424_v38, %v733_v12  ;;  %1457 = vmatmul.bf16.gmra.mxu1 %v8280_v15 }
 0x15f   : > { %v8306_v19 = vld [vmem:[#allocation2 + $0x48] sm:$0xff]  ;;  %v2273_v4 = vrot.slane %v8332_v17, 1 }
 0x160   : > { %v1759_v26 = vshll.u32 %v8306_v19, 16  ;;  %v806_v23 = vmax.f32 %v734_v47, 0.0  ;;  %v1763_v61 = vshrl.u32 %v8306_v19, 16 }
 0x161   : > { %v2274_v24 = vsel %vm2255_vm0, %v2271_v46, %v2273_v4 }
 0x162   : > { %v1761_v56 = vrot.slane %v1759_v26, 1  ;;  %v1093_v37 = vmul.f32 %v9453_v54, %v806_v23  ;;  %2407 = vmatmul.bf16.gmra.mxu3 %v2274_v24 }
 0x163   : > { %v9620_v58 = vpop.f32.mrf.mxu1 }
 0x164   : > { %v1762_v43 = vsel %vm1686_vm1, %v1757_v14, %v1761_v56  ;;  %v8610_v62 = vpack.c.bf16 %v1093_v37, %v1092_v60  ;;  %v1765_v28 = vor.u32 %v1763_v61, %v1761_v56  ;;  %v4223_v14 = vsel %vm3761_vm2, %v4220_v22, %v4222_v1  ;;  %v8395_v56 = vld [vmem:[%s10746_s4 + $0x110] sm:$0xff] }
 0x165   : > { %1949 = vmatmul.bf16.gmra.mxu2 %v1762_v43  ;;  %v736_v8 = vpop.f32.mrf.mxu0  ;;  %v2368_v9 = vpop.f32.mrf.mxu3 }
 0x166   : > { %8846 = vst [vmem:[#allocation2 + $0x50] sm:$0xff] %v8610_v62   ;;  %v737_v54 = vadd.f32 %v9424_v38, %v736_v8  ;;  %3412 = vmatpush.bf16.msrb.mxu2 %v8395_v56  ;;  %v8431_v56 = vld [vmem:[#allocation2 + $0x30] sm:$0xff] }
 0x168   : > { %v1910_v46 = vpop.f32.mrf.mxu2  ;;  %4330 = vmatmul.bf16.vlgmr.msrb.gmra.mxu0 %v4221_v52  ;;  %v807_v11 = vmax.f32 %v737_v54, 0.0  ;;  %v8430_v54 = vld [vmem:[#allocation2 + $0x28] sm:$0xff] }
 0x169   : > { %v2036_v33 = vadd.f32 %v1910_v46, %v9596_v30 }
 0x16a   : > { %v1094_v29 = vmul.f32 %v9451_v53, %v807_v11 }
 0x16b   : > { %v9628_v48 = vadd.f32 %v2368_v9, %v2036_v33  ;;  %v9630_v5 = vpop.f32.mrf.mxu1 }
 0x16d   : > { %v738_v13 = vpop.f32.mrf.mxu0  ;;  %v2370_v50 = vpop.f32.mrf.mxu3  ;;  %v8281_v51 = vld [vmem:[#allocation2 + $0x50] sm:$0xff] }
 0x16e   : > { %v8333_v55 = vld [vmem:[#allocation2 + $0x50] sm:$0xff]  ;;  %v739_v30 = vadd.f32 %v9424_v38, %v738_v13  ;;  %1462 = vmatmul.bf16.gmra.mxu1 %v8281_v51 }
 0x16f   : > { %v8307_v57 = vld [vmem:[#allocation2 + $0x50] sm:$0xff]  ;;  %v2275_v20 = vrot.slane %v8333_v55, 1 }
 0x170   : > { %v1912_v59 = vpop.f32.mrf.mxu2  ;;  %v1767_v10 = vshll.u32 %v8307_v57, 16  ;;  %v808_v12 = vmax.f32 %v739_v30, 0.0  ;;  %v1771_v52 = vshrl.u32 %v8307_v57, 16 }
 0x171   : > { %v2037_v15 = vadd.f32 %v1912_v59, %v9603_v31  ;;  %v2276_v17 = vsel %vm2255_vm0, %v2273_v4, %v2275_v20 }
 0x172   : > { %v1769_v47 = vrot.slane %v1767_v10, 1  ;;  %v1095_v32 = vmul.f32 %v9440_v45, %v808_v12  ;;  %2412 = vmatmul.bf16.gmra.mxu3 %v2276_v17  ;;  %v4224_v10 = vrot.slane %v8430_v54, 2  ;;  %v4226_v54 = vrot.slane %v8431_v56, 2 }
 0x173   : > { %v9637_v34 = vadd.f32 %v2370_v50, %v2037_v15  ;;  %v9640_v23 = vpop.f32.mrf.mxu1 }
 0x174   : > { %v1770_v26 = vsel %vm1686_vm1, %v1765_v28, %v1769_v47  ;;  %v8615_v19 = vpack.c.bf16 %v1095_v32, %v1094_v29  ;;  %v1773_v51 = vor.u32 %v1771_v52, %v1769_v47  ;;  %v8425_v28 = vld [vmem:[%s10746_s4 + $0x170] sm:$0xff] }
 0x175   : > { %1954 = vmatmul.bf16.gmra.mxu2 %v1770_v26  ;;  %v741_v24 = vpop.f32.mrf.mxu0  ;;  %v2373_v31 = vpop.f32.mrf.mxu3  ;;  %3866 = vmatpush.bf16.msrb.mxu3 %v8425_v28 }
 0x176   : > { %8847 = vst [vmem:[#allocation2 + $0x58] sm:$0xff] %v8615_v19   ;;  %v742_v45 = vadd.f32 %v9424_v38, %v741_v24 }
 0x178   : > { %v1915_v4 = vpop.f32.mrf.mxu2  ;;  %4335 = vmatmul.bf16.gmra.mxu0 %v4223_v14  ;;  %v809_v22 = vmax.f32 %v742_v45, 0.0 }
 0x179   : > { %v2038_v53 = vadd.f32 %v1915_v4, %v9613_v41 }
 0x17a   : > { %v1096_v11 = vmul.f32 %v9464_v7, %v809_v22 }
 0x17b   : > { %v9648_v49 = vadd.f32 %v2373_v31, %v2038_v53  ;;  %v9650_v60 = vpop.f32.mrf.mxu1 }
 0x17d   : > { %v743_v37 = vpop.f32.mrf.mxu0  ;;  %v2375_v43 = vpop.f32.mrf.mxu3  ;;  %v8282_v62 = vld [vmem:[#allocation2 + $0x58] sm:$0xff] }
 0x17e   : > { %v8334_v8 = vld [vmem:[#allocation2 + $0x58] sm:$0xff]  ;;  %v744_v41 = vadd.f32 %v9424_v38, %v743_v37  ;;  %1467 = vmatmul.bf16.gmra.mxu1 %v8282_v62 }
 0x17f   : > { %v8308_v9 = vld [vmem:[#allocation2 + $0x58] sm:$0xff]  ;;  %v2277_v46 = vrot.slane %v8334_v8, 1 }
 0x180   : > { %v1917_v16 = vpop.f32.mrf.mxu2  ;;  %v1775_v33 = vshll.u32 %v8308_v9, 16  ;;  %v810_v2 = vmax.f32 %v744_v41, 0.0  ;;  %v1779_v53 = vshrl.u32 %v8308_v9, 16 }
 0x181   : > { %v2039_v13 = vadd.f32 %v1917_v16, %v9620_v58  ;;  %v2278_v50 = vsel %vm2255_vm0, %v2275_v20, %v2277_v46  ;;  %v8369_v20 = vld [vmem:[%s10746_s4 + $0xd0] sm:$0xff] }
 0x182   : > { %v1777_v55 = vrot.slane %v1775_v33, 1  ;;  %v1097_v30 = vmul.f32 %v9462_v6, %v810_v2  ;;  %2417 = vmatmul.bf16.gmra.mxu3 %v2278_v50  ;;  %v4225_v6 = vsel %vm3761_vm2, %v4222_v1, %v4224_v10  ;;  %2821 = vmatpush.bf16.msra.mxu1 %v8369_v20  ;;  %v4227_v50 = vsel %vm3761_vm2, %v4224_v10, %v4226_v54 }
 0x183   : > { %v9657_v59 = vadd.f32 %v2375_v43, %v2039_v13  ;;  %v9660_v40 = vpop.f32.mrf.mxu1 }
 0x184   : > { %v1778_v61 = vsel %vm1686_vm1, %v1773_v51, %v1777_v55  ;;  %v8620_v57 = vpack.c.bf16 %v1097_v30, %v1096_v11  ;;  %v1781_v8 = vor.u32 %v1779_v53, %v1777_v55 }
 0x185   : > { %1959 = vmatmul.bf16.gmra.mxu2 %v1778_v61  ;;  %v746_v12 = vpop.f32.mrf.mxu0  ;;  %v2378_v58 = vpop.f32.mrf.mxu3 }
 0x186   : > { %8848 = vst [vmem:[#allocation2 + $0x60] sm:$0xff] %v8620_v57   ;;  %v747_v17 = vadd.f32 %v9424_v38, %v746_v12 }
 0x188   : > { %v1920_v7 = vpop.f32.mrf.mxu2  ;;  %4340 = vmatmul.bf16.gmra.mxu0 %v4225_v6  ;;  %v811_v31 = vmax.f32 %v747_v17, 0.0 }
 0x189   : > { %v2040_v15 = vadd.f32 %v1920_v7, %v9630_v5 }
 0x18a   : > { %v1098_v41 = vmul.f32 %v9458_v0, %v811_v31 }
 0x18b   : > { %v9671_v47 = vadd.f32 %v2378_v58, %v2040_v15  ;;  %v9673_v29 = vpop.f32.mrf.mxu1  ;;  %v9693_v15 = vld [vmem:[#allocation2 + $0x38] sm:$0xff] }
 0x18d   : > { %v748_v32 = vpop.f32.mrf.mxu0  ;;  %v2380_v26 = vpop.f32.mrf.mxu3  ;;  %v8283_v19 = vld [vmem:[#allocation2 + $0x60] sm:$0xff] }
 0x18e   : > { %v8335_v24 = vld [vmem:[#allocation2 + $0x60] sm:$0xff]  ;;  %v749_v5 = vadd.f32 %v9424_v38, %v748_v32  ;;  %1472 = vmatmul.bf16.gmra.mxu1 %v8283_v19 }
 0x18f   : > { %v8309_v1 = vld [vmem:[#allocation2 + $0x60] sm:$0xff]  ;;  %v2279_v14 = vrot.slane %v8335_v24, 1 }
 0x190   : > { %v1922_v4 = vpop.f32.mrf.mxu2  ;;  %v1783_v45 = vshll.u32 %v8309_v1, 16  ;;  %v812_v37 = vmax.f32 %v749_v5, 0.0  ;;  %v1787_v6 = vshrl.u32 %v8309_v1, 16  ;;  %v4228_v1 = vrot.slane %v9693_v15, 2 }
 0x191   : > { %v2041_v43 = vadd.f32 %v1922_v4, %v9640_v23  ;;  %v2280_v62 = vsel %vm2255_vm0, %v2277_v46, %v2279_v14 }
 0x192   : > { %v1785_v22 = vrot.slane %v1783_v45, 1  ;;  %v1099_v16 = vmul.f32 %v9478_v25, %v812_v37  ;;  %2422 = vmatmul.bf16.gmra.mxu3 %v2280_v62  ;;  %v4229_v56 = vsel %vm3761_vm2, %v4226_v54, %v4228_v1 }
 0x193   : > { %v9680_v52 = vadd.f32 %v2380_v26, %v2041_v43  ;;  %v9683_v2 = vpop.f32.mrf.mxu1  ;;  %v9716_v43 = vld [vmem:[%s10745_s3] ss:$0 sm:$0xff] }
 0x194   : > { %v1786_v33 = vsel %vm1686_vm1, %v1781_v8, %v1785_v22  ;;  %v8625_v9 = vpack.c.bf16 %v1099_v16, %v1098_v41  ;;  %v1789_v26 = vor.u32 %v1787_v6, %v1785_v22 }
 0x195   : > { %1964 = vmatmul.bf16.gmra.mxu2 %v1786_v33  ;;  %v751_v13 = vpop.f32.mrf.mxu0  ;;  %v2383_v23 = vpop.f32.mrf.mxu3 }
 0x196   : > { %8849 = vst [vmem:[#allocation2 + $0x68] sm:$0xff] %v8625_v9   ;;  %v752_v25 = vadd.f32 %v9424_v38, %v751_v13 }
 0x198   : > { %v1925_v46 = vpop.f32.mrf.mxu2  ;;  %4345 = vmatmul.bf16.gmra.mxu0 %v4227_v50  ;;  %v813_v58 = vmax.f32 %v752_v25, 0.0  ;;  %v8433_v25 = vld [vmem:[#allocation2 + $0x40] sm:$0xff] }
 0x199   : > { %v2042_v0 = vadd.f32 %v1925_v46, %v9650_v60  ;;  %v4230_v15 = vrot.slane %v8433_v25, 2 }
 0x19a   : > { %v1100_v24 = vmul.f32 %v9476_v21, %v813_v58  ;;  %v8394_v21 = vld [vmem:[%s10746_s4 + $0x108] sm:$0xff] }
 0x19b   : > { %v9688_v51 = vadd.f32 %v2383_v23, %v2042_v0  ;;  %v9690_v55 = vpop.f32.mrf.mxu1  ;;  %3413 = vmatpush.bf16.msrb.mxu2 %v8394_v21 }
 0x19d   : > { %v753_v11 = vpop.f32.mrf.mxu0  ;;  %v2385_v30 = vpop.f32.mrf.mxu3  ;;  %v8284_v61 = vld [vmem:[#allocation2 + $0x68] sm:$0xff] }
 0x19e   : > { %v8336_v57 = vld [vmem:[#allocation2 + $0x68] sm:$0xff]  ;;  %v754_v20 = vadd.f32 %v9424_v38, %v753_v11  ;;  %1477 = vmatmul.bf16.gmra.mxu1 %v8284_v61 }
 0x19f   : > { %v8310_v12 = vld [vmem:[#allocation2 + $0x68] sm:$0xff]  ;;  %v2281_v10 = vrot.slane %v8336_v57, 1 }
 0x1a0   : > { %v1927_v7 = vpop.f32.mrf.mxu2  ;;  %v1791_v60 = vshll.u32 %v8310_v12, 16  ;;  %v814_v17 = vmax.f32 %v754_v20, 0.0  ;;  %v1795_v50 = vshrl.u32 %v8310_v12, 16 }
 0x1a1   : > { %v2043_v28 = vadd.f32 %v1927_v7, %v9660_v40  ;;  %v2282_v32 = vsel %vm2255_vm0, %v2279_v14, %v2281_v10 }
 0x1a2   : > { %v1793_v19 = vrot.slane %v1791_v60, 1  ;;  %v1101_v31 = vmul.f32 %v9474_v18, %v814_v17  ;;  %2427 = vmatmul.bf16.gmra.mxu3 %v2282_v32  ;;  %v8368_v18 = vld [vmem:[%s10746_s4 + $0xc8] sm:$0xff] }
 0x1a3   : > { %v9699_v38 = vadd.f32 %v2385_v30, %v2043_v28  ;;  %v9703_v53 = vpop.f32.mrf.mxu1  ;;  %2822 = vmatpush.bf16.msra.mxu1 %v8368_v18 }
 0x1a4   : > { %v1794_v5 = vsel %vm1686_vm1, %v1789_v26, %v1793_v19  ;;  %v8630_v4 = vpack.c.bf16 %v1101_v31, %v1100_v24  ;;  %v1797_v57 = vor.u32 %v1795_v50, %v1793_v19 }
 0x1a5   : > { %1969 = vmatmul.bf16.gmra.mxu2 %v1794_v5  ;;  %v756_v40 = vpop.f32.mrf.mxu0  ;;  %v2388_v45 = vpop.f32.mrf.mxu3 }
 0x1a6   : > { %8850 = vst [vmem:[#allocation2 + $0x70] sm:$0xff] %v8630_v4   ;;  %v757_v62 = vadd.f32 %v9716_v43, %v756_v40 }
 0x1a8   : > { %v1930_v14 = vpop.f32.mrf.mxu2  ;;  %4350 = vmatmul.bf16.gmra.mxu0 %v4229_v56 }
 0x1a9   : > { %v2044_v37 = vadd.f32 %v1930_v14, %v9673_v29  ;;  %v815_v29 = vmax.f32 %v757_v62, 0.0 }
 0x1ab   : > { %v9719_v8 = vadd.f32 %v2388_v45, %v2044_v37  ;;  %v9721_v22 = vpop.f32.mrf.mxu1  ;;  %v1102_v20 = vmul.f32 %v9485_v42, %v815_v29  ;;  %v9744_v37 = vld [vmem:[#allocation2 + $0x48] sm:$0xff] }
 0x1ad   : > { %v758_v41 = vpop.f32.mrf.mxu0  ;;  %v2390_v16 = vpop.f32.mrf.mxu3  ;;  %v8285_v33 = vld [vmem:[#allocation2 + $0x70] sm:$0xff] }
 0x1ae   : > { %v8337_v54 = vld [vmem:[#allocation2 + $0x70] sm:$0xff]  ;;  %v759_v13 = vadd.f32 %v9716_v43, %v758_v41  ;;  %1482 = vmatmul.bf16.gmra.mxu1 %v8285_v33 }
 0x1af   : > { %v8311_v9 = vld [vmem:[#allocation2 + $0x70] sm:$0xff]  ;;  %v2283_v46 = vrot.slane %v8337_v54, 1 }
 0x1b0   : > { %v1932_v23 = vpop.f32.mrf.mxu2  ;;  %v1799_v0 = vshll.u32 %v8311_v9, 16  ;;  %v816_v11 = vmax.f32 %v759_v13, 0.0 }
 0x1b1   : > { %v2045_v30 = vadd.f32 %v1932_v23, %v9683_v2  ;;  %v2284_v61 = vsel %vm2255_vm0, %v2281_v10, %v2283_v46  ;;  %v8424_v10 = vld [vmem:[%s10746_s4 + $0x168] sm:$0xff] }
 0x1b2   : > { %v1801_v58 = vrot.slane %v1799_v0, 1  ;;  %v1103_v7 = vmul.f32 %v9483_v39, %v816_v11  ;;  %2432 = vmatmul.bf16.gmra.mxu3 %v2284_v61  ;;  %v4231_v39 = vsel %vm3761_vm2, %v4228_v1, %v4230_v15 }
 0x1b3   : > { %v9728_v6 = vadd.f32 %v2390_v16, %v2045_v30  ;;  %v9731_v17 = vpop.f32.mrf.mxu1  ;;  %3867 = vmatpush.bf16.msrb.mxu3 %v8424_v10 }
 0x1b4   : > { %v1802_v60 = vsel %vm1686_vm1, %v1797_v57, %v1801_v58  ;;  %v8635_v12 = vpack.c.bf16 %v1103_v7, %v1102_v20 }
 0x1b5   : > { %1974 = vmatmul.bf16.gmra.mxu2 %v1802_v60  ;;  %v761_v28 = vpop.f32.mrf.mxu0  ;;  %v2393_v2 = vpop.f32.mrf.mxu3 }
 0x1b6   : > { %8851 = vst [vmem:[#allocation2 + $0x78] sm:$0xff] %v8635_v12   ;;  %v762_v26 = vadd.f32 %v9716_v43, %v761_v28 }
 0x1b8   : > { %v1935_v42 = vpop.f32.mrf.mxu2  ;;  %4355 = vmatmul.bf16.gmra.mxu0 %v4231_v39  ;;  %v817_v21 = vmax.f32 %v762_v26, 0.0  ;;  %v9770_v26 = vld [vmem:[#allocation2 + $0x50] sm:$0xff] }
 0x1b9   : > { %v2046_v32 = vadd.f32 %v1935_v42, %v9690_v55  ;;  %v1803_v55 = vshrl.u32 %v8311_v9, 16  ;;  %v4232_v9 = vrot.slane %v9744_v37, 2  ;;  %v4234_v37 = vrot.slane %v9770_v26, 2 }
 0x1ba   : > { %v1104_v29 = vmul.f32 %v9487_v44, %v817_v21  ;;  %v8393_v44 = vld [vmem:[%s10746_s4 + $0x100] sm:$0xff] }
 0x1bb   : > { %v9739_v19 = vadd.f32 %v2393_v2, %v2046_v32  ;;  %v9741_v24 = vpop.f32.mrf.mxu1  ;;  %v1805_v33 = vor.u32 %v1803_v55, %v1801_v58  ;;  %v4233_v30 = vsel %vm3761_vm2, %v4230_v15, %v4232_v9  ;;  %3414 = vmatpush.bf16.msrb.mxu2 %v8393_v44 }
 0x1bd   : > { %v763_v31 = vpop.f32.mrf.mxu0  ;;  %v2395_v5 = vpop.f32.mrf.mxu3  ;;  %v8286_v4 = vld [vmem:[#allocation2 + $0x78] sm:$0xff] }
 0x1be   : > { %v8338_v40 = vld [vmem:[#allocation2 + $0x78] sm:$0xff]  ;;  %v764_v18 = vadd.f32 %v9716_v43, %v763_v31  ;;  %1487 = vmatmul.bf16.gmra.mxu1 %v8286_v4  ;;  %v8423_v4 = vld [vmem:[%s10746_s4 + $0x160] sm:$0xff] }
 0x1bf   : > { %v8312_v45 = vld [vmem:[#allocation2 + $0x78] sm:$0xff]  ;;  %v2285_v14 = vrot.slane %v8338_v40, 1  ;;  %3868 = vmatpush.bf16.msrb.mxu3 %v8423_v4 }
 0x1c0   : > { %v1937_v1 = vpop.f32.mrf.mxu2  ;;  %v1807_v56 = vshll.u32 %v8312_v45, 16  ;;  %v818_v62 = vmax.f32 %v764_v18, 0.0  ;;  %v1811_v39 = vshrl.u32 %v8312_v45, 16 }
 0x1c1   : > { %v2047_v41 = vadd.f32 %v1937_v1, %v9703_v53  ;;  %v2286_v16 = vsel %vm2255_vm0, %v2283_v46, %v2285_v14 }
 0x1c2   : > { %v1809_v54 = vrot.slane %v1807_v56, 1  ;;  %v1105_v13 = vmul.f32 %v9493_v3, %v818_v62  ;;  %2437 = vmatmul.bf16.gmra.mxu3 %v2286_v16  ;;  %v8367_v3 = vld [vmem:[%s10746_s4 + $0xc0] sm:$0xff]  ;;  %v4235_v16 = vsel %vm3761_vm2, %v4232_v9, %v4234_v37 }
 0x1c3   : > { %v9750_v23 = vadd.f32 %v2395_v5, %v2047_v41  ;;  %v9754_v25 = vpop.f32.mrf.mxu1  ;;  %2823 = vmatpush.bf16.msra.mxu1 %v8367_v3 }
 0x1c4   : > { %v1810_v50 = vsel %vm1686_vm1, %v1805_v33, %v1809_v54  ;;  %v8640_v0 = vpack.c.bf16 %v1105_v13, %v1104_v29  ;;  %v1813_v21 = vor.u32 %v1811_v39, %v1809_v54  ;;  %v8421_v54 = vld [vmem:[%s10746_s4 + $0x150] sm:$0xff] }
 0x1c5   : > { %1979 = vmatmul.bf16.gmra.mxu2 %v1810_v50  ;;  %v766_v53 = vpop.f32.mrf.mxu0  ;;  %v2398_v11 = vpop.f32.mrf.mxu3 }
 0x1c6   : > { %8852 = vst [vmem:[#allocation2 + $0x80] sm:$0xff] %v8640_v0   ;;  %v767_v57 = vadd.f32 %v9716_v43, %v766_v53 }
 0x1c8   : > { %v1940_v46 = vpop.f32.mrf.mxu2  ;;  %4360 = vmatmul.bf16.gmra.mxu0 %v4233_v30  ;;  %v819_v10 = vmax.f32 %v767_v57, 0.0 }
 0x1c9   : > { %v2048_v61 = vadd.f32 %v1940_v46, %v9721_v22  ;;  %v8420_v46 = vld [vmem:[%s10746_s4 + $0x148] sm:$0xff] }
 0x1ca   : > { %v1106_v1 = vmul.f32 %v9491_v63, %v819_v10  ;;  %v8422_v63 = vld [vmem:[%s10746_s4 + $0x158] sm:$0xff] }
 0x1cb   : > { %v9765_v58 = vadd.f32 %v2398_v11, %v2048_v61  ;;  %v9767_v20 = vpop.f32.mrf.mxu1  ;;  %3869 = vmatpush.bf16.msrb.mxu3 %v8422_v63 }
 0x1cd   : > { %v768_v7 = vpop.f32.mrf.mxu0  ;;  %v2400_v60 = vpop.f32.mrf.mxu3  ;;  %v8287_v12 = vld [vmem:[#allocation2 + $0x80] sm:$0xff] }
 0x1ce   : > { %v8339_v28 = vld [vmem:[#allocation2 + $0x80] sm:$0xff]  ;;  %v769_v42 = vadd.f32 %v9716_v43, %v768_v7  ;;  %1492 = vmatmul.bf16.gmra.mxu1 %v8287_v12 }
 0x1cf   : > { %v8313_v2 = vld [vmem:[#allocation2 + $0x80] sm:$0xff]  ;;  %v2287_v22 = vrot.slane %v8339_v28, 1  ;;  %3870 = vmatpush.bf16.msrb.mxu3 %v8421_v54 }
 0x1d0   : > { %v1942_v15 = vpop.f32.mrf.mxu2  ;;  %v1815_v32 = vshll.u32 %v8313_v2, 16  ;;  %v820_v31 = vmax.f32 %v769_v42, 0.0  ;;  %v1819_v57 = vshrl.u32 %v8313_v2, 16 }
 0x1d1   : > { %v2049_v5 = vadd.f32 %v1942_v15, %v9731_v17  ;;  %v2288_v40 = vsel %vm2255_vm0, %v2285_v14, %v2287_v22 }
 0x1d2   : > { %v1817_v18 = vrot.slane %v1815_v32, 1  ;;  %v1107_v55 = vmul.f32 %v9499_v27, %v820_v31  ;;  %2442 = vmatmul.bf16.gmra.mxu3 %v2288_v40  ;;  %v8349_v40 = vld [vmem:[#allocation2 + $0x8] sm:$0xf0] }
 0x1d3   : > { %v9779_v45 = vadd.f32 %v2400_v60, %v2049_v5  ;;  %v9783_v62 = vpop.f32.mrf.mxu1  ;;  %v9808_v60 = vld [vmem:[#allocation2 + $0x58] sm:$0xff]  ;;  %3871 = vmatpush.bf16.msrb.mxu3 %v8420_v46 }
 0x1d4   : > { %v1818_v56 = vsel %vm1686_vm1, %v1813_v21, %v1817_v18  ;;  %v8645_v17 = vpack.c.bf16 %v1107_v55, %v1106_v1  ;;  %v1821_v42 = vor.u32 %v1819_v57, %v1817_v18  ;;  %v8350_v21 = vld [vmem:[#allocation2 + $0x10] sm:$0xff]  ;;  %v8504_v18 = vld [vmem:[%s10746_s4 + $0x238] sm:$0xff] }
 0x1d5   : > { %1984 = vmatmul.bf16.gmra.mxu2 %v1818_v56  ;;  %v771_v41 = vpop.f32.mrf.mxu0  ;;  %v2403_v14 = vpop.f32.mrf.mxu3  ;;  %v8478_v56 = vld [vmem:[%s10746_s4 + $0x1f8] sm:$0xff] }
 0x1d6   : > { %8853 = vst [vmem:[#allocation2 + $0x88] sm:$0xff] %v8645_v17   ;;  %v772_v29 = vadd.f32 %v9716_v43, %v771_v41  ;;  %5371 = vmatpush.bf16.msra.mxu2 %v8504_v18  ;;  %v2714_v17 = vrot.slane %v8350_v21, 1  ;;  %4913 = vmatpush.bf16.msrb.mxu1 %v8478_v56  ;;  %v7570_v21 = vld [vmem:[#allocation2 + $0x8] sm:$0xc]  ;;  %v8402_v18 = vld [vmem:[#allocation2 + $0x10] sm:$0xff] }
 0x1d8   : > { %v1945_v27 = vpop.f32.mrf.mxu2  ;;  %4365 = vmatmul.bf16.gmra.mxu0 %v4235_v16 }
 0x1d9   : > { %v2050_v33 = vadd.f32 %v1945_v27, %v9741_v24  ;;  %v821_v24 = vmax.f32 %v772_v29, 0.0 }
 0x1db   : > { %v9794_v13 = vadd.f32 %v2403_v14, %v2050_v33  ;;  %v9796_v50 = vpop.f32.mrf.mxu1  ;;  %v1108_v39 = vmul.f32 %v9506_v36, %v821_v24 }
 0x1dd   : > { %v773_v0 = vpop.f32.mrf.mxu0  ;;  %v2405_v53 = vpop.f32.mrf.mxu3  ;;  %v8288_v11 = vld [vmem:[#allocation2 + $0x88] sm:$0xff] }
 0x1de   : > { %v9798_v44 = vld [vmem:[#allocation2 + $0x88] sm:$0xff]  ;;  %v774_v3 = vadd.f32 %v9716_v43, %v773_v0  ;;  %1497 = vmatmul.bf16.gmra.mxu1 %v8288_v11  ;;  %v8419_v43 = vld [vmem:[%s10746_s4 + $0x140] sm:$0xff] }
 0x1df   : > { %v9800_v9 = vld [vmem:[#allocation2 + $0x88] sm:$0xff]  ;;  %v2289_v61 = vrot.slane %v9798_v44, 1  ;;  %3872 = vmatpush.bf16.msrb.mxu3 %v8419_v43  ;;  %v9836_v0 = vld [vmem:[#allocation2 + $0x60] sm:$0xff] }
 0x1e0   : > { %v1947_v30 = vpop.f32.mrf.mxu2  ;;  %v1823_v7 = vshll.u32 %v9800_v9, 16  ;;  %v822_v12 = vmax.f32 %v774_v3, 0.0  ;;  %v1827_v3 = vshrl.u32 %v9800_v9, 16  ;;  %v4238_v57 = vrot.slane %v9836_v0, 2 }
 0x1e1   : > { %v2051_v28 = vadd.f32 %v1947_v30, %v9754_v25  ;;  %v2290_v10 = vsel %vm2255_vm0, %v2287_v22, %v2289_v61  ;;  %v4236_v25 = vrot.slane %v9808_v60, 2  ;;  %v7330_v22 = vld [vmem:[#allocation2 + $0x8] sm:$0xe] }
 0x1e2   : > { %v1825_v15 = vrot.slane %v1823_v7, 1  ;;  %v1109_v2 = vmul.f32 %v9504_v35, %v822_v12  ;;  %2447 = vmatmul.bf16.gmra.mxu3 %v2290_v10  ;;  %v7331_v55 = vor.u32 %v8349_v40, %v7330_v22  ;;  %v7450_v10 = vld [vmem:[#allocation2 + $0x8] sm:$0xe] }
 0x1e3   : > { %v9817_v32 = vadd.f32 %v2405_v53, %v2051_v28  ;;  %v9821_v5 = vpop.f32.mrf.mxu1  ;;  %v4237_v35 = vsel %vm3761_vm2, %v4234_v37, %v4236_v25 }
 0x1e4   : > { %v1826_v26 = vsel %vm1686_vm1, %v1821_v42, %v1825_v15  ;;  %v8650_v31 = vpack.c.bf16 %v1109_v2, %v1108_v39  ;;  %v2713_v37 = vrot.slane %v7331_v55, 1  ;;  %v1829_v12 = vor.u32 %v1827_v3, %v1825_v15  ;;  %v8351_v39 = vld [vmem:[#allocation2 + $0x18] sm:$0xff]  ;;  %v8376_v2 = vld [vmem:[#allocation2 + $0x10] sm:$0xff] }
 0x1e5   : > { %1989 = vmatmul.bf16.gmra.mxu2 %v1826_v26  ;;  %v2408_v4 = vpop.f32.mrf.mxu3  ;;  %v4239_v26 = vsel %vm3761_vm2, %v4236_v25, %v4238_v57  ;;  %v2716_v22 = vrot.slane %v8351_v39, 1  ;;  %v3183_v15 = vshll.u32 %v8376_v2, 16 }
 0x1e6   : > { %8854 = vst [vmem:[#allocation2 + $0x90] sm:$0xff] %v8650_v31   ;;  %v2715_v33 = vsel %vm2255_vm0, %v2713_v37, %v2714_v17 }
 0x1e7   : > { %v2717_v37 = vsel %vm2255_vm0, %v2714_v17, %v2716_v22 }
 0x1e8   : > { %v1950_v36 = vpop.f32.mrf.mxu2  ;;  %4370 = vmatmul.bf16.gmra.mxu0 %v4237_v35 }
 0x1e9   : > { %v2052_v1 = vadd.f32 %v1950_v36, %v9767_v20  ;;  %v8401_v36 = vld [vmem:[#allocation2 + $0x8] sm:$0xf0] }
 0x1ea   : > { %v7571_v25 = vor.u32 %v8401_v36, %v7570_v21 }
 0x1eb   : > { %v9831_v41 = vadd.f32 %v2408_v4, %v2052_v1  ;;  %v9833_v14 = vpop.f32.mrf.mxu1 }
 0x1ec   : > { %v3762_v0 = vrot.slane %v7571_v25, 2 }
 0x1ed   : > { %v2410_v63 = vpop.f32.mrf.mxu3  ;;  %v2144_v27 = vld [vmem:[#allocation2 + $0x90] sm:$0x1] }
 0x1ee   : > { %v1575_v16 = vld [vmem:[#allocation2 + $0x90] sm:$0x1]  ;;  %v2235_v20 = vunpack.c.l.b16 %v2144_v27  ;;  %2824 = vmatmul.bf16.vlgmr.msra.gmra.mxu1 %v2715_v33 }
 0x1ef   : > { %v1666_v54 = vunpack.c.l.b16 %v1575_v16  ;;  %v8438_v16 = vld [vmem:[#allocation2 + $0x68] sm:$0xff] }
 0x1f0   : > { %v1952_v29 = vpop.f32.mrf.mxu2  ;;  %v2254_v11 = vpack.c.b16 %v2235_v20, %v2235_v20  ;;  %v3763_v20 = vrot.slane %v8402_v18, 2  ;;  %v8439_v18 = vld [vmem:[#allocation2 + $0x70] sm:$0xff] }
 0x1f1   : > { %v2053_v53 = vadd.f32 %v1952_v29, %v9783_v62  ;;  %v1685_v44 = vpack.c.b16 %v1666_v54, %v1666_v54  ;;  %v8375_v62 = vld [vmem:[#allocation2 + $0x8] sm:$0xf0]  ;;  %v4242_v25 = vrot.slane %v8439_v18, 2 }
 0x1f2   : > { %v2291_v24 = vrot.slane %v2254_v11, 1  ;;  %v7451_v4 = vor.u32 %v8375_v62, %v7450_v10  ;;  %v3764_v17 = vsel %vm3761_vm2, %v3762_v0, %v3763_v20  ;;  %v8503_v62 = vld [vmem:[%s10746_s4 + $0x230] sm:$0xff] }
 0x1f3   : > { %v1831_v46 = vshll.u32 %v1685_v44, 16  ;;  %v9840_v30 = vadd.f32 %v2410_v63, %v2053_v53  ;;  %v9843_v7 = vpop.f32.mrf.mxu1  ;;  %v4240_v44 = vrot.slane %v8438_v16, 2  ;;  %5372 = vmatpush.bf16.msra.mxu2 %v8503_v62 }
 0x1f4   : > { %v2292_v60 = vsel %vm2255_vm0, %v2289_v61, %v2291_v24  ;;  %v3180_v61 = vshrl.u32 %v8376_v2, 16  ;;  %v3172_v1 = vshrl.u32 %v7451_v4, 16  ;;  %v3175_v55 = vshll.u32 %v7451_v4, 16  ;;  %v8403_v4 = vld [vmem:[#allocation2 + $0x18] sm:$0xff] }
 0x1f5   : > { %v1833_v28 = vrot.slane %v1831_v46, 1  ;;  %2452 = vmatmul.bf16.gmra.mxu3 %v2292_v60  ;;  %v2413_v43 = vpop.f32.mrf.mxu3 }
 0x1f6   : > { %v3182_v63 = vrot.slane %v3180_v61, 1  ;;  %v3174_v54 = vrot.slane %v3172_v1, 1  ;;  %v3177_v29 = vrot.slane %v3175_v55, 2  ;;  %v3765_v55 = vrot.slane %v8403_v4, 2 }
 0x1f7   : > { %v1834_v42 = vsel %vm1686_vm1, %v1829_v12, %v1833_v28  ;;  %v8352_v12 = vld [vmem:[#allocation2 + $0x20] sm:$0xff] }
 0x1f8   : > { %1994 = vmatmul.bf16.gmra.mxu2 %v1834_v42  ;;  %v1955_v9 = vpop.f32.mrf.mxu2  ;;  %4375 = vmatmul.bf16.gmra.mxu0 %v4239_v26  ;;  %v3178_v3 = vor.u32 %v3177_v29, %v3174_v54  ;;  %v9866_v42 = vpop.f32.mrf.mxu0  ;;  %v2718_v39 = vrot.slane %v8352_v12, 1  ;;  %v8378_v54 = vld [vmem:[#allocation2 + $0x20] sm:$0xff] }
 0x1f9   : > { %v2054_v31 = vadd.f32 %v1955_v9, %v9796_v50  ;;  %v3185_v50 = vrot.slane %v3183_v15, 2 }
 0x1fb   : > { %v9849_v40 = vadd.f32 %v2413_v43, %v2054_v31  ;;  %v9851_v35 = vpop.f32.mrf.mxu1  ;;  %v3186_v53 = vor.u32 %v3185_v50, %v3182_v63  ;;  %v4241_v43 = vsel %vm3761_vm2, %v4238_v57, %v4240_v44  ;;  %v2719_v57 = vsel %vm2255_vm0, %v2716_v22, %v2718_v39 }
 0x1fd   : > { %v2415_v56 = vpop.f32.mrf.mxu3  ;;  %v3187_v60 = vsel %vm3170_vm3, %v3178_v3, %v3186_v53  ;;  %v3198_v3 = vshrl.u32 %v8378_v54, 16 }
 0x1fe   : > { %2829 = vmatmul.bf16.gmra.mxu1 %v2717_v37 }
 0x200   : > { %v1957_v27 = vpop.f32.mrf.mxu2  ;;  %v9877_v63 = vpop.f32.mrf.mxu0 }
 0x201   : > { %v2055_v33 = vadd.f32 %v1957_v27, %v9821_v5  ;;  %v8377_v5 = vld [vmem:[#allocation2 + $0x18] sm:$0xff]  ;;  %v3766_v27 = vsel %vm3761_vm2, %v3763_v20, %v3765_v55  ;;  %v8404_v20 = vld [vmem:[#allocation2 + $0x20] sm:$0xff] }
 0x202   : > { %v3189_v2 = vshrl.u32 %v8377_v5, 16  ;;  %v3192_v9 = vshll.u32 %v8377_v5, 16 }
 0x203   : > { %v9855_v11 = vadd.f32 %v2415_v56, %v2055_v33  ;;  %v9857_v24 = vpop.f32.mrf.mxu1  ;;  %v8353_v33 = vld [vmem:[#allocation2 + $0x28] sm:$0xff] }
 0x204   : > { %v3191_v15 = vrot.slane %v3189_v2, 1  ;;  %v3194_v21 = vrot.slane %v3192_v9, 2  ;;  %v3767_v2 = vrot.slane %v8404_v20, 2 }
 0x205   : > { %3873 = vmatmul.bf16.vlgmr.msrb.gmra.mxu3 %v3764_v17  ;;  %v2418_v46 = vpop.f32.mrf.mxu3  ;;  %v2720_v17 = vrot.slane %v8353_v33, 1 }
 0x206   : > { %v3195_v56 = vor.u32 %v3194_v21, %v3191_v15 }
 0x208   : > { %3415 = vmatmul.bf16.vlgmr.msrb.gmra.mxu2 %v3187_v60  ;;  %v1960_v28 = vpop.f32.mrf.mxu2  ;;  %4380 = vmatmul.bf16.gmra.mxu0 %v4241_v43  ;;  %v3196_v16 = vsel %vm3170_vm3, %v3186_v53, %v3195_v56  ;;  %v2721_v53 = vsel %vm2255_vm0, %v2718_v39, %v2720_v17  ;;  %v3200_v43 = vrot.slane %v3198_v3, 1  ;;  %v8354_v39 = vld [vmem:[#allocation2 + $0x30] sm:$0xff] }
 0x209   : > { %v2056_v10 = vadd.f32 %v1960_v28, %v9833_v14  ;;  %v8477_v14 = vld [vmem:[%s10746_s4 + $0x1f0] sm:$0xff]  ;;  %v9885_v28 = vpop.f32.mrf.mxu0 }
 0x20a   : > { %4914 = vmatpush.bf16.msrb.mxu1 %v8477_v14 }
 0x20b   : > { %v9868_v26 = vadd.f32 %v2418_v46, %v2056_v10  ;;  %v1473_v31 = vpop.f32.mrf.mxu1  ;;  %v3201_v46 = vshll.u32 %v8378_v54, 16 }
 0x20d   : > { %v2420_v61 = vpop.f32.mrf.mxu3  ;;  %v3203_v10 = vrot.slane %v3201_v46, 2 }
 0x20e   : > { %2834 = vmatmul.bf16.gmra.mxu1 %v2719_v57  ;;  %v3768_v57 = vsel %vm3761_vm2, %v3765_v55, %v3767_v2 }
 0x20f   : > { %v3204_v9 = vor.u32 %v3203_v10, %v3200_v43 }
 0x210   : > { %v1962_v36 = vpop.f32.mrf.mxu2 }
 0x211   : > { %v2057_v1 = vadd.f32 %v1962_v36, %v9843_v7  ;;  %v4243_v7 = vsel %vm3761_vm2, %v4240_v44, %v4242_v25  ;;  %v8440_v44 = vld [vmem:[#allocation2 + $0x78] sm:$0xff]  ;;  %v3205_v21 = vsel %vm3170_vm3, %v3195_v56, %v3204_v9  ;;  %v8379_v36 = vld [vmem:[#allocation2 + $0x28] sm:$0xff] }
 0x212   : > { %v3210_v33 = vshll.u32 %v8379_v36, 16  ;;  %v8502_v56 = vld [vmem:[%s10746_s4 + $0x228] sm:$0xff] }
 0x213   : > { %v9875_v37 = vadd.f32 %v2420_v61, %v2057_v1  ;;  %v1475_v50 = vpop.f32.mrf.mxu1  ;;  %v4244_v61 = vrot.slane %v8440_v44, 2  ;;  %5373 = vmatpush.bf16.msra.mxu2 %v8502_v56 }
 0x215   : > { %3878 = vmatmul.bf16.gmra.mxu3 %v3766_v27  ;;  %v2423_v22 = vpop.f32.mrf.mxu3  ;;  %v4245_v1 = vsel %vm3761_vm2, %v4242_v25, %v4244_v61  ;;  %v9894_v27 = vpop.f32.mrf.mxu0  ;;  %v3212_v25 = vrot.slane %v3210_v33, 2 }
 0x218   : > { %3420 = vmatmul.bf16.gmra.mxu2 %v3196_v16  ;;  %v1965_v29 = vpop.f32.mrf.mxu2  ;;  %4385 = vmatmul.bf16.gmra.mxu0 %v4243_v7  ;;  %v3207_v16 = vshrl.u32 %v8379_v36, 16 }
 0x219   : > { %v2058_v0 = vadd.f32 %v1965_v29, %v9851_v35  ;;  %v8405_v29 = vld [vmem:[#allocation2 + $0x28] sm:$0xff] }
 0x21a   : > { %v3209_v3 = vrot.slane %v3207_v16, 1 }
 0x21b   : > { %v9883_v60 = vadd.f32 %v2423_v22, %v2058_v0  ;;  %v1478_v12 = vpop.f32.mrf.mxu1  ;;  %v2722_v22 = vrot.slane %v8354_v39, 1 }
 0x21c   : > { %v3213_v10 = vor.u32 %v3212_v25, %v3209_v3 }
 0x21d   : > { %v2425_v5 = vpop.f32.mrf.mxu3  ;;  %v2723_v0 = vsel %vm2255_vm0, %v2720_v17, %v2722_v22  ;;  %v9905_v43 = vpop.f32.mrf.mxu0 }
 0x21e   : > { %2839 = vmatmul.bf16.gmra.mxu1 %v2721_v53  ;;  %v8476_v53 = vld [vmem:[%s10746_s4 + $0x1e8] sm:$0xff]  ;;  %10757 = vst [vmem:[#allocation9_spill] sm:$0xff] %v9905_v43 }
 0x21f   : > { %4915 = vmatpush.bf16.msrb.mxu1 %v8476_v53 }
 0x220   : > { %v1967_v62 = vpop.f32.mrf.mxu2 }
 0x221   : > { %v2059_v35 = vadd.f32 %v1967_v62, %v9857_v24 }
 0x223   : > { %v9889_v4 = vadd.f32 %v2425_v5, %v2059_v35  ;;  %v1480_v14 = vpop.f32.mrf.mxu1  ;;  %v3769_v5 = vrot.slane %v8405_v29, 2 }
 0x225   : > { %3883 = vmatmul.bf16.gmra.mxu3 %v3768_v57  ;;  %v2428_v15 = vpop.f32.mrf.mxu3  ;;  %v3770_v35 = vsel %vm3761_vm2, %v3767_v2, %v3769_v5  ;;  %v9914_v29 = vpop.f32.mrf.mxu0 }
 0x226   : > { %10758 = vst [vmem:[#allocation10_spill] sm:$0xff] %v9914_v29 }
 0x228   : > { %3425 = vmatmul.bf16.gmra.mxu2 %v3205_v21  ;;  %v1970_v18 = vpop.f32.mrf.mxu2  ;;  %4390 = vmatmul.bf16.gmra.mxu0 %v4245_v1  ;;  %v8380_v21 = vld [vmem:[#allocation2 + $0x30] sm:$0xff] }
 0x229   : > { %v2060_v24 = vadd.f32 %v1970_v18, %v1473_v31  ;;  %v8441_v31 = vld [vmem:[#allocation2 + $0x80] sm:$0xff]  ;;  %v3219_v16 = vshll.u32 %v8380_v21, 16 }
 0x22a   : > { %v4246_v44 = vrot.slane %v8441_v31, 2 }
 0x22b   : > { %v9896_v54 = vadd.f32 %v2428_v15, %v2060_v24  ;;  %v1483_v55 = vpop.f32.mrf.mxu1  ;;  %v3214_v15 = vsel %vm3170_vm3, %v3204_v9, %v3213_v10  ;;  %v3216_v24 = vshrl.u32 %v8380_v21, 16  ;;  %v3221_v3 = vrot.slane %v3219_v16, 2  ;;  %v8356_v21 = vld [vmem:[#allocation2 + $0x40] sm:$0xff] }
 0x22c   : > { %v4247_v36 = vsel %vm3761_vm2, %v4244_v61, %v4246_v44 }
 0x22d   : > { %v2430_v7 = vpop.f32.mrf.mxu3 }
 0x22e   : > { %2844 = vmatmul.bf16.gmra.mxu1 %v2723_v0  ;;  %v3218_v0 = vrot.slane %v3216_v24, 1  ;;  %v2726_v24 = vrot.slane %v8356_v21, 1 }
 0x230   : > { %v1972_v46 = vpop.f32.mrf.mxu2  ;;  %v3222_v31 = vor.u32 %v3221_v3, %v3218_v0 }
 0x231   : > { %v2061_v20 = vadd.f32 %v1972_v46, %v1475_v50  ;;  %v8355_v50 = vld [vmem:[#allocation2 + $0x38] sm:$0xff]  ;;  %v8442_v46 = vld [vmem:[#allocation2 + $0x88] sm:$0xff] }
 0x232   : > { %v2724_v1 = vrot.slane %v8355_v50, 1  ;;  %v4248_v53 = vrot.slane %v8442_v46, 2  ;;  %v9920_v50 = vpop.f32.mrf.mxu0 }
 0x233   : > { %v9907_v62 = vadd.f32 %v2430_v7, %v2061_v20  ;;  %v1485_v17 = vpop.f32.mrf.mxu1  ;;  %v8406_v7 = vld [vmem:[#allocation2 + $0x30] sm:$0xff]  ;;  %10759 = vst [vmem:[#allocation11_spill] sm:$0xff] %v9920_v50 }
 0x234   : > { %v2725_v9 = vsel %vm2255_vm0, %v2722_v22, %v2724_v1  ;;  %v3223_v22 = vsel %vm3170_vm3, %v3213_v10, %v3222_v31  ;;  %v2727_v3 = vsel %vm2255_vm0, %v2724_v1, %v2726_v24 }
 0x235   : > { %3888 = vmatmul.bf16.gmra.mxu3 %v3770_v35  ;;  %v2433_v57 = vpop.f32.mrf.mxu3 }
 0x238   : > { %3430 = vmatmul.bf16.gmra.mxu2 %v3214_v15  ;;  %v1975_v39 = vpop.f32.mrf.mxu2  ;;  %4395 = vmatmul.bf16.gmra.mxu0 %v4247_v36 }
 0x239   : > { %v2062_v18 = vadd.f32 %v1975_v39, %v1478_v12  ;;  %v3771_v12 = vrot.slane %v8406_v7, 2  ;;  %v8381_v39 = vld [vmem:[#allocation2 + $0x38] sm:$0xff] }
 0x23a   : > { %v3225_v16 = vshrl.u32 %v8381_v39, 16  ;;  %v3228_v7 = vshll.u32 %v8381_v39, 16 }
 0x23b   : > { %v9912_v33 = vadd.f32 %v2433_v57, %v2062_v18  ;;  %v1488_v2 = vpop.f32.mrf.mxu1  ;;  %v3772_v57 = vsel %vm3761_vm2, %v3769_v5, %v3771_v12 }
 0x23c   : > { %v3230_v10 = vrot.slane %v3228_v7, 2 }
 0x23d   : > { %v2435_v56 = vpop.f32.mrf.mxu3 }
 0x23e   : > { %2849 = vmatmul.bf16.gmra.mxu1 %v2725_v9  ;;  %v8407_v9 = vld [vmem:[#allocation2 + $0x38] sm:$0xff] }
 0x240   : > { %v1977_v25 = vpop.f32.mrf.mxu2 }
 0x241   : > { %v2063_v61 = vadd.f32 %v1977_v25, %v1480_v14  ;;  %v4249_v14 = vsel %vm3761_vm2, %v4246_v44, %v4248_v53  ;;  %v3227_v25 = vrot.slane %v3225_v16, 1  ;;  %v8357_v16 = vld [vmem:[#allocation2 + $0x48] sm:$0xff] }
 0x243   : > { %v9917_v20 = vadd.f32 %v2435_v56, %v2063_v61  ;;  %v1490_v35 = vpop.f32.mrf.mxu1  ;;  %v8443_v61 = vld [vmem:[#allocation2 + $0x90] sm:$0xff] }
 0x244   : > { %v4250_v39 = vrot.slane %v8443_v61, 2 }
 0x245   : > { %3893 = vmatmul.bf16.gmra.mxu3 %v3772_v57  ;;  %v2438_v15 = vpop.f32.mrf.mxu3  ;;  %v9927_v57 = vpop.f32.mrf.mxu0 }
 0x246   : > { %10760 = vst [vmem:[#allocation12_spill] sm:$0xff] %v9927_v57 }
 0x248   : > { %3435 = vmatmul.bf16.gmra.mxu2 %v3223_v22  ;;  %v1980_v36 = vpop.f32.mrf.mxu2  ;;  %4400 = vmatmul.bf16.gmra.mxu0 %v4249_v14  ;;  %v8501_v22 = vld [vmem:[%s10746_s4 + $0x220] sm:$0xff] }
 0x249   : > { %v2064_v18 = vadd.f32 %v1980_v36, %v1483_v55  ;;  %v3773_v55 = vrot.slane %v8407_v9, 2  ;;  %5374 = vmatpush.bf16.msra.mxu2 %v8501_v22  ;;  %v4251_v9 = vsel %vm3761_vm2, %v4248_v53, %v4250_v39 }
 0x24b   : > { %v9924_v56 = vadd.f32 %v2438_v15, %v2064_v18  ;;  %v1493_v5 = vpop.f32.mrf.mxu1  ;;  %v3231_v15 = vor.u32 %v3230_v10, %v3227_v25  ;;  %v3774_v1 = vsel %vm3761_vm2, %v3771_v12, %v3773_v55  ;;  %v2728_v12 = vrot.slane %v8357_v16, 1 }
 0x24d   : > { %v2440_v0 = vpop.f32.mrf.mxu3  ;;  %v3232_v18 = vsel %vm3170_vm3, %v3222_v31, %v3231_v15  ;;  %v9942_v25 = vpop.f32.mrf.mxu0  ;;  %v2729_v53 = vsel %vm2255_vm0, %v2726_v24, %v2728_v12 }
 0x24e   : > { %2854 = vmatmul.bf16.gmra.mxu1 %v2727_v3  ;;  %10761 = vst [vmem:[#allocation13_spill] sm:$0xff] %v9942_v25 }
 0x250   : > { %v1982_v46 = vpop.f32.mrf.mxu2 }
 0x251   : > { %v2065_v44 = vadd.f32 %v1982_v46, %v1485_v17  ;;  %v8382_v17 = vld [vmem:[#allocation2 + $0x40] sm:$0xff] }
 0x252   : > { %v3234_v10 = vshrl.u32 %v8382_v17, 16  ;;  %v3237_v46 = vshll.u32 %v8382_v17, 16 }
 0x253   : > { %v9932_v21 = vadd.f32 %v2440_v0, %v2065_v44  ;;  %v9934_v36 = vpop.f32.mrf.mxu1  ;;  %v8475_v0 = vld [vmem:[%s10746_s4 + $0x1e0] sm:$0xff] }
 0x254   : > { %4916 = vmatpush.bf16.msrb.mxu1 %v8475_v0  ;;  %v8408_v44 = vld [vmem:[#allocation2 + $0x40] sm:$0xff] }
 0x255   : > { %3898 = vmatmul.bf16.gmra.mxu3 %v3774_v1  ;;  %v2443_v14 = vpop.f32.mrf.mxu3  ;;  %v3236_v1 = vrot.slane %v3234_v10, 1  ;;  %v9951_v16 = vpop.f32.mrf.mxu0  ;;  %v8358_v10 = vld [vmem:[#allocation2 + $0x50] sm:$0xff] }
 0x256   : > { %10762 = vst [vmem:[#allocation14_spill] sm:$0xff] %v9951_v16 }
 0x258   : > { %3440 = vmatmul.bf16.gmra.mxu2 %v3232_v18  ;;  %v1985_v7 = vpop.f32.mrf.mxu2  ;;  %4405 = vmatmul.bf16.gmra.mxu0 %v4251_v9  ;;  %v3239_v18 = vrot.slane %v3237_v46, 2  ;;  %v8444_v9 = vld [vmem:[#allocation2 + $0x98] sm:$0xff]  ;;  %v8383_v46 = vld [vmem:[#allocation2 + $0x48] sm:$0xff] }
 0x259   : > { %v2066_v3 = vadd.f32 %v1985_v7, %v1488_v2  ;;  %v3775_v7 = vrot.slane %v8408_v44, 2 }
 0x25a   : > { %v3240_v0 = vor.u32 %v3239_v18, %v3236_v1  ;;  %v3243_v1 = vshrl.u32 %v8383_v46, 16  ;;  %v3246_v18 = vshll.u32 %v8383_v46, 16 }
 0x25b   : > { %v9944_v61 = vadd.f32 %v2443_v14, %v2066_v3  ;;  %v9946_v31 = vpop.f32.mrf.mxu1  ;;  %v3776_v17 = vsel %vm3761_vm2, %v3773_v55, %v3775_v7  ;;  %v4252_v3 = vrot.slane %v8444_v9, 2  ;;  %v8409_v9 = vld [vmem:[#allocation2 + $0x48] sm:$0xff] }
 0x25c   : > { %v3241_v24 = vsel %vm3170_vm3, %v3231_v15, %v3240_v0  ;;  %v3245_v29 = vrot.slane %v3243_v1, 1  ;;  %v8359_v1 = vld [vmem:[#allocation2 + $0x58] sm:$0xff] }
 0x25d   : > { %v2445_v22 = vpop.f32.mrf.mxu3  ;;  %v9963_v15 = vpop.f32.mrf.mxu0 }
 0x25e   : > { %2859 = vmatmul.bf16.gmra.mxu1 %v2729_v53  ;;  %v2730_v53 = vrot.slane %v8358_v10, 1 }
 0x260   : > { %v1987_v57 = vpop.f32.mrf.mxu2 }
 0x261   : > { %v2067_v2 = vadd.f32 %v1987_v57, %v1490_v35  ;;  %v4253_v57 = vsel %vm3761_vm2, %v4250_v39, %v4252_v3  ;;  %v3248_v39 = vrot.slane %v3246_v18, 2  ;;  %v8384_v18 = vld [vmem:[#allocation2 + $0x50] sm:$0xff] }
 0x263   : > { %v9949_v25 = vadd.f32 %v2445_v22, %v2067_v2  ;;  %v9953_v14 = vpop.f32.mrf.mxu1  ;;  %v4108_v22 = vld [vmem:[#allocation2 + $0xa0] sm:$0x3] }
 0x264   : > { %v4199_v55 = vunpack.c.l.b16 %v4108_v22 }
 0x265   : > { %3903 = vmatmul.bf16.gmra.mxu3 %v3776_v17  ;;  %v2448_v50 = vpop.f32.mrf.mxu3 }
 0x268   : > { %3445 = vmatmul.bf16.gmra.mxu2 %v3241_v24  ;;  %v1990_v35 = vpop.f32.mrf.mxu2  ;;  %4410 = vmatmul.bf16.gmra.mxu0 %v4253_v57  ;;  %v2731_v24 = vsel %vm2255_vm0, %v2728_v12, %v2730_v53  ;;  %v3249_v57 = vor.u32 %v3248_v39, %v3245_v29  ;;  %v8500_v29 = vld [vmem:[%s10746_s4 + $0x218] sm:$0xff] }
 0x269   : > { %v2068_v44 = vadd.f32 %v1990_v35, %v1493_v5  ;;  %v4218_v35 = vpack.c.b16 %v4199_v55, %v4199_v55  ;;  %5375 = vmatpush.bf16.msra.mxu2 %v8500_v29 }
 0x26a   : > { %v3250_v12 = vsel %vm3170_vm3, %v3240_v0, %v3249_v57 }
 0x26b   : > { %v9958_v2 = vadd.f32 %v2448_v50, %v2068_v44  ;;  %v2825_v17 = vpop.f32.mrf.mxu1  ;;  %v3777_v50 = vrot.slane %v8409_v9, 2  ;;  %v4254_v22 = vrot.slane %v4218_v35, 2 }
 0x26c   : > { %v9961_v16 = vadd.f32 %v2825_v17, %v9628_v48 }
 0x26d   : > { %v2450_v10 = vpop.f32.mrf.mxu3  ;;  %v3778_v48 = vsel %vm3761_vm2, %v3775_v7, %v3777_v50  ;;  %v4255_v55 = vsel %vm3761_vm2, %v4252_v3, %v4254_v22  ;;  %v8474_v3 = vld [vmem:[%s10746_s4 + $0x1d8] sm:$0xff] }
 0x26e   : > { %2864 = vmatmul.bf16.gmra.mxu1 %v2731_v24  ;;  %v3255_v24 = vshll.u32 %v8384_v18, 16 }
 0x26f   : > { %4917 = vmatpush.bf16.msrb.mxu1 %v8474_v3 }
 0x270   : > { %v1992_v5 = vpop.f32.mrf.mxu2 }
 0x271   : > { %v2069_v46 = vadd.f32 %v1992_v5, %v9934_v36  ;;  %v9978_v36 = vpop.f32.mrf.mxu0  ;;  %v8410_v5 = vld [vmem:[#allocation2 + $0x50] sm:$0xff] }
 0x272   : > { %10763 = vst [vmem:[#allocation15_spill] sm:$0xff] %v9978_v36 }
 0x273   : > { %v9967_v44 = vadd.f32 %v2450_v10, %v2069_v46  ;;  %v2827_v43 = vpop.f32.mrf.mxu1 }
 0x274   : > { %v9971_v17 = vadd.f32 %v2827_v43, %v9637_v34  ;;  %v2732_v34 = vrot.slane %v8359_v1, 1  ;;  %v3252_v43 = vshrl.u32 %v8384_v18, 16  ;;  %v3779_v1 = vrot.slane %v8410_v5, 2 }
 0x275   : > { %3908 = vmatmul.bf16.gmra.mxu3 %v3778_v48  ;;  %v3257_v48 = vrot.slane %v3255_v24, 2  ;;  %v8360_v24 = vld [vmem:[#allocation2 + $0x60] sm:$0xff] }
 0x276   : > { %v2733_v46 = vsel %vm2255_vm0, %v2730_v53, %v2732_v34  ;;  %v3254_v22 = vrot.slane %v3252_v43, 1  ;;  %v8530_v53 = vld [vmem:[%s10748_s6 + $0x38] sm:$0xff]  ;;  %v2734_v5 = vrot.slane %v8360_v24, 1 }
 0x277   : > { %5974 = vmatpush.bf16.msra.mxu3 %v8530_v53 }
 0x278   : > { %3450 = vmatmul.bf16.gmra.mxu2 %v3250_v12  ;;  %v2453_v9 = vpop.f32.mrf.mxu3  ;;  %4415 = vmatmul.bf16.gmra.mxu0 %v4255_v55 }
 0x27b   : > { %v1995_v7 = vpop.f32.mrf.mxu2  ;;  %v2830_v39 = vpop.f32.mrf.mxu1 }
 0x27c   : > { %v2070_v0 = vadd.f32 %v1995_v7, %v9946_v31  ;;  %v2953_v35 = vadd.f32 %v2830_v39, %v9648_v49  ;;  %v3258_v31 = vor.u32 %v3257_v48, %v3254_v22  ;;  %v3780_v49 = vsel %vm3761_vm2, %v3777_v50, %v3779_v1  ;;  %v8411_v22 = vld [vmem:[#allocation2 + $0x58] sm:$0xff] }
 0x27d   : > { %v3781_v53 = vrot.slane %v8411_v22, 2 }
 0x27e   : > { %v9985_v10 = vadd.f32 %v2453_v9, %v2070_v0  ;;  %2869 = vmatmul.bf16.gmra.mxu1 %v2733_v46  ;;  %v3259_v43 = vsel %vm3170_vm3, %v3249_v57, %v3258_v31  ;;  %v8385_v0 = vld [vmem:[#allocation2 + $0x58] sm:$0xff] }
 0x27f   : > { %v3261_v3 = vshrl.u32 %v8385_v0, 16  ;;  %v3264_v50 = vshll.u32 %v8385_v0, 16  ;;  %v8556_v57 = vld [vmem:[%s10750_s8 + $0x38] sm:$0xff] }
 0x280   : > { %v2455_v12 = vpop.f32.mrf.mxu3  ;;  %6460 = vmatpush.bf16.msra.mxu0 %v8556_v57 }
 0x283   : > { %v1997_v18 = vpop.f32.mrf.mxu2  ;;  %v2832_v29 = vpop.f32.mrf.mxu1 }
 0x284   : > { %v2071_v55 = vadd.f32 %v1997_v18, %v9953_v14  ;;  %v2954_v7 = vadd.f32 %v2832_v29, %v9657_v59  ;;  %v2735_v18 = vsel %vm2255_vm0, %v2732_v34, %v2734_v5  ;;  %v3266_v29 = vrot.slane %v3264_v50, 2  ;;  %v8386_v50 = vld [vmem:[#allocation2 + $0x60] sm:$0xff] }
 0x285   : > { %3913 = vmatmul.bf16.gmra.mxu3 %v3780_v49  ;;  %v3270_v57 = vshrl.u32 %v8386_v50, 16 }
 0x286   : > { %v9994_v9 = vadd.f32 %v2455_v12, %v2071_v55  ;;  %v3263_v55 = vrot.slane %v3261_v3, 1  ;;  %v8361_v3 = vld [vmem:[#allocation2 + $0x68] sm:$0xff] }
 0x287   : > { %v2736_v22 = vrot.slane %v8361_v3, 1 }
 0x288   : > { %3455 = vmatmul.bf16.gmra.mxu2 %v3259_v43  ;;  %v3874_v39 = vpop.f32.mrf.mxu3 }
 0x28b   : > { %v3416_v14 = vpop.f32.mrf.mxu2  ;;  %v2835_v46 = vpop.f32.mrf.mxu1 }
 0x28c   : > { %v3542_v59 = vadd.f32 %v3416_v14, %v9961_v16  ;;  %v2955_v12 = vadd.f32 %v2835_v46, %v9671_v47  ;;  %v3267_v16 = vor.u32 %v3266_v29, %v3263_v55  ;;  %v8412_v29 = vld [vmem:[#allocation2 + $0x60] sm:$0xff] }
 0x28e   : > { %v9998_v48 = vadd.f32 %v3874_v39, %v3542_v59  ;;  %2874 = vmatmul.bf16.gmra.mxu1 %v2735_v18  ;;  %v3782_v39 = vsel %vm3761_vm2, %v3779_v1, %v3781_v53  ;;  %v3268_v34 = vsel %vm3170_vm3, %v3258_v31, %v3267_v16  ;;  %v3273_v18 = vshll.u32 %v8386_v50, 16  ;;  %v8473_v31 = vld [vmem:[%s10746_s4 + $0x1d0] sm:$0xff] }
 0x28f   : > { %4918 = vmatpush.bf16.msrb.mxu1 %v8473_v31 }
 0x290   : > { %v3876_v49 = vpop.f32.mrf.mxu3 }
 0x293   : > { %v3418_v43 = vpop.f32.mrf.mxu2  ;;  %v2837_v0 = vpop.f32.mrf.mxu1 }
 0x294   : > { %v3543_v24 = vadd.f32 %v3418_v43, %v9971_v17  ;;  %v2956_v14 = vadd.f32 %v2837_v0, %v9680_v52  ;;  %v8499_v52 = vld [vmem:[%s10746_s4 + $0x210] sm:$0xff]  ;;  %v3275_v0 = vrot.slane %v3273_v18, 2  ;;  %v8387_v18 = vld [vmem:[#allocation2 + $0x68] sm:$0xff] }
 0x295   : > { %3918 = vmatmul.bf16.gmra.mxu3 %v3782_v39  ;;  %5376 = vmatpush.bf16.msra.mxu2 %v8499_v52  ;;  %v3783_v39 = vrot.slane %v8412_v29, 2  ;;  %v8529_v29 = vld [vmem:[%s10748_s6 + $0x30] sm:$0xff]  ;;  %v3279_v31 = vshrl.u32 %v8387_v18, 16 }
 0x296   : > { %v10007_v47 = vadd.f32 %v3876_v49, %v3543_v24  ;;  %v2737_v49 = vsel %vm2255_vm0, %v2734_v5, %v2736_v22  ;;  %v3272_v24 = vrot.slane %v3270_v57, 1  ;;  %v8362_v57 = vld [vmem:[#allocation2 + $0x70] sm:$0xff]  ;;  %5975 = vmatpush.bf16.msra.mxu3 %v8529_v29 }
 0x298   : > { %3460 = vmatmul.bf16.gmra.mxu2 %v3268_v34  ;;  %v3879_v59 = vpop.f32.mrf.mxu3  ;;  %v3276_v3 = vor.u32 %v3275_v0, %v3272_v24  ;;  %v8413_v0 = vld [vmem:[#allocation2 + $0x68] sm:$0xff] }
 0x29a   : > { %v3277_v5 = vsel %vm3170_vm3, %v3267_v16, %v3276_v3 }
 0x29b   : > { %v3421_v46 = vpop.f32.mrf.mxu2  ;;  %v2840_v17 = vpop.f32.mrf.mxu1 }
 0x29c   : > { %v3544_v55 = vadd.f32 %v3421_v46, %v2953_v35  ;;  %v2957_v1 = vadd.f32 %v2840_v17, %v9688_v51 }
 0x29e   : > { %v10011_v43 = vadd.f32 %v3879_v59, %v3544_v55  ;;  %2879 = vmatmul.bf16.gmra.mxu1 %v2737_v49  ;;  %v3784_v59 = vsel %vm3761_vm2, %v3781_v53, %v3783_v39  ;;  %v3282_v49 = vshll.u32 %v8387_v18, 16 }
 0x2a0   : > { %v3881_v35 = vpop.f32.mrf.mxu3 }
 0x2a3   : > { %v3423_v34 = vpop.f32.mrf.mxu2  ;;  %v2842_v50 = vpop.f32.mrf.mxu1 }
 0x2a4   : > { %v3545_v51 = vadd.f32 %v3423_v34, %v2954_v7  ;;  %v2958_v55 = vadd.f32 %v2842_v50, %v9699_v38  ;;  %v2738_v7 = vrot.slane %v8362_v57, 1  ;;  %v3284_v50 = vrot.slane %v3282_v49, 2 }
 0x2a5   : > { %3923 = vmatmul.bf16.gmra.mxu3 %v3784_v59 }
 0x2a6   : > { %v10022_v46 = vadd.f32 %v3881_v35, %v3545_v51  ;;  %v8555_v35 = vld [vmem:[%s10750_s8 + $0x30] sm:$0xff]  ;;  %v2739_v34 = vsel %vm2255_vm0, %v2736_v22, %v2738_v7  ;;  %v3281_v51 = vrot.slane %v3279_v31, 1  ;;  %v8363_v22 = vld [vmem:[#allocation2 + $0x78] sm:$0xff] }
 0x2a7   : > { %6461 = vmatpush.bf16.msra.mxu0 %v8555_v35  ;;  %v8388_v31 = vld [vmem:[#allocation2 + $0x70] sm:$0xff]  ;;  %v2740_v35 = vrot.slane %v8363_v22, 1 }
 0x2a8   : > { %3465 = vmatmul.bf16.gmra.mxu2 %v3277_v5  ;;  %v3884_v17 = vpop.f32.mrf.mxu3  ;;  %v3785_v5 = vrot.slane %v8413_v0, 2  ;;  %v3288_v0 = vshrl.u32 %v8388_v31, 16 }
 0x2ab   : > { %v3426_v52 = vpop.f32.mrf.mxu2  ;;  %v2845_v24 = vpop.f32.mrf.mxu1 }
 0x2ac   : > { %v3546_v53 = vadd.f32 %v3426_v52, %v2955_v12  ;;  %v2959_v16 = vadd.f32 %v2845_v24, %v9719_v8  ;;  %v3285_v12 = vor.u32 %v3284_v50, %v3281_v51  ;;  %v8414_v50 = vld [vmem:[#allocation2 + $0x70] sm:$0xff] }
 0x2ae   : > { %v10029_v38 = vadd.f32 %v3884_v17, %v3546_v53  ;;  %2884 = vmatmul.bf16.gmra.mxu1 %v2739_v34  ;;  %v3786_v17 = vsel %vm3761_vm2, %v3783_v39, %v3785_v5  ;;  %v3286_v53 = vsel %vm3170_vm3, %v3276_v3, %v3285_v12  ;;  %v3291_v34 = vshll.u32 %v8388_v31, 16 }
 0x2af   : > { %v2741_v3 = vsel %vm2255_vm0, %v2738_v7, %v2740_v35  ;;  %v8472_v7 = vld [vmem:[%s10746_s4 + $0x1c8] sm:$0xff] }
 0x2b0   : > { %v3886_v59 = vpop.f32.mrf.mxu3  ;;  %4919 = vmatpush.bf16.msrb.mxu1 %v8472_v7 }
 0x2b3   : > { %v3428_v57 = vpop.f32.mrf.mxu2  ;;  %v2847_v29 = vpop.f32.mrf.mxu1 }
 0x2b4   : > { %v3547_v18 = vadd.f32 %v3428_v57, %v2956_v14  ;;  %v2960_v8 = vadd.f32 %v2847_v29, %v9728_v6  ;;  %v8498_v6 = vld [vmem:[%s10746_s4 + $0x208] sm:$0xff] }
 0x2b5   : > { %3928 = vmatmul.bf16.gmra.mxu3 %v3786_v17  ;;  %5377 = vmatpush.bf16.msra.mxu2 %v8498_v6  ;;  %v3787_v17 = vrot.slane %v8414_v50, 2 }
 0x2b6   : > { %v10037_v52 = vadd.f32 %v3886_v59, %v3547_v18  ;;  %v3290_v59 = vrot.slane %v3288_v0, 1  ;;  %v3293_v18 = vrot.slane %v3291_v34, 2  ;;  %v8364_v34 = vld [vmem:[#allocation2 + $0x80] sm:$0xff] }
 0x2b7   : > { %v2742_v50 = vrot.slane %v8364_v34, 1 }
 0x2b8   : > { %3470 = vmatmul.bf16.gmra.mxu2 %v3286_v53  ;;  %v3889_v49 = vpop.f32.mrf.mxu3 }
 0x2bb   : > { %v3431_v24 = vpop.f32.mrf.mxu2  ;;  %v2850_v14 = vpop.f32.mrf.mxu1 }
 0x2bc   : > { %v3548_v51 = vadd.f32 %v3431_v24, %v2957_v1  ;;  %v2961_v39 = vadd.f32 %v2850_v14, %v9739_v19  ;;  %v3294_v1 = vor.u32 %v3293_v18, %v3290_v59  ;;  %v8415_v18 = vld [vmem:[#allocation2 + $0x78] sm:$0xff] }
 0x2bd   : > { %v3789_v7 = vrot.slane %v8415_v18, 2 }
 0x2be   : > { %v10041_v57 = vadd.f32 %v3889_v49, %v3548_v51  ;;  %2889 = vmatmul.bf16.gmra.mxu1 %v2741_v3  ;;  %v3788_v49 = vsel %vm3761_vm2, %v3785_v5, %v3787_v17  ;;  %v3295_v0 = vsel %vm3170_vm3, %v3285_v12, %v3294_v1  ;;  %v8389_v51 = vld [vmem:[#allocation2 + $0x78] sm:$0xff]  ;;  %v8528_v12 = vld [vmem:[%s10748_s6 + $0x28] sm:$0xff] }
 0x2bf   : > { %v3297_v6 = vshrl.u32 %v8389_v51, 16  ;;  %v3300_v5 = vshll.u32 %v8389_v51, 16  ;;  %5976 = vmatpush.bf16.msra.mxu3 %v8528_v12 }
 0x2c0   : > { %v3891_v29 = vpop.f32.mrf.mxu3 }
 0x2c3   : > { %v3433_v53 = vpop.f32.mrf.mxu2  ;;  %v2852_v31 = vpop.f32.mrf.mxu1 }
 0x2c4   : > { %v3549_v22 = vadd.f32 %v3433_v53, %v2958_v55  ;;  %v2962_v19 = vadd.f32 %v2852_v31, %v9750_v23  ;;  %v2743_v53 = vsel %vm2255_vm0, %v2740_v35, %v2742_v50  ;;  %v3302_v31 = vrot.slane %v3300_v5, 2  ;;  %v8554_v35 = vld [vmem:[%s10750_s8 + $0x28] sm:$0xff] }
 0x2c5   : > { %3933 = vmatmul.bf16.gmra.mxu3 %v3788_v49  ;;  %v8365_v5 = vld [vmem:[#allocation2 + $0x88] sm:$0xff]  ;;  %6462 = vmatpush.bf16.msra.mxu0 %v8554_v35 }
 0x2c6   : > { %v10049_v24 = vadd.f32 %v3891_v29, %v3549_v22  ;;  %v3299_v22 = vrot.slane %v3297_v6, 1  ;;  %v2744_v18 = vrot.slane %v8365_v5, 1 }
 0x2c8   : > { %3475 = vmatmul.bf16.gmra.mxu2 %v3295_v0  ;;  %v3894_v14 = vpop.f32.mrf.mxu3 }
 0x2cb   : > { %v3436_v55 = vpop.f32.mrf.mxu2  ;;  %v2855_v59 = vpop.f32.mrf.mxu1 }
 0x2cc   : > { %v3550_v3 = vadd.f32 %v3436_v55, %v2959_v16  ;;  %v2963_v29 = vadd.f32 %v2855_v59, %v9765_v58  ;;  %v3303_v16 = vor.u32 %v3302_v31, %v3299_v22  ;;  %v8416_v31 = vld [vmem:[#allocation2 + $0x80] sm:$0xff] }
 0x2ce   : > { %v10056_v23 = vadd.f32 %v3894_v14, %v3550_v3  ;;  %2894 = vmatmul.bf16.gmra.mxu1 %v2743_v53  ;;  %v3790_v14 = vsel %vm3761_vm2, %v3787_v17, %v3789_v7  ;;  %v3304_v6 = vsel %vm3170_vm3, %v3294_v1, %v3303_v16  ;;  %v8390_v3 = vld [vmem:[#allocation2 + $0x80] sm:$0xff] }
 0x2cf   : > { %v3306_v12 = vshrl.u32 %v8390_v3, 16  ;;  %v3309_v17 = vshll.u32 %v8390_v3, 16 }
 0x2d0   : > { %v3896_v49 = vpop.f32.mrf.mxu3 }
 0x2d1   : > { %v3311_v1 = vrot.slane %v3309_v17, 2 }
 0x2d3   : > { %v3438_v0 = vpop.f32.mrf.mxu2  ;;  %v2857_v51 = vpop.f32.mrf.mxu1 }
 0x2d4   : > { %v3551_v34 = vadd.f32 %v3438_v0, %v2960_v8  ;;  %v2964_v58 = vadd.f32 %v2857_v51, %v9779_v45  ;;  %v2745_v0 = vsel %vm2255_vm0, %v2742_v50, %v2744_v18 }
 0x2d5   : > { %3938 = vmatmul.bf16.gmra.mxu3 %v3790_v14  ;;  %v3791_v14 = vrot.slane %v8416_v31, 2 }
 0x2d6   : > { %v10064_v55 = vadd.f32 %v3896_v49, %v3551_v34  ;;  %v3308_v34 = vrot.slane %v3306_v12, 1  ;;  %v8391_v12 = vld [vmem:[#allocation2 + $0x88] sm:$0xff] }
 0x2d7   : > { %v3792_v3 = vsel %vm3761_vm2, %v3789_v7, %v3791_v14  ;;  %v3315_v17 = vshrl.u32 %v8391_v12, 16 }
 0x2d8   : > { %3480 = vmatmul.bf16.gmra.mxu2 %v3304_v6  ;;  %v3899_v59 = vpop.f32.mrf.mxu3  ;;  %v3312_v6 = vor.u32 %v3311_v1, %v3308_v34 }
 0x2da   : > { %v3313_v50 = vsel %vm3170_vm3, %v3303_v16, %v3312_v6 }
 0x2db   : > { %v3441_v8 = vpop.f32.mrf.mxu2  ;;  %v2860_v22 = vpop.f32.mrf.mxu1 }
 0x2dc   : > { %v3552_v53 = vadd.f32 %v3441_v8, %v2961_v39  ;;  %v2965_v49 = vadd.f32 %v2860_v22, %v9794_v13  ;;  %v8497_v13 = vld [vmem:[%s10746_s4 + $0x200] sm:$0xff]  ;;  %v8366_v8 = vld [vmem:[#allocation2 + $0x90] sm:$0xff] }
 0x2dd   : > { %5378 = vmatpush.bf16.msra.mxu2 %v8497_v13  ;;  %v8527_v13 = vld [vmem:[%s10748_s6 + $0x20] sm:$0xff] }
 0x2de   : > { %v10071_v45 = vadd.f32 %v3899_v59, %v3552_v53  ;;  %2899 = vmatmul.bf16.gmra.mxu1 %v2745_v0  ;;  %v3318_v53 = vshll.u32 %v8391_v12, 16  ;;  %v8417_v0 = vld [vmem:[#allocation2 + $0x88] sm:$0xff]  ;;  %5977 = vmatpush.bf16.msra.mxu3 %v8527_v13 }
 0x2e0   : > { %v3901_v51 = vpop.f32.mrf.mxu3 }
 0x2e3   : > { %v3443_v35 = vpop.f32.mrf.mxu2  ;;  %v2862_v5 = vpop.f32.mrf.mxu1 }
 0x2e4   : > { %v3553_v36 = vadd.f32 %v3443_v35, %v2962_v19  ;;  %v10079_v59 = vadd.f32 %v2862_v5, %v9817_v32  ;;  %v8471_v19 = vld [vmem:[%s10746_s4 + $0x1c0] sm:$0xff]  ;;  %v2746_v32 = vrot.slane %v8366_v8, 1  ;;  %v3320_v35 = vrot.slane %v3318_v53, 2 }
 0x2e5   : > { %3943 = vmatmul.bf16.gmra.mxu3 %v3792_v3  ;;  %4920 = vmatpush.bf16.msrb.mxu1 %v8471_v19  ;;  %v3793_v3 = vrot.slane %v8417_v0, 2  ;;  %v8553_v53 = vld [vmem:[%s10750_s8 + $0x20] sm:$0xff] }
 0x2e6   : > { %v10076_v39 = vadd.f32 %v3901_v51, %v3553_v36  ;;  %v2747_v1 = vsel %vm2255_vm0, %v2744_v18, %v2746_v32  ;;  %v3317_v51 = vrot.slane %v3315_v17, 1  ;;  %v8392_v17 = vld [vmem:[#allocation2 + $0x90] sm:$0xff]  ;;  %6463 = vmatpush.bf16.msra.mxu0 %v8553_v53 }
 0x2e7   : > { %v3794_v19 = vsel %vm3761_vm2, %v3791_v14, %v3793_v3  ;;  %v3324_v0 = vshrl.u32 %v8392_v17, 16 }
 0x2e8   : > { %3485 = vmatmul.bf16.gmra.mxu2 %v3313_v50  ;;  %v3904_v7 = vpop.f32.mrf.mxu3  ;;  %v3321_v8 = vor.u32 %v3320_v35, %v3317_v51 }
 0x2eb   : > { %v3446_v36 = vpop.f32.mrf.mxu2  ;;  %v2865_v31 = vpop.f32.mrf.mxu1 }
 0x2ec   : > { %v3554_v22 = vadd.f32 %v3446_v36, %v2963_v29  ;;  %v10091_v16 = vadd.f32 %v2865_v31, %v9831_v41  ;;  %v2602_v29 = vld [vmem:[#allocation2 + $0x98] sm:$0x1]  ;;  %v3322_v36 = vsel %vm3170_vm3, %v3312_v6, %v3321_v8 }
 0x2ed   : > { %v2693_v18 = vunpack.c.l.b16 %v2602_v29  ;;  %v7810_v29 = vld [vmem:[#allocation2 + $0x10] sm:$0xc] }
 0x2ee   : > { %v10088_v34 = vadd.f32 %v3904_v7, %v3554_v22  ;;  %2904 = vmatmul.bf16.gmra.mxu1 %v2747_v1  ;;  %v3327_v1 = vshll.u32 %v8392_v17, 16 }
 0x2ef   : > { %v2712_v31 = vpack.c.b16 %v2693_v18, %v2693_v18  ;;  %v8454_v18 = vld [vmem:[#allocation2 + $0x18] sm:$0xff] }
 0x2f0   : > { %10764 = vst [vmem:[#allocation16_spill] sm:$0xff] %v10088_v34  ;;  %v10094_v5 = vpop.f32.mrf.mxu3 }
 0x2f1   : > { %v2748_v35 = vrot.slane %v2712_v31, 1 }
 0x2f3   : > { %v3448_v50 = vpop.f32.mrf.mxu2  ;;  %v2867_v41 = vpop.f32.mrf.mxu1 }
 0x2f4   : > { %v10099_v12 = vadd.f32 %v3448_v50, %v2964_v58  ;;  %v10103_v7 = vadd.f32 %v2867_v41, %v9840_v30  ;;  %v8418_v30 = vld [vmem:[#allocation2 + $0x90] sm:$0xff]  ;;  %v2749_v41 = vsel %vm2255_vm0, %v2746_v32, %v2748_v35 }
 0x2f5   : > { %3948 = vmatmul.bf16.gmra.mxu3 %v3794_v19  ;;  %v8453_v50 = vld [vmem:[#allocation2 + $0x10] sm:$0xf0]  ;;  %v3326_v19 = vrot.slane %v3324_v0, 1  ;;  %v3795_v17 = vrot.slane %v8418_v30, 2 }
 0x2f8   : > { %3490 = vmatmul.bf16.gmra.mxu2 %v3322_v36  ;;  %v3909_v22 = vpop.f32.mrf.mxu3  ;;  %v3329_v36 = vrot.slane %v3327_v1, 2 }
 0x2fa   : > { %v3330_v34 = vor.u32 %v3329_v36, %v3326_v19 }
 0x2fb   : > { %v3451_v58 = vpop.f32.mrf.mxu2  ;;  %v2870_v51 = vpop.f32.mrf.mxu1 }
 0x2fc   : > { %v3556_v14 = vadd.f32 %v3451_v58, %v2965_v49  ;;  %v10112_v6 = vadd.f32 %v2870_v51, %v9849_v40  ;;  %v7811_v49 = vor.u32 %v8453_v50, %v7810_v29  ;;  %v3059_v58 = vld [vmem:[#allocation2 + $0x98] sm:$0x3]  ;;  %v3331_v30 = vsel %vm3170_vm3, %v3321_v8, %v3330_v34 }
 0x2fd   : > { %v3150_v1 = vunpack.c.l.b16 %v3059_v58 }
 0x2fe   : > { %v10109_v13 = vadd.f32 %v3909_v22, %v3556_v14  ;;  %2909 = vmatmul.bf16.gmra.mxu1 %v2749_v41  ;;  %v4686_v22 = vshrl.u32 %v8454_v18, 16  ;;  %v4689_v14 = vshll.u32 %v8454_v18, 16  ;;  %v4678_v32 = vshrl.u32 %v7811_v49, 16  ;;  %v3650_v41 = vld [vmem:[#allocation2 + $0x98] sm:$0x3] }
 0x2ff   : > { %v4681_v0 = vshll.u32 %v7811_v49, 16  ;;  %v3169_v18 = vpack.c.b16 %v3150_v1, %v3150_v1 }
 0x300   : > { %10765 = vst [vmem:[#allocation17_spill] sm:$0xff] %v10109_v13  ;;  %v10115_v53 = vpop.f32.mrf.mxu3  ;;  %v3796_v13 = vsel %vm3761_vm2, %v3793_v3, %v3795_v17  ;;  %v4688_v29 = vrot.slane %v4686_v22, 2  ;;  %v4691_v50 = vrot.slane %v4689_v14, 3  ;;  %v4680_v36 = vrot.slane %v4678_v32, 2  ;;  %v8455_v32 = vld [vmem:[#allocation2 + $0x20] sm:$0xff] }
 0x301   : > { %10766 = vst [vmem:[#allocation18_spill] sm:$0xff] %v10115_v53  ;;  %v3741_v3 = vunpack.c.l.b16 %v3650_v41  ;;  %v4698_v41 = vshll.u32 %v8455_v32, 16 }
 0x302   : > { %v4692_v53 = vor.u32 %v4691_v50, %v4688_v29  ;;  %v4695_v50 = vshrl.u32 %v8455_v32, 16  ;;  %v8479_v32 = vld [vmem:[#allocation2 + $0x10] sm:$0xf0] }
 0x303   : > { %v3453_v31 = vpop.f32.mrf.mxu2  ;;  %v2872_v51 = vpop.f32.mrf.mxu1  ;;  %v3760_v14 = vpack.c.b16 %v3741_v3, %v3741_v3 }
 0x304   : > { %v10118_v40 = vadd.f32 %v3453_v31, %v10079_v59  ;;  %v10122_v35 = vadd.f32 %v2872_v51, %v9855_v11  ;;  %v4683_v59 = vrot.slane %v4681_v0, 3  ;;  %v3333_v51 = vshrl.u32 %v3169_v18, 16 }
 0x305   : > { %3953 = vmatmul.bf16.gmra.mxu3 %v3796_v13  ;;  %v3336_v13 = vshll.u32 %v3169_v18, 16 }
 0x306   : > { %10767 = vst [vmem:[#allocation19_spill] sm:$0xff] %v10118_v40  ;;  %v4684_v11 = vor.u32 %v4683_v59, %v4680_v36  ;;  %v3335_v1 = vrot.slane %v3333_v51, 1 }
 0x308   : > { %3495 = vmatmul.bf16.gmra.mxu2 %v3331_v30  ;;  %v3914_v19 = vpop.f32.mrf.mxu3  ;;  %v4693_v22 = vsel %vm4676_vm4, %v4684_v11, %v4692_v53  ;;  %v3338_v30 = vrot.slane %v3336_v13, 2 }
 0x30b   : > { %v3456_v31 = vpop.f32.mrf.mxu2  ;;  %v2875_v58 = vpop.f32.mrf.mxu1 }
 0x30c   : > { %v3558_v49 = vadd.f32 %v3456_v31, %v10091_v16  ;;  %v2971_v8 = vadd.f32 %v2875_v58, %v9868_v26  ;;  %v3797_v16 = vrot.slane %v3760_v14, 2  ;;  %v3339_v26 = vor.u32 %v3338_v30, %v3335_v1  ;;  %v8526_v31 = vld [vmem:[%s10748_s6 + $0x18] sm:$0xff]  ;;  %v7930_v14 = vld [vmem:[#allocation2 + $0x10] sm:$0x8] }
 0x30d   : > { %v4700_v58 = vrot.slane %v4698_v41, 3  ;;  %5978 = vmatpush.bf16.msra.mxu3 %v8526_v31  ;;  %v8480_v30 = vld [vmem:[#allocation2 + $0x18] sm:$0xff] }
 0x30e   : > { %v10126_v40 = vadd.f32 %v3914_v19, %v3558_v49  ;;  %4921 = vmatmul.bf16.vlgmr.msrb.gmra.mxu1 %v4693_v22  ;;  %v3798_v59 = vsel %vm3761_vm2, %v3795_v17, %v3797_v16  ;;  %v3340_v3 = vsel %vm3170_vm3, %v3330_v34, %v3339_v26  ;;  %v4697_v49 = vrot.slane %v4695_v50, 2  ;;  %v8552_v34 = vld [vmem:[%s10750_s8 + $0x18] sm:$0xff] }
 0x30f   : > { %6464 = vmatpush.bf16.msra.mxu0 %v8552_v34  ;;  %v5269_v41 = vrot.slane %v8480_v30, 3  ;;  %v8457_v30 = vld [vmem:[#allocation2 + $0x30] sm:$0xff] }
 0x310   : > { %v10130_v0 = vpop.f32.mrf.mxu3  ;;  %v4701_v51 = vor.u32 %v4700_v58, %v4697_v49 }
 0x312   : > { %v4702_v1 = vsel %vm4676_vm4, %v4692_v53, %v4701_v51 }
 0x313   : > { %v3458_v29 = vpop.f32.mrf.mxu2  ;;  %v2877_v19 = vpop.f32.mrf.mxu1 }
 0x314   : > { %v10133_v36 = vadd.f32 %v3458_v29, %v10103_v7  ;;  %v2972_v18 = vadd.f32 %v2877_v19, %v9875_v37  ;;  %v8456_v29 = vld [vmem:[#allocation2 + $0x28] sm:$0xff] }
 0x315   : > { %3958 = vmatmul.bf16.gmra.mxu3 %v3798_v59  ;;  %v4704_v19 = vshrl.u32 %v8456_v29, 16  ;;  %v4707_v59 = vshll.u32 %v8456_v29, 16 }
 0x317   : > { %v4706_v49 = vrot.slane %v4704_v19, 2  ;;  %v4709_v58 = vrot.slane %v4707_v59, 3  ;;  %v4716_v19 = vshll.u32 %v8457_v30, 16 }
 0x318   : > { %3500 = vmatmul.bf16.gmra.mxu2 %v3340_v3  ;;  %v3919_v11 = vpop.f32.mrf.mxu3 }
 0x31b   : > { %v3461_v7 = vpop.f32.mrf.mxu2  ;;  %v2880_v17 = vpop.f32.mrf.mxu1 }
 0x31c   : > { %v3560_v13 = vadd.f32 %v3461_v7, %v10112_v6  ;;  %v2973_v37 = vadd.f32 %v2880_v17, %v9883_v60  ;;  %v7931_v6 = vor.u32 %v8479_v32, %v7930_v14 }
 0x31e   : > { %v10142_v22 = vadd.f32 %v3919_v11, %v3560_v13  ;;  %4926 = vmatmul.bf16.gmra.mxu1 %v4702_v1  ;;  %v5268_v31 = vrot.slane %v7931_v6, 3  ;;  %v4710_v13 = vor.u32 %v4709_v58, %v4706_v49  ;;  %v8481_v1 = vld [vmem:[#allocation2 + $0x20] sm:$0xff]  ;;  %v8525_v49 = vld [vmem:[%s10748_s6 + $0x10] sm:$0xff] }
 0x31f   : > { %v5271_v6 = vrot.slane %v8481_v1, 3  ;;  %5979 = vmatpush.bf16.msra.mxu3 %v8525_v49  ;;  %v8482_v1 = vld [vmem:[#allocation2 + $0x28] sm:$0xff] }
 0x320   : > { %v10149_v16 = vpop.f32.mrf.mxu3  ;;  %v5270_v53 = vsel %vm5267_vm5, %v5268_v31, %v5269_v41  ;;  %v4711_v34 = vsel %vm4676_vm4, %v4701_v51, %v4710_v13 }
 0x321   : > { %v5272_v31 = vsel %vm5267_vm5, %v5269_v41, %v5271_v6  ;;  %v8551_v41 = vld [vmem:[%s10750_s8 + $0x10] sm:$0xff] }
 0x322   : > { %6465 = vmatpush.bf16.msra.mxu0 %v8551_v41 }
 0x323   : > { %v3463_v50 = vpop.f32.mrf.mxu2  ;;  %v2882_v26 = vpop.f32.mrf.mxu1 }
 0x324   : > { %v10152_v60 = vadd.f32 %v3463_v50, %v10122_v35  ;;  %v2974_v3 = vadd.f32 %v2882_v26, %v9889_v4  ;;  %v4713_v50 = vshrl.u32 %v8457_v30, 16  ;;  %v8458_v30 = vld [vmem:[#allocation2 + $0x38] sm:$0xff] }
 0x328   : > { %5379 = vmatmul.bf16.vlgmr.msra.gmra.mxu2 %v5270_v53  ;;  %v3924_v11 = vpop.f32.mrf.mxu3  ;;  %v4715_v53 = vrot.slane %v4713_v50, 2  ;;  %v5273_v50 = vrot.slane %v8482_v1, 3 }
 0x32b   : > { %v3466_v7 = vpop.f32.mrf.mxu2  ;;  %v2885_v14 = vpop.f32.mrf.mxu1 }
 0x32c   : > { %v3562_v17 = vadd.f32 %v3466_v7, %v2971_v8  ;;  %v2975_v35 = vadd.f32 %v2885_v14, %v9896_v54  ;;  %v4718_v54 = vrot.slane %v4716_v19, 3  ;;  %v4722_v19 = vshrl.u32 %v8458_v30, 16 }
 0x32e   : > { %v10156_v32 = vadd.f32 %v3924_v11, %v3562_v17  ;;  %4931 = vmatmul.bf16.gmra.mxu1 %v4711_v34  ;;  %v4719_v11 = vor.u32 %v4718_v54, %v4715_v53  ;;  %v10169_v17 = vpop.f32.mrf.mxu0 }
 0x330   : > { %v10160_v4 = vpop.f32.mrf.mxu3  ;;  %v4720_v34 = vsel %vm4676_vm4, %v4710_v13, %v4719_v11  ;;  %v4724_v13 = vrot.slane %v4722_v19, 2 }
 0x333   : > { %v3468_v29 = vpop.f32.mrf.mxu2  ;;  %v2887_v26 = vpop.f32.mrf.mxu1 }
 0x334   : > { %v10162_v59 = vadd.f32 %v3468_v29, %v2972_v18  ;;  %v2976_v8 = vadd.f32 %v2887_v26, %v9907_v62  ;;  %v4725_v26 = vshll.u32 %v8458_v30, 16 }
 0x336   : > { %v10183_v54 = vpop.f32.mrf.mxu0  ;;  %v4727_v49 = vrot.slane %v4725_v26, 3 }
 0x338   : > { %5384 = vmatmul.bf16.gmra.mxu2 %v5272_v31  ;;  %v3929_v51 = vpop.f32.mrf.mxu3 }
 0x33b   : > { %v3471_v58 = vpop.f32.mrf.mxu2  ;;  %v2890_v18 = vpop.f32.mrf.mxu1 }
 0x33c   : > { %v3564_v7 = vadd.f32 %v3471_v58, %v2973_v37  ;;  %v2977_v62 = vadd.f32 %v2890_v18, %v9912_v33  ;;  %v4728_v18 = vor.u32 %v4727_v49, %v4724_v13 }
 0x33e   : > { %v10171_v14 = vadd.f32 %v3929_v51, %v3564_v7  ;;  %4936 = vmatmul.bf16.gmra.mxu1 %v4720_v34  ;;  %v5274_v51 = vsel %vm5267_vm5, %v5271_v6, %v5273_v50  ;;  %v4729_v30 = vsel %vm4676_vm4, %v4719_v11, %v4728_v18 }
 0x340   : > { %10768 = vst [vmem:[#allocation20_spill] sm:$0xff] %v10171_v14  ;;  %v10178_v29 = vpop.f32.mrf.mxu3 }
 0x341   : > { %10769 = vst [vmem:[#allocation21_spill] sm:$0xff] %v10178_v29 }
 0x343   : > { %v3473_v37 = vpop.f32.mrf.mxu2  ;;  %v2892_v53 = vpop.f32.mrf.mxu1 }
 0x344   : > { %v10180_v31 = vadd.f32 %v3473_v37, %v2974_v3  ;;  %v2978_v33 = vadd.f32 %v2892_v53, %v9917_v20  ;;  %v8483_v37 = vld [vmem:[#allocation2 + $0x30] sm:$0xff]  ;;  %v8459_v20 = vld [vmem:[#allocation2 + $0x40] sm:$0xff]  ;;  %v10190_v53 = vpop.f32.mrf.mxu0 }
 0x345   : > { %v5275_v26 = vrot.slane %v8483_v37, 3  ;;  %v4734_v14 = vshll.u32 %v8459_v20, 16 }
 0x346   : > { %10770 = vst [vmem:[#allocation22_spill] sm:$0xff] %v10180_v31 }
 0x347   : > { %v4736_v11 = vrot.slane %v4734_v14, 3  ;;  %v8460_v14 = vld [vmem:[#allocation2 + $0x48] sm:$0xff] }
 0x348   : > { %5389 = vmatmul.bf16.gmra.mxu2 %v5274_v51  ;;  %v3934_v58 = vpop.f32.mrf.mxu3  ;;  %v4731_v51 = vshrl.u32 %v8459_v20, 16  ;;  %v8484_v20 = vld [vmem:[#allocation2 + $0x38] sm:$0xff] }
 0x34b   : > { %v3476_v7 = vpop.f32.mrf.mxu2  ;;  %v2895_v34 = vpop.f32.mrf.mxu1 }
 0x34c   : > { %v3566_v41 = vadd.f32 %v3476_v7, %v2975_v35  ;;  %v2979_v3 = vadd.f32 %v2895_v34, %v9924_v56  ;;  %v5276_v56 = vsel %vm5267_vm5, %v5273_v50, %v5275_v26 }
 0x34e   : > { %v10186_v1 = vadd.f32 %v3934_v58, %v3566_v41  ;;  %4941 = vmatmul.bf16.gmra.mxu1 %v4729_v30  ;;  %v4733_v58 = vrot.slane %v4731_v51, 2  ;;  %v10198_v41 = vpop.f32.mrf.mxu0 }
 0x350   : > { %10771 = vst [vmem:[#allocation23_spill] sm:$0xff] %v10186_v1  ;;  %v10192_v6 = vpop.f32.mrf.mxu3  ;;  %v4737_v30 = vor.u32 %v4736_v11, %v4733_v58 }
 0x351   : > { %10772 = vst [vmem:[#allocation24_spill] sm:$0xff] %v10192_v6 }
 0x352   : > { %v4738_v50 = vsel %vm4676_vm4, %v4728_v18, %v4737_v30  ;;  %v8550_v18 = vld [vmem:[%s10750_s8 + $0x8] sm:$0xff] }
 0x353   : > { %v3478_v19 = vpop.f32.mrf.mxu2  ;;  %v2897_v35 = vpop.f32.mrf.mxu1  ;;  %6466 = vmatpush.bf16.msra.mxu0 %v8550_v18 }
 0x354   : > { %v10194_v13 = vadd.f32 %v3478_v19, %v2976_v8  ;;  %v2980_v49 = vadd.f32 %v2897_v35, %v9932_v21  ;;  %v8524_v21 = vld [vmem:[%s10748_s6 + $0x8] sm:$0xff]  ;;  %v5277_v35 = vrot.slane %v8484_v20, 3 }
 0x355   : > { %5980 = vmatpush.bf16.msra.mxu3 %v8524_v21 }
 0x356   : > { %10773 = vst [vmem:[#allocation25_spill] sm:$0xff] %v10194_v13  ;;  %v10211_v58 = vpop.f32.mrf.mxu0  ;;  %v5278_v11 = vsel %vm5267_vm5, %v5275_v26, %v5277_v35 }
 0x358   : > { %5394 = vmatmul.bf16.gmra.mxu2 %v5276_v56  ;;  %v3939_v7 = vpop.f32.mrf.mxu3  ;;  %v4743_v56 = vshll.u32 %v8460_v14, 16 }
 0x35b   : > { %v3481_v34 = vpop.f32.mrf.mxu2  ;;  %v2900_v6 = vpop.f32.mrf.mxu1 }
 0x35c   : > { %v3568_v1 = vadd.f32 %v3481_v34, %v2977_v62  ;;  %v2981_v8 = vadd.f32 %v2900_v6, %v9944_v61  ;;  %v4740_v62 = vshrl.u32 %v8460_v14, 16  ;;  %v4745_v34 = vrot.slane %v4743_v56, 3 }
 0x35e   : > { %v10200_v37 = vadd.f32 %v3939_v7, %v3568_v1  ;;  %4946 = vmatmul.bf16.gmra.mxu1 %v4738_v50  ;;  %v4742_v7 = vrot.slane %v4740_v62, 2 }
 0x360   : > { %10774 = vst [vmem:[#allocation26_spill] sm:$0xff] %v10200_v37  ;;  %v10207_v19 = vpop.f32.mrf.mxu3  ;;  %v4746_v20 = vor.u32 %v4745_v34, %v4742_v7 }
 0x361   : > { %10775 = vst [vmem:[#allocation27_spill] sm:$0xff] %v10207_v19  ;;  %v8485_v19 = vld [vmem:[#allocation2 + $0x40] sm:$0xff] }
 0x362   : > { %v5279_v56 = vrot.slane %v8485_v19, 3 }
 0x363   : > { %v3483_v51 = vpop.f32.mrf.mxu2  ;;  %v2902_v61 = vpop.f32.mrf.mxu1 }
 0x364   : > { %v10209_v1 = vadd.f32 %v3483_v51, %v2978_v33  ;;  %v2982_v6 = vadd.f32 %v2902_v61, %v9949_v25  ;;  %v10221_v25 = vpop.f32.mrf.mxu0  ;;  %v4747_v61 = vsel %vm4676_vm4, %v4737_v30, %v4746_v20 }
 0x366   : > { %10776 = vst [vmem:[#allocation28_spill] sm:$0xff] %v10209_v1  ;;  %v8461_v1 = vld [vmem:[#allocation2 + $0x50] sm:$0xff] }
 0x367   : > { %v4749_v18 = vshrl.u32 %v8461_v1, 16 }
 0x368   : > { %5399 = vmatmul.bf16.gmra.mxu2 %v5278_v11  ;;  %v3944_v21 = vpop.f32.mrf.mxu3  ;;  %v4752_v11 = vshll.u32 %v8461_v1, 16 }
 0x36b   : > { %v3486_v50 = vpop.f32.mrf.mxu2  ;;  %v2905_v14 = vpop.f32.mrf.mxu1 }
 0x36c   : > { %v3570_v33 = vadd.f32 %v3486_v50, %v2979_v3  ;;  %v2983_v37 = vadd.f32 %v2905_v14, %v9958_v2  ;;  %v5280_v2 = vsel %vm5267_vm5, %v5277_v35, %v5279_v56  ;;  %v4754_v50 = vrot.slane %v4752_v11, 3  ;;  %v10230_v30 = vpop.f32.mrf.mxu0 }
 0x36e   : > { %v10218_v51 = vadd.f32 %v3944_v21, %v3570_v33  ;;  %4951 = vmatmul.bf16.gmra.mxu1 %v4747_v61  ;;  %v4751_v21 = vrot.slane %v4749_v18, 2  ;;  %v8523_v18 = vld [vmem:[%s10748_s6] sm:$0xff] }
 0x36f   : > { %5981 = vmatpush.bf16.msra.mxu3 %v8523_v18 }
 0x370   : > { %10777 = vst [vmem:[#allocation29_spill] sm:$0xff] %v10218_v51  ;;  %v10224_v26 = vpop.f32.mrf.mxu3  ;;  %v4755_v61 = vor.u32 %v4754_v50, %v4751_v21 }
 0x371   : > { %10778 = vst [vmem:[#allocation30_spill] sm:$0xff] %v10224_v26 }
 0x372   : > { %v4756_v1 = vsel %vm4676_vm4, %v4746_v20, %v4755_v61 }
 0x373   : > { %v3488_v62 = vpop.f32.mrf.mxu2  ;;  %v2907_v3 = vpop.f32.mrf.mxu1 }
 0x374   : > { %v10226_v7 = vadd.f32 %v3488_v62, %v2980_v49  ;;  %v2984_v34 = vadd.f32 %v2907_v3, %v9967_v44  ;;  %v8486_v62 = vld [vmem:[#allocation2 + $0x48] sm:$0xff]  ;;  %v8462_v44 = vld [vmem:[#allocation2 + $0x58] sm:$0xff]  ;;  %v10241_v11 = vpop.f32.mrf.mxu0 }
 0x376   : > { %10779 = vst [vmem:[#allocation31_spill] sm:$0xff] %v10226_v7  ;;  %v8138_v7 = vld [vmem:[%s9226_s11 + $0x8] sm:$0xe] }
 0x378   : > { %5404 = vmatmul.bf16.gmra.mxu2 %v5280_v2  ;;  %v3949_v33 = vpop.f32.mrf.mxu3  ;;  %v4758_v2 = vshrl.u32 %v8462_v44, 16 }
 0x37a   : > { %v4760_v50 = vrot.slane %v4758_v2, 2  ;;  %v8463_v2 = vld [vmem:[#allocation2 + $0x60] sm:$0xff] }
 0x37b   : > { %v3491_v14 = vpop.f32.mrf.mxu2  ;;  %v2910_v26 = vpop.f32.mrf.mxu1 }
 0x37c   : > { %v3572_v51 = vadd.f32 %v3491_v14, %v2981_v8  ;;  %v2985_v49 = vadd.f32 %v2910_v26, %v9985_v10  ;;  %v5281_v8 = vrot.slane %v8486_v62, 3  ;;  %v8549_v14 = vld [vmem:[%s10750_s8] sm:$0xff]  ;;  %v10250_v18 = vpop.f32.mrf.mxu0 }
 0x37d   : > { %6467 = vmatpush.bf16.msra.mxu0 %v8549_v14  ;;  %10783 = vst [vmem:[#allocation35_spill] sm:$0xff] %v10250_v18 }
 0x37e   : > { %v10232_v19 = vadd.f32 %v3949_v33, %v3572_v51  ;;  %4956 = vmatmul.bf16.gmra.mxu1 %v4756_v1  ;;  %v4761_v51 = vshll.u32 %v8462_v44, 16  ;;  %v5282_v26 = vsel %vm5267_vm5, %v5279_v56, %v5281_v8  ;;  %v8487_v56 = vld [vmem:[#allocation2 + $0x50] sm:$0xff] }
 0x380   : > { %10780 = vst [vmem:[#allocation32_spill] sm:$0xff] %v10232_v19  ;;  %v10236_v35 = vpop.f32.mrf.mxu3  ;;  %v4763_v33 = vrot.slane %v4761_v51, 3 }
 0x381   : > { %10781 = vst [vmem:[#allocation33_spill] sm:$0xff] %v10236_v35  ;;  %v4767_v35 = vshrl.u32 %v8463_v2, 16 }
 0x382   : > { %v4764_v19 = vor.u32 %v4763_v33, %v4760_v50 }
 0x383   : > { %v3493_v3 = vpop.f32.mrf.mxu2  ;;  %v2912_v10 = vpop.f32.mrf.mxu1 }
 0x384   : > { %v10243_v21 = vadd.f32 %v3493_v3, %v2982_v6  ;;  %v2986_v20 = vadd.f32 %v2912_v10, %v9994_v9  ;;  %v4765_v9 = vsel %vm4676_vm4, %v4755_v61, %v4764_v19 }
 0x386   : > { %10782 = vst [vmem:[#allocation34_spill] sm:$0xff] %v10243_v21  ;;  %v4770_v21 = vshll.u32 %v8463_v2, 16 }
 0x388   : > { %5409 = vmatmul.bf16.gmra.mxu2 %v5282_v26  ;;  %v3954_v1 = vpop.f32.mrf.mxu3  ;;  %v5283_v26 = vrot.slane %v8487_v56, 3 }
 0x38a   : > { %v5284_v33 = vsel %vm5267_vm5, %v5281_v8, %v5283_v26 }
 0x38b   : > { %v3496_v62 = vpop.f32.mrf.mxu2  ;;  %v4922_v6 = vpop.f32.mrf.mxu1 }
 0x38c   : > { %v3574_v44 = vadd.f32 %v3496_v62, %v2983_v37  ;;  %v10259_v37 = vpop.f32.mrf.mxu0  ;;  %v4772_v62 = vrot.slane %v4770_v21, 3 }
 0x38d   : > { %10787 = vst [vmem:[#allocation39_spill] sm:$0xff] %v10259_v37 }
 0x38e   : > { %v10252_v3 = vadd.f32 %v3954_v1, %v3574_v44  ;;  %4961 = vmatmul.bf16.gmra.mxu1 %v4765_v9  ;;  %v4769_v1 = vrot.slane %v4767_v35, 2 }
 0x390   : > { %10784 = vst [vmem:[#allocation36_spill] sm:$0xff] %v10252_v3  ;;  %v10255_v51 = vpop.f32.mrf.mxu3  ;;  %v4773_v44 = vor.u32 %v4772_v62, %v4769_v1  ;;  %v8531_v1 = vld [vmem:[%s9226_s11 + $0x8] sm:$0xf0]  ;;  %v8532_v62 = vld [vmem:[%s9226_s11 + $0x10] sm:$0xff] }
 0x391   : > { %10785 = vst [vmem:[#allocation37_spill] sm:$0xff] %v10255_v51  ;;  %v8464_v51 = vld [vmem:[#allocation2 + $0x68] sm:$0xff]  ;;  %v6233_v29 = vshrl.u32 %v8532_v62, 16 }
 0x393   : > { %v3498_v10 = vpop.f32.mrf.mxu2  ;;  %v4924_v50 = vpop.f32.mrf.mxu1 }
 0x394   : > { %v10257_v14 = vadd.f32 %v3498_v10, %v2984_v34  ;;  %v8488_v34 = vld [vmem:[#allocation2 + $0x58] sm:$0xff]  ;;  %v4774_v10 = vsel %vm4676_vm4, %v4764_v19, %v4773_v44  ;;  %v10267_v8 = vpop.f32.mrf.mxu0 }
 0x395   : > { %10789 = vst [vmem:[#allocation41_spill] sm:$0xff] %v10267_v8  ;;  %v5285_v35 = vrot.slane %v8488_v34, 3  ;;  %v6236_v8 = vshll.u32 %v8532_v62, 16 }
 0x396   : > { %10786 = vst [vmem:[#allocation38_spill] sm:$0xff] %v10257_v14  ;;  %v4779_v14 = vshll.u32 %v8464_v51, 16 }
 0x397   : > { %v6238_v37 = vrot.slane %v6236_v8, 2  ;;  %v8465_v8 = vld [vmem:[#allocation2 + $0x70] sm:$0xff] }
 0x398   : > { %5414 = vmatmul.bf16.gmra.mxu2 %v5284_v33  ;;  %v3959_v3 = vpop.f32.mrf.mxu3  ;;  %v4776_v33 = vshrl.u32 %v8464_v51, 16  ;;  %v6235_v51 = vrot.slane %v6233_v29, 1  ;;  %v8489_v29 = vld [vmem:[#allocation2 + $0x60] sm:$0xff] }
 0x39b   : > { %v3501_v61 = vpop.f32.mrf.mxu2  ;;  %v10262_v56 = vpop.f32.mrf.mxu1 }
 0x39c   : > { %v3576_v9 = vadd.f32 %v3501_v61, %v2985_v49  ;;  %v8139_v61 = vor.u32 %v8531_v1, %v8138_v7  ;;  %v6239_v1 = vor.u32 %v6238_v37, %v6235_v51  ;;  %v10290_v37 = vld [vmem:[%s10747_s5] ss:$0 sm:$0xff] }
 0x39e   : > { %v10264_v2 = vadd.f32 %v3959_v3, %v3576_v9  ;;  %4966 = vmatmul.bf16.gmra.mxu1 %v4774_v10  ;;  %v5286_v3 = vsel %vm5267_vm5, %v5283_v26, %v5285_v35  ;;  %v6225_v9 = vshrl.u32 %v8139_v61, 16  ;;  %v6228_v19 = vshll.u32 %v8139_v61, 16 }
 0x39f   : > { %v4781_v10 = vrot.slane %v4779_v14, 3  ;;  %v4457_v26 = vadd.f32 %v9866_v42, %v9998_v48 }
 0x3a0   : > { %10788 = vst [vmem:[#allocation40_spill] sm:$0xff] %v10264_v2  ;;  %v4778_v2 = vrot.slane %v4776_v33, 2  ;;  %v6227_v34 = vrot.slane %v6225_v9, 1  ;;  %v6230_v31 = vrot.slane %v6228_v19, 2  ;;  %v8533_v9 = vld [vmem:[%s9226_s11 + $0x18] sm:$0xff] }
 0x3a1   : > { %v5048_v33 = vadd.f32 %v4922_v6, %v4457_v26  ;;  %v4785_v6 = vshrl.u32 %v8465_v8, 16 }
 0x3a2   : > { %v6231_v18 = vor.u32 %v6230_v31, %v6227_v34  ;;  %v4782_v7 = vor.u32 %v4781_v10, %v4778_v2  ;;  %v4458_v31 = vadd.f32 %v9877_v63, %v10007_v47  ;;  %v4788_v2 = vshll.u32 %v8465_v8, 16 }
 0x3a3   : > { %v3503_v21 = vpop.f32.mrf.mxu2  ;;  %v10274_v13 = vpop.f32.mrf.mxu1  ;;  %v6242_v47 = vshrl.u32 %v8533_v9, 16  ;;  %v6245_v34 = vshll.u32 %v8533_v9, 16  ;;  %v8466_v9 = vld [vmem:[#allocation2 + $0x78] sm:$0xff] }
 0x3a4   : > { %v10271_v49 = vadd.f32 %v3503_v21, %v2986_v20  ;;  %v10277_v20 = vpop.f32.mrf.mxu0  ;;  %v6240_v14 = vsel %vm3170_vm3, %v6231_v18, %v6239_v1  ;;  %v4783_v62 = vsel %vm4676_vm4, %v4773_v44, %v4782_v7  ;;  %v5049_v42 = vadd.f32 %v4924_v50, %v4458_v31 }
 0x3a5   : > { %6468 = vmatmul.bf16.vlgmr.msra.gmra.mxu0 %v6240_v14  ;;  %v5287_v18 = vrot.slane %v8489_v29, 3  ;;  %v4790_v50 = vrot.slane %v4788_v2, 3 }
 0x3a6   : > { %10790 = vst [vmem:[#allocation42_spill] sm:$0xff] %v10271_v49 }
 0x3a7   : > { %v5288_v51 = vsel %vm5267_vm5, %v5285_v35, %v5287_v18 }
 0x3a8   : > { %5419 = vmatmul.bf16.gmra.mxu2 %v5286_v3 }
 0x3ab   : > { %v5380_v21 = vpop.f32.mrf.mxu2  ;;  %v10281_v49 = vpop.f32.mrf.mxu1 }
 0x3ac   : > { %v5506_v61 = vadd.f32 %v5380_v21, %v5048_v33  ;;  %v10294_v19 = vpop.f32.mrf.mxu0  ;;  %v4787_v21 = vrot.slane %v4785_v6, 2  ;;  %v6244_v33 = vrot.slane %v6242_v47, 1 }
 0x3ae   : > { %4971 = vmatmul.bf16.gmra.mxu1 %v4783_v62  ;;  %v5618_v3 = vadd.f32 %v10290_v37, %v5506_v61  ;;  %v6247_v62 = vrot.slane %v6245_v34, 2  ;;  %v4791_v61 = vor.u32 %v4790_v50, %v4787_v21 }
 0x3b0   : > { %v5654_v26 = vmax.f32 %v5618_v3, 0.0  ;;  %v6248_v8 = vor.u32 %v6247_v62, %v6244_v33  ;;  %v4792_v2 = vsel %vm4676_vm4, %v4782_v7, %v4791_v61  ;;  %v8490_v3 = vld [vmem:[#allocation2 + $0x68] sm:$0xff] }
 0x3b1   : > { %v5289_v34 = vrot.slane %v8490_v3, 3 }
 0x3b3   : > { %v5382_v48 = vpop.f32.mrf.mxu2  ;;  %v10296_v10 = vpop.f32.mrf.mxu1 }
 0x3b4   : > { %v5507_v44 = vadd.f32 %v5382_v48, %v5049_v42  ;;  %v4459_v42 = vadd.f32 %v9885_v28, %v10011_v43  ;;  %v6249_v48 = vsel %vm3170_vm3, %v6239_v1, %v6248_v8  ;;  %v10306_v6 = vpop.f32.mrf.mxu0 }
 0x3b5   : > { %6473 = vmatmul.bf16.gmra.mxu0 %v6249_v48 }
 0x3b6   : > { %v5619_v63 = vadd.f32 %v10290_v37, %v5507_v44  ;;  %v5050_v35 = vadd.f32 %v10262_v56, %v4459_v42  ;;  %v4797_v56 = vshll.u32 %v8466_v9, 16 }
 0x3b8   : > { %v5655_v14 = vmax.f32 %v5619_v63, 0.0  ;;  %5424 = vmatmul.bf16.gmra.mxu2 %v5288_v51  ;;  %v4460_v63 = vadd.f32 %v9894_v27, %v10022_v46  ;;  %v4794_v51 = vshrl.u32 %v8466_v9, 16  ;;  %v5290_v46 = vsel %vm5267_vm5, %v5287_v18, %v5289_v34 }
 0x3ba   : > { %v8660_v29 = vpack.c.bf16 %v5655_v14, %v5654_v26  ;;  %v5051_v28 = vadd.f32 %v10274_v13, %v4460_v63  ;;  %v8534_v26 = vld [vmem:[%s9226_s11 + $0x20] sm:$0xff]  ;;  %v4796_v62 = vrot.slane %v4794_v51, 2  ;;  %v4799_v13 = vrot.slane %v4797_v56, 3  ;;  %v8491_v56 = vld [vmem:[#allocation2 + $0x70] sm:$0xff] }
 0x3bb   : > { %v5385_v31 = vpop.f32.mrf.mxu2  ;;  %v10303_v44 = vpop.f32.mrf.mxu1  ;;  %v6251_v33 = vshrl.u32 %v8534_v26, 16  ;;  %v6254_v27 = vshll.u32 %v8534_v26, 16 }
 0x3bc   : > { %8661 = vst [vmem:[#allocation4] sm:$0xff] %v8660_v29   ;;  %v5508_v47 = vadd.f32 %v5385_v31, %v5050_v35  ;;  %v10318_v35 = vpop.f32.mrf.mxu0  ;;  %v4800_v63 = vor.u32 %v4799_v13, %v4796_v62 }
 0x3bd   : > { %v6253_v42 = vrot.slane %v6251_v33, 1  ;;  %v6256_v48 = vrot.slane %v6254_v27, 2 }
 0x3be   : > { %4976 = vmatmul.bf16.gmra.mxu1 %v4792_v2  ;;  %v5620_v21 = vadd.f32 %v10290_v37, %v5508_v47  ;;  %v10791_v47 = vld [vmem:[#allocation9_spill] sm:$0xff]  ;;  %v4801_v51 = vsel %vm4676_vm4, %v4791_v61, %v4800_v63  ;;  %v8535_v61 = vld [vmem:[%s9226_s11 + $0x28] sm:$0xff] }
 0x3bf   : > { %v6257_v3 = vor.u32 %v6256_v48, %v6253_v42  ;;  %v6260_v42 = vshrl.u32 %v8535_v61, 16  ;;  %v6263_v48 = vshll.u32 %v8535_v61, 16 }
 0x3c0   : > { %v5656_v29 = vmax.f32 %v5620_v21, 0.0  ;;  %v8467_v21 = vld [vmem:[#allocation2 + $0x80] sm:$0xff] }
 0x3c1   : > { %v4803_v62 = vshrl.u32 %v8467_v21, 16 }
 0x3c3   : > { %v5387_v43 = vpop.f32.mrf.mxu2  ;;  %v8505_v1 = vld [vmem:[#allocation4] sm:$0xff]  ;;  %v10314_v14 = vpop.f32.mrf.mxu1 }
 0x3c4   : > { %v5509_v50 = vadd.f32 %v5387_v43, %v5051_v28  ;;  %5982 = vmatmul.bf16.vlgmr.msra.gmra.mxu3 %v8505_v1  ;;  %v4461_v28 = vadd.f32 %v10791_v47, %v10029_v38  ;;  %v6258_v43 = vsel %vm3170_vm3, %v6248_v8, %v6257_v3  ;;  %v10330_v33 = vpop.f32.mrf.mxu0 }
 0x3c5   : > { %6478 = vmatmul.bf16.gmra.mxu0 %v6258_v43  ;;  %v6262_v43 = vrot.slane %v6260_v42, 1 }
 0x3c6   : > { %v5621_v7 = vadd.f32 %v10290_v37, %v5509_v50  ;;  %v5052_v1 = vadd.f32 %v10281_v49, %v4461_v28  ;;  %v10792_v50 = vld [vmem:[#allocation10_spill] sm:$0xff]  ;;  %v4806_v49 = vshll.u32 %v8467_v21, 16 }
 0x3c7   : > { %v4462_v26 = vadd.f32 %v10792_v50, %v10037_v52 }
 0x3c8   : > { %v5657_v31 = vmax.f32 %v5621_v7, 0.0  ;;  %5429 = vmatmul.bf16.gmra.mxu2 %v5290_v46  ;;  %v5291_v46 = vrot.slane %v8491_v56, 3 }
 0x3c9   : > { %v5053_v38 = vadd.f32 %v10296_v10, %v4462_v26  ;;  %v10793_v26 = vld [vmem:[#allocation11_spill] sm:$0xff] }
 0x3ca   : > { %v8665_v2 = vpack.c.bf16 %v5657_v31, %v5656_v29  ;;  %v5292_v10 = vsel %vm5267_vm5, %v5289_v34, %v5291_v46 }
 0x3cb   : > { %v5390_v9 = vpop.f32.mrf.mxu2  ;;  %v10323_v18 = vpop.f32.mrf.mxu1 }
 0x3cc   : > { %8856 = vst [vmem:[#allocation4 + $0x38] sm:$0xff] %v8665_v2   ;;  %v5510_v7 = vadd.f32 %v5390_v9, %v5052_v1  ;;  %v4805_v2 = vrot.slane %v4803_v62, 2  ;;  %v4808_v9 = vrot.slane %v4806_v49, 3  ;;  %v6265_v1 = vrot.slane %v6263_v48, 2  ;;  %v8492_v49 = vld [vmem:[#allocation2 + $0x78] sm:$0xff] }
 0x3cd   : > { %v5293_v48 = vrot.slane %v8492_v49, 3 }
 0x3ce   : > { %4981 = vmatmul.bf16.gmra.mxu1 %v4801_v51  ;;  %v5622_v13 = vadd.f32 %v10290_v37, %v5510_v7  ;;  %v6266_v56 = vor.u32 %v6265_v1, %v6262_v43  ;;  %v4809_v50 = vor.u32 %v4808_v9, %v4805_v2  ;;  %v4463_v7 = vadd.f32 %v10793_v26, %v10041_v57 }
 0x3d0   : > { %v5658_v47 = vmax.f32 %v5622_v13, 0.0  ;;  %v4810_v62 = vsel %vm4676_vm4, %v4800_v63, %v4809_v50  ;;  %v8468_v13 = vld [vmem:[#allocation2 + $0x88] sm:$0xff] }
 0x3d1   : > { %v4815_v2 = vshll.u32 %v8468_v13, 16 }
 0x3d3   : > { %v5392_v8 = vpop.f32.mrf.mxu2  ;;  %v8506_v27 = vld [vmem:[#allocation4 + $0x38] sm:$0xff]  ;;  %v10334_v31 = vpop.f32.mrf.mxu1 }
 0x3d4   : > { %v5511_v29 = vadd.f32 %v5392_v8, %v5053_v38  ;;  %5987 = vmatmul.bf16.gmra.mxu3 %v8506_v27  ;;  %v6267_v38 = vsel %vm3170_vm3, %v6257_v3, %v6266_v56  ;;  %v10341_v8 = vpop.f32.mrf.mxu0  ;;  %v5054_v27 = vadd.f32 %v10303_v44, %v4463_v7 }
 0x3d5   : > { %6483 = vmatmul.bf16.gmra.mxu0 %v6267_v38 }
 0x3d6   : > { %v5623_v52 = vadd.f32 %v10290_v37, %v5511_v29  ;;  %v10794_v29 = vld [vmem:[#allocation12_spill] sm:$0xff] }
 0x3d7   : > { %v4464_v61 = vadd.f32 %v10794_v29, %v10049_v24 }
 0x3d8   : > { %v5659_v28 = vmax.f32 %v5623_v52, 0.0  ;;  %5434 = vmatmul.bf16.gmra.mxu2 %v5292_v10  ;;  %v4812_v10 = vshrl.u32 %v8468_v13, 16 }
 0x3d9   : > { %v5055_v57 = vadd.f32 %v10314_v14, %v4464_v61  ;;  %v5294_v14 = vsel %vm5267_vm5, %v5291_v46, %v5293_v48  ;;  %v10795_v61 = vld [vmem:[#allocation13_spill] sm:$0xff] }
 0x3da   : > { %v8670_v51 = vpack.c.bf16 %v5659_v28, %v5658_v47  ;;  %v8536_v47 = vld [vmem:[%s9226_s11 + $0x30] sm:$0xff] }
 0x3db   : > { %v5395_v21 = vpop.f32.mrf.mxu2  ;;  %v10343_v34 = vpop.f32.mrf.mxu1  ;;  %v6269_v43 = vshrl.u32 %v8536_v47, 16  ;;  %v6272_v24 = vshll.u32 %v8536_v47, 16 }
 0x3dc   : > { %8857 = vst [vmem:[#allocation4 + $0x78] sm:$0xff] %v8670_v51   ;;  %v5512_v52 = vadd.f32 %v5395_v21, %v5054_v27  ;;  %v10355_v1 = vpop.f32.mrf.mxu0  ;;  %v4814_v51 = vrot.slane %v4812_v10, 2  ;;  %v4817_v21 = vrot.slane %v4815_v2, 3  ;;  %v8493_v10 = vld [vmem:[#allocation2 + $0x80] sm:$0xff]  ;;  %v8469_v2 = vld [vmem:[#allocation2 + $0x90] sm:$0xff] }
 0x3dd   : > { %v6271_v38 = vrot.slane %v6269_v43, 1  ;;  %v6274_v27 = vrot.slane %v6272_v24, 2  ;;  %v5295_v24 = vrot.slane %v8493_v10, 3 }
 0x3de   : > { %4986 = vmatmul.bf16.gmra.mxu1 %v4810_v62  ;;  %v5624_v44 = vadd.f32 %v10290_v37, %v5512_v52  ;;  %v4818_v29 = vor.u32 %v4817_v21, %v4814_v51  ;;  %v4465_v52 = vadd.f32 %v10795_v61, %v10056_v23 }
 0x3df   : > { %v6275_v49 = vor.u32 %v6274_v27, %v6271_v38  ;;  %v5296_v27 = vsel %vm5267_vm5, %v5293_v48, %v5295_v24 }
 0x3e0   : > { %v5660_v26 = vmax.f32 %v5624_v44, 0.0  ;;  %v5056_v46 = vadd.f32 %v10323_v18, %v4465_v52  ;;  %v10796_v44 = vld [vmem:[#allocation14_spill] sm:$0xff]  ;;  %v4824_v18 = vshll.u32 %v8469_v2, 16 }
 0x3e3   : > { %v5397_v3 = vpop.f32.mrf.mxu2  ;;  %v8507_v42 = vld [vmem:[#allocation4 + $0x78] sm:$0xff]  ;;  %v10352_v28 = vpop.f32.mrf.mxu1 }
 0x3e4   : > { %v5513_v9 = vadd.f32 %v5397_v3, %v5055_v57  ;;  %5992 = vmatmul.bf16.gmra.mxu3 %v8507_v42  ;;  %v6276_v57 = vsel %vm3170_vm3, %v6266_v56, %v6275_v49  ;;  %v4819_v42 = vsel %vm4676_vm4, %v4809_v50, %v4818_v29  ;;  %v8537_v50 = vld [vmem:[%s9226_s11 + $0x38] sm:$0xff] }
 0x3e5   : > { %6488 = vmatmul.bf16.gmra.mxu0 %v6276_v57  ;;  %v6281_v38 = vshll.u32 %v8537_v50, 16 }
 0x3e6   : > { %v5625_v63 = vadd.f32 %v10290_v37, %v5513_v9  ;;  %v4466_v9 = vadd.f32 %v10796_v44, %v10064_v55 }
 0x3e7   : > { %v6283_v57 = vrot.slane %v6281_v38, 2 }
 0x3e8   : > { %v5661_v7 = vmax.f32 %v5625_v63, 0.0  ;;  %5439 = vmatmul.bf16.gmra.mxu2 %v5294_v14  ;;  %v10367_v63 = vpop.f32.mrf.mxu0  ;;  %v5057_v23 = vadd.f32 %v10334_v31, %v4466_v9  ;;  %v4821_v14 = vshrl.u32 %v8469_v2, 16  ;;  %v4826_v31 = vrot.slane %v4824_v18, 3 }
 0x3e9   : > { %v4467_v9 = vadd.f32 %v9963_v15, %v10071_v45 }
 0x3ea   : > { %v8675_v62 = vpack.c.bf16 %v5661_v7, %v5660_v26  ;;  %v6278_v7 = vshrl.u32 %v8537_v50, 16 }
 0x3eb   : > { %v5400_v13 = vpop.f32.mrf.mxu2  ;;  %v10361_v3 = vpop.f32.mrf.mxu1 }
 0x3ec   : > { %8858 = vst [vmem:[#allocation4 + $0x58] sm:$0xff] %v8675_v62   ;;  %v5514_v47 = vadd.f32 %v5400_v13, %v5056_v46  ;;  %v4823_v62 = vrot.slane %v4821_v14, 2  ;;  %v6280_v52 = vrot.slane %v6278_v7, 1  ;;  %v10797_v14 = vld [vmem:[#allocation15_spill] sm:$0xff] }
 0x3ed   : > { %v4468_v18 = vadd.f32 %v10797_v14, %v10076_v39 }
 0x3ee   : > { %4991 = vmatmul.bf16.gmra.mxu1 %v4819_v42  ;;  %v5626_v51 = vadd.f32 %v10290_v37, %v5514_v47  ;;  %v10376_v42 = vor.u32 %v6283_v57, %v6280_v52  ;;  %v4827_v44 = vor.u32 %v4826_v31, %v4823_v62 }
 0x3ef   : > { %v5059_v15 = vadd.f32 %v10352_v28, %v4468_v18 }
 0x3f0   : > { %v5662_v13 = vmax.f32 %v5626_v51, 0.0  ;;  %v10378_v10 = vpop.f32.mrf.mxu0  ;;  %v6285_v48 = vsel %vm3170_vm3, %v6275_v49, %v10376_v42 }
 0x3f3   : > { %v5402_v56 = vpop.f32.mrf.mxu2  ;;  %v8508_v43 = vld [vmem:[#allocation4 + $0x58] sm:$0xff]  ;;  %v10372_v26 = vpop.f32.mrf.mxu1 }
 0x3f4   : > { %v5515_v21 = vadd.f32 %v5402_v56, %v5057_v23  ;;  %5997 = vmatmul.bf16.gmra.mxu3 %v8508_v43  ;;  %v5058_v23 = vadd.f32 %v10343_v34, %v4467_v9  ;;  %v4828_v56 = vsel %vm4676_vm4, %v4818_v29, %v4827_v44  ;;  %v8494_v43 = vld [vmem:[#allocation2 + $0x88] sm:$0xff]  ;;  %v8538_v9 = vld [vmem:[%s9226_s11 + $0x40] sm:$0xff] }
 0x3f5   : > { %6493 = vmatmul.bf16.gmra.mxu0 %v6285_v48  ;;  %v4013_v48 = vadd.f32 %v10094_v5, %v10099_v12  ;;  %v6287_v14 = vshrl.u32 %v8538_v9, 16  ;;  %v6290_v18 = vshll.u32 %v8538_v9, 16 }
 0x3f6   : > { %v5627_v55 = vadd.f32 %v10290_v37, %v5515_v21  ;;  %v8470_v21 = vld [vmem:[#allocation2 + $0x98] sm:$0xff] }
 0x3f7   : > { %v4830_v29 = vshrl.u32 %v8470_v21, 16  ;;  %v4470_v5 = vadd.f32 %v10183_v54, %v4013_v48 }
 0x3f8   : > { %v5663_v61 = vmax.f32 %v5627_v55, 0.0  ;;  %5444 = vmatmul.bf16.gmra.mxu2 %v5296_v27  ;;  %v5297_v55 = vrot.slane %v8494_v43, 3  ;;  %v10392_v38 = vpop.f32.mrf.mxu0  ;;  %v4833_v27 = vshll.u32 %v8470_v21, 16 }
 0x3fa   : > { %v8680_v46 = vpack.c.bf16 %v5663_v61, %v5662_v13  ;;  %v5298_v62 = vsel %vm5267_vm5, %v5295_v24, %v5297_v55  ;;  %v4565_v13 = vld [vmem:[#allocation2 + $0xa0] sm:$0x7]  ;;  %v4832_v61 = vrot.slane %v4830_v29, 2  ;;  %v4835_v52 = vrot.slane %v4833_v27, 3 }
 0x3fb   : > { %v5405_v2 = vpop.f32.mrf.mxu2  ;;  %v10384_v47 = vpop.f32.mrf.mxu1  ;;  %v5061_v29 = vadd.f32 %v10372_v26, %v4470_v5 }
 0x3fc   : > { %8859 = vst [vmem:[#allocation4 + $0x20] sm:$0xff] %v8680_v46   ;;  %v5516_v51 = vadd.f32 %v5405_v2, %v5058_v23  ;;  %v4656_v2 = vunpack.c.l.b16 %v4565_v13  ;;  %v10798_v23 = vld [vmem:[#allocation16_spill] sm:$0xff]  ;;  %v4836_v24 = vor.u32 %v4835_v52, %v4832_v61 }
 0x3fe   : > { %4996 = vmatmul.bf16.gmra.mxu1 %v4828_v56  ;;  %v5628_v49 = vadd.f32 %v10290_v37, %v5516_v51  ;;  %v4469_v56 = vadd.f32 %v10169_v17, %v10798_v23 }
 0x400   : > { %v5664_v31 = vmax.f32 %v5628_v49, 0.0  ;;  %v5060_v51 = vadd.f32 %v10361_v3, %v4469_v56  ;;  %v10406_v21 = vpop.f32.mrf.mxu0  ;;  %v6289_v49 = vrot.slane %v6287_v14, 1  ;;  %v8539_v56 = vld [vmem:[%s9226_s11 + $0x48] sm:$0xff] }
 0x401   : > { %v10799_v14 = vld [vmem:[#allocation19_spill] sm:$0xff] }
 0x403   : > { %v5407_v45 = vpop.f32.mrf.mxu2  ;;  %v8509_v50 = vld [vmem:[#allocation4 + $0x20] sm:$0xff]  ;;  %v10394_v34 = vpop.f32.mrf.mxu1 }
 0x404   : > { %v5517_v7 = vadd.f32 %v5407_v45, %v5059_v15  ;;  %6002 = vmatmul.bf16.gmra.mxu3 %v8509_v50  ;;  %v4837_v15 = vsel %vm4676_vm4, %v4827_v44, %v4836_v24  ;;  %v8495_v45 = vld [vmem:[#allocation2 + $0x90] sm:$0xff]  ;;  %v4675_v50 = vpack.c.b16 %v4656_v2, %v4656_v2 }
 0x406   : > { %v5629_v39 = vadd.f32 %v10290_v37, %v5517_v7  ;;  %v6292_v7 = vrot.slane %v6290_v18, 2  ;;  %v4842_v3 = vshll.u32 %v4675_v50, 16  ;;  %v10800_v18 = vld [vmem:[#allocation18_spill] sm:$0xff] }
 0x408   : > { %v5665_v28 = vmax.f32 %v5629_v39, 0.0  ;;  %5449 = vmatmul.bf16.gmra.mxu2 %v5298_v62  ;;  %v6293_v17 = vor.u32 %v6292_v7, %v6289_v49  ;;  %v5299_v62 = vrot.slane %v8495_v45, 3  ;;  %v10418_v9 = vpop.f32.mrf.mxu0  ;;  %v6299_v49 = vshll.u32 %v8539_v56, 16 }
 0x40a   : > { %v8685_v57 = vpack.c.bf16 %v5665_v28, %v5664_v31  ;;  %v4839_v31 = vshrl.u32 %v4675_v50, 16  ;;  %v6294_v28 = vsel %vm3170_vm3, %v10376_v42, %v6293_v17  ;;  %v5300_v26 = vsel %vm5267_vm5, %v5297_v55, %v5299_v62 }
 0x40b   : > { %v5410_v46 = vpop.f32.mrf.mxu2  ;;  %v10403_v43 = vpop.f32.mrf.mxu1  ;;  %6498 = vmatmul.bf16.gmra.mxu0 %v6294_v28  ;;  %v6296_v55 = vshrl.u32 %v8539_v56, 16  ;;  %v4017_v56 = vadd.f32 %v10130_v0, %v10133_v36 }
 0x40c   : > { %8860 = vst [vmem:[#allocation4 + $0x8] sm:$0xff] %v8685_v57   ;;  %v5518_v12 = vadd.f32 %v5410_v46, %v5060_v51  ;;  %v4841_v52 = vrot.slane %v4839_v31, 2  ;;  %v4844_v57 = vrot.slane %v4842_v3, 3  ;;  %v4015_v51 = vadd.f32 %v10800_v18, %v10799_v14  ;;  %v8496_v31 = vld [vmem:[#allocation2 + $0x98] sm:$0xff]  ;;  %v8540_v18 = vld [vmem:[%s9226_s11 + $0x50] sm:$0xff] }
 0x40d   : > { %v4473_v14 = vadd.f32 %v10211_v58, %v10126_v40 }
 0x40e   : > { %5001 = vmatmul.bf16.gmra.mxu1 %v4837_v15  ;;  %v5630_v44 = vadd.f32 %v10290_v37, %v5518_v12  ;;  %v4845_v23 = vor.u32 %v4844_v57, %v4841_v52  ;;  %v10801_v15 = vld [vmem:[#allocation17_spill] sm:$0xff]  ;;  %v6298_v12 = vrot.slane %v6296_v55, 1 }
 0x40f   : > { %v4471_v45 = vadd.f32 %v10190_v53, %v10801_v15  ;;  %v6305_v15 = vshrl.u32 %v8540_v18, 16 }
 0x410   : > { %v5666_v46 = vmax.f32 %v5630_v44, 0.0  ;;  %v4846_v5 = vsel %vm4676_vm4, %v4836_v24, %v4845_v23  ;;  %v10431_v53 = vpop.f32.mrf.mxu0 }
 0x411   : > { %v5062_v7 = vadd.f32 %v10384_v47, %v4471_v45  ;;  %v6308_v45 = vshll.u32 %v8540_v18, 16 }
 0x413   : > { %v5412_v27 = vpop.f32.mrf.mxu2  ;;  %v8510_v39 = vld [vmem:[#allocation4 + $0x8] sm:$0xff]  ;;  %v10414_v61 = vpop.f32.mrf.mxu1 }
 0x414   : > { %v5519_v13 = vadd.f32 %v5412_v27, %v5061_v29  ;;  %6007 = vmatmul.bf16.gmra.mxu3 %v8510_v39  ;;  %v6301_v29 = vrot.slane %v6299_v49, 2  ;;  %v4472_v27 = vadd.f32 %v10198_v41, %v4015_v51  ;;  %v5301_v41 = vrot.slane %v8496_v31, 3 }
 0x415   : > { %v4474_v49 = vadd.f32 %v10221_v25, %v4017_v56 }
 0x416   : > { %v5631_v54 = vadd.f32 %v10290_v37, %v5519_v13  ;;  %v6302_v3 = vor.u32 %v6301_v29, %v6298_v12  ;;  %v5063_v28 = vadd.f32 %v10394_v34, %v4472_v27  ;;  %v5302_v57 = vsel %vm5267_vm5, %v5299_v62, %v5301_v41 }
 0x417   : > { %v5064_v62 = vadd.f32 %v10403_v43, %v4473_v14  ;;  %v6310_v12 = vrot.slane %v6308_v45, 2  ;;  %v5065_v29 = vadd.f32 %v10414_v61, %v4474_v49 }
 0x418   : > { %v5667_v2 = vmax.f32 %v5631_v54, 0.0  ;;  %5454 = vmatmul.bf16.gmra.mxu2 %v5300_v26  ;;  %v6303_v54 = vsel %vm3170_vm3, %v6293_v17, %v6302_v3 }
 0x41a   : > { %v8690_v42 = vpack.c.bf16 %v5667_v2, %v5666_v46  ;;  %v5156_v2 = vld [vmem:[#allocation2 + $0xa0] sm:$0x7] }
 0x41b   : > { %v5415_v48 = vpop.f32.mrf.mxu2  ;;  %v10425_v50 = vpop.f32.mrf.mxu1  ;;  %6503 = vmatmul.bf16.gmra.mxu0 %v6303_v54  ;;  %v5247_v23 = vunpack.c.l.b16 %v5156_v2 }
 0x41c   : > { %8861 = vst [vmem:[#allocation4 + $0x70] sm:$0xff] %v8690_v42   ;;  %v5520_v39 = vadd.f32 %v5415_v48, %v5062_v7 }
 0x41d   : > { %v5266_v55 = vpack.c.b16 %v5247_v23, %v5247_v23 }
 0x41e   : > { %5006 = vmatmul.bf16.gmra.mxu1 %v4846_v5  ;;  %v5632_v47 = vadd.f32 %v10290_v37, %v5520_v39  ;;  %v6307_v5 = vrot.slane %v6305_v15, 1 }
 0x41f   : > { %v5303_v40 = vrot.slane %v5266_v55, 3 }
 0x420   : > { %v5668_v46 = vmax.f32 %v5632_v47, 0.0  ;;  %v6311_v0 = vor.u32 %v6310_v12, %v6307_v5  ;;  %v10485_v5 = vld [vmem:[%s10749_s7] ss:$0 sm:$0xff] }
 0x421   : > { %v5304_v61 = vsel %vm5267_vm5, %v5301_v41, %v5303_v40 }
 0x422   : > { %v10437_v17 = vpop.f32.mrf.mxu0  ;;  %v6312_v43 = vsel %vm3170_vm3, %v6302_v3, %v6311_v0  ;;  %v4475_v3 = vadd.f32 %v10230_v30, %v10142_v22 }
 0x423   : > { %v5417_v44 = vpop.f32.mrf.mxu2  ;;  %v8511_v13 = vld [vmem:[#allocation4 + $0x70] sm:$0xff]  ;;  %v4969_v24 = vpop.f32.mrf.mxu1 }
 0x424   : > { %v5521_v26 = vadd.f32 %v5417_v44, %v5063_v28  ;;  %6012 = vmatmul.bf16.gmra.mxu3 %v8511_v13 }
 0x426   : > { %v5633_v52 = vadd.f32 %v10290_v37, %v5521_v26 }
 0x428   : > { %v5669_v34 = vmax.f32 %v5633_v52, 0.0  ;;  %5459 = vmatmul.bf16.gmra.mxu2 %v5302_v57  ;;  %v4019_v52 = vadd.f32 %v10149_v16, %v10152_v60  ;;  %v8541_v57 = vld [vmem:[%s9226_s11 + $0x58] sm:$0xff] }
 0x429   : > { %v6314_v41 = vshrl.u32 %v8541_v57, 16  ;;  %v6317_v2 = vshll.u32 %v8541_v57, 16 }
 0x42a   : > { %v8695_v42 = vpack.c.bf16 %v5669_v34, %v5668_v46  ;;  %v10449_v58 = vpop.f32.mrf.mxu0  ;;  %v5066_v34 = vadd.f32 %v10425_v50, %v4475_v3 }
 0x42b   : > { %v5420_v48 = vpop.f32.mrf.mxu2  ;;  %v10444_v51 = vpop.f32.mrf.mxu1  ;;  %6508 = vmatmul.bf16.gmra.mxu0 %v6312_v43  ;;  %v6316_v56 = vrot.slane %v6314_v41, 1  ;;  %v6319_v14 = vrot.slane %v6317_v2, 2 }
 0x42c   : > { %8862 = vst [vmem:[#allocation4 + $0x80] sm:$0xff] %v8695_v42   ;;  %v5522_v7 = vadd.f32 %v5420_v48, %v5064_v62  ;;  %v10467_v42 = vpop.f32.mrf.mxu3  ;;  %v4476_v48 = vadd.f32 %v10241_v11, %v4019_v52 }
 0x42d   : > { %v6320_v16 = vor.u32 %v6319_v14, %v6316_v56 }
 0x42e   : > { %v5634_v39 = vadd.f32 %v10290_v37, %v5522_v7  ;;  %v5067_v18 = vadd.f32 %v4969_v24, %v4476_v48  ;;  %v10480_v7 = vld [vmem:[%s10751_s9] ss:$0 sm:$0xff] }
 0x42f   : > { %v6321_v50 = vsel %vm3170_vm3, %v6311_v0, %v6320_v16 }
 0x430   : > { %v5670_v44 = vmax.f32 %v5634_v39, 0.0  ;;  %v8542_v39 = vld [vmem:[%s9226_s11 + $0x60] sm:$0xff] }
 0x432   : > { %v10457_v26 = vpop.f32.mrf.mxu0 }
 0x433   : > { %v5422_v36 = vpop.f32.mrf.mxu2  ;;  %v8512_v27 = vld [vmem:[#allocation4 + $0x80] sm:$0xff]  ;;  %v10453_v28 = vpop.f32.mrf.mxu1 }
 0x434   : > { %v5523_v31 = vadd.f32 %v5422_v36, %v5065_v29  ;;  %6017 = vmatmul.bf16.gmra.mxu3 %v8512_v27  ;;  %v4021_v36 = vadd.f32 %v10160_v4, %v10162_v59  ;;  %v10802_v27 = vld [vmem:[#allocation35_spill] sm:$0xff] }
 0x435   : > { %v4477_v40 = vadd.f32 %v10802_v27, %v10156_v32  ;;  %v10807_v27 = vld [vmem:[#allocation41_spill] sm:$0xff] }
 0x436   : > { %v5635_v25 = vadd.f32 %v10290_v37, %v5523_v31  ;;  %v6470_v31 = vadd.f32 %v10480_v7, %v10437_v17  ;;  %v6472_v17 = vadd.f32 %v10480_v7, %v10449_v58 }
 0x438   : > { %v5671_v13 = vmax.f32 %v5635_v25, 0.0  ;;  %5464 = vmatmul.bf16.gmra.mxu2 %v5304_v61  ;;  %v5068_v25 = vadd.f32 %v10444_v51, %v4477_v40  ;;  %v6323_v61 = vshrl.u32 %v8542_v39, 16 }
 0x43a   : > { %v8700_v54 = vpack.c.bf16 %v5671_v13, %v5670_v44  ;;  %v10470_v22 = vpop.f32.mrf.mxu0  ;;  %v6326_v44 = vshll.u32 %v8542_v39, 16  ;;  %v10803_v13 = vld [vmem:[#allocation39_spill] sm:$0xff]  ;;  %v6325_v32 = vrot.slane %v6323_v61, 1 }
 0x43b   : > { %v5425_v47 = vpop.f32.mrf.mxu2  ;;  %v10464_v46 = vpop.f32.mrf.mxu1  ;;  %6513 = vmatmul.bf16.gmra.mxu0 %v6321_v50  ;;  %v8543_v39 = vld [vmem:[%s9226_s11 + $0x68] sm:$0xff] }
 0x43c   : > { %8863 = vst [vmem:[#allocation4 + $0x88] sm:$0xff] %v8700_v54   ;;  %v5524_v23 = vadd.f32 %v5425_v47, %v5066_v34  ;;  %v4478_v54 = vadd.f32 %v10803_v13, %v4021_v36  ;;  %v6328_v52 = vrot.slane %v6326_v44, 2  ;;  %v10806_v36 = vld [vmem:[#allocation20_spill] sm:$0xff]  ;;  %v6332_v61 = vshrl.u32 %v8543_v39, 16 }
 0x43d   : > { %v4479_v40 = vadd.f32 %v10807_v27, %v10806_v36  ;;  %v6335_v44 = vshll.u32 %v8543_v39, 16 }
 0x43e   : > { %v5636_v30 = vadd.f32 %v10290_v37, %v5524_v23  ;;  %v5069_v34 = vadd.f32 %v10453_v28, %v4478_v54  ;;  %v6329_v51 = vor.u32 %v6328_v52, %v6325_v32 }
 0x43f   : > { %v6337_v32 = vrot.slane %v6335_v44, 2 }
 0x440   : > { %v5672_v55 = vmax.f32 %v5636_v30, 0.0 }
 0x442   : > { %v10487_v0 = vpop.f32.mrf.mxu0 }
 0x443   : > { %v5427_v60 = vpop.f32.mrf.mxu2  ;;  %v8513_v62 = vld [vmem:[#allocation4 + $0x88] sm:$0xff]  ;;  %v10475_v11 = vpop.f32.mrf.mxu1  ;;  %v6480_v36 = vadd.f32 %v10480_v7, %v10487_v0 }
 0x444   : > { %v5525_v15 = vadd.f32 %v5427_v60, %v5067_v18  ;;  %6022 = vmatmul.bf16.gmra.mxu3 %v8513_v62  ;;  %v6330_v18 = vsel %vm3170_vm3, %v6320_v16, %v6329_v51  ;;  %v10804_v16 = vld [vmem:[#allocation22_spill] sm:$0xff] }
 0x446   : > { %v5637_v45 = vadd.f32 %v10290_v37, %v5525_v15 }
 0x447   : > { %v5983_v24 = vpop.f32.mrf.mxu3 }
 0x448   : > { %v5673_v49 = vmax.f32 %v5637_v45, 0.0  ;;  %v5984_v43 = vadd.f32 %v10485_v5, %v5983_v24 }
 0x44a   : > { %v8705_v12 = vpack.c.bf16 %v5673_v49, %v5672_v55  ;;  %v6559_v3 = vadd.f32 %v6470_v31, %v5984_v43  ;;  %v10508_v23 = vpop.f32.mrf.mxu0  ;;  %v6475_v31 = vadd.f32 %v10480_v7, %v10457_v26 }
 0x44b   : > { %v5430_v29 = vpop.f32.mrf.mxu2  ;;  %v10500_v4 = vpop.f32.mrf.mxu1  ;;  %6518 = vmatmul.bf16.gmra.mxu0 %v6330_v18 }
 0x44c   : > { %8864 = vst [vmem:[#allocation4 + $0x40] sm:$0xff] %v8705_v12   ;;  %v5526_v47 = vadd.f32 %v5430_v29, %v5068_v25  ;;  %v6595_v60 = vmax.f32 %v6559_v3, 0.0  ;;  %v10805_v12 = vld [vmem:[#allocation21_spill] sm:$0xff]  ;;  %v5070_v25 = vadd.f32 %v10464_v46, %v4479_v40  ;;  %v6477_v3 = vadd.f32 %v10480_v7, %v10470_v22 }
 0x44d   : > { %v4023_v29 = vadd.f32 %v10805_v12, %v10804_v16  ;;  %v10810_v16 = vld [vmem:[#allocation23_spill] sm:$0xff] }
 0x44e   : > { %v5638_v56 = vadd.f32 %v10290_v37, %v5526_v47  ;;  %v4481_v12 = vadd.f32 %v10294_v19, %v10810_v16  ;;  %v6482_v19 = vadd.f32 %v10480_v7, %v10508_v23 }
 0x44f   : > { %v5985_v59 = vpop.f32.mrf.mxu3  ;;  %v4480_v13 = vadd.f32 %v10277_v20, %v4023_v29  ;;  %v8544_v29 = vld [vmem:[%s9226_s11 + $0x70] sm:$0xff] }
 0x450   : > { %v5986_v57 = vadd.f32 %v10485_v5, %v5985_v59  ;;  %v5674_v30 = vmax.f32 %v5638_v56, 0.0  ;;  %v6334_v59 = vrot.slane %v6332_v61, 1  ;;  %v5072_v40 = vadd.f32 %v10500_v4, %v4481_v12 }
 0x451   : > { %v5071_v26 = vadd.f32 %v10475_v11, %v4480_v13  ;;  %v6341_v39 = vshrl.u32 %v8544_v29, 16 }
 0x452   : > { %v6560_v41 = vadd.f32 %v6472_v17, %v5986_v57  ;;  %v10516_v24 = vpop.f32.mrf.mxu0  ;;  %v6338_v57 = vor.u32 %v6337_v32, %v6334_v59 }
 0x453   : > { %v5432_v2 = vpop.f32.mrf.mxu2  ;;  %v8514_v48 = vld [vmem:[#allocation4 + $0x40] sm:$0xff]  ;;  %v4984_v55 = vpop.f32.mrf.mxu1  ;;  %v6343_v13 = vrot.slane %v6341_v39, 1 }
 0x454   : > { %v5527_v14 = vadd.f32 %v5432_v2, %v5069_v34  ;;  %v6596_v62 = vmax.f32 %v6560_v41, 0.0  ;;  %6027 = vmatmul.bf16.gmra.mxu3 %v8514_v48  ;;  %v6339_v56 = vsel %vm3170_vm3, %v6329_v51, %v6338_v57 }
 0x456   : > { %v5639_v58 = vadd.f32 %v10290_v37, %v5527_v14  ;;  %v8750_v28 = vpack.c.bf16 %v6596_v62, %v6595_v60 }
 0x457   : > { %v5988_v50 = vpop.f32.mrf.mxu3 }
 0x458   : > { %v5675_v15 = vmax.f32 %v5639_v58, 0.0  ;;  %8751 = vst [vmem:[%s10513_s20] sm:$0xff] %v8750_v28   ;;  %v5989_v43 = vadd.f32 %v10485_v5, %v5988_v50 }
 0x45a   : > { %v8710_v45 = vpack.c.bf16 %v5675_v15, %v5674_v30  ;;  %v6561_v52 = vadd.f32 %v6475_v31, %v5989_v43  ;;  %v10532_v2 = vpop.f32.mrf.mxu0  ;;  %v6344_v31 = vshll.u32 %v8544_v29, 16 }
 0x45b   : > { %v5435_v49 = vpop.f32.mrf.mxu2  ;;  %v4987_v18 = vpop.f32.mrf.mxu1  ;;  %6523 = vmatmul.bf16.gmra.mxu0 %v6339_v56 }
 0x45c   : > { %8865 = vst [vmem:[#allocation4 + $0x50] sm:$0xff] %v8710_v45   ;;  %v5528_v54 = vadd.f32 %v5435_v49, %v5070_v25  ;;  %v6597_v14 = vmax.f32 %v6561_v52, 0.0  ;;  %v10808_v45 = vld [vmem:[#allocation25_spill] sm:$0xff]  ;;  %v10809_v49 = vld [vmem:[#allocation24_spill] sm:$0xff] }
 0x45d   : > { %v4025_v51 = vadd.f32 %v10809_v49, %v10808_v45 }
 0x45e   : > { %v5640_v20 = vadd.f32 %v10290_v37, %v5528_v54  ;;  %v6346_v54 = vrot.slane %v6344_v31, 2 }
 0x45f   : > { %v5990_v47 = vpop.f32.mrf.mxu3  ;;  %v4482_v25 = vadd.f32 %v10306_v6, %v4025_v51 }
 0x460   : > { %v5991_v17 = vadd.f32 %v10485_v5, %v5990_v47  ;;  %v5676_v62 = vmax.f32 %v5640_v20, 0.0  ;;  %v6347_v32 = vor.u32 %v6346_v54, %v6343_v13 }
 0x461   : > { %v5073_v0 = vadd.f32 %v4984_v55, %v4482_v25 }
 0x462   : > { %v6562_v34 = vadd.f32 %v6477_v3, %v5991_v17  ;;  %v10538_v50 = vpop.f32.mrf.mxu0 }
 0x463   : > { %v5437_v41 = vpop.f32.mrf.mxu2  ;;  %v8515_v46 = vld [vmem:[#allocation4 + $0x50] sm:$0xff]  ;;  %v4989_v43 = vpop.f32.mrf.mxu1 }
 0x464   : > { %v5529_v48 = vadd.f32 %v5437_v41, %v5071_v26  ;;  %v6598_v22 = vmax.f32 %v6562_v34, 0.0  ;;  %6032 = vmatmul.bf16.gmra.mxu3 %v8515_v46  ;;  %v6348_v34 = vsel %vm3170_vm3, %v6338_v57, %v6347_v32 }
 0x466   : > { %v5641_v11 = vadd.f32 %v10290_v37, %v5529_v48  ;;  %v8755_v60 = vpack.c.bf16 %v6598_v22, %v6597_v14 }
 0x467   : > { %v5993_v28 = vpop.f32.mrf.mxu3 }
 0x468   : > { %v5677_v58 = vmax.f32 %v5641_v11, 0.0  ;;  %8873 = vst [vmem:[%s10513_s20 + $0x8] sm:$0xff] %v8755_v60   ;;  %v5994_v27 = vadd.f32 %v10485_v5, %v5993_v28  ;;  %v10811_v60 = vld [vmem:[#allocation28_spill] sm:$0xff]  ;;  %v10813_v28 = vld [vmem:[#allocation26_spill] sm:$0xff] }
 0x469   : > { %v4483_v57 = vadd.f32 %v10318_v35, %v10813_v28  ;;  %v6487_v35 = vadd.f32 %v10480_v7, %v10532_v2 }
 0x46a   : > { %v8715_v30 = vpack.c.bf16 %v5677_v58, %v5676_v62  ;;  %v6563_v47 = vadd.f32 %v6480_v36, %v5994_v27  ;;  %v10553_v17 = vpop.f32.mrf.mxu0  ;;  %v10812_v62 = vld [vmem:[#allocation27_spill] sm:$0xff] }
 0x46b   : > { %v5440_v15 = vpop.f32.mrf.mxu2  ;;  %6528 = vmatmul.bf16.gmra.mxu0 %v6348_v34  ;;  %v4992_v14 = vpop.f32.mrf.mxu1  ;;  %v4027_v58 = vadd.f32 %v10812_v62, %v10811_v60  ;;  %v5074_v49 = vadd.f32 %v4987_v18, %v4483_v57 }
 0x46c   : > { %8866 = vst [vmem:[#allocation4 + $0x28] sm:$0xff] %v8715_v30   ;;  %v5530_v61 = vadd.f32 %v5440_v15, %v5072_v40  ;;  %v6599_v41 = vmax.f32 %v6563_v47, 0.0  ;;  %v8545_v30 = vld [vmem:[%s9226_s11 + $0x78] sm:$0xff]  ;;  %v6485_v15 = vadd.f32 %v10480_v7, %v10516_v24 }
 0x46d   : > { %v6350_v51 = vshrl.u32 %v8545_v30, 16  ;;  %v6353_v16 = vshll.u32 %v8545_v30, 16  ;;  %v4484_v12 = vadd.f32 %v10330_v33, %v4027_v58  ;;  %v10576_v33 = vld [vmem:[%s10747_s5] ss:$0 sm:$0xff] }
 0x46e   : > { %v5642_v6 = vadd.f32 %v10290_v37, %v5530_v61 }
 0x46f   : > { %v5995_v44 = vpop.f32.mrf.mxu3  ;;  %v6352_v27 = vrot.slane %v6350_v51, 1  ;;  %v6355_v40 = vrot.slane %v6353_v16, 2  ;;  %v5075_v24 = vadd.f32 %v4989_v43, %v4484_v12 }
 0x470   : > { %v5996_v59 = vadd.f32 %v10485_v5, %v5995_v44  ;;  %v5678_v20 = vmax.f32 %v5642_v6, 0.0 }
 0x471   : > { %v6356_v25 = vor.u32 %v6355_v40, %v6352_v27 }
 0x472   : > { %v6564_v52 = vadd.f32 %v6482_v19, %v5996_v59  ;;  %v10567_v45 = vpop.f32.mrf.mxu0 }
 0x473   : > { %v5442_v3 = vpop.f32.mrf.mxu2  ;;  %v8516_v4 = vld [vmem:[#allocation4 + $0x28] sm:$0xff]  ;;  %v4994_v61 = vpop.f32.mrf.mxu1  ;;  %v6357_v19 = vsel %vm3170_vm3, %v6347_v32, %v6356_v25  ;;  %v10816_v32 = vld [vmem:[#allocation29_spill] sm:$0xff] }
 0x474   : > { %v5531_v26 = vadd.f32 %v5442_v3, %v5073_v0  ;;  %v6600_v46 = vmax.f32 %v6564_v52, 0.0  ;;  %6037 = vmatmul.bf16.gmra.mxu3 %v8516_v4 }
 0x476   : > { %v5643_v23 = vadd.f32 %v10290_v37, %v5531_v26  ;;  %v8760_v55 = vpack.c.bf16 %v6600_v46, %v6599_v41  ;;  %v10814_v41 = vld [vmem:[#allocation31_spill] sm:$0xff]  ;;  %v10815_v46 = vld [vmem:[#allocation30_spill] sm:$0xff] }
 0x477   : > { %v5998_v56 = vpop.f32.mrf.mxu3 }
 0x478   : > { %v5679_v48 = vmax.f32 %v5643_v23, 0.0  ;;  %8874 = vst [vmem:[%s10513_s20 + $0x10] sm:$0xff] %v8760_v55   ;;  %v5999_v37 = vadd.f32 %v10485_v5, %v5998_v56  ;;  %v4029_v23 = vadd.f32 %v10815_v46, %v10814_v41  ;;  %v4485_v55 = vadd.f32 %v10341_v8, %v10816_v32 }
 0x479   : > { %v6490_v56 = vadd.f32 %v10480_v7, %v10538_v50  ;;  %v6492_v8 = vadd.f32 %v10480_v7, %v10553_v17 }
 0x47a   : > { %v8720_v22 = vpack.c.bf16 %v5679_v48, %v5678_v20  ;;  %v6565_v39 = vadd.f32 %v6485_v15, %v5999_v37  ;;  %v10581_v52 = vpop.f32.mrf.mxu0  ;;  %v8546_v20 = vld [vmem:[%s9226_s11 + $0x80] sm:$0xff]  ;;  %v4486_v58 = vadd.f32 %v10355_v1, %v4029_v23 }
 0x47b   : > { %v5445_v11 = vpop.f32.mrf.mxu2  ;;  %6533 = vmatmul.bf16.gmra.mxu0 %v6357_v19  ;;  %v4997_v48 = vpop.f32.mrf.mxu1  ;;  %v6359_v60 = vshrl.u32 %v8546_v20, 16  ;;  %v6362_v62 = vshll.u32 %v8546_v20, 16  ;;  %v10818_v19 = vld [vmem:[#allocation33_spill] sm:$0xff] }
 0x47c   : > { %8867 = vst [vmem:[#allocation4 + $0x10] sm:$0xff] %v8720_v22   ;;  %v5532_v29 = vadd.f32 %v5445_v11, %v5074_v49  ;;  %v6601_v2 = vmax.f32 %v6565_v39, 0.0  ;;  %v5076_v11 = vadd.f32 %v4992_v14, %v4485_v55  ;;  %v5077_v50 = vadd.f32 %v4994_v61, %v4486_v58 }
 0x47d   : > { %v6361_v30 = vrot.slane %v6359_v60, 1  ;;  %v6364_v15 = vrot.slane %v6362_v62, 2 }
 0x47e   : > { %v5644_v54 = vadd.f32 %v10576_v33, %v5532_v29 }
 0x47f   : > { %v6000_v36 = vpop.f32.mrf.mxu3  ;;  %v6365_v16 = vor.u32 %v6364_v15, %v6361_v30 }
 0x480   : > { %v6001_v31 = vadd.f32 %v10485_v5, %v6000_v36  ;;  %v5680_v3 = vmax.f32 %v5644_v54, 0.0 }
 0x481   : > { %v6366_v27 = vsel %vm3170_vm3, %v6356_v25, %v6365_v16  ;;  %v10819_v25 = vld [vmem:[#allocation32_spill] sm:$0xff] }
 0x482   : > { %v6566_v44 = vadd.f32 %v6487_v35, %v6001_v31 }
 0x483   : > { %v5447_v13 = vpop.f32.mrf.mxu2  ;;  %v8517_v18 = vld [vmem:[#allocation4 + $0x10] sm:$0xff]  ;;  %v4999_v35 = vpop.f32.mrf.mxu1 }
 0x484   : > { %v5533_v47 = vadd.f32 %v5447_v13, %v5075_v24  ;;  %v6602_v59 = vmax.f32 %v6566_v44, 0.0  ;;  %6042 = vmatmul.bf16.gmra.mxu3 %v8517_v18 }
 0x486   : > { %v5645_v43 = vadd.f32 %v10576_v33, %v5533_v47  ;;  %v8765_v0 = vpack.c.bf16 %v6602_v59, %v6601_v2  ;;  %v10817_v47 = vld [vmem:[#allocation34_spill] sm:$0xff]  ;;  %v4487_v59 = vadd.f32 %v10367_v63, %v10819_v25  ;;  %v6497_v63 = vadd.f32 %v10480_v7, %v10581_v52 }
 0x487   : > { %v6003_v6 = vpop.f32.mrf.mxu3  ;;  %v4031_v2 = vadd.f32 %v10818_v19, %v10817_v47 }
 0x488   : > { %v5681_v4 = vmax.f32 %v5645_v43, 0.0  ;;  %8875 = vst [vmem:[%s10513_s20 + $0x18] sm:$0xff] %v8765_v0   ;;  %v6004_v22 = vadd.f32 %v10485_v5, %v6003_v6  ;;  %v10596_v51 = vpop.f32.mrf.mxu0  ;;  %v8547_v43 = vld [vmem:[%s9226_s11 + $0x88] sm:$0xff]  ;;  %v6495_v0 = vadd.f32 %v10480_v7, %v10567_v45 }
 0x489   : > { %v6368_v6 = vshrl.u32 %v8547_v43, 16 }
 0x48a   : > { %v8725_v26 = vpack.c.bf16 %v5681_v4, %v5680_v3  ;;  %v6567_v37 = vadd.f32 %v6490_v56, %v6004_v22  ;;  %v5078_v4 = vadd.f32 %v4997_v48, %v4487_v59 }
 0x48b   : > { %v5450_v34 = vpop.f32.mrf.mxu2  ;;  %6538 = vmatmul.bf16.gmra.mxu0 %v6366_v27  ;;  %v6370_v23 = vrot.slane %v6368_v6, 1  ;;  %v5002_v55 = vpop.f32.mrf.mxu1 }
 0x48c   : > { %8868 = vst [vmem:[#allocation4 + $0x48] sm:$0xff] %v8725_v26   ;;  %v5534_v28 = vadd.f32 %v5450_v34, %v5076_v11  ;;  %v6603_v40 = vmax.f32 %v6567_v37, 0.0  ;;  %v6371_v26 = vshll.u32 %v8547_v43, 16  ;;  %v4488_v34 = vadd.f32 %v10378_v10, %v4031_v2 }
 0x48e   : > { %v5646_v1 = vadd.f32 %v10576_v33, %v5534_v28  ;;  %v6373_v32 = vrot.slane %v6371_v26, 2  ;;  %v5079_v45 = vadd.f32 %v4999_v35, %v4488_v34 }
 0x48f   : > { %v6005_v57 = vpop.f32.mrf.mxu3 }
 0x490   : > { %v6006_v49 = vadd.f32 %v10485_v5, %v6005_v57  ;;  %v5682_v24 = vmax.f32 %v5646_v1, 0.0  ;;  %v6501_v13 = vpop.f32.mrf.mxu0  ;;  %v6374_v11 = vor.u32 %v6373_v32, %v6370_v23  ;;  %v10820_v1 = vld [vmem:[#allocation38_spill] sm:$0xff] }
 0x491   : > { %v6502_v25 = vadd.f32 %v10480_v7, %v6501_v13 }
 0x492   : > { %v6568_v12 = vadd.f32 %v6492_v8, %v6006_v49  ;;  %v6375_v28 = vsel %vm3170_vm3, %v6365_v16, %v6374_v11  ;;  %v10822_v16 = vld [vmem:[#allocation36_spill] sm:$0xff] }
 0x493   : > { %v5452_v14 = vpop.f32.mrf.mxu2  ;;  %v8518_v29 = vld [vmem:[#allocation4 + $0x48] sm:$0xff] }
 0x494   : > { %v5535_v36 = vadd.f32 %v5452_v14, %v5077_v50  ;;  %v6604_v39 = vmax.f32 %v6568_v12, 0.0  ;;  %6047 = vmatmul.bf16.gmra.mxu3 %v8518_v29  ;;  %v5004_v14 = vpop.f32.mrf.mxu1 }
 0x496   : > { %v5647_v17 = vadd.f32 %v10576_v33, %v5535_v36  ;;  %v8770_v31 = vpack.c.bf16 %v6604_v39, %v6603_v40  ;;  %v10821_v36 = vld [vmem:[#allocation37_spill] sm:$0xff]  ;;  %v4489_v40 = vadd.f32 %v10392_v38, %v10822_v16 }
 0x497   : > { %v6008_v44 = vpop.f32.mrf.mxu3  ;;  %v4033_v27 = vadd.f32 %v10821_v36, %v10820_v1  ;;  %v8548_v39 = vld [vmem:[%s9226_s11 + $0x90] sm:$0xff] }
 0x498   : > { %v5683_v61 = vmax.f32 %v5647_v17, 0.0  ;;  %8876 = vst [vmem:[%s10513_s20 + $0x20] sm:$0xff] %v8770_v31   ;;  %v6009_v3 = vadd.f32 %v10485_v5, %v6008_v44  ;;  %v10614_v22 = vpop.f32.mrf.mxu0  ;;  %v6500_v17 = vadd.f32 %v10480_v7, %v10596_v51  ;;  %v5080_v31 = vadd.f32 %v5002_v55, %v4489_v40 }
 0x499   : > { %v4490_v44 = vadd.f32 %v10406_v21, %v4033_v27 }
 0x49a   : > { %v8730_v18 = vpack.c.bf16 %v5683_v61, %v5682_v24  ;;  %v6569_v20 = vadd.f32 %v6495_v0, %v6009_v3  ;;  %v6377_v24 = vshrl.u32 %v8548_v39, 16  ;;  %v6380_v61 = vshll.u32 %v8548_v39, 16 }
 0x49b   : > { %v5455_v54 = vpop.f32.mrf.mxu2  ;;  %6543 = vmatmul.bf16.gmra.mxu0 %v6375_v28  ;;  %v5081_v59 = vadd.f32 %v5004_v14, %v4490_v44 }
 0x49c   : > { %8869 = vst [vmem:[#allocation4 + $0x30] sm:$0xff] %v8730_v18   ;;  %v5536_v41 = vadd.f32 %v5455_v54, %v5078_v4  ;;  %v6605_v57 = vmax.f32 %v6569_v20, 0.0  ;;  %v6379_v47 = vrot.slane %v6377_v24, 1  ;;  %v6382_v19 = vrot.slane %v6380_v61, 2  ;;  %v5007_v34 = vpop.f32.mrf.mxu1 }
 0x49e   : > { %v5648_v10 = vadd.f32 %v10576_v33, %v5536_v41  ;;  %v6383_v51 = vor.u32 %v6382_v19, %v6379_v47 }
 0x49f   : > { %v6010_v46 = vpop.f32.mrf.mxu3 }
 0x4a0   : > { %v6011_v56 = vadd.f32 %v10485_v5, %v6010_v46  ;;  %v5684_v37 = vmax.f32 %v5648_v10, 0.0  ;;  %v6506_v50 = vpop.f32.mrf.mxu0  ;;  %v6384_v26 = vsel %vm3170_vm3, %v6374_v11, %v6383_v51  ;;  %v10824_v10 = vld [vmem:[#allocation40_spill] sm:$0xff] }
 0x4a2   : > { %v6570_v48 = vadd.f32 %v6497_v63, %v6011_v56  ;;  %v6109_v63 = vld [vmem:[%s9226_s11 + $0x98] sm:$0x3]  ;;  %s8900_s11 = smul.u32 144, %s9038_s16  ;;  %s6704_s16 = scalar_lea.sflag [#allocation6], %s412_s21 }
 0x4a3   : > { %v5457_v60 = vpop.f32.mrf.mxu2  ;;  %v8519_v62 = vld [vmem:[#allocation4 + $0x30] sm:$0xff] }
 0x4a4   : > { %v5537_v58 = vadd.f32 %v5457_v60, %v5079_v45  ;;  %v6606_v30 = vmax.f32 %v6570_v48, 0.0  ;;  %6052 = vmatmul.bf16.gmra.mxu3 %v8519_v62  ;;  %v6203_v48 = vunpack.c.l.b16 %v6109_v63  ;;  %v10823_v62 = vld [vmem:[#allocation42_spill] sm:$0xff]  ;;  %s6716_s12 = scalar_lea.hbm %s10752_s10, %s8900_s11 }
 0x4a5   : > { %v4035_v11 = vadd.f32 %v10467_v42, %v10823_v62  ;;  %s6719_s22 = sshll.u32 %s6716_s12, 4  ;;  %s6720_s22 = int_to_ptr.hbm [resolvable:$true] %s6719_s22 }
 0x4a6   : > { %v5649_v52 = vadd.f32 %v10576_v33, %v5537_v58  ;;  %v8775_v15 = vpack.c.bf16 %v6606_v30, %v6605_v57  ;;  %v4491_v58 = vadd.f32 %v10418_v9, %v10824_v10  ;;  %v6222_v28 = vpack.c.b16 %v6203_v48, %v6203_v48  ;;  %s8982_s24 = sshra.s32 %s6720_s22, 4  ;;  %s8983_s24 = int_to_ptr.hbm [resolvable:$true] %s8982_s24 }
 0x4a7   : > { %v6013_v49 = vpop.f32.mrf.mxu3  ;;  %v6505_v57 = vadd.f32 %v10480_v7, %v10614_v22  ;;  %v6507_v9 = vadd.f32 %v10480_v7, %v6506_v50  ;;  %s8984_s28 = scalar_lea.hbm %s8983_s24, 144  ;;  %p8989_p1 = scmp.lt.s32.totalorder %s8983_s24, %s10752_s10 }
 0x4a8   : > { %v5685_v8 = vmax.f32 %v5649_v52, 0.0  ;;  %8877 = vst [vmem:[%s10513_s20 + $0x28] sm:$0xff] %v8775_v15   ;;  %v6014_v35 = vadd.f32 %v10485_v5, %v6013_v49  ;;  %v10631_v43 = vpop.f32.mrf.mxu0  ;;  %v5082_v52 = vadd.f32 %v5007_v34, %v4491_v58  ;;  %v6386_v15 = vshrl.u32 %v6222_v28, 16  ;;  %p8985_p12 = scmp.ne.s32.totalorder %s8983_s24, %s8984_s28  ;;  %p8990_p2 = scmp.lt.s32.totalorder %s8988_s30, %s8984_s28 }
 0x4a9   : > { %v4492_v49 = vadd.f32 %v10431_v53, %v4035_v11 }
 0x4aa   : > { %v8735_v12 = vpack.c.bf16 %v5685_v8, %v5684_v37  ;;  %v6571_v2 = vadd.f32 %v6500_v17, %v6014_v35  ;;  %v6389_v37 = vshll.u32 %v6222_v28, 16  ;;  %v5009_v8 = vpop.f32.mrf.mxu1  ;;  %p8986_p13 = pnand %p8985_p12, %p9146_p4  ;;  %p8991_p3 = por %p8990_p2, %p8989_p1 }
 0x4ab   : > { %v5460_v29 = vpop.f32.mrf.mxu2  ;;  %6548 = vmatmul.bf16.gmra.mxu0 %v6384_v26  ;;  %v5083_v27 = vadd.f32 %v5009_v8, %v4492_v49 }
 0x4ac   : > { %8870 = vst [vmem:[#allocation4 + $0x18] sm:$0xff] %v8735_v12   ;;  %v5538_v18 = vadd.f32 %v5460_v29, %v5080_v31  ;;  %v6607_v41 = vmax.f32 %v6571_v2, 0.0  ;;  %v6388_v29 = vrot.slane %v6386_v15, 1  ;;  %v6391_v42 = vrot.slane %v6389_v37, 2  ;;  %p8987_p0 = pneg %p8986_p13 }
 0x4ae   : > { %v5650_v21 = vadd.f32 %v10576_v33, %v5538_v18  ;;  %v6392_v22 = vor.u32 %v6391_v42, %v6388_v29  ;;  %p8992_p5 = pnand %p8991_p3, %p8987_p0 }
 0x4af   : > { %v6015_v54 = vpop.f32.mrf.mxu3 }
 0x4b0   : > { %v6016_v38 = vadd.f32 %v10485_v5, %v6015_v54  ;;  %v5686_v32 = vmax.f32 %v5650_v21, 0.0  ;;  %v6511_v45 = vpop.f32.mrf.mxu0  ;;  %v6393_v53 = vsel %vm3170_vm3, %v6383_v51, %v6392_v22 }
 0x4b2   : > { %v6572_v0 = vadd.f32 %v6502_v25, %v6016_v38  ;;  %v6510_v25 = vadd.f32 %v10480_v7, %v10631_v43 }
 0x4b3   : > { %v5462_v3 = vpop.f32.mrf.mxu2  ;;  %v8520_v4 = vld [vmem:[#allocation4 + $0x18] sm:$0xff] }
 0x4b4   : > { %v5539_v6 = vadd.f32 %v5462_v3, %v5081_v59  ;;  %v6608_v46 = vmax.f32 %v6572_v0, 0.0  ;;  %6057 = vmatmul.bf16.gmra.mxu3 %v8520_v4  ;;  %v6512_v0 = vadd.f32 %v10480_v7, %v6511_v45 }
 0x4b6   : > { %v5651_v13 = vadd.f32 %v10576_v33, %v5539_v6  ;;  %v8780_v23 = vpack.c.bf16 %v6608_v46, %v6607_v41 }
 0x4b7   : > { %v6018_v20 = vpop.f32.mrf.mxu3 }
 0x4b8   : > { %v5687_v55 = vmax.f32 %v5651_v13, 0.0  ;;  %8878 = vst [vmem:[%s10513_s20 + $0x30] sm:$0xff] %v8780_v23   ;;  %v6019_v30 = vadd.f32 %v10485_v5, %v6018_v20  ;;  %v6514_v16 = vpop.f32.mrf.mxu0 }
 0x4b9   : > { %v6515_v43 = vadd.f32 %v10480_v7, %v6514_v16 }
 0x4ba   : > { %v8740_v56 = vpack.c.bf16 %v5687_v55, %v5686_v32  ;;  %v6573_v1 = vadd.f32 %v6505_v57, %v6019_v30 }
 0x4bb   : > { %v5465_v60 = vpop.f32.mrf.mxu2  ;;  %6553 = vmatmul.bf16.gmra.mxu0 %v6393_v53 }
 0x4bc   : > { %8871 = vst [vmem:[#allocation4 + $0x68] sm:$0xff] %v8740_v56   ;;  %v5540_v12 = vadd.f32 %v5465_v60, %v5082_v52  ;;  %v6609_v24 = vmax.f32 %v6573_v1, 0.0 }
 0x4be   : > { %v5652_v35 = vadd.f32 %v10576_v33, %v5540_v12 }
 0x4bf   : > { %v6020_v14 = vpop.f32.mrf.mxu3 }
 0x4c0   : > { %v6021_v36 = vadd.f32 %v10485_v5, %v6020_v14  ;;  %v5688_v18 = vmax.f32 %v5652_v35, 0.0  ;;  %v6516_v2 = vpop.f32.mrf.mxu0 }
 0x4c1   : > { %v6517_v55 = vadd.f32 %v10480_v7, %v6516_v2 }
 0x4c2   : > { %v6574_v40 = vadd.f32 %v6507_v9, %v6021_v36 }
 0x4c3   : > { %v5467_v39 = vpop.f32.mrf.mxu2  ;;  %v8521_v17 = vld [vmem:[#allocation4 + $0x68] sm:$0xff] }
 0x4c4   : > { %v5541_v31 = vadd.f32 %v5467_v39, %v5083_v27  ;;  %v6610_v61 = vmax.f32 %v6574_v40, 0.0  ;;  %6062 = vmatmul.bf16.gmra.mxu3 %v8521_v17 }
 0x4c6   : > { %v5653_v50 = vadd.f32 %v10576_v33, %v5541_v31  ;;  %v8785_v44 = vpack.c.bf16 %v6610_v61, %v6609_v24 }
 0x4c7   : > { %v6023_v47 = vpop.f32.mrf.mxu3 }
 0x4c8   : > { %v5689_v54 = vmax.f32 %v5653_v50, 0.0  ;;  %8879 = vst [vmem:[%s10513_s20 + $0x38] sm:$0xff] %v8785_v44   ;;  %v6024_v38 = vadd.f32 %v10485_v5, %v6023_v47  ;;  %v6519_v3 = vpop.f32.mrf.mxu0 }
 0x4c9   : > { %v6520_v10 = vadd.f32 %v10480_v7, %v6519_v3 }
 0x4ca   : > { %v8745_v19 = vpack.c.bf16 %v5689_v54, %v5688_v18  ;;  %v6575_v51 = vadd.f32 %v6510_v25, %v6024_v38 }
 0x4cc   : > { %8872 = vst [vmem:[#allocation4 + $0x60] sm:$0xff] %v8745_v19   ;;  %v6611_v6 = vmax.f32 %v6575_v51, 0.0 }
 0x4cf   : > { %v6025_v59 = vpop.f32.mrf.mxu3 }
 0x4d0   : > { %v6026_v33 = vadd.f32 %v10485_v5, %v6025_v59  ;;  %v6521_v46 = vpop.f32.mrf.mxu0 }
 0x4d1   : > { %v6522_v30 = vadd.f32 %v10480_v7, %v6521_v46 }
 0x4d2   : > { %v6576_v4 = vadd.f32 %v6512_v0, %v6026_v33 }
 0x4d3   : > { %v8522_v21 = vld [vmem:[#allocation4 + $0x60] sm:$0xff] }
 0x4d4   : > { %v6612_v26 = vmax.f32 %v6576_v4, 0.0  ;;  %6067 = vmatmul.bf16.gmra.mxu3 %v8522_v21 }
 0x4d6   : > { %v8790_v34 = vpack.c.bf16 %v6612_v26, %v6611_v6 }
 0x4d7   : > { %v6028_v41 = vpop.f32.mrf.mxu3 }
 0x4d8   : > { %8880 = vst [vmem:[%s10513_s20 + $0x40] sm:$0xff] %v8790_v34   ;;  %v6029_v13 = vadd.f32 %v10485_v5, %v6028_v41  ;;  %v6524_v63 = vpop.f32.mrf.mxu0 }
 0x4d9   : > { %v6525_v42 = vadd.f32 %v10480_v7, %v6524_v63 }
 0x4da   : > { %v6577_v32 = vadd.f32 %v6515_v43, %v6029_v13 }
 0x4dc   : > { %v6613_v45 = vmax.f32 %v6577_v32, 0.0 }
 0x4df   : > { %v6030_v23 = vpop.f32.mrf.mxu3 }
 0x4e0   : > { %v6031_v20 = vadd.f32 %v10485_v5, %v6030_v23  ;;  %v6526_v11 = vpop.f32.mrf.mxu0 }
 0x4e1   : > { %v6527_v27 = vadd.f32 %v10480_v7, %v6526_v11 }
 0x4e2   : > { %v6578_v56 = vadd.f32 %v6517_v55, %v6031_v20 }
 0x4e4   : > { %v6614_v48 = vmax.f32 %v6578_v56, 0.0 }
 0x4e6   : > { %v8795_v60 = vpack.c.bf16 %v6614_v48, %v6613_v45 }
 0x4e7   : > { %v6033_v62 = vpop.f32.mrf.mxu3 }
 0x4e8   : > { %8881 = vst [vmem:[%s10513_s20 + $0x48] sm:$0xff] %v8795_v60   ;;  %v6034_v58 = vadd.f32 %v10485_v5, %v6033_v62  ;;  %v6529_v15 = vpop.f32.mrf.mxu0 }
 0x4e9   : > { %v6530_v53 = vadd.f32 %v10480_v7, %v6529_v15 }
 0x4ea   : > { %v6579_v57 = vadd.f32 %v6520_v10, %v6034_v58 }
 0x4ec   : > { %v6615_v8 = vmax.f32 %v6579_v57, 0.0 }
 0x4ef   : > { %v6035_v28 = vpop.f32.mrf.mxu3 }
 0x4f0   : > { %v6036_v52 = vadd.f32 %v10485_v5, %v6035_v28  ;;  %v6531_v29 = vpop.f32.mrf.mxu0 }
 0x4f1   : > { %v6532_v18 = vadd.f32 %v10480_v7, %v6531_v29 }
 0x4f2   : > { %v6580_v37 = vadd.f32 %v6522_v30, %v6036_v52 }
 0x4f4   : > { %v6616_v49 = vmax.f32 %v6580_v37, 0.0 }
 0x4f6   : > { %v8800_v12 = vpack.c.bf16 %v6616_v49, %v6615_v8 }
 0x4f7   : > { %v6038_v14 = vpop.f32.mrf.mxu3 }
 0x4f8   : > { %8882 = vst [vmem:[%s10513_s20 + $0x50] sm:$0xff] %v8800_v12   ;;  %v6039_v1 = vadd.f32 %v10485_v5, %v6038_v14  ;;  %v6534_v40 = vpop.f32.mrf.mxu0 }
 0x4f9   : > { %v6535_v51 = vadd.f32 %v10480_v7, %v6534_v40 }
 0x4fa   : > { %v6581_v36 = vadd.f32 %v6525_v42, %v6039_v1 }
 0x4fc   : > { %v6617_v39 = vmax.f32 %v6581_v36, 0.0 }
 0x4ff   : > { %v6040_v9 = vpop.f32.mrf.mxu3 }
 0x500   : > { %v6041_v16 = vadd.f32 %v10485_v5, %v6040_v9  ;;  %v6536_v61 = vpop.f32.mrf.mxu0 }
 0x501   : > { %v6537_v4 = vadd.f32 %v10480_v7, %v6536_v61 }
 0x502   : > { %v6582_v22 = vadd.f32 %v6527_v27, %v6041_v16 }
 0x504   : > { %v6618_v17 = vmax.f32 %v6582_v22, 0.0 }
 0x506   : > { %v8805_v35 = vpack.c.bf16 %v6618_v17, %v6617_v39 }
 0x507   : > { %v6043_v31 = vpop.f32.mrf.mxu3 }
 0x508   : > { %8883 = vst [vmem:[%s10513_s20 + $0x58] sm:$0xff] %v8805_v35   ;;  %v6044_v24 = vadd.f32 %v10485_v5, %v6043_v31  ;;  %v6539_v59 = vpop.f32.mrf.mxu0 }
 0x509   : > { %v6540_v23 = vadd.f32 %v10480_v7, %v6539_v59 }
 0x50a   : > { %v6583_v44 = vadd.f32 %v6530_v53, %v6044_v24 }
 0x50c   : > { %v6619_v19 = vmax.f32 %v6583_v44, 0.0 }
 0x50f   : > { %v6045_v50 = vpop.f32.mrf.mxu3 }
 0x510   : > { %v6046_v54 = vadd.f32 %v10485_v5, %v6045_v50  ;;  %v6541_v6 = vpop.f32.mrf.mxu0 }
 0x511   : > { %v6542_v63 = vadd.f32 %v10480_v7, %v6541_v6 }
 0x512   : > { %v6584_v47 = vadd.f32 %v6532_v18, %v6046_v54 }
 0x514   : > { %v6620_v2 = vmax.f32 %v6584_v47, 0.0 }
 0x516   : > { %v8810_v25 = vpack.c.bf16 %v6620_v2, %v6619_v19 }
 0x517   : > { %v6048_v38 = vpop.f32.mrf.mxu3 }
 0x518   : > { %8884 = vst [vmem:[%s10513_s20 + $0x60] sm:$0xff] %v8810_v25   ;;  %v6049_v0 = vadd.f32 %v10485_v5, %v6048_v38  ;;  %v6544_v13 = vpop.f32.mrf.mxu0 }
 0x519   : > { %v6545_v58 = vadd.f32 %v10480_v7, %v6544_v13 }
 0x51a   : > { %v6585_v3 = vadd.f32 %v6535_v51, %v6049_v0 }
 0x51c   : > { %v6621_v34 = vmax.f32 %v6585_v3, 0.0 }
 0x51f   : > { %v6050_v33 = vpop.f32.mrf.mxu3 }
 0x520   : > { %v6051_v21 = vadd.f32 %v10485_v5, %v6050_v33  ;;  %v6546_v62 = vpop.f32.mrf.mxu0 }
 0x521   : > { %v6547_v15 = vadd.f32 %v10480_v7, %v6546_v62 }
 0x522   : > { %v6586_v26 = vadd.f32 %v6537_v4, %v6051_v21 }
 0x524   : > { %v6622_v41 = vmax.f32 %v6586_v26, 0.0 }
 0x526   : > { %v8815_v46 = vpack.c.bf16 %v6622_v41, %v6621_v34 }
 0x527   : > { %v6053_v43 = vpop.f32.mrf.mxu3 }
 0x528   : > { %8885 = vst [vmem:[%s10513_s20 + $0x68] sm:$0xff] %v8815_v46   ;;  %v6054_v32 = vadd.f32 %v10485_v5, %v6053_v43  ;;  %v6549_v30 = vpop.f32.mrf.mxu0 }
 0x529   : > { %v6550_v1 = vadd.f32 %v10480_v7, %v6549_v30 }
 0x52a   : > { %v6587_v20 = vadd.f32 %v6540_v23, %v6054_v32 }
 0x52c   : > { %v6623_v48 = vmax.f32 %v6587_v20, 0.0 }
 0x52f   : > { %v6055_v55 = vpop.f32.mrf.mxu3 }
 0x530   : > { %v6056_v56 = vadd.f32 %v10485_v5, %v6055_v55  ;;  %v6551_v42 = vpop.f32.mrf.mxu0 }
 0x531   : > { %v6552_v16 = vadd.f32 %v10480_v7, %v6551_v42 }
 0x532   : > { %v6588_v45 = vadd.f32 %v6542_v63, %v6056_v56 }
 0x534   : > { %v6624_v60 = vmax.f32 %v6588_v45, 0.0 }
 0x536   : > { %v8820_v11 = vpack.c.bf16 %v6624_v60, %v6623_v48 }
 0x537   : > { %v6058_v10 = vpop.f32.mrf.mxu3 }
 0x538   : > { %8886 = vst [vmem:[%s10513_s20 + $0x70] sm:$0xff] %v8820_v11   ;;  %v6059_v28 = vadd.f32 %v10485_v5, %v6058_v10  ;;  %v6554_v39 = vpop.f32.mrf.mxu0 }
 0x539   : > { %v6555_v24 = vadd.f32 %v10480_v7, %v6554_v39 }
 0x53a   : > { %v6589_v52 = vadd.f32 %v6545_v58, %v6059_v28 }
 0x53c   : > { %v6625_v49 = vmax.f32 %v6589_v52, 0.0 }
 0x53f   : > { %v6060_v57 = vpop.f32.mrf.mxu3 }
 0x540   : > { %v6061_v37 = vadd.f32 %v10485_v5, %v6060_v57  ;;  %v6556_v50 = vpop.f32.mrf.mxu0 }
 0x541   : > { %v6557_v54 = vadd.f32 %v10480_v7, %v6556_v50 }
 0x542   : > { %v6590_v8 = vadd.f32 %v6547_v15, %v6061_v37 }
 0x544   : > { %v6626_v12 = vmax.f32 %v6590_v8, 0.0 }
 0x546   : > { %v8825_v14 = vpack.c.bf16 %v6626_v12, %v6625_v49 }
 0x547   : > { %v6063_v29 = vpop.f32.mrf.mxu3 }
 0x548   : > { %8887 = vst [vmem:[%s10513_s20 + $0x78] sm:$0xff] %v8825_v14   ;;  %v6064_v9 = vadd.f32 %v10485_v5, %v6063_v29 }
 0x54a   : > { %v6591_v27 = vadd.f32 %v6550_v1, %v6064_v9 }
 0x54c   : > { %v6627_v17 = vmax.f32 %v6591_v27, 0.0 }
 0x54f   : > { %v6065_v36 = vpop.f32.mrf.mxu3 }
 0x550   : > { %v6066_v22 = vadd.f32 %v10485_v5, %v6065_v36 }
 0x552   : > { %v6592_v40 = vadd.f32 %v6552_v16, %v6066_v22 }
 0x554   : > { %v6628_v35 = vmax.f32 %v6592_v40, 0.0 }
 0x556   : > { %v8830_v31 = vpack.c.bf16 %v6628_v35, %v6627_v17 }
 0x557   : > { %v6068_v53 = vpop.f32.mrf.mxu3 }
 0x558   : > { %8888 = vst [vmem:[%s10513_s20 + $0x80] sm:$0xff] %v8830_v31   ;;  %v6069_v61 = vadd.f32 %v10485_v5, %v6068_v53 }
 0x55a   : > { %v6593_v18 = vadd.f32 %v6555_v24, %v6069_v61 }
 0x55c   : > { %v6629_v2 = vmax.f32 %v6593_v18, 0.0 }
 0x55f   : > { %v6070_v44 = vpop.f32.mrf.mxu3 }
 0x560   : > { %v6071_v47 = vadd.f32 %v10485_v5, %v6070_v44 }
 0x562   : > { %v6594_v19 = vadd.f32 %v6557_v54, %v6071_v47 }
 0x564   : > { %v6630_v25 = vmax.f32 %v6594_v19, 0.0 }
 0x566   : > { %v8835_v38 = vpack.c.bf16 %v6630_v25, %v6629_v2 }
 0x568   : > { %8889 = vst [vmem:[%s10513_s20 + $0x88] sm:$0xff] %v8835_v38  }
 0x569   : > { %8995 = shalt.err (!%p8992_p5)
}
 0x56a   : > { %s9049_s21 = smov 64   ;;  %s9050_s20 = smov 4  }
 0x56b   : > { %8901 = dma.vmem_to_hbm [thread:$0]  (%p9146_p4), %s6718_s19, 2304, %s6720_s22, %s6704_s16, %s9049_s21, %s9049_s21, %s9050_s20  }
 0x56c PF: > { %p8907_p6 = scmp.ge.s32.totalorder %s9046_s18, 2  ;;  %s6734_s29 = sand.u32 1, %s9026_s13  }
 0x56d   : > { %s6735_s11 = scalar_lea.sflag [#allocation6], %s6734_s29 }
 0x56e   : > { %p8904_p7 = pnand %p8907_p6, %p9153_p8 }
 0x570   : > { %p8905_p9 = pneg %p8904_p7 }
 0x572   : > { %9021 = dma.done.wait (%p8905_p9), %s6735_s11, 2304  }
 0x573   : > { %9023 = vsyncadd (%p8905_p9), %s6735_s11, 4294964992  ;;  %s23_s18 = sadd.s32 1, %s9046_s18   ;;  %s10825_s23 = sld [smem:[#allocation8_spill]] }
 0x574   : > { %p20_p10 = scmp.ge.s32.totalorder %s23_s18, 4   ;;  %s10826_s13 = smov %s9030_s14 }
 0x575   : > { %s10827_s14 = smov %s9034_s15  ;;  %s10828_s15 = smov %s9159_s26 }
 0x576   : > { %s10829_s16 = smov %s9042_s17  ;;  %22 = sbr.rel (!%p20_p10) target bundleno = 4 (0x4), region = 119 }
 0x579   : > { %s10830_s17 = smov %s10825_s23 }
 0x57b   :  { %6741 = vsyncpa [#allocation6], 1 }
 0x57c   :  { %6743 = vsyncpa [#allocation6 + $0x1], 1 }

</bundles_post_ra>
